<compile_context>
chip_gen: v7x
topology: tpu7x:2x2x1
jax: 0.10.0
libtpu: 0.0.40
codegen_flags: <defaults>
</compile_context>

<pallas_src>
import functools
import math

import numpy as np
import jax
import jax.numpy as jnp
from jax.experimental import pallas as pl
from jax.experimental.pallas import tpu as pltpu


# ----------------------------------------------------------------------------
# Anchor helpers (pure numpy, identical math to the reference)
# ----------------------------------------------------------------------------
def generate_anchor(orisize, ratios, anchors_scales):
    cy = cx = orisize / 2
    R = len(ratios) * len(anchors_scales)
    res = np.zeros((R, 4), dtype=np.float32)
    idx = 0
    for ratio in ratios:
        for anchor in anchors_scales:
            h = orisize * anchor * np.sqrt(ratio)
            w = orisize * anchor * np.sqrt(1 / ratio)
            res[idx, :] = [cy - h / 2, cx - w / 2, cy + h / 2, cx + w / 2]
            idx += 1
    return res


def shift_the_anchor(anchor_base, feat_stride, height, width):
    h_ = np.arange(0, feat_stride * height, feat_stride)
    w_ = np.arange(0, feat_stride * width, feat_stride)
    yy, xx = np.meshgrid(h_, w_)
    yy = yy.reshape((yy.size,))
    xx = xx.reshape((xx.size,))
    anchors = np.stack([yy, xx, yy, xx], axis=1)
    res = anchors.reshape(anchors.shape[0], 1, 4) + anchor_base.reshape(
        1, anchor_base.shape[0], 4
    )
    return res.reshape(res.shape[0] * res.shape[1], 4).astype(np.float32)


# ----------------------------------------------------------------------------
# Fused Pallas kernel
# ----------------------------------------------------------------------------
PADL = 8     # 8-aligned left halo offset inside the padded-width scratch
OUT_W = 128  # lane-dense combined output width


def _rpn_fused_kernel(x_ref, wm_ref, bm_ref, wl_ref, bl_ref, ws_ref, bs_ref,
                      out_ref, xp_ref, hp_ref, *, H, W, A, RH):
    """Per-image fused RPN head.

    x_ref   : (1, H, W, Cin)            input feature tile (NHWC)
    wm_ref  : (9*Cin, Cmid)             mid 3x3 conv weights, im2col-packed (dy,dx,Cin)
    wl_ref  : (9*Cmid, 4A)              loc 3x3 conv weights, im2col-packed
    ws_ref  : (Cmid, 2A)                score 1x1 weights, [bg*A | fg*A] order
    out_ref : (1, H*W, 128)             cols 0:4A locs, 4A:5A bg prob, 5A:6A fg prob
    xp_ref  : VMEM (H+2, W+2*PADL, Cin)   zero-haloed input
    hp_ref  : VMEM (H+2, W+2*PADL, Cmid)  zero-haloed hidden (never leaves VMEM)
    """
    Cin = x_ref.shape[-1]
    Cmid = hp_ref.shape[-1]

    # 'same' halo in VMEM scratch (replaces wrapper-side jnp.pad / extra HBM copy).
    # Re-zeroed every grid step: cheap at this size and correct under megacore
    # batch splitting (a core may never see grid step 0).
    xp_ref[...] = jnp.zeros_like(xp_ref)
    hp_ref[...] = jnp.zeros_like(hp_ref)
    xp_ref[1:H + 1, PADL:PADL + W, :] = x_ref[0]   # 8-aligned column offset

    # Hoist all weight / bias loads out of the row-chunk loops.
    wm = wm_ref[...]
    wl = wl_ref[...]
    ws = ws_ref[...]
    bm = bm_ref[...]
    bl = bl_ref[...]
    bs = bs_ref[...]

    def conv3x3_chunk(src_ref, w, r0, cin):
        """3x3 'same' conv for output rows [r0, r0+RH): ONE matmul, K = 9*cin."""
        parts = []
        for dy in range(3):
            rows = src_ref[r0 + dy:r0 + dy + RH, :, :]            # (RH, Wp, cin)
            for dx in range(3):
                parts.append(rows[:, PADL - 1 + dx:PADL - 1 + dx + W, :])
        patch = jnp.concatenate(parts, axis=-1).reshape(RH * W, 9 * cin)
        return jnp.dot(patch, w, preferred_element_type=jnp.float32)  # (RH*W, Cout)

    # ---- stage 1: hidden = relu(conv3x3(x)) -> hp scratch (stays in VMEM) ----
    for r0 in range(0, H, RH):
        hidden = jnp.maximum(conv3x3_chunk(xp_ref, wm, r0, Cin) + bm, 0.0)
        hp_ref[1 + r0:1 + r0 + RH, PADL:PADL + W, :] = hidden.reshape(RH, W, Cmid)

    # ---- stage 2: loc conv + score conv + pairwise softmax, lane-dense store ----
    zpad = jnp.zeros((RH * W, OUT_W - 6 * A), jnp.float32)        # hoisted
    for r0 in range(0, H, RH):
        locs = conv3x3_chunk(hp_ref, wl, r0, Cmid) + bl           # (RH*W, 4A)

        hid = hp_ref[1 + r0:1 + r0 + RH, PADL:PADL + W, :].reshape(RH * W, Cmid)
        s = jnp.dot(hid, ws, preferred_element_type=jnp.float32) + bs
        s0 = s[:, :A]            # background logits
        s1 = s[:, A:2 * A]       # foreground logits
        m = jnp.maximum(s0, s1)
        e0 = jnp.exp(s0 - m)
        e1 = jnp.exp(s1 - m)
        inv = pl.reciprocal(e0 + e1, approx=True)

        # Build the full 128-lane slab in vregs, then a single unmasked store.
        out_ref[0, r0 * W:(r0 + RH) * W, :] = jnp.concatenate(
            [locs, e0 * inv, e1 * inv, zpad], axis=-1)


# ----------------------------------------------------------------------------
# JAX wrapper (all glue outside the kernel is cheap XLA reshapes/slices)
# ----------------------------------------------------------------------------
@jax.jit
def _rpn_forward(x_nchw, w_mid, b_mid, w_loc, b_loc, w_score, b_score):
    N, Cin, H, W = x_nchw.shape
    Cmid = w_mid.shape[-1]
    A = w_score.shape[-1] // 2
    assert 6 * A <= OUT_W
    RH = math.gcd(H, 8)                       # row-chunk (RH*W = 128 at H=W=16)

    x = jnp.transpose(x_nchw, (0, 2, 3, 1))   # NCHW -> NHWC
    wm = w_mid.reshape(9 * Cin, Cmid)         # (dy*dx*Cin, Cout), im2col order
    wl = w_loc.reshape(9 * Cmid, 4 * A)
    # Deinterleave score channels [bg0,fg0,bg1,fg1,...] -> [bg*A | fg*A].
    ws = jnp.concatenate([w_score[:, 0::2], w_score[:, 1::2]], axis=1)
    bs = jnp.concatenate([b_score[:, 0::2], b_score[:, 1::2]], axis=1)

    kern = functools.partial(_rpn_fused_kernel, H=H, W=W, A=A, RH=RH)
    out = pl.pallas_call(
        kern,
        out_shape=jax.ShapeDtypeStruct((N, H * W, OUT_W), jnp.float32),
        grid=(N,),
        in_specs=[
            pl.BlockSpec((1, H, W, Cin), lambda i: (i, 0, 0, 0)),
            pl.BlockSpec((9 * Cin, Cmid), lambda i: (0, 0)),
            pl.BlockSpec((1, Cmid), lambda i: (0, 0)),
            pl.BlockSpec((9 * Cmid, 4 * A), lambda i: (0, 0)),
            pl.BlockSpec((1, 4 * A), lambda i: (0, 0)),
            pl.BlockSpec((Cmid, 2 * A), lambda i: (0, 0)),
            pl.BlockSpec((1, 2 * A), lambda i: (0, 0)),
        ],
        out_specs=pl.BlockSpec((1, H * W, OUT_W), lambda i: (i, 0, 0)),
        scratch_shapes=[
            pltpu.VMEM((H + 2, W + 2 * PADL, Cin), jnp.float32),
            pltpu.VMEM((H + 2, W + 2 * PADL, Cmid), jnp.float32),
        ],
        compiler_params=pltpu.CompilerParams(dimension_semantics=("parallel",)),
    )(x, wm, b_mid, wl, b_loc, ws, bs)

    rpn_locs = out[:, :, :4 * A].reshape(N, H * W * A, 4)
    p0 = out[:, :, 4 * A:5 * A]
    p1 = out[:, :, 5 * A:6 * A]
    rpn_scores = jnp.stack([p0, p1], axis=-1).reshape(N, H * W * A, 2)
    return rpn_locs, rpn_scores


# TODO(synk): for realistic backbone feature maps (e.g. 64x64x512, mid=512) add a
# spatial row-tile grid axis with a 1-row halo and bf16 weight/activation storage
# (v6e/v7x); at this test size a whole image per grid step fits VMEM comfortably.


# ----------------------------------------------------------------------------
# RPN module
# ----------------------------------------------------------------------------
class RPN:
    def __init__(self, in_channels, midchannels, key):
        # TODO(synk): reference stores `.shape[0]` then indexes it again; intended
        # behaviour is anchor_base = (9, 4) array, n_anchors = 9.
        self.anchor_base = generate_anchor(16, [0.5, 1, 2], [8, 16, 32])
        n_anchors = self.anchor_base.shape[0]
        self.n_anchors = n_anchors

        k1, k2, k3, k4, k5, k6 = jax.random.split(key, 6)
        self.w_mid = 0.05 * jax.random.normal(
            k1, (3, 3, in_channels, midchannels), jnp.float32)
        self.b_mid = 0.01 * jax.random.normal(k2, (1, midchannels), jnp.float32)
        self.w_loc = 0.05 * jax.random.normal(
            k3, (3, 3, midchannels, 4 * n_anchors), jnp.float32)
        self.b_loc = 0.01 * jax.random.normal(k4, (1, 4 * n_anchors), jnp.float32)
        self.w_score = 0.05 * jax.random.normal(
            k5, (midchannels, 2 * n_anchors), jnp.float32)
        self.b_score = 0.01 * jax.random.normal(k6, (1, 2 * n_anchors), jnp.float32)

    def forward(self, x_nchw):
        n, c, h, w = x_nchw.shape
        # TODO(synk): reference applies F.relu to the scalar height `h` and never
        # uses self.middlelayer; implementing the intended hidden = relu(mid(x)).
        # TODO(synk): reference convscore is Conv2d(k=1, stride=1, padding=1) which
        # inflates spatial dims and breaks the following .view; implemented as the
        # intended 1x1 conv (padding=0) fused with the pairwise softmax.
        rpn_locs, rpn_scores = _rpn_forward(
            x_nchw, self.w_mid, self.b_mid, self.w_loc, self.b_loc,
            self.w_score, self.b_score)
        anchor = shift_the_anchor(self.anchor_base, 16, h, w)
        # TODO(synk): reference forward returns None; returning computed tensors.
        return rpn_locs, rpn_scores, anchor


# ----------------------------------------------------------------------------
# Pure-JAX reference for numerical check
# ----------------------------------------------------------------------------
def _ref_forward(rpn, x_nchw):
    n, c, h, w = x_nchw.shape
    x = jnp.transpose(x_nchw, (0, 2, 3, 1))
    dn = ("NHWC", "HWIO", "NHWC")
    hid = jax.lax.conv_general_dilated(
        x, rpn.w_mid, (1, 1), "SAME", dimension_numbers=dn
    ) + rpn.b_mid.reshape(1, 1, 1, -1)
    hid = jnp.maximum(hid, 0.0)
    locs = jax.lax.conv_general_dilated(
        hid, rpn.w_loc, (1, 1), "SAME", dimension_numbers=dn
    ) + rpn.b_loc.reshape(1, 1, 1, -1)
    rpn_locs = locs.reshape(n, h * w * rpn.n_anchors, 4)
    s = jnp.einsum("nhwc,ck->nhwk", hid, rpn.w_score) + rpn.b_score.reshape(1, 1, 1, -1)
    s = s.reshape(n, h, w, rpn.n_anchors, 2)
    p = jax.nn.softmax(s, axis=-1)
    return rpn_locs, p.reshape(n, h * w * rpn.n_anchors, 2)


if __name__ == "__main__":
    key = jax.random.PRNGKey(0)
    kx, kp = jax.random.split(key)

    in_channels, midchannels = 4, 32
    x = jax.random.normal(kx, (2, in_channels, 16, 16), jnp.float32)  # NCHW input

    rpn = RPN(in_channels, midchannels, kp)
    rpn_locs, rpn_scores, anchor = rpn.forward(x)
    jax.block_until_ready((rpn_locs, rpn_scores))

    ref_locs, ref_scores = _ref_forward(rpn, x)
    np.testing.assert_allclose(np.asarray(rpn_locs), np.asarray(ref_locs),
                               rtol=1e-4, atol=1e-4)
    # scores use pl.reciprocal(approx=True) -> allow ~1e-3 relative error
    np.testing.assert_allclose(np.asarray(rpn_scores), np.asarray(ref_scores),
                               rtol=1e-3, atol=1e-3)

    assert rpn_locs.shape == (2, 16 * 16 * 9, 4)
    assert rpn_scores.shape == (2, 16 * 16 * 9, 2)
    assert anchor.shape == (16 * 16 * 9, 4)
    print("KERNEL_OK")
</pallas_src>

<mosaic_0001>
module attributes {stable_mosaic.version = 11 : i64} {
  func.func @_rpn_fused_kernel(%arg0: i32, %arg1: memref<1x16x16x4xf32, #tpu.memory_space<vmem>>, %arg2: memref<36x32xf32, #tpu.memory_space<vmem>>, %arg3: memref<1x32xf32, #tpu.memory_space<vmem>>, %arg4: memref<288x36xf32, #tpu.memory_space<vmem>>, %arg5: memref<1x36xf32, #tpu.memory_space<vmem>>, %arg6: memref<32x18xf32, #tpu.memory_space<vmem>>, %arg7: memref<1x18xf32, #tpu.memory_space<vmem>>, %arg8: memref<1x256x128xf32, #tpu.memory_space<vmem>>, %arg9: memref<18x32x4xf32, #tpu.memory_space<vmem>>, %arg10: memref<18x32x32xf32, #tpu.memory_space<vmem>>) attributes {dimension_semantics = [#tpu.dimension_semantics<parallel>], iteration_bounds = array<i64: 2>, scalar_prefetch = 0 : i64, scratch_operands = 2 : i64, tpu.core_type = #tpu.core_type<tc>, window_params = [{transform_indices = @transform_0, window_bounds = array<i64: 1, 16, 16, 4>}, {pipeline_mode = #tpu.pipeline_mode<synchronous>, transform_indices = @transform_1, window_bounds = array<i64: 36, 32>}, {pipeline_mode = #tpu.pipeline_mode<synchronous>, transform_indices = @transform_2, window_bounds = array<i64: 1, 32>}, {pipeline_mode = #tpu.pipeline_mode<synchronous>, transform_indices = @transform_3, window_bounds = array<i64: 288, 36>}, {pipeline_mode = #tpu.pipeline_mode<synchronous>, transform_indices = @transform_4, window_bounds = array<i64: 1, 36>}, {pipeline_mode = #tpu.pipeline_mode<synchronous>, transform_indices = @transform_5, window_bounds = array<i64: 32, 18>}, {pipeline_mode = #tpu.pipeline_mode<synchronous>, transform_indices = @transform_6, window_bounds = array<i64: 1, 18>}, {transform_indices = @transform_7, window_bounds = array<i64: 1, 256, 128>}]} {
    %cst = arith.constant 0.000000e+00 : f32
    %0 = vector.broadcast %cst : f32 to vector<18x32x4xf32>
    %c0 = arith.constant 0 : index
    %c0_0 = arith.constant 0 : index
    %c0_1 = arith.constant 0 : index
    %1 = vector.load %arg9[%c0, %c0_0, %c0_1] : memref<18x32x4xf32, #tpu.memory_space<vmem>>, vector<18x32x4xf32>
    tpu.vector_store %arg9[%c0, %c0_0, %c0_1], %0 {strides = array<i32>} : memref<18x32x4xf32, #tpu.memory_space<vmem>>, vector<18x32x4xf32>,
    %cst_2 = arith.constant 0.000000e+00 : f32
    %2 = vector.broadcast %cst_2 : f32 to vector<18x32x32xf32>
    %c0_3 = arith.constant 0 : index
    %c0_4 = arith.constant 0 : index
    %c0_5 = arith.constant 0 : index
    %3 = vector.load %arg10[%c0_3, %c0_4, %c0_5] : memref<18x32x32xf32, #tpu.memory_space<vmem>>, vector<18x32x32xf32>
    tpu.vector_store %arg10[%c0_3, %c0_4, %c0_5], %2 {strides = array<i32>} : memref<18x32x32xf32, #tpu.memory_space<vmem>>, vector<18x32x32xf32>,
    %c0_6 = arith.constant 0 : index
    %c0_7 = arith.constant 0 : index
    %c0_8 = arith.constant 0 : index
    %c0_9 = arith.constant 0 : index
    %4 = vector.load %arg1[%c0_6, %c0_7, %c0_8, %c0_9] : memref<1x16x16x4xf32, #tpu.memory_space<vmem>>, vector<1x16x16x4xf32>
    %5 = vector.shape_cast %4 : vector<1x16x16x4xf32> to vector<16x16x4xf32>
    %c1 = arith.constant 1 : index
    %c8 = arith.constant 8 : index
    %c0_10 = arith.constant 0 : index
    %6 = vector.load %arg9[%c1, %c8, %c0_10] : memref<18x32x4xf32, #tpu.memory_space<vmem>>, vector<16x16x4xf32>
    tpu.vector_store %arg9[%c1, %c8, %c0_10], %5 {strides = array<i32>} : memref<18x32x4xf32, #tpu.memory_space<vmem>>, vector<16x16x4xf32>,
    %c0_11 = arith.constant 0 : index
    %c0_12 = arith.constant 0 : index
    %7 = vector.load %arg2[%c0_11, %c0_12] : memref<36x32xf32, #tpu.memory_space<vmem>>, vector<36x32xf32>
    %c0_13 = arith.constant 0 : index
    %c0_14 = arith.constant 0 : index
    %8 = vector.load %arg4[%c0_13, %c0_14] : memref<288x36xf32, #tpu.memory_space<vmem>>, vector<288x36xf32>
    %c0_15 = arith.constant 0 : index
    %c0_16 = arith.constant 0 : index
    %9 = vector.load %arg6[%c0_15, %c0_16] : memref<32x18xf32, #tpu.memory_space<vmem>>, vector<32x18xf32>
    %c0_17 = arith.constant 0 : index
    %c0_18 = arith.constant 0 : index
    %10 = vector.load %arg3[%c0_17, %c0_18] : memref<1x32xf32, #tpu.memory_space<vmem>>, vector<1x32xf32>
    %c0_19 = arith.constant 0 : index
    %c0_20 = arith.constant 0 : index
    %11 = vector.load %arg5[%c0_19, %c0_20] : memref<1x36xf32, #tpu.memory_space<vmem>>, vector<1x36xf32>
    %c0_21 = arith.constant 0 : index
    %c0_22 = arith.constant 0 : index
    %12 = vector.load %arg7[%c0_21, %c0_22] : memref<1x18xf32, #tpu.memory_space<vmem>>, vector<1x18xf32>
    %c0_23 = arith.constant 0 : index
    %c0_24 = arith.constant 0 : index
    %c0_25 = arith.constant 0 : index
    %13 = vector.load %arg9[%c0_23, %c0_24, %c0_25] : memref<18x32x4xf32, #tpu.memory_space<vmem>>, vector<8x32x4xf32>
    %14 = vector.extract_strided_slice %13 {offsets = [0, 7, 0], sizes = [8, 16, 4], strides = [1, 1, 1]} : vector<8x32x4xf32> to vector<8x16x4xf32>
    %15 = vector.extract_strided_slice %13 {offsets = [0, 8, 0], sizes = [8, 16, 4], strides = [1, 1, 1]} : vector<8x32x4xf32> to vector<8x16x4xf32>
    %16 = vector.extract_strided_slice %13 {offsets = [0, 9, 0], sizes = [8, 16, 4], strides = [1, 1, 1]} : vector<8x32x4xf32> to vector<8x16x4xf32>
    %c1_26 = arith.constant 1 : index
    %c0_27 = arith.constant 0 : index
    %c0_28 = arith.constant 0 : index
    %17 = vector.load %arg9[%c1_26, %c0_27, %c0_28] : memref<18x32x4xf32, #tpu.memory_space<vmem>>, vector<8x32x4xf32>
    %18 = vector.extract_strided_slice %17 {offsets = [0, 7, 0], sizes = [8, 16, 4], strides = [1, 1, 1]} : vector<8x32x4xf32> to vector<8x16x4xf32>
    %19 = vector.extract_strided_slice %17 {offsets = [0, 8, 0], sizes = [8, 16, 4], strides = [1, 1, 1]} : vector<8x32x4xf32> to vector<8x16x4xf32>
    %20 = vector.extract_strided_slice %17 {offsets = [0, 9, 0], sizes = [8, 16, 4], strides = [1, 1, 1]} : vector<8x32x4xf32> to vector<8x16x4xf32>
    %c2 = arith.constant 2 : index
    %c0_29 = arith.constant 0 : index
    %c0_30 = arith.constant 0 : index
    %21 = vector.load %arg9[%c2, %c0_29, %c0_30] : memref<18x32x4xf32, #tpu.memory_space<vmem>>, vector<8x32x4xf32>
    %22 = vector.extract_strided_slice %21 {offsets = [0, 7, 0], sizes = [8, 16, 4], strides = [1, 1, 1]} : vector<8x32x4xf32> to vector<8x16x4xf32>
    %23 = vector.extract_strided_slice %21 {offsets = [0, 8, 0], sizes = [8, 16, 4], strides = [1, 1, 1]} : vector<8x32x4xf32> to vector<8x16x4xf32>
    %24 = vector.extract_strided_slice %21 {offsets = [0, 9, 0], sizes = [8, 16, 4], strides = [1, 1, 1]} : vector<8x32x4xf32> to vector<8x16x4xf32>
    %25 = tpu.concatenate %14, %15, %16, %18, %19, %20, %22, %23, %24 in 2 : vector<8x16x4xf32>, vector<8x16x4xf32>, vector<8x16x4xf32>, vector<8x16x4xf32>, vector<8x16x4xf32>, vector<8x16x4xf32>, vector<8x16x4xf32>, vector<8x16x4xf32>, vector<8x16x4xf32> -> vector<8x16x36xf32>
    %26 = vector.shape_cast %25 : vector<8x16x36xf32> to vector<128x36xf32>
    %cst_31 = arith.constant dense<0.000000e+00> : vector<128x32xf32>
    %27 = tpu.matmul %26, %7, %cst_31 {dimension_numbers = #tpu.dot_dimension_numbers<[1], [0], [0], [1], [0, 0, 1, 1], [], []>} : vector<128x36xf32>, vector<36x32xf32>, vector<128x32xf32> -> vector<128x32xf32>
    %28 = vector.broadcast %10 : vector<1x32xf32> to vector<128x32xf32>
    %29 = arith.addf %27, %28 : vector<128x32xf32>
    %cst_32 = arith.constant 0.000000e+00 : f32
    %30 = vector.broadcast %cst_32 : f32 to vector<128x32xf32>
    %31 = arith.maximumf %29, %30 : vector<128x32xf32>
    %32 = vector.shape_cast %31 : vector<128x32xf32> to vector<8x16x32xf32>
    %c1_33 = arith.constant 1 : index
    %c8_34 = arith.constant 8 : index
    %c0_35 = arith.constant 0 : index
    %33 = vector.load %arg10[%c1_33, %c8_34, %c0_35] : memref<18x32x32xf32, #tpu.memory_space<vmem>>, vector<8x16x32xf32>
    tpu.vector_store %arg10[%c1_33, %c8_34, %c0_35], %32 {strides = array<i32>} : memref<18x32x32xf32, #tpu.memory_space<vmem>>, vector<8x16x32xf32>,
    %c8_36 = arith.constant 8 : index
    %c0_37 = arith.constant 0 : index
    %c0_38 = arith.constant 0 : index
    %34 = vector.load %arg9[%c8_36, %c0_37, %c0_38] : memref<18x32x4xf32, #tpu.memory_space<vmem>>, vector<8x32x4xf32>
    %35 = vector.extract_strided_slice %34 {offsets = [0, 7, 0], sizes = [8, 16, 4], strides = [1, 1, 1]} : vector<8x32x4xf32> to vector<8x16x4xf32>
    %36 = vector.extract_strided_slice %34 {offsets = [0, 8, 0], sizes = [8, 16, 4], strides = [1, 1, 1]} : vector<8x32x4xf32> to vector<8x16x4xf32>
    %37 = vector.extract_strided_slice %34 {offsets = [0, 9, 0], sizes = [8, 16, 4], strides = [1, 1, 1]} : vector<8x32x4xf32> to vector<8x16x4xf32>
    %c9 = arith.constant 9 : index
    %c0_39 = arith.constant 0 : index
    %c0_40 = arith.constant 0 : index
    %38 = vector.load %arg9[%c9, %c0_39, %c0_40] : memref<18x32x4xf32, #tpu.memory_space<vmem>>, vector<8x32x4xf32>
    %39 = vector.extract_strided_slice %38 {offsets = [0, 7, 0], sizes = [8, 16, 4], strides = [1, 1, 1]} : vector<8x32x4xf32> to vector<8x16x4xf32>
    %40 = vector.extract_strided_slice %38 {offsets = [0, 8, 0], sizes = [8, 16, 4], strides = [1, 1, 1]} : vector<8x32x4xf32> to vector<8x16x4xf32>
    %41 = vector.extract_strided_slice %38 {offsets = [0, 9, 0], sizes = [8, 16, 4], strides = [1, 1, 1]} : vector<8x32x4xf32> to vector<8x16x4xf32>
    %c10 = arith.constant 10 : index
    %c0_41 = arith.constant 0 : index
    %c0_42 = arith.constant 0 : index
    %42 = vector.load %arg9[%c10, %c0_41, %c0_42] : memref<18x32x4xf32, #tpu.memory_space<vmem>>, vector<8x32x4xf32>
    %43 = vector.extract_strided_slice %42 {offsets = [0, 7, 0], sizes = [8, 16, 4], strides = [1, 1, 1]} : vector<8x32x4xf32> to vector<8x16x4xf32>
    %44 = vector.extract_strided_slice %42 {offsets = [0, 8, 0], sizes = [8, 16, 4], strides = [1, 1, 1]} : vector<8x32x4xf32> to vector<8x16x4xf32>
    %45 = vector.extract_strided_slice %42 {offsets = [0, 9, 0], sizes = [8, 16, 4], strides = [1, 1, 1]} : vector<8x32x4xf32> to vector<8x16x4xf32>
    %46 = tpu.concatenate %35, %36, %37, %39, %40, %41, %43, %44, %45 in 2 : vector<8x16x4xf32>, vector<8x16x4xf32>, vector<8x16x4xf32>, vector<8x16x4xf32>, vector<8x16x4xf32>, vector<8x16x4xf32>, vector<8x16x4xf32>, vector<8x16x4xf32>, vector<8x16x4xf32> -> vector<8x16x36xf32>
    %47 = vector.shape_cast %46 : vector<8x16x36xf32> to vector<128x36xf32>
    %cst_43 = arith.constant dense<0.000000e+00> : vector<128x32xf32>
    %48 = tpu.matmul %47, %7, %cst_43 {dimension_numbers = #tpu.dot_dimension_numbers<[1], [0], [0], [1], [0, 0, 1, 1], [], []>} : vector<128x36xf32>, vector<36x32xf32>, vector<128x32xf32> -> vector<128x32xf32>
    %49 = vector.broadcast %10 : vector<1x32xf32> to vector<128x32xf32>
    %50 = arith.addf %48, %49 : vector<128x32xf32>
    %cst_44 = arith.constant 0.000000e+00 : f32
    %51 = vector.broadcast %cst_44 : f32 to vector<128x32xf32>
    %52 = arith.maximumf %50, %51 : vector<128x32xf32>
    %53 = vector.shape_cast %52 : vector<128x32xf32> to vector<8x16x32xf32>
    %c9_45 = arith.constant 9 : index
    %c8_46 = arith.constant 8 : index
    %c0_47 = arith.constant 0 : index
    %54 = vector.load %arg10[%c9_45, %c8_46, %c0_47] : memref<18x32x32xf32, #tpu.memory_space<vmem>>, vector<8x16x32xf32>
    tpu.vector_store %arg10[%c9_45, %c8_46, %c0_47], %53 {strides = array<i32>} : memref<18x32x32xf32, #tpu.memory_space<vmem>>, vector<8x16x32xf32>,
    %cst_48 = arith.constant 0.000000e+00 : f32
    %55 = vector.broadcast %cst_48 : f32 to vector<128x74xf32>
    %c0_49 = arith.constant 0 : index
    %c0_50 = arith.constant 0 : index
    %c0_51 = arith.constant 0 : index
    %56 = vector.load %arg10[%c0_49, %c0_50, %c0_51] : memref<18x32x32xf32, #tpu.memory_space<vmem>>, vector<8x32x32xf32>
    %57 = vector.extract_strided_slice %56 {offsets = [0, 7, 0], sizes = [8, 16, 32], strides = [1, 1, 1]} : vector<8x32x32xf32> to vector<8x16x32xf32>
    %58 = vector.extract_strided_slice %56 {offsets = [0, 8, 0], sizes = [8, 16, 32], strides = [1, 1, 1]} : vector<8x32x32xf32> to vector<8x16x32xf32>
    %59 = vector.extract_strided_slice %56 {offsets = [0, 9, 0], sizes = [8, 16, 32], strides = [1, 1, 1]} : vector<8x32x32xf32> to vector<8x16x32xf32>
    %c1_52 = arith.constant 1 : index
    %c0_53 = arith.constant 0 : index
    %c0_54 = arith.constant 0 : index
    %60 = vector.load %arg10[%c1_52, %c0_53, %c0_54] : memref<18x32x32xf32, #tpu.memory_space<vmem>>, vector<8x32x32xf32>
    %61 = vector.extract_strided_slice %60 {offsets = [0, 7, 0], sizes = [8, 16, 32], strides = [1, 1, 1]} : vector<8x32x32xf32> to vector<8x16x32xf32>
    %62 = vector.extract_strided_slice %60 {offsets = [0, 8, 0], sizes = [8, 16, 32], strides = [1, 1, 1]} : vector<8x32x32xf32> to vector<8x16x32xf32>
    %63 = vector.extract_strided_slice %60 {offsets = [0, 9, 0], sizes = [8, 16, 32], strides = [1, 1, 1]} : vector<8x32x32xf32> to vector<8x16x32xf32>
    %c2_55 = arith.constant 2 : index
    %c0_56 = arith.constant 0 : index
    %c0_57 = arith.constant 0 : index
    %64 = vector.load %arg10[%c2_55, %c0_56, %c0_57] : memref<18x32x32xf32, #tpu.memory_space<vmem>>, vector<8x32x32xf32>
    %65 = vector.extract_strided_slice %64 {offsets = [0, 7, 0], sizes = [8, 16, 32], strides = [1, 1, 1]} : vector<8x32x32xf32> to vector<8x16x32xf32>
    %66 = vector.extract_strided_slice %64 {offsets = [0, 8, 0], sizes = [8, 16, 32], strides = [1, 1, 1]} : vector<8x32x32xf32> to vector<8x16x32xf32>
    %67 = vector.extract_strided_slice %64 {offsets = [0, 9, 0], sizes = [8, 16, 32], strides = [1, 1, 1]} : vector<8x32x32xf32> to vector<8x16x32xf32>
    %68 = tpu.concatenate %57, %58, %59, %61, %62, %63, %65, %66, %67 in 2 : vector<8x16x32xf32>, vector<8x16x32xf32>, vector<8x16x32xf32>, vector<8x16x32xf32>, vector<8x16x32xf32>, vector<8x16x32xf32>, vector<8x16x32xf32>, vector<8x16x32xf32>, vector<8x16x32xf32> -> vector<8x16x288xf32>
    %69 = vector.shape_cast %68 : vector<8x16x288xf32> to vector<128x288xf32>
    %cst_58 = arith.constant dense<0.000000e+00> : vector<128x36xf32>
    %70 = tpu.matmul %69, %8, %cst_58 {dimension_numbers = #tpu.dot_dimension_numbers<[1], [0], [0], [1], [0, 0, 1, 1], [], []>} : vector<128x288xf32>, vector<288x36xf32>, vector<128x36xf32> -> vector<128x36xf32>
    %71 = vector.broadcast %11 : vector<1x36xf32> to vector<128x36xf32>
    %72 = arith.addf %70, %71 : vector<128x36xf32>
    %c1_59 = arith.constant 1 : index
    %c8_60 = arith.constant 8 : index
    %c0_61 = arith.constant 0 : index
    %73 = vector.load %arg10[%c1_59, %c8_60, %c0_61] : memref<18x32x32xf32, #tpu.memory_space<vmem>>, vector<8x16x32xf32>
    %74 = vector.shape_cast %73 : vector<8x16x32xf32> to vector<128x32xf32>
    %cst_62 = arith.constant dense<0.000000e+00> : vector<128x18xf32>
    %75 = tpu.matmul %74, %9, %cst_62 {dimension_numbers = #tpu.dot_dimension_numbers<[1], [0], [0], [1], [0, 0, 1, 1], [], []>} : vector<128x32xf32>, vector<32x18xf32>, vector<128x18xf32> -> vector<128x18xf32>
    %76 = vector.broadcast %12 : vector<1x18xf32> to vector<128x18xf32>
    %77 = arith.addf %75, %76 : vector<128x18xf32>
    %78 = vector.extract_strided_slice %77 {offsets = [0, 0], sizes = [128, 9], strides = [1, 1]} : vector<128x18xf32> to vector<128x9xf32>
    %79 = vector.extract_strided_slice %77 {offsets = [0, 9], sizes = [128, 9], strides = [1, 1]} : vector<128x18xf32> to vector<128x9xf32>
    %80 = arith.maximumf %78, %79 : vector<128x9xf32>
    %81 = arith.subf %78, %80 : vector<128x9xf32>
    %82 = math.exp %81 : vector<128x9xf32>
    %83 = arith.subf %79, %80 : vector<128x9xf32>
    %84 = math.exp %83 : vector<128x9xf32>
    %85 = arith.addf %82, %84 : vector<128x9xf32>
    %86 = tpu.reciprocal %85 {approx = true} : vector<128x9xf32> -> vector<128x9xf32>
    %87 = arith.mulf %82, %86 : vector<128x9xf32>
    %88 = arith.mulf %84, %86 : vector<128x9xf32>
    %89 = tpu.concatenate %72, %87, %88, %55 in 1 : vector<128x36xf32>, vector<128x9xf32>, vector<128x9xf32>, vector<128x74xf32> -> vector<128x128xf32>
    %c0_63 = arith.constant 0 : index
    %c0_64 = arith.constant 0 : index
    %c0_65 = arith.constant 0 : index
    %90 = vector.load %arg8[%c0_63, %c0_64, %c0_65] : memref<1x256x128xf32, #tpu.memory_space<vmem>>, vector<1x128x128xf32>
    %91 = vector.shape_cast %90 : vector<1x128x128xf32> to vector<128x128xf32>
    %92 = vector.shape_cast %89 : vector<128x128xf32> to vector<1x128x128xf32>
    tpu.vector_store %arg8[%c0_63, %c0_64, %c0_65], %92 {strides = array<i32>} : memref<1x256x128xf32, #tpu.memory_space<vmem>>, vector<1x128x128xf32>,
    %c8_66 = arith.constant 8 : index
    %c0_67 = arith.constant 0 : index
    %c0_68 = arith.constant 0 : index
    %93 = vector.load %arg10[%c8_66, %c0_67, %c0_68] : memref<18x32x32xf32, #tpu.memory_space<vmem>>, vector<8x32x32xf32>
    %94 = vector.extract_strided_slice %93 {offsets = [0, 7, 0], sizes = [8, 16, 32], strides = [1, 1, 1]} : vector<8x32x32xf32> to vector<8x16x32xf32>
    %95 = vector.extract_strided_slice %93 {offsets = [0, 8, 0], sizes = [8, 16, 32], strides = [1, 1, 1]} : vector<8x32x32xf32> to vector<8x16x32xf32>
    %96 = vector.extract_strided_slice %93 {offsets = [0, 9, 0], sizes = [8, 16, 32], strides = [1, 1, 1]} : vector<8x32x32xf32> to vector<8x16x32xf32>
    %c9_69 = arith.constant 9 : index
    %c0_70 = arith.constant 0 : index
    %c0_71 = arith.constant 0 : index
    %97 = vector.load %arg10[%c9_69, %c0_70, %c0_71] : memref<18x32x32xf32, #tpu.memory_space<vmem>>, vector<8x32x32xf32>
    %98 = vector.extract_strided_slice %97 {offsets = [0, 7, 0], sizes = [8, 16, 32], strides = [1, 1, 1]} : vector<8x32x32xf32> to vector<8x16x32xf32>
    %99 = vector.extract_strided_slice %97 {offsets = [0, 8, 0], sizes = [8, 16, 32], strides = [1, 1, 1]} : vector<8x32x32xf32> to vector<8x16x32xf32>
    %100 = vector.extract_strided_slice %97 {offsets = [0, 9, 0], sizes = [8, 16, 32], strides = [1, 1, 1]} : vector<8x32x32xf32> to vector<8x16x32xf32>
    %c10_72 = arith.constant 10 : index
    %c0_73 = arith.constant 0 : index
    %c0_74 = arith.constant 0 : index
    %101 = vector.load %arg10[%c10_72, %c0_73, %c0_74] : memref<18x32x32xf32, #tpu.memory_space<vmem>>, vector<8x32x32xf32>
    %102 = vector.extract_strided_slice %101 {offsets = [0, 7, 0], sizes = [8, 16, 32], strides = [1, 1, 1]} : vector<8x32x32xf32> to vector<8x16x32xf32>
    %103 = vector.extract_strided_slice %101 {offsets = [0, 8, 0], sizes = [8, 16, 32], strides = [1, 1, 1]} : vector<8x32x32xf32> to vector<8x16x32xf32>
    %104 = vector.extract_strided_slice %101 {offsets = [0, 9, 0], sizes = [8, 16, 32], strides = [1, 1, 1]} : vector<8x32x32xf32> to vector<8x16x32xf32>
    %105 = tpu.concatenate %94, %95, %96, %98, %99, %100, %102, %103, %104 in 2 : vector<8x16x32xf32>, vector<8x16x32xf32>, vector<8x16x32xf32>, vector<8x16x32xf32>, vector<8x16x32xf32>, vector<8x16x32xf32>, vector<8x16x32xf32>, vector<8x16x32xf32>, vector<8x16x32xf32> -> vector<8x16x288xf32>
    %106 = vector.shape_cast %105 : vector<8x16x288xf32> to vector<128x288xf32>
    %cst_75 = arith.constant dense<0.000000e+00> : vector<128x36xf32>
    %107 = tpu.matmul %106, %8, %cst_75 {dimension_numbers = #tpu.dot_dimension_numbers<[1], [0], [0], [1], [0, 0, 1, 1], [], []>} : vector<128x288xf32>, vector<288x36xf32>, vector<128x36xf32> -> vector<128x36xf32>
    %108 = vector.broadcast %11 : vector<1x36xf32> to vector<128x36xf32>
    %109 = arith.addf %107, %108 : vector<128x36xf32>
    %c9_76 = arith.constant 9 : index
    %c8_77 = arith.constant 8 : index
    %c0_78 = arith.constant 0 : index
    %110 = vector.load %arg10[%c9_76, %c8_77, %c0_78] : memref<18x32x32xf32, #tpu.memory_space<vmem>>, vector<8x16x32xf32>
    %111 = vector.shape_cast %110 : vector<8x16x32xf32> to vector<128x32xf32>
    %cst_79 = arith.constant dense<0.000000e+00> : vector<128x18xf32>
    %112 = tpu.matmul %111, %9, %cst_79 {dimension_numbers = #tpu.dot_dimension_numbers<[1], [0], [0], [1], [0, 0, 1, 1], [], []>} : vector<128x32xf32>, vector<32x18xf32>, vector<128x18xf32> -> vector<128x18xf32>
    %113 = vector.broadcast %12 : vector<1x18xf32> to vector<128x18xf32>
    %114 = arith.addf %112, %113 : vector<128x18xf32>
    %115 = vector.extract_strided_slice %114 {offsets = [0, 0], sizes = [128, 9], strides = [1, 1]} : vector<128x18xf32> to vector<128x9xf32>
    %116 = vector.extract_strided_slice %114 {offsets = [0, 9], sizes = [128, 9], strides = [1, 1]} : vector<128x18xf32> to vector<128x9xf32>
    %117 = arith.maximumf %115, %116 : vector<128x9xf32>
    %118 = arith.subf %115, %117 : vector<128x9xf32>
    %119 = math.exp %118 : vector<128x9xf32>
    %120 = arith.subf %116, %117 : vector<128x9xf32>
    %121 = math.exp %120 : vector<128x9xf32>
    %122 = arith.addf %119, %121 : vector<128x9xf32>
    %123 = tpu.reciprocal %122 {approx = true} : vector<128x9xf32> -> vector<128x9xf32>
    %124 = arith.mulf %119, %123 : vector<128x9xf32>
    %125 = arith.mulf %121, %123 : vector<128x9xf32>
    %126 = tpu.concatenate %109, %124, %125, %55 in 1 : vector<128x36xf32>, vector<128x9xf32>, vector<128x9xf32>, vector<128x74xf32> -> vector<128x128xf32>
    %c0_80 = arith.constant 0 : index
    %c128 = arith.constant 128 : index
    %c0_81 = arith.constant 0 : index
    %127 = vector.load %arg8[%c0_80, %c128, %c0_81] : memref<1x256x128xf32, #tpu.memory_space<vmem>>, vector<1x128x128xf32>
    %128 = vector.shape_cast %127 : vector<1x128x128xf32> to vector<128x128xf32>
    %129 = vector.shape_cast %126 : vector<128x128xf32> to vector<1x128x128xf32>
    tpu.vector_store %arg8[%c0_80, %c128, %c0_81], %129 {strides = array<i32>} : memref<1x256x128xf32, #tpu.memory_space<vmem>>, vector<1x128x128xf32>,
    return
  }
  func.func @transform_0(%arg0: i32) -> (i32, i32, i32, i32) {
    %c0_i32 = arith.constant 0 : i32
    %c0_i32_0 = arith.constant 0 : i32
    %c0_i32_1 = arith.constant 0 : i32
    %c0_i32_2 = arith.constant 0 : i32
    return %arg0, %c0_i32, %c0_i32_0, %c0_i32_1 : i32, i32, i32, i32
  }
  func.func @transform_1(%arg0: i32) -> (i32, i32) {
    %c0_i32 = arith.constant 0 : i32
    %c0_i32_0 = arith.constant 0 : i32
    %c0_i32_1 = arith.constant 0 : i32
    return %c0_i32, %c0_i32_0 : i32, i32
  }
  func.func @transform_2(%arg0: i32) -> (i32, i32) {
    %c0_i32 = arith.constant 0 : i32
    %c0_i32_0 = arith.constant 0 : i32
    %c0_i32_1 = arith.constant 0 : i32
    return %c0_i32, %c0_i32_0 : i32, i32
  }
  func.func @transform_3(%arg0: i32) -> (i32, i32) {
    %c0_i32 = arith.constant 0 : i32
    %c0_i32_0 = arith.constant 0 : i32
    %c0_i32_1 = arith.constant 0 : i32
    return %c0_i32, %c0_i32_0 : i32, i32
  }
  func.func @transform_4(%arg0: i32) -> (i32, i32) {
    %c0_i32 = arith.constant 0 : i32
    %c0_i32_0 = arith.constant 0 : i32
    %c0_i32_1 = arith.constant 0 : i32
    return %c0_i32, %c0_i32_0 : i32, i32
  }
  func.func @transform_5(%arg0: i32) -> (i32, i32) {
    %c0_i32 = arith.constant 0 : i32
    %c0_i32_0 = arith.constant 0 : i32
    %c0_i32_1 = arith.constant 0 : i32
    return %c0_i32, %c0_i32_0 : i32, i32
  }
  func.func @transform_6(%arg0: i32) -> (i32, i32) {
    %c0_i32 = arith.constant 0 : i32
    %c0_i32_0 = arith.constant 0 : i32
    %c0_i32_1 = arith.constant 0 : i32
    return %c0_i32, %c0_i32_0 : i32, i32
  }
  func.func @transform_7(%arg0: i32) -> (i32, i32, i32) {
    %c0_i32 = arith.constant 0 : i32
    %c0_i32_0 = arith.constant 0 : i32
    %c0_i32_1 = arith.constant 0 : i32
    return %arg0, %c0_i32, %c0_i32_0 : i32, i32, i32
  }
}

</mosaic_0001>

<bundles_post_ra>
// kernel: _rpn_forward.1
= control target key start
LH: loop header
LB: loop body
LE: loop exit
PB: predicated region body
PF: predicated region fallthrough
CT: control target
= control target key end

     0   :  { %12 = vsyncpa [#allocation5], 0  ;;  %s17180_s0 = inlined_call_operand.vmem [shape: f32[2,16,16,4], index: 0, kind: input, shape index: {}]   ;;  %s17181_s1 = inlined_call_operand.vmem [shape: f32[36,32], index: 1, kind: input, shape index: {}]   ;;  %s17182_s2 = inlined_call_operand.hbm [shape: f32[1,32], index: 2, kind: input, shape index: {}]   ;;  %s17183_s3 = inlined_call_operand.hbm [shape: f32[288,36], index: 3, kind: input, shape index: {}]   ;;  %s17184_s4 = inlined_call_operand.hbm [shape: f32[1,36], index: 4, kind: input, shape index: {}]   ;;  %s17185_s5 = inlined_call_operand.vmem [shape: f32[32,18], index: 5, kind: input, shape index: {}]   ;;  %s17186_s6 = inlined_call_operand.vmem [shape: f32[1,18], index: 6, kind: input, shape index: {}]   ;;  %s17187_s7 = inlined_call_operand.vmem [shape: f32[2,256,128], index: 7, kind: output, shape index: {}]  }
   0x1   :  { %13 = vsyncpa [#allocation7], 0  ;;  %s10169_s24 = smov 0  }
   0x2 LB: > { %s10110_s25 = smov [#allocation6]   ;;  %s10175_s27 = sadd.s32 4294967295, %s10108_s24   ;;  %s10108_s24 = sphi %s10169_s24, %s19_s24  }
   0x3   : > { %s228_s26 = sshll.u32 %s10110_s25, 4  ;;  %p8207_p0 = scmp.ge.s32.totalorder %s10108_s24, 1  ;;  %s10184_s26 = int_to_ptr.vmem [resolvable:$true] %s228_s26 }
   0x4   : > { %p202_p1 = scmp.lt.s32.totalorder %s10108_s24, 3  ;;  %p8937_p2 = scmp.eq.s32.totalorder %s10175_s27, 0 }
   0x5   : > { %s10111_s29 = smov [#allocation4]   ;;  %s10112_s9 = smov [#allocation8]  }
   0x6   : > { %p10180_p3 = pnand %p8207_p0, %p202_p1  ;;  %s218_s30 = sshll.u32 %s10111_s29, 4  ;;  %s10194_s30 = int_to_ptr.vmem [resolvable:$true] %s218_s30 }
   0x7   : > { %s242_s10 = sshll.u32 %s10112_s9, 4  ;;  %s10010_s13 = scalar_lea.hbm %s17183_s3, 4608  ;;  %s10196_s10 = int_to_ptr.vmem [resolvable:$true] %s242_s10 }
   0x8   : > { %p8927_p4 = pneg %p10180_p3  ;;  %p10011_p6 = scmp.ne.s32.totalorder %s17183_s3, %s10010_s13 }
   0x9   : > { %p10017_p10 = scmp.lt.u32.totalorder %s10010_s13, %s17183_s3 }
   0xa   : > { %p10190_p5 = pnand %p8937_p2, %p8927_p4 }
   0xc   : > { %p10206_p7 = pneg %p10190_p5 }
   0xe   : > { %p10013_p8 = pnand %p10206_p7, %p10011_p6 }
  0x10   : > { %p10014_p9 = pneg %p10013_p8 }
  0x12   : > { %p10019_p11 = pnand %p10017_p10, %p10014_p9 }
  0x14   : > { %10022 = shalt.err (!%p10019_p11)
}
  0x15   : > { %s10023_s19 = scalar_lea.vmem %s10184_s26, 4608  ;;  %p10031_p1 = scmp.lt.s32.totalorder %s10184_s26, %s10184_s26 }
  0x16   : > { %p10024_p12 = scmp.ne.s32.totalorder %s10184_s26, %s10023_s19  ;;  %p10032_p4 = scmp.lt.s32.totalorder %s10023_s19, %s10023_s19 }
  0x18   : > { %p10026_p13 = pnand %p10024_p12, %p10206_p7  ;;  %p10033_p6 = por %p10032_p4, %p10031_p1 }
  0x1a   : > { %p10027_p0 = pneg %p10026_p13 }
  0x1c   : > { %p10034_p8 = pnand %p10033_p6, %p10027_p0 }
  0x1e   : > { %10037 = shalt.err (!%p10034_p8)
}
  0x1f   : > { %s10113_s20 = smov 128   ;;  %s10114_s21 = smov 8  }
  0x20   : > { %8933 = dma.hbm_to_vmem [thread:$0]  (!%p10190_p5), %s17183_s3, 4608, %s10184_s26, [#allocation7], %s10113_s20, %s10113_s20, %s10114_s21  }
  0x21   : > { %s10038_s9 = scalar_lea.hbm %s17182_s2, 16 }
  0x22   : > { %p10039_p9 = scmp.ne.s32.totalorder %s17182_s2, %s10038_s9  ;;  %p10045_p12 = scmp.lt.u32.totalorder %s10038_s9, %s17182_s2 }
  0x24   : > { %p10041_p10 = pnand %p10039_p9, %p10206_p7 }
  0x26   : > { %p10042_p11 = pneg %p10041_p10 }
  0x28   : > { %p10047_p13 = pnand %p10045_p12, %p10042_p11 }
  0x2a   : > { %10050 = shalt.err (!%p10047_p13)
}
  0x2b   : > { %s10051_s26 = scalar_lea.vmem %s10194_s30, 16  ;;  %s10058_s15 = scalar_lea.vmem %s10194_s30, 32 }
  0x2c   : > { %p10052_p0 = scmp.ne.s32.totalorder %s10194_s30, %s10051_s26  ;;  %p10059_p6 = scmp.lt.s32.totalorder %s10194_s30, %s10194_s30 }
  0x2d   : > { %p10060_p8 = scmp.lt.s32.totalorder %s10058_s15, %s10051_s26 }
  0x2e   : > { %p10054_p1 = pnand %p10052_p0, %p10206_p7 }
  0x2f   : > { %p10061_p9 = por %p10060_p8, %p10059_p6 }
  0x30   : > { %p10055_p4 = pneg %p10054_p1 }
  0x32   : > { %p10062_p10 = pnand %p10061_p9, %p10055_p4 }
  0x34   : > { %10065 = shalt.err (!%p10062_p10)
}
  0x35   : > { %8930 = dma.hbm_to_vmem [thread:$0]  (!%p10190_p5), %s17182_s2, 16, %s10194_s30, [#allocation5]  }
  0x36   : > { %s10066_s21 = scalar_lea.hbm %s17184_s4, 16 }
  0x37   : > { %p10067_p11 = scmp.ne.s32.totalorder %s17184_s4, %s10066_s21  ;;  %p10073_p0 = scmp.lt.u32.totalorder %s10066_s21, %s17184_s4 }
  0x39   : > { %p10069_p12 = pnand %p10067_p11, %p10206_p7 }
  0x3b   : > { %p10070_p13 = pneg %p10069_p12 }
  0x3d   : > { %p10075_p1 = pnand %p10073_p0, %p10070_p13 }
  0x3f   : > { %10078 = shalt.err (!%p10075_p1)
}
  0x40   : > { %s10079_s30 = scalar_lea.vmem %s10196_s10, 16  ;;  %s10086_s9 = scalar_lea.vmem %s10196_s10, 32 }
  0x41   : > { %p10080_p4 = scmp.ne.s32.totalorder %s10196_s10, %s10079_s30  ;;  %p10087_p9 = scmp.lt.s32.totalorder %s10196_s10, %s10196_s10 }
  0x42   : > { %p10088_p10 = scmp.lt.s32.totalorder %s10086_s9, %s10079_s30 }
  0x43   : > { %p10082_p6 = pnand %p10080_p4, %p10206_p7 }
  0x44   : > { %p10089_p11 = por %p10088_p10, %p10087_p9 }
  0x45   : > { %p10083_p8 = pneg %p10082_p6 }
  0x47   : > { %p10090_p12 = pnand %p10089_p11, %p10083_p8 }
  0x49   : > { %10093 = shalt.err (!%p10090_p12)
}
  0x4a   : > { %8936 = dma.hbm_to_vmem [thread:$0]  (!%p10190_p5), %s17184_s4, 16, %s10196_s10, [#allocation7]  }
  0x4b   : > { %269 = sbr.rel (%p10180_p3) target bundleno = 2667 (0xa6b), region = 48 }
  0x52   : > { %10099 = dma.done.wait (%p8937_p2), [#allocation5], 16  }
  0x53   : > { %10101 = vsyncadd (%p8937_p2), [#allocation5], 4294967280 }
  0x54   : > { %10103 = dma.done.wait (%p8937_p2), [#allocation7], 4624  }
  0x55   : > { %10105 = vsyncadd (%p8937_p2), [#allocation7], 4294962672  ;;  %vm319_vm0 = vcmask 31744   ;;  %v17188_v0 = vmov 0.0   ;;  %p309_p2 = scmp.lt.s32.totalorder %s10175_s27, 1  ;;  %vm691_vm1 = vcmask 1046528  }
  0x56   : > { %321 = vst.msk [vmem:[#allocation2 + $0x8] sm:$0xff] %vm319_vm0, %v17188_v0  ;;  %320 = vst.msk [vmem:[#allocation2] sm:$0xff] %vm319_vm0, %v17188_v0  ;;  %s10116_s13 = smov 4   ;;  %vm796_vm2 = vcmask 1045504   ;;  %s10117_s14 = smov 8   ;;  %vm392_vm3 = vcmask 261120  }
  0x57   : > { %322 = vst.msk [vmem:[#allocation2 + $0x10] sm:$0xff] %vm319_vm0, %v17188_v0  ;;  %323 = vst.msk [vmem:[#allocation2 + $0x18] sm:$0xff] %vm319_vm0, %v17188_v0  ;;  %s18636_s27 = smov (!%p309_p2, %s10175_s27), 1  ;;  %s10118_s26 = smov 12   ;;  %vm1835_vm4 = vcmask 1043456   ;;  %vm1557_vm5 = vcmask 64512  }
  0x58   : > { %324 = vst.msk [vmem:[#allocation2 + $0x20] sm:$0xff] %vm319_vm0, %v17188_v0  ;;  %325 = vst.msk [vmem:[#allocation2 + $0x28] sm:$0xff] %vm319_vm0, %v17188_v0  ;;  %s8323_s28 = sshll.u32 %s18636_s27, 8  ;;  %s10119_s15 = smov 16   ;;  %vm1582_vm6 = vcmask 97280   ;;  %vm1607_vm7 = vcmask 130048  }
  0x59   : > { %326 = vst.msk [vmem:[#allocation2 + $0x30] sm:$0xff] %vm319_vm0, %v17188_v0  ;;  %327 = vst.msk [vmem:[#allocation2 + $0x38] sm:$0xff] %vm319_vm0, %v17188_v0  ;;  %s10439_s16 = scalar_lea.vmem %s17180_s0, %s8323_s28  ;;  %s10120_s17 = smov 20   ;;  %vm1632_vm8 = vcmask 162816   ;;  %vm1657_vm9 = vcmask 195584   ;;  %vm1682_vm10 = vcmask 228352  }
  0x5a   : > { %328 = vst.msk [vmem:[#allocation2 + $0x40] sm:$0xff] %vm319_vm0, %v17188_v0  ;;  %329 = vst.msk [vmem:[#allocation2 + $0x48] sm:$0xff] %vm319_vm0, %v17188_v0  ;;  %v465_v1 = vld [vmem:[%s10439_s16] sm:$0xff]  ;;  %v467_v2 = vld [vmem:[%s10439_s16 + $0x10] sm:$0xff]  ;;  %s10121_s18 = smov 24   ;;  %s10122_s19 = smov 28  }
  0x5b   : > { %330 = vst.msk [vmem:[#allocation2 + $0x50] sm:$0xff] %vm319_vm0, %v17188_v0  ;;  %331 = vst.msk [vmem:[#allocation2 + $0x58] sm:$0xff] %vm319_vm0, %v17188_v0  ;;  %v466_v3 = vld [vmem:[%s10439_s16 + $0x8] sm:$0xff]  ;;  %v468_v6 = vld [vmem:[%s10439_s16 + $0x18] sm:$0xff]  ;;  %s10123_s8 = smov 32   ;;  %vm1755_vm11 = vcmask 1040384  }
  0x5c   : > { %332 = vst.msk [vmem:[#allocation2 + $0x60] sm:$0xff] %vm319_vm0, %v17188_v0  ;;  %333 = vst.msk [vmem:[#allocation2 + $0x68] sm:$0xff] %vm319_vm0, %v17188_v0  ;;  %v469_v9 = vld [vmem:[%s10439_s16 + $0x20] sm:$0xff]  ;;  %v470_v10 = vld [vmem:[%s10439_s16 + $0x28] sm:$0xff]  ;;  %vm1802_vm12 = vcmask 293888   ;;  %s10124_s10 = smov 64  }
  0x5d   : > { %334 = vst.msk [vmem:[#allocation2 + $0x70] sm:$0xff] %vm319_vm0, %v17188_v0  ;;  %335 = vst.msk [vmem:[#allocation2 + $0x78] sm:$0xff] %vm319_vm0, %v17188_v0  ;;  %v10444_v4 = vld [vmem:[#allocation2 + $0x8] sm:$0xff]  ;;  %v471_v11 = vld [vmem:[%s10439_s16 + $0x30] sm:$0xff]  ;;  %vm4295_vm13 = vcmask 523264   ;;  %vm4320_vm14 = vcmask 785408  }
  0x5e   : > { %336 = vst.msk [vmem:[#allocation2 + $0x80] sm:$0xff] %vm319_vm0, %v17188_v0  ;;  %337 = vst.msk [vmem:[#allocation2 + $0x88] sm:$0xff] %vm319_vm0, %v17188_v0  ;;  %v10446_v5 = vld [vmem:[#allocation2 + $0x10] sm:$0xff]  ;;  %v692_v7 = vrot.slane %v10444_v4, 1  ;;  %v472_v12 = vld [vmem:[%s10439_s16 + $0x38] sm:$0xff]  ;;  %v797_v59 = vrot.slane %v10444_v4, 2 }
  0x5f   : > { %338 = vst.msk [vmem:[#allocation2 + $0x90] sm:$0xff] %vm319_vm0, %v17188_v0  ;;  %339 = vst.msk [vmem:[#allocation2 + $0x98] sm:$0xff] %vm319_vm0, %v17188_v0  ;;  %v693_v8 = vrot.slane %v10446_v5, 1  ;;  %v473_v13 = vld [vmem:[%s10439_s16 + $0x40] sm:$0xff]  ;;  %v474_v14 = vld [vmem:[%s10439_s16 + $0x48] sm:$0xff]  ;;  %v798_v58 = vrot.slane %v10446_v5, 2 }
  0x60   : > { %340 = vst.msk [vmem:[#allocation2 + $0xa0] sm:$0xff] %vm319_vm0, %v17188_v0  ;;  %341 = vst.msk [vmem:[#allocation2 + $0xa8] sm:$0xff] %vm319_vm0, %v17188_v0  ;;  %716 = vrot.lane.b32.xlu0 %v692_v7, %s10116_s13  ;;  %v475_v15 = vld [vmem:[%s10439_s16 + $0x50] sm:$0xff]  ;;  %v476_v16 = vld [vmem:[%s10439_s16 + $0x58] sm:$0xff]  ;;  %s10126_s23 = smov 119   ;;  %s10127_s25 = smov 9  }
  0x61   : > { %342 = vst.msk [vmem:[#allocation2 + $0xb0] sm:$0xff] %vm319_vm0, %v17188_v0  ;;  %343 = vst.msk [vmem:[#allocation2 + $0xb8] sm:$0xff] %vm319_vm0, %v17188_v0  ;;  %720 = vrot.lane.b32.xlu1 %v693_v8, %s10116_s13  ;;  %v694_v17 = vsel %vm691_vm1, %v692_v7, %v693_v8  ;;  %v477_v18 = vld [vmem:[%s10439_s16 + $0x60] sm:$0xff]  ;;  %v478_v19 = vld [vmem:[%s10439_s16 + $0x68] sm:$0xff]  ;;  %v799_v61 = vsel %vm796_vm2, %v797_v59, %v798_v58  ;;  %s10128_s29 = smov 36   ;;  %vm5736_vm15 = vcmask 367616  }
  0x62   : > { %344 = vst.msk [vmem:[#allocation2 + $0xc0] sm:$0xff] %vm319_vm0, %v17188_v0  ;;  %345 = vst.msk [vmem:[#allocation2 + $0xc8] sm:$0xff] %vm319_vm0, %v17188_v0  ;;  %v479_v31 = vld [vmem:[%s10439_s16 + $0x70] sm:$0xff]  ;;  %v480_v32 = vld [vmem:[%s10439_s16 + $0x78] sm:$0xff] }
  0x63   : > { %346 = vst.msk [vmem:[#allocation2 + $0xd0] sm:$0xff] %vm319_vm0, %v17188_v0  ;;  %347 = vst.msk [vmem:[#allocation2 + $0xd8] sm:$0xff] %vm319_vm0, %v17188_v0  ;;  %v581_v57 = vld [vmem:[#allocation2 + $0x18] sm:$0xff] }
  0x64   : > { %348 = vst.msk [vmem:[#allocation2 + $0xe0] sm:$0xff] %vm319_vm0, %v17188_v0  ;;  %349 = vst.msk [vmem:[#allocation2 + $0xe8] sm:$0xff] %vm319_vm0, %v17188_v0  ;;  %718 = vrot.lane.b32.xlu0 %v694_v17, %s10116_s13  ;;  %v800_v60 = vrot.slane %v581_v57, 2  ;;  %v589_v5 = vld [vmem:[#allocation2 + $0x58] sm:$0xff] }
  0x65   : > { %350 = vst.msk [vmem:[#allocation2 + $0xf0] sm:$0xff] %vm319_vm0, %v17188_v0  ;;  %351 = vst.msk [vmem:[#allocation2 + $0xf8] sm:$0xff] %vm319_vm0, %v17188_v0 }
  0x66   : > { %352 = vst.msk [vmem:[#allocation2 + $0x100] sm:$0xff] %vm319_vm0, %v17188_v0  ;;  %353 = vst.msk [vmem:[#allocation2 + $0x108] sm:$0xff] %vm319_vm0, %v17188_v0  ;;  %v801_v62 = vsel %vm796_vm2, %v798_v58, %v800_v60  ;;  %v597_v17 = vld [vmem:[#allocation2 + $0x98] sm:$0xff] }
  0x67   : > { %354 = vst.msk [vmem:[#allocation2 + $0x110] sm:$0xff] %vm319_vm0, %v17188_v0  ;;  %355 = vst.msk [vmem:[#allocation2 + $0x118] sm:$0xff] %vm319_vm0, %v17188_v0 }
  0x68   : > { %356 = vst.msk [vmem:[#allocation2 + $0x120] sm:$0xff] %vm319_vm0, %v17188_v0  ;;  %357 = vst.msk [vmem:[#allocation2 + $0x128] sm:$0xff] %vm319_vm0, %v17188_v0 }
  0x69   : > { %358 = vst.msk [vmem:[#allocation2 + $0x130] sm:$0xff] %vm319_vm0, %v17188_v0  ;;  %359 = vst.msk [vmem:[#allocation2 + $0x138] sm:$0xff] %vm319_vm0, %v17188_v0 }
  0x6a   : > { %360 = vst.msk [vmem:[#allocation2 + $0x140] sm:$0xff] %vm319_vm0, %v17188_v0  ;;  %361 = vst.msk [vmem:[#allocation2 + $0x148] sm:$0xff] %vm319_vm0, %v17188_v0 }
  0x6b   : > { %362 = vst.msk [vmem:[#allocation2 + $0x150] sm:$0xff] %vm319_vm0, %v17188_v0  ;;  %363 = vst.msk [vmem:[#allocation2 + $0x158] sm:$0xff] %vm319_vm0, %v17188_v0 }
  0x6c   : > { %364 = vst.msk [vmem:[#allocation2 + $0x160] sm:$0xff] %vm319_vm0, %v17188_v0  ;;  %365 = vst.msk [vmem:[#allocation2 + $0x168] sm:$0xff] %vm319_vm0, %v17188_v0 }
  0x6d   : > { %366 = vst.msk [vmem:[#allocation2 + $0x170] sm:$0xff] %vm319_vm0, %v17188_v0  ;;  %367 = vst.msk [vmem:[#allocation2 + $0x178] sm:$0xff] %vm319_vm0, %v17188_v0 }
  0x6e   : > { %368 = vst.msk [vmem:[#allocation2 + $0x180] sm:$0xff] %vm319_vm0, %v17188_v0  ;;  %369 = vst.msk [vmem:[#allocation2 + $0x188] sm:$0xff] %vm319_vm0, %v17188_v0 }
  0x6f   : > { %370 = vst.msk [vmem:[#allocation2 + $0x190] sm:$0xff] %vm319_vm0, %v17188_v0  ;;  %371 = vst.msk [vmem:[#allocation2 + $0x198] sm:$0xff] %vm319_vm0, %v17188_v0 }
  0x70   : > { %372 = vst.msk [vmem:[#allocation2 + $0x1a0] sm:$0xff] %vm319_vm0, %v17188_v0  ;;  %373 = vst.msk [vmem:[#allocation2 + $0x1a8] sm:$0xff] %vm319_vm0, %v17188_v0 }
  0x71   : > { %374 = vst.msk [vmem:[#allocation2 + $0x1b0] sm:$0xff] %vm319_vm0, %v17188_v0  ;;  %375 = vst.msk [vmem:[#allocation2 + $0x1b8] sm:$0xff] %vm319_vm0, %v17188_v0 }
  0x72   : > { %376 = vst.msk [vmem:[#allocation2 + $0x1c0] sm:$0xff] %vm319_vm0, %v17188_v0  ;;  %377 = vst.msk [vmem:[#allocation2 + $0x1c8] sm:$0xff] %vm319_vm0, %v17188_v0 }
  0x73   : > { %378 = vst.msk [vmem:[#allocation2 + $0x1d0] sm:$0xff] %vm319_vm0, %v17188_v0  ;;  %379 = vst.msk [vmem:[#allocation2 + $0x1d8] sm:$0xff] %vm319_vm0, %v17188_v0 }
  0x74   : > { %380 = vst.msk [vmem:[#allocation2 + $0x1e0] sm:$0xff] %vm319_vm0, %v17188_v0  ;;  %381 = vst.msk [vmem:[#allocation2 + $0x1e8] sm:$0xff] %vm319_vm0, %v17188_v0 }
  0x75   : > { %382 = vst.msk [vmem:[#allocation2 + $0x1f0] sm:$0xff] %vm319_vm0, %v17188_v0  ;;  %383 = vst.msk [vmem:[#allocation2 + $0x1f8] sm:$0xff] %vm319_vm0, %v17188_v0 }
  0x76   : > { %384 = vst.msk [vmem:[#allocation2 + $0x200] sm:$0xff] %vm319_vm0, %v17188_v0  ;;  %385 = vst.msk [vmem:[#allocation2 + $0x208] sm:$0xff] %vm319_vm0, %v17188_v0 }
  0x77   : > { %386 = vst.msk [vmem:[#allocation2 + $0x210] sm:$0xff] %vm319_vm0, %v17188_v0  ;;  %387 = vst.msk [vmem:[#allocation2 + $0x218] sm:$0xff] %vm319_vm0, %v17188_v0 }
  0x78   : > { %388 = vst.msk [vmem:[#allocation2 + $0x220] sm:$0xff] %vm319_vm0, %v17188_v0  ;;  %389 = vst.msk [vmem:[#allocation2 + $0x228] sm:$0xff] %vm319_vm0, %v17188_v0 }
  0x79   : > { %390 = vst.msk [vmem:[#allocation2 + $0x230] sm:$0xff] %vm319_vm0, %v17188_v0  ;;  %391 = vst.msk [vmem:[#allocation2 + $0x238] sm:$0xff] %vm319_vm0, %v17188_v0 }
  0x7a   : > { %498 = vst.msk [vmem:[#allocation2 + $0x28] sm:$0xff] %vm319_vm0, %v465_v1  ;;  %500 = vst.msk [vmem:[#allocation2 + $0x48] sm:$0xff] %vm319_vm0, %v467_v2  ;;  %v585_v2 = vld [vmem:[#allocation2 + $0x38] sm:$0xff] }
  0x7b   : > { %499 = vst.msk [vmem:[#allocation2 + $0x30] sm:$0xff] %vm319_vm0, %v466_v3  ;;  %501 = vst.msk [vmem:[#allocation2 + $0x50] sm:$0xff] %vm319_vm0, %v468_v6  ;;  %v805_v3 = vrot.slane %v585_v2, 2  ;;  %v605_v2 = vld [vmem:[#allocation2 + $0xd8] sm:$0xff] }
  0x7c   : > { %502 = vst.msk [vmem:[#allocation2 + $0x68] sm:$0xff] %vm319_vm0, %v469_v9  ;;  %503 = vst.msk [vmem:[#allocation2 + $0x70] sm:$0xff] %vm319_vm0, %v470_v10  ;;  %v810_v9 = vrot.slane %v589_v5, 2 }
  0x7d   : > { %504 = vst.msk [vmem:[#allocation2 + $0x88] sm:$0xff] %vm319_vm0, %v471_v11  ;;  %505 = vst.msk [vmem:[#allocation2 + $0x90] sm:$0xff] %vm319_vm0, %v472_v12 }
  0x7e   : > { %506 = vst.msk [vmem:[#allocation2 + $0xa8] sm:$0xff] %vm319_vm0, %v473_v13  ;;  %507 = vst.msk [vmem:[#allocation2 + $0xb0] sm:$0xff] %vm319_vm0, %v474_v14  ;;  %v593_v14 = vld [vmem:[#allocation2 + $0x78] sm:$0xff] }
  0x7f   : > { %508 = vst.msk [vmem:[#allocation2 + $0xc8] sm:$0xff] %vm319_vm0, %v475_v15  ;;  %509 = vst.msk [vmem:[#allocation2 + $0xd0] sm:$0xff] %vm319_vm0, %v476_v16  ;;  %v815_v15 = vrot.slane %v593_v14, 2  ;;  %v830_v14 = vrot.slane %v605_v2, 2 }
  0x80   : > { %510 = vst.msk [vmem:[#allocation2 + $0xe8] sm:$0xff] %vm319_vm0, %v477_v18  ;;  %511 = vst.msk [vmem:[#allocation2 + $0xf0] sm:$0xff] %vm319_vm0, %v478_v19 }
  0x81   : > { %v10479_v20 = vld [vmem:[#allocation2 + $0x28] sm:$0xff]  ;;  %512 = vst.msk [vmem:[#allocation2 + $0x108] sm:$0xff] %vm319_vm0, %v479_v31  ;;  %513 = vst.msk [vmem:[#allocation2 + $0x110] sm:$0xff] %vm319_vm0, %v480_v32  ;;  %v820_v32 = vrot.slane %v597_v17, 2 }
  0x82   : > { %v10481_v21 = vld [vmem:[#allocation2 + $0x48] sm:$0xff]  ;;  %v10483_v22 = vld [vmem:[#allocation2 + $0x30] sm:$0xff]  ;;  %v10486_v23 = vrot.slane %v10479_v20, 1  ;;  %v10636_v63 = vrot.slane %v10479_v20, 2 }
  0x83   : > { %v10489_v24 = vrot.slane %v10481_v21, 1  ;;  %v10491_v25 = vld [vmem:[#allocation2 + $0x50] sm:$0xff]  ;;  %v10496_v26 = vrot.slane %v10483_v22, 1  ;;  %v10503_v28 = vld [vmem:[#allocation2 + $0x68] sm:$0xff]  ;;  %v803_v1 = vrot.slane %v10483_v22, 2  ;;  %v10653_v7 = vrot.slane %v10481_v21, 2 }
  0x84   : > { %722 = vrot.lane.b32.xlu1 %v10486_v23, %s10116_s13  ;;  %v10501_v27 = vrot.slane %v10491_v25, 1  ;;  %v10505_v29 = vld [vmem:[#allocation2 + $0x70] sm:$0xff]  ;;  %v10510_v30 = vrot.slane %v10503_v28, 1  ;;  %v10540_v37 = vld [vmem:[#allocation2 + $0x88] sm:$0xff]  ;;  %v10656_v8 = vrot.slane %v10491_v25, 2  ;;  %v10672_v12 = vrot.slane %v10503_v28, 2 }
  0x85   : > { %728 = vrot.lane.b32.xlu0 %v10489_v24, %s10116_s13  ;;  %v10519_v33 = vsel %vm691_vm1, %v10486_v23, %v10496_v26  ;;  %v10522_v34 = vrot.slane %v10505_v29, 1  ;;  %v10542_v38 = vld [vmem:[#allocation2 + $0x90] sm:$0xff]  ;;  %v10549_v39 = vrot.slane %v10540_v37, 1  ;;  %v10554_v41 = vld [vmem:[#allocation2 + $0xa8] sm:$0xff]  ;;  %v10643_v4 = vsel %vm796_vm2, %v10636_v63, %v803_v1 }
  0x86   : > { %v10533_v35 = vsel %vm691_vm1, %v10489_v24, %v10501_v27  ;;  %v10552_v40 = vrot.slane %v10542_v38, 1  ;;  %v10556_v42 = vld [vmem:[#allocation2 + $0xb0] sm:$0xff]  ;;  %v10568_v44 = vrot.slane %v10554_v41, 1  ;;  %v10582_v47 = vld [vmem:[#allocation2 + $0xc8] sm:$0xff]  ;;  %v10650_v6 = vsel %vm796_vm2, %v803_v1, %v805_v3  ;;  %17448 = vst [vmem:[#allocation15_spill] sm:$0xff] %v10656_v8 }
  0x87   : > { %v10538_v36 = vsel %vm691_vm1, %v10510_v30, %v10522_v34  ;;  %v10571_v45 = vrot.slane %v10556_v42, 1  ;;  %17444 = vst [vmem:[#allocation11_spill] sm:$0xff] %v10582_v47  ;;  %v10584_v48 = vld [vmem:[#allocation2 + $0xd0] sm:$0xff]  ;;  %v10591_v49 = vrot.slane %v10582_v47, 1  ;;  %v10596_v51 = vld [vmem:[#allocation2 + $0xe8] sm:$0xff]  ;;  %v10665_v10 = vsel %vm796_vm2, %v10653_v7, %v10656_v8 }
  0x88   : > { %726 = vrot.lane.b32.xlu1 %v10496_v26, %s10116_s13  ;;  %v10565_v43 = vsel %vm691_vm1, %v10549_v39, %v10552_v40  ;;  %17445 = vst [vmem:[#allocation12_spill] sm:$0xff] %v10584_v48  ;;  %v10594_v50 = vrot.slane %v10584_v48, 1  ;;  %17446 = vst [vmem:[#allocation13_spill] sm:$0xff] %v10596_v51  ;;  %v10598_v52 = vld [vmem:[#allocation2 + $0xf0] sm:$0xff]  ;;  %v10610_v54 = vrot.slane %v10596_v51, 1  ;;  %v10669_v11 = vsel %vm796_vm2, %v10656_v8, %v810_v9 }
  0x89   : > { %732 = vrot.lane.b32.xlu0 %v10501_v27, %s10116_s13  ;;  %v10580_v46 = vsel %vm691_vm1, %v10568_v44, %v10571_v45  ;;  %17447 = vst [vmem:[#allocation14_spill] sm:$0xff] %v10598_v52  ;;  %v10613_v55 = vrot.slane %v10598_v52, 1  ;;  %v10675_v13 = vrot.slane %v10505_v29, 2  ;;  %v10695_v19 = vrot.slane %v10540_v37, 2 }
  0x8a   : > { %v10607_v53 = vsel %vm691_vm1, %v10591_v49, %v10594_v50  ;;  %v10698_v31 = vrot.slane %v10542_v38, 2  ;;  %v10717_v60 = vrot.slane %v10556_v42, 2  ;;  %v10737_v5 = vrot.slane %v10582_v47, 2 }
  0x8b   : > { %v10622_v56 = vsel %vm691_vm1, %v10610_v54, %v10613_v55  ;;  %17449 = vst [vmem:[#allocation16_spill] sm:$0xff] %v10675_v13  ;;  %v10684_v16 = vsel %vm796_vm2, %v10672_v12, %v10675_v13  ;;  %v10692_v18 = vsel %vm796_vm2, %v10675_v13, %v815_v15  ;;  %v10740_v9 = vrot.slane %v10584_v48, 2 }
  0x8c   : > { %734 = vrot.lane.b32.xlu1 %v10510_v30, %s10116_s13  ;;  %17450 = vst [vmem:[#allocation17_spill] sm:$0xff] %v10698_v31  ;;  %v10707_v57 = vsel %vm796_vm2, %v10695_v19, %v10698_v31  ;;  %v10711_v58 = vsel %vm796_vm2, %v10698_v31, %v820_v32  ;;  %17451 = vst [vmem:[#allocation18_spill] sm:$0xff] %v10717_v60  ;;  %v10756_v32 = vrot.slane %v10596_v51, 2 }
  0x8d   : > { %724 = vrot.lane.b32.xlu0 %v10519_v33, %s10116_s13  ;;  %17452 = vst [vmem:[#allocation19_spill] sm:$0xff] %v10740_v9  ;;  %v10749_v15 = vsel %vm796_vm2, %v10737_v5, %v10740_v9  ;;  %v10753_v17 = vsel %vm796_vm2, %v10740_v9, %v830_v14  ;;  %v610_v9 = vld [vmem:[#allocation2 + $0x20] sm:$0xff] }
  0x90   : > { %730 = vrot.lane.b32.xlu1 %v10533_v35, %s10116_s13 }
  0x91   : > { %736 = vrot.lane.b32.xlu0 %v10538_v36, %s10116_s13 }
  0x94   : > { %738 = vrot.lane.b32.xlu1 %v10522_v34, %s10116_s13 }
  0x95   : > { %740 = vrot.lane.b32.xlu0 %v10549_v39, %s10116_s13 }
  0x98   : > { %742 = vrot.lane.b32.xlu1 %v10565_v43, %s10116_s13 }
  0x99   : > { %744 = vrot.lane.b32.xlu0 %v10552_v40, %s10116_s13 }
  0x9c   : > { %746 = vrot.lane.b32.xlu1 %v10568_v44, %s10116_s13 }
  0x9d   : > { %748 = vrot.lane.b32.xlu0 %v10580_v46, %s10116_s13 }
  0xa0   : > { %750 = vrot.lane.b32.xlu1 %v10571_v45, %s10116_s13 }
  0xa1   : > { %752 = vrot.lane.b32.xlu0 %v10591_v49, %s10116_s13 }
  0xa4   : > { %754 = vrot.lane.b32.xlu1 %v10607_v53, %s10116_s13 }
  0xa5   : > { %756 = vrot.lane.b32.xlu0 %v10594_v50, %s10116_s13 }
  0xa8   : > { %758 = vrot.lane.b32.xlu1 %v10610_v54, %s10116_s13 }
  0xa9   : > { %760 = vrot.lane.b32.xlu0 %v10622_v56, %s10116_s13 }
  0xac   : > { %762 = vrot.lane.b32.xlu1 %v10613_v55, %s10116_s13 }
  0xad   : > { %837 = vrot.lane.b32.xlu0 %v797_v59, %s10117_s14  ;;  %v10714_v59 = vrot.slane %v10554_v41, 2 }
  0xaf   : > { %v10726_v1 = vsel %vm796_vm2, %v10714_v59, %v10717_v60 }
  0xb0   : > { %839 = vrot.lane.b32.xlu1 %v799_v61, %s10117_s14  ;;  %v601_v61 = vld [vmem:[#allocation2 + $0xb8] sm:$0xff] }
  0xb1   : > { %841 = vrot.lane.b32.xlu0 %v801_v62, %s10117_s14  ;;  %v825_v62 = vrot.slane %v601_v61, 2  ;;  %v10759_v61 = vrot.slane %v10598_v52, 2 }
  0xb3   : > { %v10734_v3 = vsel %vm796_vm2, %v10717_v60, %v825_v62  ;;  %17453 = vst [vmem:[#allocation20_spill] sm:$0xff] %v10759_v61  ;;  %v609_v62 = vld [vmem:[#allocation2 + $0xf8] sm:$0xff]  ;;  %v10768_v0 = vsel %vm796_vm2, %v10756_v32, %v10759_v61 }
  0xb4   : > { %843 = vrot.lane.b32.xlu1 %v10636_v63, %s10117_s14  ;;  %v835_v2 = vrot.slane %v609_v62, 2  ;;  %v10785_v62 = vld [vmem:[#allocation2 + $0x40] sm:$0xff] }
  0xb5   : > { %845 = vrot.lane.b32.xlu0 %v10643_v4, %s10117_s14 }
  0xb6   : > { %v10776_v14 = vsel %vm796_vm2, %v10759_v61, %v835_v2  ;;  %v10791_v2 = vld [vmem:[#allocation2 + $0x60] sm:$0xff] }
  0xb7   : > { %v10811_v61 = vld [vmem:[#allocation2 + $0xa0] sm:$0xff] }
  0xb8   : > { %847 = vrot.lane.b32.xlu1 %v10650_v6, %s10117_s14 }
  0xb9   : > { %849 = vrot.lane.b32.xlu0 %v10653_v7, %s10117_s14 }
  0xbc   : > { %851 = vrot.lane.b32.xlu1 %v10665_v10, %s10117_s14 }
  0xbd   : > { %853 = vrot.lane.b32.xlu0 %v10669_v11, %s10117_s14 }
  0xc0   : > { %855 = vrot.lane.b32.xlu1 %v10672_v12, %s10117_s14 }
  0xc1   : > { %857 = vrot.lane.b32.xlu0 %v10684_v16, %s10117_s14 }
  0xc4   : > { %859 = vrot.lane.b32.xlu1 %v10692_v18, %s10117_s14 }
  0xc5   : > { %861 = vrot.lane.b32.xlu0 %v10695_v19, %s10117_s14 }
  0xc8   : > { %863 = vrot.lane.b32.xlu1 %v10707_v57, %s10117_s14 }
  0xc9   : > { %865 = vrot.lane.b32.xlu0 %v10711_v58, %s10117_s14 }
  0xcc   : > { %867 = vrot.lane.b32.xlu1 %v10714_v59, %s10117_s14 }
  0xcd   : > { %869 = vrot.lane.b32.xlu0 %v10726_v1, %s10117_s14 }
  0xd0   : > { %871 = vrot.lane.b32.xlu1 %v10734_v3, %s10117_s14 }
  0xd1   : > { %873 = vrot.lane.b32.xlu0 %v10737_v5, %s10117_s14 }
  0xd4   : > { %875 = vrot.lane.b32.xlu1 %v10749_v15, %s10117_s14 }
  0xd5   : > { %877 = vrot.lane.b32.xlu0 %v10753_v17, %s10117_s14 }
  0xd8   : > { %879 = vrot.lane.b32.xlu1 %v10756_v32, %s10117_s14 }
  0xd9   : > { %881 = vrot.lane.b32.xlu0 %v10768_v0, %s10117_s14 }
  0xdc   : > { %883 = vrot.lane.b32.xlu1 %v10776_v14, %s10117_s14 }
  0xdd   : > { %933 = vrot.lane.b32.xlu0 %v610_v9, %s10118_s26  ;;  %v10807_v9 = vpop.permute.xlu1 %720 }
  0xde   : > { %17455 = vst [vmem:[#allocation22_spill] sm:$0xff] %v10807_v9  ;;  %v10827_v9 = vld [vmem:[#allocation2 + $0xc0] sm:$0xff] }
  0xe0   : > { %935 = vrot.lane.b32.xlu1 %v10479_v20, %s10118_s26  ;;  %v10801_v20 = vld [vmem:[#allocation2 + $0x80] sm:$0xff] }
  0xe1   : > { %937 = vrot.lane.b32.xlu0 %v10483_v22, %s10118_s26  ;;  %v10803_v22 = vpop.permute.xlu0 %716 }
  0xe2   : > { %17454 = vst [vmem:[#allocation21_spill] sm:$0xff] %v10803_v22 }
  0xe4   : > { %939 = vrot.lane.b32.xlu1 %v10785_v62, %s10118_s26 }
  0xe5   : > { %941 = vrot.lane.b32.xlu0 %v10481_v21, %s10118_s26  ;;  %v10813_v60 = vpop.permute.xlu0 %718 }
  0xe6   : > { %17456 = vst [vmem:[#allocation23_spill] sm:$0xff] %v10813_v60 }
  0xe8   : > { %943 = vrot.lane.b32.xlu1 %v10491_v25, %s10118_s26 }
  0xe9   : > { %945 = vrot.lane.b32.xlu0 %v10791_v2, %s10118_s26 }
  0xec   : > { %947 = vrot.lane.b32.xlu1 %v10503_v28, %s10118_s26 }
  0xed   : > { %949 = vrot.lane.b32.xlu0 %v10505_v29, %s10118_s26 }
  0xf0   : > { %951 = vrot.lane.b32.xlu1 %v10801_v20, %s10118_s26 }
  0xf1   : > { %953 = vrot.lane.b32.xlu0 %v10540_v37, %s10118_s26 }
  0xf4   : > { %955 = vrot.lane.b32.xlu1 %v10542_v38, %s10118_s26 }
  0xf5   : > { %957 = vrot.lane.b32.xlu0 %v10811_v61, %s10118_s26 }
  0xf6   : > { %v10819_v31 = vpop.permute.xlu1 %722 }
  0xf7   : > { %17457 = vst [vmem:[#allocation24_spill] sm:$0xff] %v10819_v31  ;;  %v10821_v22 = vpop.permute.xlu0 %728 }
  0xf8   : > { %17458 = vst [vmem:[#allocation25_spill] sm:$0xff] %v10821_v22  ;;  %959 = vrot.lane.b32.xlu1 %v10554_v41, %s10118_s26  ;;  %v10839_v22 = vld [vmem:[#allocation2 + $0xe0] sm:$0xff] }
  0xf9   : > { %961 = vrot.lane.b32.xlu0 %v10556_v42, %s10118_s26 }
  0xfa   : > { %v10829_v13 = vpop.permute.xlu1 %726 }
  0xfb   : > { %17459 = vst [vmem:[#allocation26_spill] sm:$0xff] %v10829_v13  ;;  %v10831_v60 = vpop.permute.xlu0 %732 }
  0xfc   : > { %17460 = vst [vmem:[#allocation27_spill] sm:$0xff] %v10831_v60  ;;  %963 = vrot.lane.b32.xlu1 %v10827_v9, %s10118_s26 }
  0xfd   : > { %965 = vrot.lane.b32.xlu0 %v10582_v47, %s10118_s26  ;;  %v10859_v47 = vld [vmem:[#allocation2 + $0x108] sm:$0xff] }
  0xfe   : > { %v10837_v31 = vpop.permute.xlu1 %734 }
  0xff   : > { %17461 = vst [vmem:[#allocation28_spill] sm:$0xff] %v10837_v31  ;;  %v10841_v8 = vpop.permute.xlu0 %724  ;;  %v10855_v31 = vld [vmem:[#allocation2 + $0x100] sm:$0xff] }
 0x100   : > { %17462 = vst [vmem:[#allocation29_spill] sm:$0xff] %v10841_v8  ;;  %967 = vrot.lane.b32.xlu1 %v10584_v48, %s10118_s26  ;;  %17465 = vst [vmem:[#allocation32_spill] sm:$0xff] %v10855_v31 }
 0x101   : > { %969 = vrot.lane.b32.xlu0 %v10839_v22, %s10118_s26 }
 0x102   : > { %v10847_v13 = vpop.permute.xlu1 %730 }
 0x103   : > { %17463 = vst [vmem:[#allocation30_spill] sm:$0xff] %v10847_v13  ;;  %v10849_v60 = vpop.permute.xlu0 %736 }
 0x104   : > { %17464 = vst [vmem:[#allocation31_spill] sm:$0xff] %v10849_v60  ;;  %971 = vrot.lane.b32.xlu1 %v10596_v51, %s10118_s26  ;;  %v10867_v60 = vld [vmem:[#allocation2 + $0x110] sm:$0xff]  ;;  %v482_v51 = vld [vmem:[%s10439_s16 + $0x88] sm:$0xff] }
 0x105   : > { %973 = vrot.lane.b32.xlu0 %v10598_v52, %s10118_s26  ;;  %515 = vst.msk [vmem:[#allocation2 + $0x130] sm:$0xff] %vm319_vm0, %v482_v51 }
 0x106   : > { %v10857_v8 = vpop.permute.xlu1 %738 }
 0x107   : > { %17466 = vst [vmem:[#allocation33_spill] sm:$0xff] %v10857_v8  ;;  %v10861_v48 = vpop.permute.xlu0 %740 }
 0x108   : > { %17467 = vst [vmem:[#allocation34_spill] sm:$0xff] %v10861_v48  ;;  %975 = vrot.lane.b32.xlu1 %v10855_v31, %s10118_s26  ;;  %v481_v31 = vld [vmem:[%s10439_s16 + $0x80] sm:$0xff] }
 0x109   : > { %977 = vrot.lane.b32.xlu0 %v10859_v47, %s10118_s26  ;;  %514 = vst.msk [vmem:[#allocation2 + $0x128] sm:$0xff] %vm319_vm0, %v481_v31 }
 0x10a   : > { %v10869_v13 = vpop.permute.xlu1 %742 }
 0x10b   : > { %17468 = vst [vmem:[#allocation35_spill] sm:$0xff] %v10869_v13  ;;  %v10871_v52 = vpop.permute.xlu0 %744 }
 0x10c   : > { %17469 = vst [vmem:[#allocation36_spill] sm:$0xff] %v10871_v52  ;;  %979 = vrot.lane.b32.xlu1 %v10867_v60, %s10118_s26 }
 0x10d   : > { %1029 = vrot.lane.b32.xlu0 %v10486_v23, %s10119_s15 }
 0x10e   : > { %v10877_v48 = vpop.permute.xlu1 %746 }
 0x10f   : > { %v10879_v8 = vpop.permute.xlu0 %748 }
 0x110   : > { %1031 = vrot.lane.b32.xlu1 %v10519_v33, %s10119_s15 }
 0x111   : > { %1033 = vrot.lane.b32.xlu0 %v10496_v26, %s10119_s15 }
 0x112   : > { %v10887_v52 = vpop.permute.xlu1 %750 }
 0x113   : > { %17470 = vst [vmem:[#allocation37_spill] sm:$0xff] %v10887_v52  ;;  %v10889_v13 = vpop.permute.xlu0 %752 }
 0x114   : > { %17471 = vst [vmem:[#allocation38_spill] sm:$0xff] %v10889_v13  ;;  %1035 = vrot.lane.b32.xlu1 %v10489_v24, %s10119_s15 }
 0x115   : > { %1037 = vrot.lane.b32.xlu0 %v10533_v35, %s10119_s15 }
 0x116   : > { %v10897_v23 = vpop.permute.xlu1 %754 }
 0x117   : > { %17472 = vst [vmem:[#allocation39_spill] sm:$0xff] %v10897_v23  ;;  %v10899_v33 = vpop.permute.xlu0 %756 }
 0x118   : > { %17473 = vst [vmem:[#allocation40_spill] sm:$0xff] %v10899_v33  ;;  %1039 = vrot.lane.b32.xlu1 %v10501_v27, %s10119_s15 }
 0x119   : > { %1041 = vrot.lane.b32.xlu0 %v10510_v30, %s10119_s15 }
 0x11a   : > { %v10905_v26 = vpop.permute.xlu1 %758 }
 0x11b   : > { %17474 = vst [vmem:[#allocation41_spill] sm:$0xff] %v10905_v26  ;;  %v10907_v31 = vpop.permute.xlu0 %760 }
 0x11c   : > { %17475 = vst [vmem:[#allocation42_spill] sm:$0xff] %v10907_v31  ;;  %1043 = vrot.lane.b32.xlu1 %v10538_v36, %s10119_s15 }
 0x11d   : > { %1045 = vrot.lane.b32.xlu0 %v10522_v34, %s10119_s15 }
 0x11e   : > { %v10913_v51 = vpop.permute.xlu1 %762 }
 0x11f   : > { %17476 = vst [vmem:[#allocation43_spill] sm:$0xff] %v10913_v51  ;;  %v10915_v23 = vpop.permute.xlu0 %837 }
 0x120   : > { %17477 = vst [vmem:[#allocation44_spill] sm:$0xff] %v10915_v23  ;;  %1047 = vrot.lane.b32.xlu1 %v10549_v39, %s10119_s15 }
 0x121   : > { %1049 = vrot.lane.b32.xlu0 %v10565_v43, %s10119_s15 }
 0x122   : > { %v10921_v33 = vpop.permute.xlu1 %839 }
 0x123   : > { %17478 = vst [vmem:[#allocation45_spill] sm:$0xff] %v10921_v33  ;;  %v10923_v26 = vpop.permute.xlu0 %841 }
 0x124   : > { %17479 = vst [vmem:[#allocation46_spill] sm:$0xff] %v10923_v26  ;;  %1051 = vrot.lane.b32.xlu1 %v10552_v40, %s10119_s15 }
 0x125   : > { %1053 = vrot.lane.b32.xlu0 %v10568_v44, %s10119_s15 }
 0x126   : > { %v10929_v31 = vpop.permute.xlu1 %843 }
 0x127   : > { %17480 = vst [vmem:[#allocation47_spill] sm:$0xff] %v10929_v31  ;;  %v10931_v51 = vpop.permute.xlu0 %845 }
 0x128   : > { %17481 = vst [vmem:[#allocation48_spill] sm:$0xff] %v10931_v51  ;;  %1055 = vrot.lane.b32.xlu1 %v10580_v46, %s10119_s15  ;;  %v10959_v51 = vrot.slane %v10859_v47, 1 }
 0x129   : > { %1057 = vrot.lane.b32.xlu0 %v10571_v45, %s10119_s15 }
 0x12a   : > { %v10937_v23 = vpop.permute.xlu1 %847 }
 0x12b   : > { %17482 = vst [vmem:[#allocation49_spill] sm:$0xff] %v10937_v23  ;;  %v10939_v33 = vpop.permute.xlu0 %849  ;;  %v10954_v23 = vrot.slane %v10867_v60, 1 }
 0x12c   : > { %17483 = vst [vmem:[#allocation50_spill] sm:$0xff] %v10939_v33  ;;  %1059 = vrot.lane.b32.xlu1 %v10591_v49, %s10119_s15 }
 0x12d   : > { %1061 = vrot.lane.b32.xlu0 %v10607_v53, %s10119_s15 }
 0x12e   : > { %v10945_v26 = vpop.permute.xlu1 %851 }
 0x12f   : > { %17484 = vst [vmem:[#allocation51_spill] sm:$0xff] %v10945_v26  ;;  %v10947_v31 = vpop.permute.xlu0 %853  ;;  %v10972_v26 = vsel %vm691_vm1, %v10959_v51, %v10954_v23 }
 0x130   : > { %17485 = vst [vmem:[#allocation52_spill] sm:$0xff] %v10947_v31  ;;  %1063 = vrot.lane.b32.xlu1 %v10594_v50, %s10119_s15 }
 0x131   : > { %1065 = vrot.lane.b32.xlu0 %v10610_v54, %s10119_s15 }
 0x132   : > { %v10956_v33 = vpop.permute.xlu1 %855 }
 0x133   : > { %17486 = vst [vmem:[#allocation53_spill] sm:$0xff] %v10956_v33  ;;  %v10961_v13 = vpop.permute.xlu0 %857 }
 0x134   : > { %17487 = vst [vmem:[#allocation54_spill] sm:$0xff] %v10961_v13  ;;  %1067 = vrot.lane.b32.xlu1 %v10622_v56, %s10119_s15 }
 0x135   : > { %1069 = vrot.lane.b32.xlu0 %v10613_v55, %s10119_s15 }
 0x136   : > { %v10967_v31 = vpop.permute.xlu1 %859 }
 0x137   : > { %17488 = vst [vmem:[#allocation55_spill] sm:$0xff] %v10967_v31  ;;  %v10974_v52 = vpop.permute.xlu0 %861 }
 0x138   : > { %17489 = vst [vmem:[#allocation56_spill] sm:$0xff] %v10974_v52  ;;  %1071 = vrot.lane.b32.xlu1 %v10959_v51, %s10119_s15 }
 0x139   : > { %1073 = vrot.lane.b32.xlu0 %v10972_v26, %s10119_s15 }
 0x13a   : > { %v10980_v13 = vpop.permute.xlu1 %863 }
 0x13b   : > { %17490 = vst [vmem:[#allocation57_spill] sm:$0xff] %v10980_v13  ;;  %v10982_v33 = vpop.permute.xlu0 %865 }
 0x13c   : > { %17491 = vst [vmem:[#allocation58_spill] sm:$0xff] %v10982_v33  ;;  %1075 = vrot.lane.b32.xlu1 %v10954_v23, %s10119_s15 }
 0x13d   : > { %1149 = vrot.lane.b32.xlu0 %v10636_v63, %s10120_s17 }
 0x13e   : > { %v10988_v31 = vpop.permute.xlu1 %867 }
 0x13f   : > { %17492 = vst [vmem:[#allocation59_spill] sm:$0xff] %v10988_v31  ;;  %v10990_v52 = vpop.permute.xlu0 %869 }
 0x140   : > { %1151 = vrot.lane.b32.xlu1 %v10643_v4, %s10120_s17 }
 0x141   : > { %1153 = vrot.lane.b32.xlu0 %v10650_v6, %s10120_s17 }
 0x142   : > { %v10996_v13 = vpop.permute.xlu1 %871 }
 0x143   : > { %v10998_v33 = vpop.permute.xlu0 %873 }
 0x144   : > { %17493 = vst [vmem:[#allocation60_spill] sm:$0xff] %v10998_v33  ;;  %1155 = vrot.lane.b32.xlu1 %v10653_v7, %s10120_s17 }
 0x145   : > { %1157 = vrot.lane.b32.xlu0 %v10665_v10, %s10120_s17 }
 0x146   : > { %v11004_v63 = vpop.permute.xlu1 %875 }
 0x147   : > { %17494 = vst [vmem:[#allocation61_spill] sm:$0xff] %v11004_v63  ;;  %v11006_v31 = vpop.permute.xlu0 %877 }
 0x148   : > { %1159 = vrot.lane.b32.xlu1 %v10669_v11, %s10120_s17 }
 0x149   : > { %1161 = vrot.lane.b32.xlu0 %v10672_v12, %s10120_s17 }
 0x14a   : > { %v11012_v4 = vpop.permute.xlu1 %879 }
 0x14b   : > { %17495 = vst [vmem:[#allocation62_spill] sm:$0xff] %v11012_v4  ;;  %v11014_v6 = vpop.permute.xlu0 %881 }
 0x14c   : > { %17496 = vst [vmem:[#allocation63_spill] sm:$0xff] %v11014_v6  ;;  %1163 = vrot.lane.b32.xlu1 %v10684_v16, %s10120_s17 }
 0x14d   : > { %1165 = vrot.lane.b32.xlu0 %v10692_v18, %s10120_s17 }
 0x14e   : > { %v11020_v33 = vpop.permute.xlu1 %883 }
 0x14f   : > { %17497 = vst [vmem:[#allocation64_spill] sm:$0xff] %v11020_v33  ;;  %v11022_v63 = vpop.permute.xlu0 %933 }
 0x150   : > { %17498 = vst [vmem:[#allocation65_spill] sm:$0xff] %v11022_v63  ;;  %1167 = vrot.lane.b32.xlu1 %v10695_v19, %s10120_s17 }
 0x151   : > { %1169 = vrot.lane.b32.xlu0 %v10707_v57, %s10120_s17 }
 0x152   : > { %v11028_v11 = vpop.permute.xlu1 %935 }
 0x153   : > { %17499 = vst [vmem:[#allocation66_spill] sm:$0xff] %v11028_v11  ;;  %v11030_v4 = vpop.permute.xlu0 %937 }
 0x154   : > { %17500 = vst [vmem:[#allocation67_spill] sm:$0xff] %v11030_v4  ;;  %1171 = vrot.lane.b32.xlu1 %v10711_v58, %s10120_s17 }
 0x155   : > { %1173 = vrot.lane.b32.xlu0 %v10714_v59, %s10120_s17 }
 0x156   : > { %v11036_v18 = vpop.permute.xlu1 %939 }
 0x157   : > { %17501 = vst [vmem:[#allocation68_spill] sm:$0xff] %v11036_v18  ;;  %v11038_v33 = vpop.permute.xlu0 %941 }
 0x158   : > { %17502 = vst [vmem:[#allocation69_spill] sm:$0xff] %v11038_v33  ;;  %1175 = vrot.lane.b32.xlu1 %v10726_v1, %s10120_s17  ;;  %v11066_v33 = vld [vmem:[#allocation2 + $0x118] sm:$0xff] }
 0x159   : > { %1177 = vrot.lane.b32.xlu0 %v10734_v3, %s10120_s17  ;;  %v11061_v3 = vrot.slane %v10859_v47, 2 }
 0x15a   : > { %v11044_v6 = vpop.permute.xlu1 %943 }
 0x15b   : > { %17503 = vst [vmem:[#allocation70_spill] sm:$0xff] %v11044_v6  ;;  %v11046_v11 = vpop.permute.xlu0 %945 }
 0x15c   : > { %17504 = vst [vmem:[#allocation71_spill] sm:$0xff] %v11046_v11  ;;  %1179 = vrot.lane.b32.xlu1 %v10737_v5, %s10120_s17  ;;  %v1145_v11 = vrot.slane %v10867_v60, 2 }
 0x15d   : > { %1181 = vrot.lane.b32.xlu0 %v10749_v15, %s10120_s17 }
 0x15e   : > { %v11052_v58 = vpop.permute.xlu1 %947 }
 0x15f   : > { %17505 = vst [vmem:[#allocation72_spill] sm:$0xff] %v11052_v58  ;;  %v11054_v18 = vpop.permute.xlu0 %949  ;;  %v11079_v58 = vsel %vm796_vm2, %v11061_v3, %v1145_v11 }
 0x160   : > { %17506 = vst [vmem:[#allocation73_spill] sm:$0xff] %v11054_v18  ;;  %1183 = vrot.lane.b32.xlu1 %v10753_v17, %s10120_s17  ;;  %v17201_v17 = vrot.slane %v11066_v33, 2 }
 0x161   : > { %1185 = vrot.lane.b32.xlu0 %v10756_v32, %s10120_s17 }
 0x162   : > { %v11064_v6 = vpop.permute.xlu1 %951 }
 0x163   : > { %17507 = vst [vmem:[#allocation74_spill] sm:$0xff] %v11064_v6  ;;  %v11068_v4 = vpop.permute.xlu0 %953 }
 0x164   : > { %17508 = vst [vmem:[#allocation75_spill] sm:$0xff] %v11068_v4  ;;  %1187 = vrot.lane.b32.xlu1 %v10768_v0, %s10120_s17 }
 0x165   : > { %1189 = vrot.lane.b32.xlu0 %v10776_v14, %s10120_s17  ;;  %v11090_v14 = vsel %vm796_vm2, %v1145_v11, %v17201_v17 }
 0x166   : > { %v11075_v18 = vpop.permute.xlu1 %955 }
 0x167   : > { %17509 = vst [vmem:[#allocation76_spill] sm:$0xff] %v11075_v18  ;;  %v11081_v63 = vpop.permute.xlu0 %957 }
 0x168   : > { %17510 = vst [vmem:[#allocation77_spill] sm:$0xff] %v11081_v63  ;;  %1191 = vrot.lane.b32.xlu1 %v11061_v3, %s10120_s17 }
 0x169   : > { %1193 = vrot.lane.b32.xlu0 %v11079_v58, %s10120_s17 }
 0x16a   : > { %v11092_v4 = vpop.permute.xlu1 %959 }
 0x16b   : > { %v11094_v18 = vpop.permute.xlu0 %961 }
 0x16c   : > { %17511 = vst [vmem:[#allocation78_spill] sm:$0xff] %v11094_v18  ;;  %1195 = vrot.lane.b32.xlu1 %v11090_v14, %s10120_s17 }
 0x16d   : > { %1245 = vrot.lane.b32.xlu0 %v10785_v62, %s10121_s18 }
 0x16e   : > { %v11100_v63 = vpop.permute.xlu1 %963 }
 0x16f   : > { %17512 = vst [vmem:[#allocation79_spill] sm:$0xff] %v11100_v63  ;;  %v11102_v6 = vpop.permute.xlu0 %965 }
 0x170   : > { %17513 = vst [vmem:[#allocation80_spill] sm:$0xff] %v11102_v6  ;;  %1247 = vrot.lane.b32.xlu1 %v10481_v21, %s10121_s18 }
 0x171   : > { %1249 = vrot.lane.b32.xlu0 %v10491_v25, %s10121_s18 }
 0x172   : > { %v11108_v11 = vpop.permute.xlu1 %967 }
 0x173   : > { %17514 = vst [vmem:[#allocation81_spill] sm:$0xff] %v11108_v11  ;;  %v11110_v17 = vpop.permute.xlu0 %969  ;;  %v491_v11 = vld [vmem:[%s10439_s16 + $0xd0] sm:$0xff] }
 0x174   : > { %17515 = vst [vmem:[#allocation82_spill] sm:$0xff] %v11110_v17  ;;  %1251 = vrot.lane.b32.xlu1 %v10791_v2, %s10121_s18  ;;  %v483_v2 = vld [vmem:[%s10439_s16 + $0x90] sm:$0xff]  ;;  %524 = vst.msk [vmem:[#allocation2 + $0x1c8] sm:$0xff] %vm319_vm0, %v491_v11  ;;  %v493_v11 = vld [vmem:[%s10439_s16 + $0xe0] sm:$0xff] }
 0x175   : > { %1253 = vrot.lane.b32.xlu0 %v10503_v28, %s10121_s18  ;;  %516 = vst.msk [vmem:[#allocation2 + $0x148] sm:$0xff] %vm319_vm0, %v483_v2  ;;  %526 = vst.msk [vmem:[#allocation2 + $0x1e8] sm:$0xff] %vm319_vm0, %v493_v11 }
 0x176   : > { %v11116_v62 = vpop.permute.xlu1 %971 }
 0x177   : > { %17516 = vst [vmem:[#allocation83_spill] sm:$0xff] %v11116_v62  ;;  %v11118_v6 = vpop.permute.xlu0 %973  ;;  %v17527_v62 = vld [vmem:[#allocation32_spill] sm:$0xff] }
 0x178   : > { %17517 = vst [vmem:[#allocation84_spill] sm:$0xff] %v11118_v6  ;;  %1255 = vrot.lane.b32.xlu1 %v10505_v29, %s10121_s18  ;;  %v484_v29 = vld [vmem:[%s10439_s16 + $0x98] sm:$0xff] }
 0x179   : > { %1257 = vrot.lane.b32.xlu0 %v10801_v20, %s10121_s18  ;;  %517 = vst.msk [vmem:[#allocation2 + $0x150] sm:$0xff] %vm319_vm0, %v484_v29  ;;  %v485_v20 = vld [vmem:[%s10439_s16 + $0xa0] sm:$0xff] }
 0x17a   : > { %v11124_v21 = vpop.permute.xlu1 %975  ;;  %518 = vst.msk [vmem:[#allocation2 + $0x168] sm:$0xff] %vm319_vm0, %v485_v20  ;;  %v17521_v29 = vld [vmem:[#allocation11_spill] sm:$0xff]  ;;  %v488_v20 = vld [vmem:[%s10439_s16 + $0xb8] sm:$0xff] }
 0x17b   : > { %17518 = vst [vmem:[#allocation85_spill] sm:$0xff] %v11124_v21  ;;  %v11126_v25 = vpop.permute.xlu0 %977  ;;  %521 = vst.msk [vmem:[#allocation2 + $0x190] sm:$0xff] %vm319_vm0, %v488_v20  ;;  %v17526_v21 = vld [vmem:[#allocation14_spill] sm:$0xff] }
 0x17c   : > { %17519 = vst [vmem:[#allocation86_spill] sm:$0xff] %v11126_v25  ;;  %1259 = vrot.lane.b32.xlu1 %v10540_v37, %s10121_s18 }
 0x17d   : > { %1261 = vrot.lane.b32.xlu0 %v10542_v38, %s10121_s18 }
 0x17e   : > { %v11132_v28 = vpop.permute.xlu1 %979 }
 0x17f   : > { %17520 = vst [vmem:[#allocation87_spill] sm:$0xff] %v11132_v28  ;;  %v11135_v6 = vpop.permute.xlu0 %1029 }
 0x180   : > { %1263 = vrot.lane.b32.xlu1 %v10811_v61, %s10121_s18  ;;  %v486_v61 = vld [vmem:[%s10439_s16 + $0xa8] sm:$0xff] }
 0x181   : > { %1265 = vrot.lane.b32.xlu0 %v10554_v41, %s10121_s18  ;;  %519 = vst.msk [vmem:[#allocation2 + $0x170] sm:$0xff] %vm319_vm0, %v486_v61  ;;  %v17523_v61 = vld [vmem:[#allocation13_spill] sm:$0xff] }
 0x182   : > { %v11144_v37 = vpop.permute.xlu1 %1031 }
 0x183   : > { %v11146_v38 = vpop.permute.xlu0 %1033 }
 0x184   : > { %1267 = vrot.lane.b32.xlu1 %v10556_v42, %s10121_s18  ;;  %v17522_v42 = vld [vmem:[#allocation12_spill] sm:$0xff] }
 0x185   : > { %1269 = vrot.lane.b32.xlu0 %v10827_v9, %s10121_s18  ;;  %v487_v9 = vld [vmem:[%s10439_s16 + $0xb0] sm:$0xff] }
 0x186   : > { %v11154_v2 = vpop.permute.xlu1 %1035  ;;  %520 = vst.msk [vmem:[#allocation2 + $0x188] sm:$0xff] %vm319_vm0, %v487_v9  ;;  %v489_v9 = vld [vmem:[%s10439_s16 + $0xc0] sm:$0xff] }
 0x187   : > { %v11158_v41 = vpop.permute.xlu0 %1037  ;;  %522 = vst.msk [vmem:[#allocation2 + $0x1a8] sm:$0xff] %vm319_vm0, %v489_v9  ;;  %v492_v9 = vld [vmem:[%s10439_s16 + $0xd8] sm:$0xff] }
 0x188   : > { %1271 = vrot.lane.b32.xlu1 %v17521_v29, %s10121_s18  ;;  %525 = vst.msk [vmem:[#allocation2 + $0x1d0] sm:$0xff] %vm319_vm0, %v492_v9 }
 0x189   : > { %1273 = vrot.lane.b32.xlu0 %v17522_v42, %s10121_s18 }
 0x18a   : > { %v11164_v28 = vpop.permute.xlu1 %1039 }
 0x18b   : > { %v11167_v25 = vpop.permute.xlu0 %1041 }
 0x18c   : > { %1275 = vrot.lane.b32.xlu1 %v10839_v22, %s10121_s18  ;;  %v490_v22 = vld [vmem:[%s10439_s16 + $0xc8] sm:$0xff] }
 0x18d   : > { %1277 = vrot.lane.b32.xlu0 %v17523_v61, %s10121_s18  ;;  %523 = vst.msk [vmem:[#allocation2 + $0x1b0] sm:$0xff] %vm319_vm0, %v490_v22  ;;  %v11198_v61 = vld [vmem:[#allocation2 + $0x128] sm:$0xff] }
 0x18e   : > { %v11176_v29 = vpop.permute.xlu1 %1043 }
 0x18f   : > { %17524 = vst [vmem:[#allocation11_spill] sm:$0xff] %v11176_v29  ;;  %v11178_v42 = vpop.permute.xlu0 %1045  ;;  %v17640_v29 = vld [vmem:[#allocation34_spill] sm:$0xff] }
 0x190   : > { %17525 = vst [vmem:[#allocation12_spill] sm:$0xff] %v11178_v42  ;;  %1279 = vrot.lane.b32.xlu1 %v17526_v21, %s10121_s18  ;;  %v671_v21 = vld [vmem:[#allocation2 + $0x120] sm:$0xff] }
 0x191   : > { %1281 = vrot.lane.b32.xlu0 %v17527_v62, %s10121_s18 }
 0x192   : > { %v11186_v17 = vpop.permute.xlu1 %1047 }
 0x193   : > { %17528 = vst [vmem:[#allocation13_spill] sm:$0xff] %v11186_v17  ;;  %v11190_v20 = vpop.permute.xlu0 %1049 }
 0x194   : > { %17529 = vst [vmem:[#allocation14_spill] sm:$0xff] %v11190_v20  ;;  %1283 = vrot.lane.b32.xlu1 %v10859_v47, %s10121_s18  ;;  %v11208_v47 = vld [vmem:[#allocation2 + $0x130] sm:$0xff]  ;;  %v11754_v20 = vld [vmem:[#allocation2 + $0x1e8] sm:$0xff] }
 0x195   : > { %1285 = vrot.lane.b32.xlu0 %v10867_v60, %s10121_s18  ;;  %17616 = vst [vmem:[#allocation160_spill] sm:$0xff] %v11754_v20 }
 0x196   : > { %v11196_v62 = vpop.permute.xlu1 %1051 }
 0x197   : > { %17530 = vst [vmem:[#allocation32_spill] sm:$0xff] %v11196_v62  ;;  %v11201_v63 = vpop.permute.xlu0 %1053 }
 0x198   : > { %17531 = vst [vmem:[#allocation88_spill] sm:$0xff] %v11201_v63  ;;  %1287 = vrot.lane.b32.xlu1 %v671_v21, %s10121_s18  ;;  %v494_v21 = vld [vmem:[%s10439_s16 + $0xe8] sm:$0xff] }
 0x199   : > { %1289 = vrot.lane.b32.xlu0 %v11198_v61, %s10121_s18  ;;  %527 = vst.msk [vmem:[#allocation2 + $0x1f0] sm:$0xff] %vm319_vm0, %v494_v21 }
 0x19a   : > { %v11211_v60 = vpop.permute.xlu1 %1055 }
 0x19b   : > { %17532 = vst [vmem:[#allocation89_spill] sm:$0xff] %v11211_v60  ;;  %v11213_v22 = vpop.permute.xlu0 %1057 }
 0x19c   : > { %17533 = vst [vmem:[#allocation90_spill] sm:$0xff] %v11213_v22  ;;  %1291 = vrot.lane.b32.xlu1 %v11208_v47, %s10121_s18 }
 0x19d   : > { %1341 = vrot.lane.b32.xlu0 %v10489_v24, %s10122_s19 }
 0x19e   : > { %v11221_v63 = vpop.permute.xlu1 %1059 }
 0x19f   : > { %17534 = vst [vmem:[#allocation91_spill] sm:$0xff] %v11221_v63  ;;  %v11225_v9 = vpop.permute.xlu0 %1061 }
 0x1a0   : > { %17535 = vst [vmem:[#allocation92_spill] sm:$0xff] %v11225_v9  ;;  %1343 = vrot.lane.b32.xlu1 %v10533_v35, %s10122_s19 }
 0x1a1   : > { %1345 = vrot.lane.b32.xlu0 %v10501_v27, %s10122_s19 }
 0x1a2   : > { %v11231_v22 = vpop.permute.xlu1 %1063 }
 0x1a3   : > { %17536 = vst [vmem:[#allocation93_spill] sm:$0xff] %v11231_v22  ;;  %v11233_v60 = vpop.permute.xlu0 %1065 }
 0x1a4   : > { %17537 = vst [vmem:[#allocation94_spill] sm:$0xff] %v11233_v60  ;;  %1347 = vrot.lane.b32.xlu1 %v10510_v30, %s10122_s19  ;;  %v650_v60 = vld [vmem:[#allocation2 + $0x78] sm:$0xff] }
 0x1a5   : > { %1349 = vrot.lane.b32.xlu0 %v10538_v36, %s10122_s19 }
 0x1a6   : > { %v11239_v24 = vpop.permute.xlu1 %1067 }
 0x1a7   : > { %17538 = vst [vmem:[#allocation95_spill] sm:$0xff] %v11239_v24  ;;  %v11241_v11 = vpop.permute.xlu0 %1069 }
 0x1a8   : > { %17539 = vst [vmem:[#allocation96_spill] sm:$0xff] %v11241_v11  ;;  %1351 = vrot.lane.b32.xlu1 %v10522_v34, %s10122_s19 }
 0x1a9   : > { %1353 = vrot.lane.b32.xlu0 %v10549_v39, %s10122_s19 }
 0x1aa   : > { %v11247_v27 = vpop.permute.xlu1 %1071 }
 0x1ab   : > { %17540 = vst [vmem:[#allocation97_spill] sm:$0xff] %v11247_v27  ;;  %v11249_v35 = vpop.permute.xlu0 %1073 }
 0x1ac   : > { %17541 = vst [vmem:[#allocation98_spill] sm:$0xff] %v11249_v35  ;;  %1355 = vrot.lane.b32.xlu1 %v10565_v43, %s10122_s19 }
 0x1ad   : > { %1357 = vrot.lane.b32.xlu0 %v10552_v40, %s10122_s19 }
 0x1ae   : > { %v11255_v30 = vpop.permute.xlu1 %1075 }
 0x1af   : > { %17542 = vst [vmem:[#allocation99_spill] sm:$0xff] %v11255_v30  ;;  %v11257_v36 = vpop.permute.xlu0 %1149  ;;  %v11300_v30 = vld [vmem:[%s17181_s1 + $0x10] sm:$0xff] }
 0x1b0   : > { %1359 = vrot.lane.b32.xlu1 %v10568_v44, %s10122_s19 }
 0x1b1   : > { %1361 = vrot.lane.b32.xlu0 %v10580_v46, %s10122_s19 }
 0x1b2   : > { %v11263_v34 = vpop.permute.xlu1 %1151 }
 0x1b3   : > { %v11265_v39 = vpop.permute.xlu0 %1153 }
 0x1b4   : > { %1363 = vrot.lane.b32.xlu1 %v10571_v45, %s10122_s19  ;;  %v530_v45 = vld [vmem:[%s17181_s1] sm:$0xff] }
 0x1b5   : > { %1365 = vrot.lane.b32.xlu0 %v10591_v49, %s10122_s19  ;;  %v531_v49 = vld [vmem:[%s17181_s1 + $0x8] sm:$0xff] }
 0x1b6   : > { %v11271_v40 = vpop.permute.xlu1 %1155  ;;  %v8803_v21 = vpack.c.bf16 %v531_v49, %v530_v45  ;;  %v11458_v45 = vrot.slane %v11198_v61, 1  ;;  %v11461_v49 = vrot.slane %v11208_v47, 1 }
 0x1b7   : > { %v11273_v43 = vpop.permute.xlu0 %1157 }
 0x1b8   : > { %1367 = vrot.lane.b32.xlu1 %v10607_v53, %s10122_s19  ;;  %8804 = vmatprep.subr.bf16.mxu0 %v8803_v21 }
 0x1b9   : > { %1369 = vrot.lane.b32.xlu0 %v10594_v50, %s10122_s19  ;;  %8812 = vmatprep.subr.bf16.mxu1 %v8803_v21 }
 0x1ba   : > { %v11279_v44 = vpop.permute.xlu1 %1159  ;;  %8806 = vmatpush3.bf16.msra.mxu0 %v8803_v21  ;;  %8814 = vmatpush3.bf16.msra.mxu1 %v8803_v21 }
 0x1bb   : > { %17543 = vst [vmem:[#allocation100_spill] sm:$0xff] %v11279_v44  ;;  %v11281_v46 = vpop.permute.xlu0 %1161 }
 0x1bc   : > { %17544 = vst [vmem:[#allocation101_spill] sm:$0xff] %v11281_v46  ;;  %1371 = vrot.lane.b32.xlu1 %v10610_v54, %s10122_s19  ;;  %v11305_v54 = vld [vmem:[%s17181_s1 + $0x18] sm:$0xff] }
 0x1bd   : > { %1373 = vrot.lane.b32.xlu0 %v10622_v56, %s10122_s19  ;;  %v17547_v56 = vmov 0.0  }
 0x1be   : > { %v11293_v50 = vpop.permute.xlu1 %1163  ;;  %393 = vst.msk [vmem:[#allocation3] sm:$0xff] %vm392_vm3, %v17547_v56  ;;  %394 = vst.msk [vmem:[#allocation3 + $0x8] sm:$0xff] %vm392_vm3, %v17547_v56 }
 0x1bf   : > { %17545 = vst [vmem:[#allocation102_spill] sm:$0xff] %v11293_v50  ;;  %v11295_v53 = vpop.permute.xlu0 %1165  ;;  %395 = vst.msk [vmem:[#allocation3 + $0x10] sm:$0xff] %vm392_vm3, %v17547_v56  ;;  %v9885_v50 = vld [vmem:[#allocation2 + $0x40] sm:$0xff] }
 0x1c0   : > { %17546 = vst [vmem:[#allocation103_spill] sm:$0xff] %v11295_v53  ;;  %1375 = vrot.lane.b32.xlu1 %v10613_v55, %s10122_s19  ;;  %396 = vst.msk [vmem:[#allocation3 + $0x18] sm:$0xff] %vm392_vm3, %v17547_v56  ;;  %v8807_v55 = vpack.c.bf16 %v11305_v54, %v11300_v30  ;;  %v11479_v54 = vsel %vm691_vm1, %v11458_v45, %v11461_v49  ;;  %v17629_v53 = vld [vmem:[#allocation23_spill] sm:$0xff] }
 0x1c1   : > { %397 = vst.msk [vmem:[#allocation3 + $0x20] sm:$0xff] %vm392_vm3, %v17547_v56  ;;  %398 = vst.msk [vmem:[#allocation3 + $0x28] sm:$0xff] %vm392_vm3, %v17547_v56  ;;  %1377 = vrot.lane.b32.xlu0 %v10959_v51, %s10122_s19  ;;  %v534_v51 = vld [vmem:[%s17181_s1 + $0x20] sm:$0xf] }
 0x1c2   : > { %399 = vst.msk [vmem:[#allocation3 + $0x30] sm:$0xff] %vm392_vm3, %v17547_v56  ;;  %400 = vst.msk [vmem:[#allocation3 + $0x38] sm:$0xff] %vm392_vm3, %v17547_v56  ;;  %v11463_v21 = vpop.permute.xlu1 %1167  ;;  %8808 = vmatprep.subr.bf16.mxu0 %v8807_v55  ;;  %8816 = vmatprep.subr.bf16.mxu1 %v8807_v55 }
 0x1c3   : > { %401 = vst.msk [vmem:[#allocation3 + $0x40] sm:$0xff] %vm392_vm3, %v17547_v56  ;;  %402 = vst.msk [vmem:[#allocation3 + $0x48] sm:$0xff] %vm392_vm3, %v17547_v56  ;;  %v11465_v35 = vpop.permute.xlu0 %1169  ;;  %8810 = vmatpush3.bf16.msra.mxu0 %v8807_v55  ;;  %8818 = vmatpush3.bf16.msra.mxu1 %v8807_v55 }
 0x1c4   : > { %403 = vst.msk [vmem:[#allocation3 + $0x50] sm:$0xff] %vm392_vm3, %v17547_v56  ;;  %404 = vst.msk [vmem:[#allocation3 + $0x58] sm:$0xff] %vm392_vm3, %v17547_v56  ;;  %1379 = vrot.lane.b32.xlu1 %v10972_v26, %s10122_s19  ;;  %8615 = vmatprep.subr.msk.mxu0 %vm1835_vm4, %v534_v51  ;;  %v646_v26 = vld [vmem:[#allocation2 + $0x58] sm:$0xff] }
 0x1c5   : > { %405 = vst.msk [vmem:[#allocation3 + $0x60] sm:$0xff] %vm392_vm3, %v17547_v56  ;;  %406 = vst.msk [vmem:[#allocation3 + $0x68] sm:$0xff] %vm392_vm3, %v17547_v56  ;;  %1381 = vrot.lane.b32.xlu0 %v10954_v23, %s10122_s19  ;;  %8649 = vmatprep.subr.msk.mxu1 %vm1835_vm4, %v534_v51  ;;  %v1424_v55 = vrot.slane %v646_v26, 2  ;;  %v1429_v26 = vrot.slane %v650_v60, 2 }
 0x1c6   : > { %407 = vst.msk [vmem:[#allocation3 + $0x70] sm:$0xff] %vm392_vm3, %v17547_v56  ;;  %408 = vst.msk [vmem:[#allocation3 + $0x78] sm:$0xff] %vm392_vm3, %v17547_v56  ;;  %v11474_v30 = vpop.permute.xlu1 %1171 }
 0x1c7   : > { %409 = vst.msk [vmem:[#allocation3 + $0x80] sm:$0xff] %vm392_vm3, %v17547_v56  ;;  %410 = vst.msk [vmem:[#allocation3 + $0x88] sm:$0xff] %vm392_vm3, %v17547_v56  ;;  %8616 = vmatpush3.msk.msra.mxu0 %vm1835_vm4, %v534_v51  ;;  %8650 = vmatpush3.msk.msra.mxu1 %vm1835_vm4, %v534_v51  ;;  %v17555_v51 = vld [vmem:[#allocation15_spill] sm:$0xff] }
 0x1c8   : > { %411 = vst.msk [vmem:[#allocation3 + $0x90] sm:$0xff] %vm392_vm3, %v17547_v56  ;;  %412 = vst.msk [vmem:[#allocation3 + $0x98] sm:$0xff] %vm392_vm3, %v17547_v56  ;;  %1383 = vrot.lane.b32.xlu1 %v11458_v45, %s10122_s19  ;;  %v1425_v24 = vsel %vm796_vm2, %v17555_v51, %v1424_v55 }
 0x1c9   : > { %413 = vst.msk [vmem:[#allocation3 + $0xa0] sm:$0xff] %vm392_vm3, %v17547_v56  ;;  %414 = vst.msk [vmem:[#allocation3 + $0xa8] sm:$0xff] %vm392_vm3, %v17547_v56  ;;  %1385 = vrot.lane.b32.xlu0 %v11479_v54, %s10122_s19 }
 0x1ca   : > { %415 = vst.msk [vmem:[#allocation3 + $0xb0] sm:$0xff] %vm392_vm3, %v17547_v56  ;;  %416 = vst.msk [vmem:[#allocation3 + $0xb8] sm:$0xff] %vm392_vm3, %v17547_v56  ;;  %v11487_v23 = vpop.permute.xlu1 %1175 }
 0x1cb   : > { %417 = vst.msk [vmem:[#allocation3 + $0xc0] sm:$0xff] %vm392_vm3, %v17547_v56  ;;  %418 = vst.msk [vmem:[#allocation3 + $0xc8] sm:$0xff] %vm392_vm3, %v17547_v56 }
 0x1cc   : > { %419 = vst.msk [vmem:[#allocation3 + $0xd0] sm:$0xff] %vm392_vm3, %v17547_v56  ;;  %420 = vst.msk [vmem:[#allocation3 + $0xd8] sm:$0xff] %vm392_vm3, %v17547_v56  ;;  %1387 = vrot.lane.b32.xlu1 %v11461_v49, %s10122_s19 }
 0x1cd   : > { %421 = vst.msk [vmem:[#allocation3 + $0xe0] sm:$0xff] %vm392_vm3, %v17547_v56  ;;  %422 = vst.msk [vmem:[#allocation3 + $0xe8] sm:$0xff] %vm392_vm3, %v17547_v56  ;;  %1461 = vrot.lane.b32.xlu0 %v10653_v7, %s10123_s8  ;;  %v17559_v7 = vld [vmem:[#allocation16_spill] sm:$0xff] }
 0x1ce   : > { %423 = vst.msk [vmem:[#allocation3 + $0xf0] sm:$0xff] %vm392_vm3, %v17547_v56  ;;  %424 = vst.msk [vmem:[#allocation3 + $0xf8] sm:$0xff] %vm392_vm3, %v17547_v56  ;;  %v11495_v11 = vpop.permute.xlu1 %1179  ;;  %v1430_v55 = vsel %vm796_vm2, %v17559_v7, %v1429_v26 }
 0x1cf   : > { %425 = vst.msk [vmem:[#allocation3 + $0x100] sm:$0xff] %vm392_vm3, %v17547_v56  ;;  %426 = vst.msk [vmem:[#allocation3 + $0x108] sm:$0xff] %vm392_vm3, %v17547_v56 }
 0x1d0   : > { %427 = vst.msk [vmem:[#allocation3 + $0x110] sm:$0xff] %vm392_vm3, %v17547_v56  ;;  %428 = vst.msk [vmem:[#allocation3 + $0x118] sm:$0xff] %vm392_vm3, %v17547_v56  ;;  %1463 = vrot.lane.b32.xlu1 %v10665_v10, %s10123_s8 }
 0x1d1   : > { %429 = vst.msk [vmem:[#allocation3 + $0x120] sm:$0xff] %vm392_vm3, %v17547_v56  ;;  %430 = vst.msk [vmem:[#allocation3 + $0x128] sm:$0xff] %vm392_vm3, %v17547_v56  ;;  %1465 = vrot.lane.b32.xlu0 %v1425_v24, %s10123_s8  ;;  %v17563_v24 = vld [vmem:[#allocation17_spill] sm:$0xff] }
 0x1d2   : > { %431 = vst.msk [vmem:[#allocation3 + $0x130] sm:$0xff] %vm392_vm3, %v17547_v56  ;;  %432 = vst.msk [vmem:[#allocation3 + $0x138] sm:$0xff] %vm392_vm3, %v17547_v56  ;;  %v11504_v9 = vpop.permute.xlu1 %1183 }
 0x1d3   : > { %433 = vst.msk [vmem:[#allocation3 + $0x140] sm:$0xff] %vm392_vm3, %v17547_v56  ;;  %434 = vst.msk [vmem:[#allocation3 + $0x148] sm:$0xff] %vm392_vm3, %v17547_v56 }
 0x1d4   : > { %435 = vst.msk [vmem:[#allocation3 + $0x150] sm:$0xff] %vm392_vm3, %v17547_v56  ;;  %436 = vst.msk [vmem:[#allocation3 + $0x158] sm:$0xff] %vm392_vm3, %v17547_v56  ;;  %1467 = vrot.lane.b32.xlu1 %v10672_v12, %s10123_s8 }
 0x1d5   : > { %437 = vst.msk [vmem:[#allocation3 + $0x160] sm:$0xff] %vm392_vm3, %v17547_v56  ;;  %438 = vst.msk [vmem:[#allocation3 + $0x168] sm:$0xff] %vm392_vm3, %v17547_v56  ;;  %1469 = vrot.lane.b32.xlu0 %v10684_v16, %s10123_s8 }
 0x1d6   : > { %439 = vst.msk [vmem:[#allocation3 + $0x170] sm:$0xff] %vm392_vm3, %v17547_v56  ;;  %440 = vst.msk [vmem:[#allocation3 + $0x178] sm:$0xff] %vm392_vm3, %v17547_v56  ;;  %v11514_v51 = vpop.permute.xlu1 %1187 }
 0x1d7   : > { %441 = vst.msk [vmem:[#allocation3 + $0x180] sm:$0xff] %vm392_vm3, %v17547_v56  ;;  %442 = vst.msk [vmem:[#allocation3 + $0x188] sm:$0xff] %vm392_vm3, %v17547_v56 }
 0x1d8   : > { %443 = vst.msk [vmem:[#allocation3 + $0x190] sm:$0xff] %vm392_vm3, %v17547_v56  ;;  %444 = vst.msk [vmem:[#allocation3 + $0x198] sm:$0xff] %vm392_vm3, %v17547_v56  ;;  %1471 = vrot.lane.b32.xlu1 %v1430_v55, %s10123_s8  ;;  %v662_v55 = vld [vmem:[#allocation2 + $0xd8] sm:$0xff] }
 0x1d9   : > { %445 = vst.msk [vmem:[#allocation3 + $0x1a0] sm:$0xff] %vm392_vm3, %v17547_v56  ;;  %446 = vst.msk [vmem:[#allocation3 + $0x1a8] sm:$0xff] %vm392_vm3, %v17547_v56  ;;  %1473 = vrot.lane.b32.xlu0 %v10695_v19, %s10123_s8  ;;  %v17566_v19 = vld [vmem:[#allocation18_spill] sm:$0xff] }
 0x1da   : > { %447 = vst.msk [vmem:[#allocation3 + $0x1b0] sm:$0xff] %vm392_vm3, %v17547_v56  ;;  %448 = vst.msk [vmem:[#allocation3 + $0x1b8] sm:$0xff] %vm392_vm3, %v17547_v56  ;;  %v11521_v60 = vpop.permute.xlu1 %1191 }
 0x1db   : > { %449 = vst.msk [vmem:[#allocation3 + $0x1c0] sm:$0xff] %vm392_vm3, %v17547_v56  ;;  %450 = vst.msk [vmem:[#allocation3 + $0x1c8] sm:$0xff] %vm392_vm3, %v17547_v56 }
 0x1dc   : > { %451 = vst.msk [vmem:[#allocation3 + $0x1d0] sm:$0xff] %vm392_vm3, %v17547_v56  ;;  %452 = vst.msk [vmem:[#allocation3 + $0x1d8] sm:$0xff] %vm392_vm3, %v17547_v56  ;;  %1475 = vrot.lane.b32.xlu1 %v10707_v57, %s10123_s8  ;;  %v1444_v57 = vrot.slane %v662_v55, 2 }
 0x1dd   : > { %453 = vst.msk [vmem:[#allocation3 + $0x1e0] sm:$0xff] %vm392_vm3, %v17547_v56  ;;  %454 = vst.msk [vmem:[#allocation3 + $0x1e8] sm:$0xff] %vm392_vm3, %v17547_v56 }
 0x1de   : > { %455 = vst.msk [vmem:[#allocation3 + $0x1f0] sm:$0xff] %vm392_vm3, %v17547_v56  ;;  %456 = vst.msk [vmem:[#allocation3 + $0x1f8] sm:$0xff] %vm392_vm3, %v17547_v56  ;;  %v11530_v26 = vpop.permute.xlu1 %1195 }
 0x1df   : > { %457 = vst.msk [vmem:[#allocation3 + $0x200] sm:$0xff] %vm392_vm3, %v17547_v56  ;;  %458 = vst.msk [vmem:[#allocation3 + $0x208] sm:$0xff] %vm392_vm3, %v17547_v56 }
 0x1e0   : > { %459 = vst.msk [vmem:[#allocation3 + $0x210] sm:$0xff] %vm392_vm3, %v17547_v56  ;;  %460 = vst.msk [vmem:[#allocation3 + $0x218] sm:$0xff] %vm392_vm3, %v17547_v56  ;;  %1479 = vrot.lane.b32.xlu1 %v10714_v59, %s10123_s8 }
 0x1e1   : > { %461 = vst.msk [vmem:[#allocation3 + $0x220] sm:$0xff] %vm392_vm3, %v17547_v56  ;;  %462 = vst.msk [vmem:[#allocation3 + $0x228] sm:$0xff] %vm392_vm3, %v17547_v56 }
 0x1e2   : > { %463 = vst.msk [vmem:[#allocation3 + $0x230] sm:$0xff] %vm392_vm3, %v17547_v56  ;;  %464 = vst.msk [vmem:[#allocation3 + $0x238] sm:$0xff] %vm392_vm3, %v17547_v56  ;;  %v11481_v56 = vpop.permute.xlu0 %1173 }
 0x1e3   : > { %17548 = vst [vmem:[#allocation104_spill] sm:$0xff] %v11463_v21  ;;  %17549 = vst [vmem:[#allocation105_spill] sm:$0xff] %v11465_v35 }
 0x1e4   : > { %17550 = vst [vmem:[#allocation106_spill] sm:$0xff] %v11474_v30  ;;  %17551 = vst [vmem:[#allocation107_spill] sm:$0xff] %v11481_v56  ;;  %v11700_v56 = vld [vmem:[#allocation2 + $0x1a8] sm:$0xff] }
 0x1e5   : > { %17552 = vst [vmem:[#allocation108_spill] sm:$0xff] %v11487_v23  ;;  %17554 = vst [vmem:[#allocation110_spill] sm:$0xff] %v11495_v11  ;;  %v11716_v30 = vrot.slane %v11700_v56, 1 }
 0x1e6   : > { %v11489_v27 = vpop.permute.xlu0 %1177  ;;  %17557 = vst [vmem:[#allocation111_spill] sm:$0xff] %v11504_v9  ;;  %17560 = vst [vmem:[#allocation16_spill] sm:$0xff] %v11514_v51 }
 0x1e7   : > { %17553 = vst [vmem:[#allocation109_spill] sm:$0xff] %v11489_v27  ;;  %v654_v27 = vld [vmem:[#allocation2 + $0x98] sm:$0xff]  ;;  %17562 = vst [vmem:[#allocation114_spill] sm:$0xff] %v11521_v60 }
 0x1e8   : > { %v1434_v10 = vrot.slane %v654_v27, 2  ;;  %17565 = vst [vmem:[#allocation115_spill] sm:$0xff] %v11530_v26  ;;  %v666_v26 = vld [vmem:[#allocation2 + $0xf8] sm:$0xff]  ;;  %17600 = vst [vmem:[#allocation144_spill] sm:$0xff] %v11700_v56  ;;  %v9896_v56 = vld [vmem:[#allocation2 + $0xa0] sm:$0xff] }
 0x1e9   : > { %17604 = vst [vmem:[#allocation148_spill] sm:$0xff] %v11716_v30 }
 0x1ea   : > { %v11499_v22 = vpop.permute.xlu0 %1181  ;;  %v1435_v12 = vsel %vm796_vm2, %v17563_v24, %v1434_v10  ;;  %v11540_v24 = vpop.permute.xlu1 %1247 }
 0x1eb   : > { %17556 = vst [vmem:[#allocation15_spill] sm:$0xff] %v11499_v22  ;;  %1477 = vrot.lane.b32.xlu0 %v1435_v12, %s10123_s8  ;;  %v17568_v12 = vld [vmem:[#allocation19_spill] sm:$0xff] }
 0x1ec   : > { %v1445_v59 = vsel %vm796_vm2, %v17568_v12, %v1444_v57 }
 0x1ee   : > { %v11506_v63 = vpop.permute.xlu0 %1185 }
 0x1ef   : > { %17558 = vst [vmem:[#allocation112_spill] sm:$0xff] %v11506_v63  ;;  %v658_v63 = vld [vmem:[#allocation2 + $0xb8] sm:$0xff]  ;;  %1481 = vrot.lane.b32.xlu0 %v10726_v1, %s10123_s8 }
 0x1f0   : > { %v1439_v27 = vrot.slane %v658_v63, 2  ;;  %v11547_v63 = vpop.permute.xlu1 %1251 }
 0x1f1   : > { %17567 = vst [vmem:[#allocation18_spill] sm:$0xff] %v11547_v63  ;;  %v9900_v63 = vld [vmem:[#allocation2 + $0xc8] sm:$0xff] }
 0x1f2   : > { %v11516_v22 = vpop.permute.xlu0 %1189  ;;  %v1440_v10 = vsel %vm796_vm2, %v17566_v19, %v1439_v27  ;;  %v1449_v27 = vrot.slane %v666_v26, 2 }
 0x1f3   : > { %17561 = vst [vmem:[#allocation113_spill] sm:$0xff] %v11516_v22  ;;  %1483 = vrot.lane.b32.xlu1 %v1440_v10, %s10123_s8  ;;  %1485 = vrot.lane.b32.xlu0 %v10737_v5, %s10123_s8  ;;  %v17572_v5 = vld [vmem:[#allocation20_spill] sm:$0xff] }
 0x1f4   : > { %v11556_v55 = vpop.permute.xlu1 %1255  ;;  %v1450_v10 = vsel %vm796_vm2, %v17572_v5, %v1449_v27 }
 0x1f5   : > { %17570 = vst [vmem:[#allocation116_spill] sm:$0xff] %v11556_v55 }
 0x1f6   : > { %v11525_v16 = vpop.permute.xlu0 %1193 }
 0x1f7   : > { %17564 = vst [vmem:[#allocation17_spill] sm:$0xff] %v11525_v16  ;;  %1487 = vrot.lane.b32.xlu1 %v10749_v15, %s10123_s8  ;;  %1489 = vrot.lane.b32.xlu0 %v1445_v59, %s10123_s8  ;;  %v11574_v15 = vrot.slane %v11198_v61, 2  ;;  %v11591_v61 = vld [vmem:[#allocation2 + $0x108] sm:$0xff] }
 0x1f8   : > { %v11566_v57 = vpop.permute.xlu1 %1259 }
 0x1f9   : > { %17573 = vst [vmem:[#allocation20_spill] sm:$0xff] %v11566_v57  ;;  %v11756_v57 = vld [vmem:[#allocation2 + $0x1f0] sm:$0xff] }
 0x1fa   : > { %v11532_v7 = vpop.permute.xlu0 %1245  ;;  %17617 = vst [vmem:[#allocation161_spill] sm:$0xff] %v11756_v57 }
 0x1fb   : > { %1491 = vrot.lane.b32.xlu1 %v10756_v32, %s10123_s8  ;;  %1493 = vrot.lane.b32.xlu0 %v10768_v0, %s10123_s8  ;;  %v1457_v32 = vrot.slane %v11208_v47, 2  ;;  %v674_v0 = vld [vmem:[#allocation2 + $0x138] sm:$0xff]  ;;  %v11593_v47 = vld [vmem:[#allocation2 + $0x110] sm:$0xff] }
 0x1fc   : > { %v11577_v26 = vpop.permute.xlu1 %1263  ;;  %v1459_v27 = vrot.slane %v674_v0, 2  ;;  %v2133_v0 = vrot.slane %v11593_v47, 1 }
 0x1fd   : > { %17575 = vst [vmem:[#allocation119_spill] sm:$0xff] %v11577_v26  ;;  %v11736_v26 = vld [vmem:[#allocation2 + $0x1d0] sm:$0xff] }
 0x1fe   : > { %v11542_v16 = vpop.permute.xlu0 %1249  ;;  %17610 = vst [vmem:[#allocation154_spill] sm:$0xff] %v11736_v26 }
 0x1ff   : > { %1495 = vrot.lane.b32.xlu1 %v1450_v10, %s10123_s8  ;;  %1497 = vrot.lane.b32.xlu0 %v11061_v3, %s10123_s8  ;;  %v11589_v3 = vsel %vm796_vm2, %v11574_v15, %v1457_v32 }
 0x200   : > { %v11585_v5 = vpop.permute.xlu1 %1267 }
 0x201   : > { %17577 = vst [vmem:[#allocation121_spill] sm:$0xff] %v11585_v5  ;;  %v11702_v5 = vld [vmem:[#allocation2 + $0x1b0] sm:$0xff] }
 0x202   : > { %v11551_v1 = vpop.permute.xlu0 %1253  ;;  %17601 = vst [vmem:[#allocation145_spill] sm:$0xff] %v11702_v5  ;;  %v11719_v18 = vrot.slane %v11702_v5, 1  ;;  %v9894_v5 = vld [vmem:[#allocation2 + $0x88] sm:$0xff] }
 0x203   : > { %17569 = vst [vmem:[#allocation19_spill] sm:$0xff] %v11551_v1  ;;  %1499 = vrot.lane.b32.xlu1 %v11079_v58, %s10123_s8  ;;  %1501 = vrot.lane.b32.xlu0 %v11090_v14, %s10123_s8  ;;  %v11602_v58 = vsel %vm796_vm2, %v1457_v32, %v1459_v27  ;;  %v2132_v14 = vrot.slane %v11591_v61, 1  ;;  %v495_v27 = vld [vmem:[%s10439_s16 + $0xf0] sm:$0xff] }
 0x204   : > { %v11606_v60 = vpop.permute.xlu1 %1271  ;;  %528 = vst.msk [vmem:[#allocation2 + $0x208] sm:$0xff] %vm319_vm0, %v495_v27  ;;  %17605 = vst [vmem:[#allocation149_spill] sm:$0xff] %v11719_v18  ;;  %v9895_v1 = vld [vmem:[#allocation2 + $0x90] sm:$0xff] }
 0x205   : > { %17579 = vst [vmem:[#allocation123_spill] sm:$0xff] %v11606_v60  ;;  %v2134_v51 = vsel %vm691_vm1, %v2132_v14, %v2133_v0  ;;  %v11626_v60 = vld [vmem:[#allocation2 + $0x150] sm:$0xff] }
 0x206   : > { %v11558_v19 = vpop.permute.xlu0 %1257 }
 0x207   : > { %17571 = vst [vmem:[#allocation117_spill] sm:$0xff] %v11558_v19  ;;  %1503 = vrot.lane.b32.xlu1 %v11574_v15, %s10123_s8  ;;  %1505 = vrot.lane.b32.xlu0 %v11589_v3, %s10123_s8  ;;  %v9883_v19 = vld [vmem:[#allocation2 + $0x8] sm:$0xff] }
 0x208   : > { %v11614_v9 = vpop.permute.xlu1 %1275 }
 0x209   : > { %17581 = vst [vmem:[#allocation125_spill] sm:$0xff] %v11614_v9  ;;  %v11682_v9 = vld [vmem:[#allocation2 + $0x190] sm:$0xff] }
 0x20a   : > { %v11568_v12 = vpop.permute.xlu0 %1261 }
 0x20b   : > { %17574 = vst [vmem:[#allocation118_spill] sm:$0xff] %v11568_v12  ;;  %1507 = vrot.lane.b32.xlu1 %v11602_v58, %s10123_s8  ;;  %2156 = vrot.lane.b32.xlu0 %v2132_v14, %s10116_s13  ;;  %v496_v14 = vld [vmem:[%s10439_s16 + $0xf8] sm:$0xff]  ;;  %s10125_s16 = smov 96  }
 0x20c   : > { %v11622_v11 = vpop.permute.xlu1 %1279  ;;  %529 = vst.msk [vmem:[#allocation2 + $0x210] sm:$0xff] %vm319_vm0, %v496_v14 }
 0x20d   : > { %17583 = vst [vmem:[#allocation127_spill] sm:$0xff] %v11622_v11 }
 0x20e   : > { %v11579_v59 = vpop.permute.xlu0 %1265 }
 0x20f   : > { %17576 = vst [vmem:[#allocation120_spill] sm:$0xff] %v11579_v59  ;;  %2158 = vrot.lane.b32.xlu1 %v2134_v51, %s10116_s13  ;;  %2160 = vrot.lane.b32.xlu0 %v2133_v0, %s10116_s13  ;;  %v11640_v0 = vrot.slane %v11626_v60, 1  ;;  %v11734_v59 = vld [vmem:[#allocation2 + $0x1c8] sm:$0xff] }
 0x210   : > { %v11642_v27 = vpop.permute.xlu1 %1283  ;;  %17609 = vst [vmem:[#allocation153_spill] sm:$0xff] %v11734_v59 }
 0x211   : > { %17586 = vst [vmem:[#allocation130_spill] sm:$0xff] %v11640_v0  ;;  %17587 = vst [vmem:[#allocation131_spill] sm:$0xff] %v11642_v27 }
 0x212   : > { %v11595_v10 = vpop.permute.xlu0 %1269 }
 0x213   : > { %17578 = vst [vmem:[#allocation122_spill] sm:$0xff] %v11595_v10  ;;  %2162 = vrot.lane.b32.xlu1 %v11458_v45, %s10116_s13  ;;  %2164 = vrot.lane.b32.xlu0 %v11479_v54, %s10116_s13 }
 0x214   : > { %v11659_v54 = vpop.permute.xlu1 %1287 }
 0x215   : > { %17590 = vst [vmem:[#allocation134_spill] sm:$0xff] %v11659_v54  ;;  %v11680_v54 = vld [vmem:[#allocation2 + $0x188] sm:$0xff] }
 0x216   : > { %v11608_v22 = vpop.permute.xlu0 %1273 }
 0x217   : > { %17580 = vst [vmem:[#allocation124_spill] sm:$0xff] %v11608_v22  ;;  %v11624_v22 = vld [vmem:[#allocation2 + $0x148] sm:$0xff]  ;;  %2166 = vrot.lane.b32.xlu1 %v11461_v49, %s10116_s13 }
 0x218   : > { %v11637_v51 = vrot.slane %v11624_v22, 1  ;;  %v11673_v49 = vpop.permute.xlu1 %1291 }
 0x219   : > { %17594 = vst [vmem:[#allocation138_spill] sm:$0xff] %v11673_v49 }
 0x21a   : > { %v11616_v32 = vpop.permute.xlu0 %1277  ;;  %17585 = vst [vmem:[#allocation129_spill] sm:$0xff] %v11637_v51  ;;  %2168 = vrot.lane.b32.xlu0 %v11637_v51, %s10116_s13  ;;  %v11657_v45 = vsel %vm691_vm1, %v11637_v51, %v11640_v0 }
 0x21b   : > { %17582 = vst [vmem:[#allocation126_spill] sm:$0xff] %v11616_v32  ;;  %v11648_v32 = vld [vmem:[#allocation2 + $0x170] sm:$0xff]  ;;  %17589 = vst [vmem:[#allocation133_spill] sm:$0xff] %v11657_v45  ;;  %2170 = vrot.lane.b32.xlu1 %v11657_v45, %s10116_s13  ;;  %v11694_v45 = vrot.slane %v11682_v9, 1 }
 0x21c   : > { %v11696_v49 = vpop.permute.xlu1 %1343 }
 0x21d   : > { %17597 = vst [vmem:[#allocation141_spill] sm:$0xff] %v11694_v45  ;;  %17598 = vst [vmem:[#allocation142_spill] sm:$0xff] %v11696_v49 }
 0x21e   : > { %v11628_v23 = vpop.permute.xlu0 %1281  ;;  %2172 = vrot.lane.b32.xlu0 %v11640_v0, %s10116_s13  ;;  %v11691_v0 = vrot.slane %v11680_v54, 1 }
 0x21f   : > { %17584 = vst [vmem:[#allocation128_spill] sm:$0xff] %v11628_v23  ;;  %v11646_v23 = vld [vmem:[#allocation2 + $0x168] sm:$0xff] }
 0x220   : > { %v11662_v14 = vrot.slane %v11646_v23, 1  ;;  %17596 = vst [vmem:[#allocation140_spill] sm:$0xff] %v11691_v0 }
 0x222   : > { %v11644_v11 = vpop.permute.xlu0 %1285  ;;  %17591 = vst [vmem:[#allocation135_spill] sm:$0xff] %v11662_v14  ;;  %2174 = vrot.lane.b32.xlu1 %v11662_v14, %s10116_s13 }
 0x223   : > { %17588 = vst [vmem:[#allocation132_spill] sm:$0xff] %v11644_v11  ;;  %v11665_v11 = vrot.slane %v11648_v32, 1 }
 0x225   : > { %17592 = vst [vmem:[#allocation136_spill] sm:$0xff] %v11665_v11  ;;  %v11678_v51 = vsel %vm691_vm1, %v11662_v14, %v11665_v11  ;;  %v11713_v14 = vpop.permute.xlu1 %1347 }
 0x226   : > { %v11667_v27 = vpop.permute.xlu0 %1289  ;;  %17595 = vst [vmem:[#allocation139_spill] sm:$0xff] %v11678_v51  ;;  %2176 = vrot.lane.b32.xlu0 %v11678_v51, %s10116_s13  ;;  %2178 = vrot.lane.b32.xlu1 %v11665_v11, %s10116_s13  ;;  %v11711_v51 = vsel %vm691_vm1, %v11691_v0, %v11694_v45  ;;  %17603 = vst [vmem:[#allocation147_spill] sm:$0xff] %v11713_v14 }
 0x227   : > { %17593 = vst [vmem:[#allocation137_spill] sm:$0xff] %v11667_v27  ;;  %17602 = vst [vmem:[#allocation146_spill] sm:$0xff] %v11711_v51 }
 0x229   : > { %v11727_v11 = vpop.permute.xlu1 %1351 }
 0x22a   : > { %v11684_v10 = vpop.permute.xlu0 %1341  ;;  %2180 = vrot.lane.b32.xlu0 %v11691_v0, %s10116_s13  ;;  %2182 = vrot.lane.b32.xlu1 %v11711_v51, %s10116_s13  ;;  %17607 = vst [vmem:[#allocation151_spill] sm:$0xff] %v11727_v11  ;;  %v11732_v0 = vsel %vm691_vm1, %v11716_v30, %v11719_v18  ;;  %v11748_v51 = vrot.slane %v11736_v26, 1  ;;  %v9882_v26 = vld [vmem:[#allocation2 + $0x10] sm:$0xff] }
 0x22b   : > { %17608 = vst [vmem:[#allocation152_spill] sm:$0xff] %v11732_v0 }
 0x22c   : > { %17613 = vst [vmem:[#allocation157_spill] sm:$0xff] %v11748_v51 }
 0x22d   : > { %v11750_v21 = vpop.permute.xlu1 %1355 }
 0x22e   : > { %v11698_v27 = vpop.permute.xlu0 %1345  ;;  %2184 = vrot.lane.b32.xlu0 %v11694_v45, %s10116_s13  ;;  %2186 = vrot.lane.b32.xlu1 %v11716_v30, %s10116_s13  ;;  %v11745_v45 = vrot.slane %v11734_v59, 1  ;;  %17614 = vst [vmem:[#allocation158_spill] sm:$0xff] %v11750_v21  ;;  %v11770_v21 = vrot.slane %v11754_v20, 1  ;;  %v578_v20 = vld [vmem:[#allocation2] sm:$0xff] }
 0x22f   : > { %17599 = vst [vmem:[#allocation143_spill] sm:$0xff] %v11698_v27  ;;  %v9901_v27 = vld [vmem:[#allocation2 + $0xd0] sm:$0xff] }
 0x230   : > { %17612 = vst [vmem:[#allocation156_spill] sm:$0xff] %v11745_v45  ;;  %17620 = vst [vmem:[#allocation164_spill] sm:$0xff] %v11770_v21 }
 0x231   : > { %v11767_v30 = vpop.permute.xlu1 %1359 }
 0x232   : > { %v11721_v62 = vpop.permute.xlu0 %1349  ;;  %2188 = vrot.lane.b32.xlu0 %v11732_v0, %s10116_s13  ;;  %2190 = vrot.lane.b32.xlu1 %v11719_v18, %s10116_s13  ;;  %v11765_v0 = vsel %vm691_vm1, %v11745_v45, %v11748_v51  ;;  %17619 = vst [vmem:[#allocation163_spill] sm:$0xff] %v11767_v30 }
 0x233   : > { %17606 = vst [vmem:[#allocation150_spill] sm:$0xff] %v11721_v62  ;;  %17618 = vst [vmem:[#allocation162_spill] sm:$0xff] %v11765_v0  ;;  %v17639_v62 = vld [vmem:[#allocation33_spill] sm:$0xff] }
 0x235   : > { %v11781_v18 = vpop.permute.xlu1 %1363 }
 0x236   : > { %v11738_v35 = vpop.permute.xlu0 %1353  ;;  %2192 = vrot.lane.b32.xlu0 %v11745_v45, %s10116_s13  ;;  %2194 = vrot.lane.b32.xlu1 %v11765_v0, %s10116_s13  ;;  %17623 = vst [vmem:[#allocation167_spill] sm:$0xff] %v11781_v18  ;;  %v2236_v0 = vrot.slane %v11591_v61, 2  ;;  %v17627_v18 = vld [vmem:[#allocation21_spill] sm:$0xff]  ;;  %v17631_v61 = vld [vmem:[#allocation24_spill] sm:$0xff] }
 0x237   : > { %17611 = vst [vmem:[#allocation155_spill] sm:$0xff] %v11738_v35  ;;  %v17628_v35 = vld [vmem:[#allocation22_spill] sm:$0xff] }
 0x23a   : > { %v11752_v12 = vpop.permute.xlu0 %1357  ;;  %2196 = vrot.lane.b32.xlu0 %v11748_v51, %s10116_s13  ;;  %2198 = vrot.lane.b32.xlu1 %v11770_v21, %s10116_s13  ;;  %v2237_v51 = vrot.slane %v11593_v47, 2 }
 0x23b   : > { %17615 = vst [vmem:[#allocation159_spill] sm:$0xff] %v11752_v12  ;;  %v11773_v12 = vrot.slane %v11756_v57, 1  ;;  %v1533_v57 = vsel %vm319_vm0, %v578_v20, %v17627_v18  ;;  %v9886_v18 = vld [vmem:[#allocation2 + $0x30] sm:$0xff]  ;;  %v17633_v20 = vld [vmem:[#allocation26_spill] sm:$0xff] }
 0x23c   : > { %v1538_v55 = vsel %vm319_vm0, %v9886_v18, %v17633_v20  ;;  %v2238_v18 = vsel %vm796_vm2, %v2236_v0, %v2237_v51  ;;  %v9891_v20 = vld [vmem:[#allocation2 + $0x68] sm:$0xff] }
 0x23d   : > { %17621 = vst [vmem:[#allocation165_spill] sm:$0xff] %v11773_v12  ;;  %v11786_v45 = vsel %vm691_vm1, %v11770_v21, %v11773_v12  ;;  %v1534_v21 = vsel %vm319_vm0, %v9883_v19, %v17629_v53  ;;  %v9888_v53 = vld [vmem:[#allocation2 + $0x60] sm:$0xff]  ;;  %v17635_v19 = vld [vmem:[#allocation28_spill] sm:$0xff] }
 0x23e   : > { %v11775_v59 = vpop.permute.xlu0 %1361  ;;  %17624 = vst [vmem:[#allocation168_spill] sm:$0xff] %v11786_v45  ;;  %2200 = vrot.lane.b32.xlu0 %v11786_v45, %s10116_s13  ;;  %v9884_v45 = vld [vmem:[#allocation2 + $0x20] sm:$0xff]  ;;  %2202 = vrot.lane.b32.xlu1 %v11773_v12, %s10116_s13  ;;  %v9892_v12 = vld [vmem:[#allocation2 + $0x70] sm:$0xff]  ;;  %s16139_s13 = scalar_lea.vmem %s17187_s7, %s8323_s28 }
 0x23f   : > { %17622 = vst [vmem:[#allocation166_spill] sm:$0xff] %v11775_v59  ;;  %v11796_v59 = vpop.permute.xlu1 %1367  ;;  %v1536_v47 = vsel %vm319_vm0, %v9884_v45, %v17631_v61  ;;  %v9889_v45 = vld [vmem:[#allocation2 + $0x28] sm:$0xff]  ;;  %v17636_v61 = vld [vmem:[#allocation29_spill] sm:$0xff] }
 0x240   : > { %17626 = vst [vmem:[#allocation170_spill] sm:$0xff] %v11796_v59  ;;  %v17632_v59 = vld [vmem:[#allocation25_spill] sm:$0xff]  ;;  %v1537_v42 = vsel %vm319_vm0, %v9889_v45, %v17636_v61 }
 0x241   : > { %v1539_v46 = vsel %vm319_vm0, %v9885_v50, %v17632_v59  ;;  %v9890_v50 = vld [vmem:[#allocation2 + $0x48] sm:$0xff]  ;;  %v17637_v59 = vld [vmem:[#allocation30_spill] sm:$0xff] }
 0x242   : > { %v11788_v30 = vpop.permute.xlu0 %1365  ;;  %v1540_v44 = vsel %vm319_vm0, %v9890_v50, %v17637_v59  ;;  %2276 = vrot.lane.b32.xlu0 %v2236_v0, %s10117_s14  ;;  %v17642_v50 = vrot.slane %v11066_v33, 2  ;;  %v17643_v0 = vld [vmem:[#allocation35_spill] sm:$0xff]  ;;  %v9898_v33 = vld [vmem:[#allocation2 + $0xb0] sm:$0xff]  ;;  %2278 = vrot.lane.b32.xlu1 %v2238_v18, %s10117_s14 }
 0x243   : > { %17625 = vst [vmem:[#allocation169_spill] sm:$0xff] %v11788_v30  ;;  %v1535_v30 = vsel %vm319_vm0, %v9882_v26, %v17628_v35  ;;  %v9887_v35 = vld [vmem:[#allocation2 + $0x50] sm:$0xff]  ;;  %v17634_v26 = vld [vmem:[#allocation27_spill] sm:$0xff]  ;;  %v11830_v61 = vpop.permute.xlu1 %1371  ;;  %v1546_v14 = vsel %vm319_vm0, %v9894_v5, %v17643_v0  ;;  %v17647_v5 = vld [vmem:[#allocation38_spill] sm:$0xff] }
 0x244   : > { %v1541_v17 = vsel %vm319_vm0, %v9887_v35, %v17634_v26  ;;  %v17638_v35 = vld [vmem:[#allocation31_spill] sm:$0xff]  ;;  %17641 = vst [vmem:[#allocation22_spill] sm:$0xff] %v11830_v61  ;;  %v2240_v59 = vsel %vm796_vm2, %v2237_v51, %v17642_v50  ;;  %v17646_v51 = vld [vmem:[#allocation37_spill] sm:$0xff] }
 0x245   : > { %v1543_v26 = vsel %vm319_vm0, %v9891_v20, %v17638_v35  ;;  %v17644_v20 = vld [vmem:[#allocation36_spill] sm:$0xff]  ;;  %v1550_v50 = vsel %vm319_vm0, %v9898_v33, %v17646_v51  ;;  %v9899_v61 = vld [vmem:[#allocation2 + $0xc0] sm:$0xff]  ;;  %v17657_v18 = vld [vmem:[#allocation45_spill] sm:$0xff] }
 0x246   : > { %v11804_v11 = vpop.permute.xlu0 %1369  ;;  %v1547_v35 = vsel %vm319_vm0, %v9895_v1, %v17644_v20  ;;  %v1551_v0 = vsel %vm319_vm0, %v9899_v61, %v17647_v5  ;;  %v17648_v1 = vld [vmem:[#allocation39_spill] sm:$0xff]  ;;  %v17652_v51 = vld [vmem:[#allocation42_spill] sm:$0xff]  ;;  %v9904_v61 = vld [vmem:[#allocation2 + $0xf0] sm:$0xff]  ;;  %2280 = vrot.lane.b32.xlu0 %v2240_v59, %s10117_s14  ;;  %2282 = vrot.lane.b32.xlu1 %v11574_v15, %s10117_s14 }
 0x247   : > { %17630 = vst [vmem:[#allocation21_spill] sm:$0xff] %v11804_v11  ;;  %v1542_v11 = vsel %vm319_vm0, %v9888_v53, %v17635_v19  ;;  %v1544_v53 = vsel %vm319_vm0, %v9892_v12, %v17639_v62  ;;  %v9893_v19 = vld [vmem:[#allocation2 + $0x80] sm:$0xff]  ;;  %v1548_v62 = vsel %vm319_vm0, %v9896_v56, %v10877_v48  ;;  %v9897_v12 = vld [vmem:[#allocation2 + $0xa8] sm:$0xff]  ;;  %v1552_v20 = vsel %vm319_vm0, %v9900_v63, %v17648_v1 }
 0x248   : > { %v1545_v45 = vsel %vm319_vm0, %v9893_v19, %v17640_v29  ;;  %v1549_v29 = vsel %vm319_vm0, %v9897_v12, %v10879_v8  ;;  %v17649_v48 = vld [vmem:[#allocation40_spill] sm:$0xff]  ;;  %v9902_v8 = vld [vmem:[#allocation2 + $0xe0] sm:$0xff]  ;;  %v17650_v12 = vld [vmem:[#allocation41_spill] sm:$0xff] }
 0x249   : > { %v1553_v56 = vsel %vm319_vm0, %v9901_v27, %v17649_v48  ;;  %v9903_v33 = vld [vmem:[#allocation2 + $0xe8] sm:$0xff]  ;;  %v1559_v48 = vsel %vm1557_vm5, %v1534_v21, %v17657_v18  ;;  %v2029_v18 = vld [vmem:[#allocation2 + $0x158] sm:$0xff] }
 0x24a   : > { %v11843_v19 = vpop.permute.xlu0 %1373  ;;  %v11860_v49 = vsel %vm319_vm0, %v9903_v33, %v17652_v51  ;;  %v17654_v5 = vld [vmem:[#allocation43_spill] sm:$0xff]  ;;  %v17656_v1 = vld [vmem:[#allocation44_spill] sm:$0xff]  ;;  %2284 = vrot.lane.b32.xlu0 %v11589_v3, %s10117_s14  ;;  %v2249_v3 = vrot.slane %v2029_v18, 2  ;;  %2286 = vrot.lane.b32.xlu1 %v11602_v58, %s10117_s14 }
 0x24b   : > { %17645 = vst [vmem:[#allocation23_spill] sm:$0xff] %v11843_v19  ;;  %v11856_v19 = vsel %vm319_vm0, %v9902_v8, %v17650_v12  ;;  %17653 = vst [vmem:[#allocation25_spill] sm:$0xff] %v11860_v49  ;;  %v11864_v63 = vsel %vm319_vm0, %v9904_v61, %v17654_v5  ;;  %v1558_v27 = vsel %vm1557_vm5, %v1533_v57, %v17656_v1  ;;  %v17658_v8 = vld [vmem:[#allocation46_spill] sm:$0xff]  ;;  %v17660_v51 = vld [vmem:[#allocation48_spill] sm:$0xff]  ;;  %v11877_v61 = vpop.permute.xlu1 %1375 }
 0x24c   : > { %17651 = vst [vmem:[#allocation24_spill] sm:$0xff] %v11856_v19  ;;  %17655 = vst [vmem:[#allocation26_spill] sm:$0xff] %v11864_v63  ;;  %v1560_v12 = vsel %vm1557_vm5, %v1535_v30, %v17658_v8  ;;  %v17659_v19 = vld [vmem:[#allocation47_spill] sm:$0xff]  ;;  %v1562_v49 = vsel %vm1557_vm5, %v1537_v42, %v17660_v51  ;;  %v17662_v5 = vld [vmem:[#allocation49_spill] sm:$0xff] }
 0x24d   : > { %v1561_v33 = vsel %vm1557_vm5, %v1536_v47, %v17659_v19  ;;  %17661 = vst [vmem:[#allocation27_spill] sm:$0xff] %v11877_v61  ;;  %v1563_v57 = vsel %vm1557_vm5, %v1538_v55, %v17662_v5  ;;  %v17663_v1 = vld [vmem:[#allocation50_spill] sm:$0xff]  ;;  %v17664_v63 = vld [vmem:[#allocation51_spill] sm:$0xff]  ;;  %v17665_v47 = vld [vmem:[#allocation52_spill] sm:$0xff] }
 0x24e   : > { %v1564_v59 = vsel %vm1557_vm5, %v1539_v46, %v17663_v1  ;;  %v1565_v21 = vsel %vm1557_vm5, %v1540_v44, %v17664_v63  ;;  %v11885_v30 = vpop.permute.xlu0 %1377  ;;  %v1566_v19 = vsel %vm1557_vm5, %v1541_v17, %v17665_v47  ;;  %v17666_v42 = vld [vmem:[#allocation53_spill] sm:$0xff]  ;;  %v17667_v51 = vld [vmem:[#allocation54_spill] sm:$0xff]  ;;  %v17668_v55 = vld [vmem:[#allocation55_spill] sm:$0xff]  ;;  %v11904_v17 = vrot.slane %v11624_v22, 2 }
 0x24f   : > { %v1567_v8 = vsel %vm1557_vm5, %v1542_v11, %v17666_v42  ;;  %v1568_v61 = vsel %vm1557_vm5, %v1543_v26, %v17667_v51  ;;  %v1569_v5 = vsel %vm1557_vm5, %v1544_v53, %v17668_v55  ;;  %v17669_v44 = vld [vmem:[#allocation56_spill] sm:$0xff]  ;;  %v17670_v63 = vld [vmem:[#allocation57_spill] sm:$0xff]  ;;  %v2247_v11 = vrot.slane %v11626_v60, 2  ;;  %v17672_v26 = vld [vmem:[#allocation58_spill] sm:$0xff] }
 0x250   : > { %v1570_v46 = vsel %vm1557_vm5, %v1545_v45, %v17669_v44  ;;  %v1571_v1 = vsel %vm1557_vm5, %v1546_v14, %v17670_v63  ;;  %17671 = vst [vmem:[#allocation28_spill] sm:$0xff] %v11904_v17  ;;  %v11909_v53 = vsel %vm1557_vm5, %v1547_v35, %v17672_v26  ;;  %v17673_v47 = vld [vmem:[#allocation59_spill] sm:$0xff]  ;;  %v11917_v45 = vsel %vm1557_vm5, %v1549_v29, %v10990_v52  ;;  %v11919_v14 = vpop.permute.xlu1 %1379  ;;  %v17674_v51 = vld [vmem:[#allocation60_spill] sm:$0xff]  ;;  %v17675_v35 = vld [vmem:[#allocation61_spill] sm:$0xff] }
 0x251   : > { %v11913_v15 = vsel %vm1557_vm5, %v1548_v62, %v17673_v47  ;;  %v11923_v42 = vsel %vm1557_vm5, %v1550_v50, %v10996_v13  ;;  %v11927_v55 = vsel %vm1557_vm5, %v1551_v0, %v17674_v51  ;;  %v11931_v44 = vsel %vm1557_vm5, %v1552_v20, %v17675_v35  ;;  %v17676_v29 = vld [vmem:[#allocation65_spill] sm:$0xff]  ;;  %v17677_v63 = vld [vmem:[#allocation66_spill] sm:$0xff]  ;;  %v17678_v50 = vld [vmem:[#allocation67_spill] sm:$0xff]  ;;  %2288 = vrot.lane.b32.xlu0 %v11904_v17, %s10117_s14 }
 0x252   : > { %v11935_v62 = vsel %vm1557_vm5, %v1553_v56, %v11006_v31  ;;  %v11937_v52 = vpop.permute.xlu0 %1381  ;;  %v1583_v18 = vsel %vm1582_vm6, %v1558_v27, %v17676_v29  ;;  %v1584_v13 = vsel %vm1582_vm6, %v1559_v48, %v17677_v63  ;;  %v1585_v0 = vsel %vm1582_vm6, %v1560_v12, %v17678_v50  ;;  %v17679_v26 = vld [vmem:[#allocation68_spill] sm:$0xff]  ;;  %v17680_v20 = vld [vmem:[#allocation69_spill] sm:$0xff]  ;;  %v17681_v56 = vld [vmem:[#allocation70_spill] sm:$0xff] }
 0x253   : > { %v1586_v47 = vsel %vm1582_vm6, %v1561_v33, %v17679_v26  ;;  %v1587_v31 = vsel %vm1582_vm6, %v1562_v49, %v17680_v20  ;;  %v1588_v51 = vsel %vm1582_vm6, %v1563_v57, %v17681_v56  ;;  %v17682_v35 = vld [vmem:[#allocation71_spill] sm:$0xff]  ;;  %v11959_v48 = vsel %vm796_vm2, %v11904_v17, %v2247_v11  ;;  %v2033_v12 = vld [vmem:[#allocation2 + $0x178] sm:$0xff]  ;;  %v17683_v33 = vld [vmem:[#allocation72_spill] sm:$0xff] }
 0x254   : > { %v1589_v27 = vsel %vm1582_vm6, %v1564_v59, %v17682_v35  ;;  %v11963_v58 = vsel %vm1582_vm6, %v1565_v21, %v17683_v33  ;;  %v11965_v29 = vpop.permute.xlu1 %1383  ;;  %v11968_v49 = vsel %vm796_vm2, %v2247_v11, %v2249_v3  ;;  %v11971_v57 = vrot.slane %v11646_v23, 2  ;;  %v17684_v63 = vld [vmem:[#allocation73_spill] sm:$0xff]  ;;  %v17685_v26 = vld [vmem:[#allocation74_spill] sm:$0xff]  ;;  %v17686_v21 = vld [vmem:[#allocation75_spill] sm:$0xff]  ;;  %2290 = vrot.lane.b32.xlu1 %v11959_v48, %s10117_s14 }
 0x255   : > { %v2252_v59 = vrot.slane %v11648_v32, 2  ;;  %v11976_v50 = vsel %vm1582_vm6, %v1566_v19, %v17684_v63  ;;  %v11980_v20 = vsel %vm1582_vm6, %v1567_v8, %v17685_v26  ;;  %v11984_v56 = vsel %vm1582_vm6, %v1568_v61, %v17686_v21  ;;  %v17687_v3 = vld [vmem:[#allocation76_spill] sm:$0xff]  ;;  %v17688_v33 = vld [vmem:[#allocation77_spill] sm:$0xff]  ;;  %2292 = vrot.lane.b32.xlu0 %v11968_v49, %s10117_s14  ;;  %v17690_v26 = vld [vmem:[#allocation143_spill] sm:$0xff] }
 0x256   : > { %v11986_v11 = vpop.permute.xlu0 %1385  ;;  %v11990_v35 = vsel %vm1582_vm6, %v1569_v5, %v17687_v3  ;;  %v11994_v17 = vsel %vm1582_vm6, %v1570_v46, %v17688_v33  ;;  %v11998_v19 = vsel %vm1582_vm6, %v1571_v1, %v11092_v4  ;;  %v2254_v61 = vrot.slane %v2033_v12, 2  ;;  %v17689_v12 = vld [vmem:[#allocation142_spill] sm:$0xff] }
 0x257   : > { %v1608_v8 = vsel %vm1607_vm7, %v1583_v18, %v11135_v6  ;;  %v1609_v63 = vsel %vm1607_vm7, %v1584_v13, %v11144_v37  ;;  %v1610_v5 = vsel %vm1607_vm7, %v1585_v0, %v11146_v38  ;;  %v1611_v4 = vsel %vm1607_vm7, %v1586_v47, %v11154_v2  ;;  %v2037_v38 = vld [vmem:[#allocation2 + $0x198] sm:$0xff] }
 0x258   : > { %v1612_v46 = vsel %vm1607_vm7, %v1587_v31, %v11158_v41  ;;  %v1633_v1 = vsel %vm1632_vm8, %v1608_v8, %v11257_v36  ;;  %v12016_v6 = vpop.permute.xlu1 %1387  ;;  %v12020_v37 = vsel %vm796_vm2, %v11971_v57, %v2252_v59  ;;  %v1613_v18 = vsel %vm1607_vm7, %v1588_v51, %v11164_v28  ;;  %2294 = vrot.lane.b32.xlu1 %v11971_v57, %s10117_s14 }
 0x259   : > { %v1614_v13 = vsel %vm1607_vm7, %v1589_v27, %v11167_v25  ;;  %v1634_v2 = vsel %vm1632_vm8, %v1609_v63, %v11263_v34  ;;  %v1658_v41 = vsel %vm1657_vm9, %v1633_v1, %v11532_v7  ;;  %v1635_v0 = vsel %vm1632_vm8, %v1610_v5, %v11265_v39  ;;  %2296 = vrot.lane.b32.xlu0 %v12020_v37, %s10117_s14 }
 0x25a   : > { %v1462_v36 = vpop.permute.xlu0 %1461  ;;  %v1683_v47 = vsel %vm1682_vm10, %v1658_v41, %v11684_v10  ;;  %v12037_v28 = vsel %vm796_vm2, %v2252_v59, %v2254_v61  ;;  %v2257_v25 = vrot.slane %v11682_v9, 2  ;;  %v1659_v34 = vsel %vm1657_vm9, %v1634_v2, %v11540_v24  ;;  %v17693_v2 = vld [vmem:[#allocation19_spill] sm:$0xff] }
 0x25b   : > { %v1707_v7 = vsel %vm392_vm3, %v1683_v47, %v1462_v36  ;;  %v12046_v39 = vrot.slane %v11680_v54, 2  ;;  %v2259_v10 = vrot.slane %v2037_v38, 2  ;;  %v1636_v31 = vsel %vm1632_vm8, %v1611_v4, %v11271_v40  ;;  %v2041_v38 = vld [vmem:[#allocation2 + $0x1b8] sm:$0xff]  ;;  %v17694_v36 = vld [vmem:[#allocation147_spill] sm:$0xff] }
 0x25c   : > { %v1637_v51 = vsel %vm1632_vm8, %v1612_v46, %v11273_v43  ;;  %v1660_v27 = vsel %vm1657_vm9, %v1635_v0, %v11542_v16  ;;  %v1684_v24 = vsel %vm1682_vm10, %v1659_v34, %v17689_v12  ;;  %v1464_v59 = vpop.permute.xlu1 %1463  ;;  %v1756_v61 = vrot.slane %v1707_v7, 7  ;;  %2298 = vrot.lane.b32.xlu1 %v12037_v28, %s10117_s14  ;;  %v17691_v16 = vld [vmem:[#allocation18_spill] sm:$0xff]  ;;  %v17692_v46 = vld [vmem:[#allocation144_spill] sm:$0xff]  ;;  %v17695_v7 = vld [vmem:[#allocation145_spill] sm:$0xff] }
 0x25d   : > { %v1685_v21 = vsel %vm1682_vm10, %v1660_v27, %v17690_v26  ;;  %v1708_v3 = vsel %vm392_vm3, %v1684_v24, %v1464_v59  ;;  %v12064_v43 = vsel %vm796_vm2, %v12046_v39, %v2257_v25  ;;  %v1661_v63 = vsel %vm1657_vm9, %v1636_v31, %v17691_v16  ;;  %2300 = vrot.lane.b32.xlu0 %v12046_v39, %s10117_s14  ;;  %v17696_v27 = vld [vmem:[#allocation11_spill] sm:$0xff]  ;;  %v17698_v26 = vld [vmem:[#allocation100_spill] sm:$0xff]  ;;  %v17700_v16 = vld [vmem:[#allocation13_spill] sm:$0xff] }
 0x25e   : > { %v1466_v33 = vpop.permute.xlu0 %1465  ;;  %v1757_v40 = vrot.slane %v1708_v3, 7  ;;  %v12071_v4 = vsel %vm796_vm2, %v2257_v25, %v2259_v10  ;;  %v12074_v1 = vrot.slane %v17692_v46, 2  ;;  %v1662_v41 = vsel %vm1657_vm9, %v1637_v51, %v17693_v2  ;;  %v17697_v10 = vld [vmem:[#allocation150_spill] sm:$0xff]  ;;  %v17702_v2 = vld [vmem:[#allocation101_spill] sm:$0xff] }
 0x25f   : > { %v1709_v8 = vsel %vm392_vm3, %v1685_v21, %v1466_v33  ;;  %v1686_v0 = vsel %vm1682_vm10, %v1661_v63, %v17694_v36  ;;  %v2262_v31 = vrot.slane %v17695_v7, 2  ;;  %v1615_v25 = vsel %vm1607_vm7, %v11963_v58, %v17696_v27  ;;  %v17701_v63 = vld [vmem:[#allocation116_spill] sm:$0xff]  ;;  %v17703_v36 = vld [vmem:[#allocation102_spill] sm:$0xff]  ;;  %v17705_v27 = vld [vmem:[#allocation103_spill] sm:$0xff] }
 0x260   : > { %v1759_v5 = vrot.slane %v1709_v8, 7  ;;  %v1468_v47 = vpop.permute.xlu1 %1467  ;;  %v1758_v34 = vsel %vm1755_vm11, %v1756_v61, %v1757_v40  ;;  %v1687_v12 = vsel %vm1682_vm10, %v1662_v41, %v17697_v10  ;;  %v1638_v21 = vsel %vm1632_vm8, %v1613_v18, %v17698_v26  ;;  %2302 = vrot.lane.b32.xlu1 %v12064_v43, %s10117_s14  ;;  %v17699_v61 = vld [vmem:[#allocation12_spill] sm:$0xff] }
 0x261   : > { %v1710_v24 = vsel %vm392_vm3, %v1686_v0, %v1468_v47  ;;  %8617 = vmatprep.mubr.msk.f32.mxu0 %vm1802_vm12, %v1758_v34  ;;  %v2264_v58 = vrot.slane %v2041_v38, 2  ;;  %v1616_v8 = vsel %vm1607_vm7, %v11976_v50, %v17699_v61  ;;  %v1663_v18 = vsel %vm1657_vm9, %v1638_v21, %v17701_v63  ;;  %2304 = vrot.lane.b32.xlu0 %v12071_v4, %s10117_s14  ;;  %v17704_v0 = vld [vmem:[#allocation151_spill] sm:$0xff]  ;;  %v2045_v34 = vld [vmem:[#allocation2 + $0x1d8] sm:$0xff] }
 0x262   : > { %v1470_v59 = vpop.permute.xlu0 %1469  ;;  %v1760_v51 = vsel %vm1755_vm11, %v1757_v40, %v1759_v5  ;;  %v1761_v3 = vrot.slane %v1710_v24, 7  ;;  %v1617_v40 = vsel %vm1607_vm7, %v11980_v20, %v17700_v16  ;;  %v1639_v41 = vsel %vm1632_vm8, %v1614_v13, %v17702_v2  ;;  %v17708_v61 = vld [vmem:[#allocation154_spill] sm:$0xff]  ;;  %v17709_v16 = vld [vmem:[#allocation20_spill] sm:$0xff] }
 0x263   : > { %v1711_v33 = vsel %vm392_vm3, %v1687_v12, %v1470_v59  ;;  %8618 = vmatmul.mubr.msk.f32.vlgmr.msra.gmra.mrb[0].mxu0 %vm1802_vm12, %v1760_v51  ;;  %v1640_v38 = vsel %vm1632_vm8, %v1615_v25, %v17703_v36  ;;  %v1688_v50 = vsel %vm1682_vm10, %v1663_v18, %v17704_v0  ;;  %v12114_v20 = vsel %vm796_vm2, %v12074_v1, %v2262_v31  ;;  %v17706_v12 = vld [vmem:[#allocation117_spill] sm:$0xff]  ;;  %v17707_v51 = vld [vmem:[#allocation155_spill] sm:$0xff]  ;;  %v17711_v36 = vld [vmem:[#allocation14_spill] sm:$0xff] }
 0x264   : > { %v1762_v5 = vrot.slane %v1711_v33, 7  ;;  %v1472_v47 = vpop.permute.xlu1 %1471  ;;  %v1641_v10 = vsel %vm1632_vm8, %v1616_v8, %v17705_v27  ;;  %v1664_v24 = vsel %vm1657_vm9, %v1639_v41, %v17706_v12  ;;  %2306 = vrot.lane.b32.xlu1 %v12074_v1, %s10117_s14  ;;  %v12128_v33 = vsel %vm796_vm2, %v2262_v31, %v2264_v58  ;;  %v17712_v31 = vld [vmem:[#allocation118_spill] sm:$0xff]  ;;  %v17714_v12 = vld [vmem:[#allocation104_spill] sm:$0xff] }
 0x265   : > { %v1712_v13 = vsel %vm392_vm3, %v1688_v50, %v1472_v47  ;;  %v1689_v26 = vsel %vm1682_vm10, %v1664_v24, %v17707_v51  ;;  %v2267_v8 = vrot.slane %v17708_v61, 2  ;;  %v1665_v63 = vsel %vm1657_vm9, %v1640_v38, %v17709_v16  ;;  %2308 = vrot.lane.b32.xlu0 %v12114_v20, %s10117_s14  ;;  %v17713_v50 = vld [vmem:[#allocation158_spill] sm:$0xff] }
 0x266   : > { %v1474_v59 = vpop.permute.xlu0 %1473  ;;  %v1763_v25 = vsel %vm1755_vm11, %v1761_v3, %v1762_v5  ;;  %v1764_v21 = vrot.slane %v1712_v13, 7  ;;  %v17710_v3 = vld [vmem:[#allocation153_spill] sm:$0xff]  ;;  %v2269_v41 = vrot.slane %v2045_v34, 2  ;;  %v1618_v0 = vsel %vm1607_vm7, %v11984_v56, %v17711_v36  ;;  %v17716_v34 = vld [vmem:[#allocation159_spill] sm:$0xff] }
 0x267   : > { %8620 = vmatprep.mubr.msk.f32.mxu0 %vm1802_vm12, %v1763_v25  ;;  %v1713_v18 = vsel %vm392_vm3, %v1689_v26, %v1474_v59  ;;  %v12137_v2 = vrot.slane %v17710_v3, 2  ;;  %v1666_v58 = vsel %vm1657_vm9, %v1641_v10, %v17712_v31  ;;  %v1690_v47 = vsel %vm1682_vm10, %v1665_v63, %v17713_v50  ;;  %v17715_v13 = vld [vmem:[#allocation105_spill] sm:$0xff]  ;;  %v17719_v31 = vld [vmem:[#allocation120_spill] sm:$0xff]  ;;  %v17720_v50 = vld [vmem:[#allocation163_spill] sm:$0xff] }
 0x268   : > { %v1476_v38 = vpop.permute.xlu1 %1475  ;;  %v1765_v27 = vsel %vm1755_vm11, %v1762_v5, %v1764_v21  ;;  %v1642_v24 = vsel %vm1632_vm8, %v1617_v40, %v17714_v12  ;;  %v1643_v59 = vsel %vm1632_vm8, %v1618_v0, %v17715_v13  ;;  %v1691_v25 = vsel %vm1682_vm10, %v1666_v58, %v17716_v34  ;;  %2310 = vrot.lane.b32.xlu1 %v12128_v33, %s10117_s14  ;;  %v17717_v5 = vld [vmem:[#allocation119_spill] sm:$0xff]  ;;  %v17721_v12 = vld [vmem:[#allocation161_spill] sm:$0xff]  ;;  %v17722_v34 = vld [vmem:[#allocation32_spill] sm:$0xff] }
 0x269   : > { %v1714_v56 = vsel %vm392_vm3, %v1690_v47, %v1476_v38  ;;  %8621 = vmatmul.mubr.msk.f32.gmra.mrb[2].mxu0 %vm1802_vm12, %v1765_v27  ;;  %v1766_v10 = vrot.slane %v1713_v18, 7  ;;  %v12160_v40 = vsel %vm796_vm2, %v12137_v2, %v2267_v8  ;;  %v1667_v21 = vsel %vm1657_vm9, %v1642_v24, %v17717_v5  ;;  %2312 = vrot.lane.b32.xlu0 %v12137_v2, %s10117_s14  ;;  %v17718_v18 = vld [vmem:[#allocation160_spill] sm:$0xff]  ;;  %v2049_v13 = vld [vmem:[#allocation2 + $0x1f8] sm:$0xff] }
 0x26a   : > { %v1478_v51 = vpop.permute.xlu0 %1477  ;;  %v1767_v26 = vrot.slane %v1714_v56, 7  ;;  %v12167_v36 = vsel %vm796_vm2, %v2267_v8, %v2269_v41  ;;  %v12170_v0 = vrot.slane %v17718_v18, 2  ;;  %v1668_v58 = vsel %vm1657_vm9, %v1643_v59, %v17719_v31  ;;  %v17723_v41 = vld [vmem:[#allocation166_spill] sm:$0xff] }
 0x26b   : > { %v1715_v16 = vsel %vm392_vm3, %v1691_v25, %v1478_v51  ;;  %v1692_v47 = vsel %vm1682_vm10, %v1667_v21, %v17720_v50  ;;  %v2272_v24 = vrot.slane %v17721_v12, 2  ;;  %v1619_v8 = vsel %vm1607_vm7, %v11990_v35, %v17722_v34  ;;  %v17725_v5 = vld [vmem:[#allocation106_spill] sm:$0xff]  ;;  %v17729_v34 = vld [vmem:[#allocation107_spill] sm:$0xff] }
 0x26c   : > { %v1769_v63 = vrot.slane %v1715_v16, 7  ;;  %v1480_v38 = vpop.permute.xlu1 %1479  ;;  %v1768_v27 = vsel %vm1755_vm11, %v1766_v10, %v1767_v26  ;;  %v1693_v25 = vsel %vm1682_vm10, %v1668_v58, %v17723_v41  ;;  %v17724_v16 = vld [vmem:[#allocation78_spill] sm:$0xff]  ;;  %v1644_v21 = vsel %vm1632_vm8, %v1619_v8, %v17725_v5  ;;  %2314 = vrot.lane.b32.xlu1 %v12160_v40, %s10117_s14  ;;  %v17726_v58 = vld [vmem:[#allocation88_spill] sm:$0xff]  ;;  %v17730_v41 = vld [vmem:[#allocation167_spill] sm:$0xff] }
 0x26d   : > { %v1716_v56 = vsel %vm392_vm3, %v1692_v47, %v1480_v38  ;;  %8623 = vmatprep.mubr.msk.f32.mxu0 %vm1802_vm12, %v1768_v27  ;;  %v1597_v10 = vsel %vm1582_vm6, %v11909_v53, %v17724_v16  ;;  %v1620_v50 = vsel %vm1607_vm7, %v11994_v17, %v17726_v58  ;;  %2316 = vrot.lane.b32.xlu0 %v12167_v36, %s10117_s14  ;;  %v2274_v53 = vrot.slane %v2049_v13, 2  ;;  %v17728_v38 = vld [vmem:[#allocation79_spill] sm:$0xff]  ;;  %v17732_v13 = vld [vmem:[#allocation122_spill] sm:$0xff] }
 0x26e   : > { %v1482_v51 = vpop.permute.xlu0 %1481  ;;  %v1770_v59 = vsel %vm1755_vm11, %v1767_v26, %v1769_v63  ;;  %v1771_v31 = vrot.slane %v1716_v56, 7  ;;  %v17727_v26 = vld [vmem:[#allocation121_spill] sm:$0xff]  ;;  %v1598_v27 = vsel %vm1582_vm6, %v11913_v15, %v17728_v38  ;;  %v1645_v8 = vsel %vm1632_vm8, %v1620_v50, %v17729_v34  ;;  %v17734_v50 = vld [vmem:[#allocation108_spill] sm:$0xff] }
 0x26f   : > { %v1717_v35 = vsel %vm392_vm3, %v1693_v25, %v1482_v51  ;;  %8624 = vmatmul.mubr.msk.f32.gmra.mrb[4].mxu0 %vm1802_vm12, %v1770_v59  ;;  %v1669_v63 = vsel %vm1657_vm9, %v1644_v21, %v17727_v26  ;;  %v12211_v17 = vsel %vm796_vm2, %v12170_v0, %v2272_v24  ;;  %v17731_v51 = vld [vmem:[#allocation89_spill] sm:$0xff]  ;;  %v1670_v16 = vsel %vm1657_vm9, %v1645_v8, %v17732_v13 }
 0x270   : > { %v1772_v47 = vrot.slane %v1717_v35, 7  ;;  %v1694_v25 = vsel %vm1682_vm10, %v1669_v63, %v17730_v41  ;;  %v1484_v56 = vpop.permute.xlu1 %1483  ;;  %v1621_v59 = vsel %vm1607_vm7, %v11998_v19, %v17731_v51  ;;  %v17733_v35 = vld [vmem:[#allocation90_spill] sm:$0xff]  ;;  %v17735_v63 = vld [vmem:[#allocation169_spill] sm:$0xff]  ;;  %2318 = vrot.lane.b32.xlu1 %v12170_v0, %s10117_s14  ;;  %v17737_v41 = vld [vmem:[#allocation123_spill] sm:$0xff] }
 0x271   : > { %v1718_v15 = vsel %vm392_vm3, %v1694_v25, %v1484_v56  ;;  %v1622_v58 = vsel %vm1607_vm7, %v1597_v10, %v17733_v35  ;;  %v1646_v26 = vsel %vm1632_vm8, %v1621_v59, %v17734_v50  ;;  %v1695_v38 = vsel %vm1682_vm10, %v1670_v16, %v17735_v63  ;;  %v17736_v19 = vld [vmem:[#allocation109_spill] sm:$0xff]  ;;  %2320 = vrot.lane.b32.xlu0 %v12211_v17, %s10117_s14  ;;  %v17738_v56 = vld [vmem:[#allocation80_spill] sm:$0xff]  ;;  %v17740_v16 = vld [vmem:[#allocation170_spill] sm:$0xff] }
 0x272   : > { %v1486_v5 = vpop.permute.xlu0 %1485  ;;  %v1773_v21 = vsel %vm1755_vm11, %v1771_v31, %v1772_v47  ;;  %v1774_v34 = vrot.slane %v1718_v15, 7  ;;  %v1647_v8 = vsel %vm1632_vm8, %v1622_v58, %v17736_v19  ;;  %v1671_v31 = vsel %vm1657_vm9, %v1646_v26, %v17737_v41  ;;  %v17739_v59 = vld [vmem:[#allocation124_spill] sm:$0xff]  ;;  %v17741_v58 = vld [vmem:[#allocation91_spill] sm:$0xff]  ;;  %v17744_v19 = vld [vmem:[#allocation110_spill] sm:$0xff] }
 0x273   : > { %8626 = vmatprep.mubr.msk.f32.mxu0 %vm1802_vm12, %v1773_v21  ;;  %v1719_v10 = vsel %vm392_vm3, %v1695_v38, %v1486_v5  ;;  %v12237_v25 = vsel %vm796_vm2, %v2272_v24, %v2274_v53  ;;  %v1599_v51 = vsel %vm1582_vm6, %v11917_v45, %v17738_v56  ;;  %v1672_v13 = vsel %vm1657_vm9, %v1647_v8, %v17739_v59  ;;  %v2051_v5 = vld [vmem:[#allocation2 + $0x120] sm:$0xff]  ;;  %v17742_v26 = vld [vmem:[#allocation92_spill] sm:$0xff]  ;;  %v17743_v53 = vld [vmem:[#allocation21_spill] sm:$0xff] }
 0x274   : > { %v1696_v15 = vsel %vm1682_vm10, %v1671_v31, %v17740_v16  ;;  %v1488_v21 = vpop.permute.xlu1 %1487  ;;  %v1775_v35 = vsel %vm1755_vm11, %v1772_v47, %v1774_v34  ;;  %v1623_v50 = vsel %vm1607_vm7, %v1598_v27, %v17741_v58  ;;  %v1624_v24 = vsel %vm1607_vm7, %v1599_v51, %v17742_v26  ;;  %2322 = vrot.lane.b32.xlu1 %v12237_v25, %s10117_s14  ;;  %v17745_v27 = vld [vmem:[#allocation62_spill] sm:$0xff]  ;;  %v17746_v31 = vld [vmem:[#allocation24_spill] sm:$0xff]  ;;  %v17747_v51 = vld [vmem:[#allocation15_spill] sm:$0xff] }
 0x275   : > { %v1697_v63 = vsel %vm1682_vm10, %v1672_v13, %v17743_v53  ;;  %v1720_v45 = vsel %vm392_vm3, %v1696_v15, %v1488_v21  ;;  %8627 = vmatmul.mubr.msk.f32.gmra.mrb[6].mxu0 %vm1802_vm12, %v1775_v35  ;;  %v1648_v8 = vsel %vm1632_vm8, %v1623_v50, %v17744_v19  ;;  %v1776_v41 = vrot.slane %v1719_v10, 7  ;;  %v17748_v13 = vld [vmem:[#allocation125_spill] sm:$0xff]  ;;  %2372 = vrot.lane.b32.xlu0 %v2051_v5, %s10118_s26  ;;  %v12268_v10 = vld [vmem:[#allocation2 + $0x128] sm:$0xff]  ;;  %v17750_v58 = vld [vmem:[#allocation126_spill] sm:$0xff] }
 0x276   : > { %v1490_v38 = vpop.permute.xlu0 %1489  ;;  %v1777_v47 = vrot.slane %v1720_v45, 7  ;;  %v1579_v56 = vsel %vm1557_vm5, %v17746_v31, %v17745_v27  ;;  %v1649_v59 = vsel %vm1632_vm8, %v1624_v24, %v17747_v51  ;;  %v1673_v16 = vsel %vm1657_vm9, %v1648_v8, %v17748_v13  ;;  %v17749_v21 = vld [vmem:[#allocation81_spill] sm:$0xff]  ;;  %v17751_v26 = vld [vmem:[#allocation22_spill] sm:$0xff]  ;;  %v17753_v19 = vld [vmem:[#allocation23_spill] sm:$0xff] }
 0x277   : > { %v1721_v34 = vsel %vm392_vm3, %v1697_v63, %v1490_v38  ;;  %v1600_v35 = vsel %vm1582_vm6, %v11923_v42, %v17749_v21  ;;  %v1674_v50 = vsel %vm1657_vm9, %v1649_v59, %v17750_v58  ;;  %v1698_v53 = vsel %vm1682_vm10, %v1673_v16, %v17751_v26  ;;  %v12278_v45 = vld [vmem:[#allocation2 + $0x130] sm:$0xff]  ;;  %v17754_v31 = vld [vmem:[#allocation82_spill] sm:$0xff]  ;;  %v17756_v21 = vld [vmem:[#allocation63_spill] sm:$0xff] }
 0x278   : > { %v1779_v15 = vrot.slane %v1721_v34, 7  ;;  %v1492_v63 = vpop.permute.xlu1 %1491  ;;  %v1778_v24 = vsel %vm1755_vm11, %v1776_v41, %v1777_v47  ;;  %v17752_v38 = vld [vmem:[#allocation93_spill] sm:$0xff]  ;;  %v1699_v8 = vsel %vm1682_vm10, %v1674_v50, %v17753_v19  ;;  %v1601_v51 = vsel %vm1582_vm6, %v11927_v55, %v17754_v31  ;;  %v17755_v41 = vld [vmem:[#allocation111_spill] sm:$0xff]  ;;  %2374 = vrot.lane.b32.xlu1 %v12268_v10, %s10118_s26  ;;  %v17762_v19 = vld [vmem:[#allocation112_spill] sm:$0xff] }
 0x279   : > { %v1625_v5 = vsel %vm1607_vm7, %v1600_v35, %v17752_v38  ;;  %v1722_v34 = vsel %vm392_vm3, %v1698_v53, %v1492_v63  ;;  %8629 = vmatprep.mubr.msk.f32.mxu0 %vm1802_vm12, %v1778_v24  ;;  %v17757_v35 = vld [vmem:[#allocation25_spill] sm:$0xff]  ;;  %v17759_v50 = vld [vmem:[#allocation127_spill] sm:$0xff]  ;;  %2376 = vrot.lane.b32.xlu0 %v12278_v45, %s10118_s26  ;;  %v17761_v38 = vld [vmem:[#allocation84_spill] sm:$0xff] }
 0x27a   : > { %v1494_v42 = vpop.permute.xlu0 %1493  ;;  %v1780_v27 = vsel %vm1755_vm11, %v1777_v47, %v1779_v15  ;;  %v1650_v59 = vsel %vm1632_vm8, %v1625_v5, %v17755_v41  ;;  %v1781_v13 = vrot.slane %v1722_v34, 7  ;;  %v1580_v58 = vsel %vm1557_vm5, %v17757_v35, %v17756_v21  ;;  %v17758_v47 = vld [vmem:[#allocation94_spill] sm:$0xff]  ;;  %v17760_v63 = vld [vmem:[#allocation83_spill] sm:$0xff]  ;;  %v17765_v41 = vld [vmem:[#allocation128_spill] sm:$0xff] }
 0x27b   : > { %v1723_v16 = vsel %vm392_vm3, %v1699_v8, %v1494_v42  ;;  %8630 = vmatmul.mubr.msk.f32.gmra.mrb[8].mxu0 %vm1802_vm12, %v1780_v27  ;;  %v1626_v15 = vsel %vm1607_vm7, %v1601_v51, %v17758_v47  ;;  %v1675_v55 = vsel %vm1657_vm9, %v1650_v59, %v17759_v50  ;;  %v12305_v53 = vld [vmem:[#allocation2 + $0x140] sm:$0xff]  ;;  %v1602_v24 = vsel %vm1582_vm6, %v11931_v44, %v17760_v63  ;;  %v17766_v35 = vld [vmem:[#allocation96_spill] sm:$0xff]  ;;  %v17768_v63 = vld [vmem:[#allocation85_spill] sm:$0xff] }
 0x27c   : > { %v1782_v26 = vrot.slane %v1723_v16, 7  ;;  %v1603_v5 = vsel %vm1582_vm6, %v11935_v62, %v17761_v38  ;;  %v1651_v8 = vsel %vm1632_vm8, %v1626_v15, %v17762_v19  ;;  %v17763_v34 = vld [vmem:[#allocation27_spill] sm:$0xff]  ;;  %v1496_v27 = vpop.permute.xlu1 %1495  ;;  %v17767_v47 = vld [vmem:[#allocation16_spill] sm:$0xff]  ;;  %2378 = vrot.lane.b32.xlu1 %v12305_v53, %s10118_s26  ;;  %v17769_v38 = vld [vmem:[#allocation113_spill] sm:$0xff] }
 0x27d   : > { %v1700_v42 = vsel %vm1682_vm10, %v1675_v55, %v17763_v34  ;;  %v17764_v31 = vld [vmem:[#allocation95_spill] sm:$0xff]  ;;  %v1676_v59 = vsel %vm1657_vm9, %v1651_v8, %v17765_v41  ;;  %v1628_v62 = vsel %vm1607_vm7, %v1603_v5, %v17766_v35  ;;  %2380 = vrot.lane.b32.xlu0 %v11624_v22, %s10118_s26 }
 0x27e   : > { %v1627_v51 = vsel %vm1607_vm7, %v1602_v24, %v17764_v31  ;;  %v1724_v16 = vsel %vm392_vm3, %v1700_v42, %v1496_v27  ;;  %v1498_v44 = vpop.permute.xlu0 %1497  ;;  %v1783_v21 = vsel %vm1755_vm11, %v1781_v13, %v1782_v26  ;;  %v1701_v50 = vsel %vm1682_vm10, %v1676_v59, %v11885_v30  ;;  %v17770_v19 = vld [vmem:[#allocation131_spill] sm:$0xff]  ;;  %v17771_v30 = vld [vmem:[#allocation86_spill] sm:$0xff]  ;;  %v17772_v42 = vld [vmem:[#allocation132_spill] sm:$0xff] }
 0x27f   : > { %v1652_v15 = vsel %vm1632_vm8, %v1627_v51, %v17767_v47  ;;  %v1784_v55 = vrot.slane %v1724_v16, 7  ;;  %8632 = vmatprep.mubr.msk.f32.mxu0 %vm1802_vm12, %v1783_v21  ;;  %v1604_v24 = vsel %vm1582_vm6, %v1579_v56, %v17768_v63  ;;  %v1653_v13 = vsel %vm1632_vm8, %v1628_v62, %v17769_v38  ;;  %v12348_v41 = vld [vmem:[#allocation2 + $0x160] sm:$0xff]  ;;  %v17773_v59 = vld [vmem:[#allocation97_spill] sm:$0xff] }
 0x280   : > { %v1677_v5 = vsel %vm1657_vm9, %v1652_v15, %v17770_v19  ;;  %v1725_v8 = vsel %vm392_vm3, %v1701_v50, %v1498_v44  ;;  %v1605_v34 = vsel %vm1582_vm6, %v1580_v58, %v17771_v30  ;;  %v1678_v27 = vsel %vm1657_vm9, %v1653_v13, %v17772_v42  ;;  %v1500_v31 = vpop.permute.xlu1 %1499  ;;  %v17774_v44 = vld [vmem:[#allocation98_spill] sm:$0xff]  ;;  %2382 = vrot.lane.b32.xlu1 %v11626_v60, %s10118_s26  ;;  %v17776_v50 = vld [vmem:[#allocation64_spill] sm:$0xff]  ;;  %v17781_v30 = vld [vmem:[#allocation137_spill] sm:$0xff] }
 0x281   : > { %v1702_v56 = vsel %vm1682_vm10, %v1677_v5, %v11919_v14  ;;  %v1785_v51 = vsel %vm1755_vm11, %v1782_v26, %v1784_v55  ;;  %v1629_v16 = vsel %vm1607_vm7, %v1604_v24, %v17773_v59  ;;  %v1630_v22 = vsel %vm1607_vm7, %v1605_v34, %v17774_v44  ;;  %v17775_v14 = vld [vmem:[#allocation114_spill] sm:$0xff]  ;;  %2384 = vrot.lane.b32.xlu0 %v12348_v41, %s10118_s26  ;;  %v17780_v5 = vld [vmem:[#allocation87_spill] sm:$0xff] }
 0x282   : > { %v1703_v58 = vsel %vm1682_vm10, %v1678_v27, %v11937_v52  ;;  %v1726_v21 = vsel %vm392_vm3, %v1702_v56, %v1500_v31  ;;  %v1502_v35 = vpop.permute.xlu0 %1501  ;;  %8633 = vmatmul.mubr.msk.f32.gmra.mrb[10].mxu0 %vm1802_vm12, %v1785_v51  ;;  %v1654_v62 = vsel %vm1632_vm8, %v1629_v16, %v17775_v14  ;;  %v1786_v26 = vrot.slane %v1725_v8, 7  ;;  %v17777_v55 = vld [vmem:[#allocation26_spill] sm:$0xff]  ;;  %v17778_v52 = vld [vmem:[#allocation17_spill] sm:$0xff]  ;;  %v17782_v56 = vld [vmem:[#allocation99_spill] sm:$0xff] }
 0x283   : > { %v1787_v47 = vrot.slane %v1726_v21, 7  ;;  %v1727_v15 = vsel %vm392_vm3, %v1703_v58, %v1502_v35  ;;  %v1581_v63 = vsel %vm1557_vm5, %v17777_v55, %v17776_v50  ;;  %v1655_v24 = vsel %vm1632_vm8, %v1630_v22, %v17778_v52  ;;  %v17779_v38 = vld [vmem:[#allocation134_spill] sm:$0xff]  ;;  %v17783_v22 = vld [vmem:[#allocation115_spill] sm:$0xff] }
 0x284   : > { %v1679_v13 = vsel %vm1657_vm9, %v1654_v62, %v17779_v38  ;;  %v1789_v19 = vrot.slane %v1727_v15, 7  ;;  %v1606_v8 = vsel %vm1582_vm6, %v1581_v63, %v17780_v5  ;;  %v1680_v60 = vsel %vm1657_vm9, %v1655_v24, %v17781_v30  ;;  %v1504_v42 = vpop.permute.xlu1 %1503  ;;  %2386 = vrot.lane.b32.xlu1 %v11646_v23, %s10118_s26  ;;  %v17784_v35 = vld [vmem:[#allocation138_spill] sm:$0xff] }
 0x285   : > { %v1704_v34 = vsel %vm1682_vm10, %v1679_v13, %v11965_v29  ;;  %v1788_v27 = vsel %vm1755_vm11, %v1786_v26, %v1787_v47  ;;  %v1631_v31 = vsel %vm1607_vm7, %v1606_v8, %v17782_v56  ;;  %v1705_v51 = vsel %vm1682_vm10, %v1680_v60, %v11986_v11  ;;  %2388 = vrot.lane.b32.xlu0 %v11648_v32, %s10118_s26  ;;  %v12396_v62 = vld [vmem:[#allocation2 + $0x180] sm:$0xff]  ;;  %v12461_v60 = vld [vmem:[#allocation2 + $0x208] sm:$0xff] }
 0x286   : > { %v1728_v59 = vsel %vm392_vm3, %v1704_v34, %v1504_v42  ;;  %v1506_v16 = vpop.permute.xlu0 %1505  ;;  %8635 = vmatprep.mubr.msk.f32.mxu0 %vm1802_vm12, %v1788_v27  ;;  %v1790_v44 = vsel %vm1755_vm11, %v1787_v47, %v1789_v19  ;;  %v1656_v58 = vsel %vm1632_vm8, %v1631_v31, %v17783_v22  ;;  %v12412_v63 = vld [vmem:[#allocation2 + $0x1a0] sm:$0xff]  ;;  %v2444_v34 = vrot.slane %v12268_v10, 1  ;;  %v17800_v22 = vld [vmem:[#allocation133_spill] sm:$0xff] }
 0x287   : > { %v1791_v29 = vrot.slane %v1728_v59, 7  ;;  %v1729_v21 = vsel %vm392_vm3, %v1705_v51, %v1506_v16  ;;  %8636 = vmatmul.mubr.msk.f32.gmra.mrb[12].mxu0 %vm1802_vm12, %v1790_v44  ;;  %v1681_v11 = vsel %vm1657_vm9, %v1656_v58, %v17784_v35  ;;  %v12441_v5 = vld [vmem:[#allocation2 + $0x1e0] sm:$0xff]  ;;  %v2445_v42 = vrot.slane %v12278_v45, 1  ;;  %v17799_v44 = vld [vmem:[#allocation129_spill] sm:$0xff] }
 0x288   : > { %v1792_v14 = vrot.slane %v1729_v21, 7  ;;  %v1706_v26 = vsel %vm1682_vm10, %v1681_v11, %v12016_v6  ;;  %v1508_v47 = vpop.permute.xlu1 %1507  ;;  %2390 = vrot.lane.b32.xlu1 %v12396_v62, %s10118_s26  ;;  %v17803_v21 = vld [vmem:[#allocation130_spill] sm:$0xff]  ;;  %v17804_v35 = vld [vmem:[#allocation135_spill] sm:$0xff] }
 0x289   : > { %v1730_v15 = vsel %vm392_vm3, %v1706_v26, %v1508_v47  ;;  %2392 = vrot.lane.b32.xlu0 %v11680_v54, %s10118_s26  ;;  %v12429_v54 = vld [vmem:[#allocation2 + $0x1c0] sm:$0xff]  ;;  %v2446_v56 = vsel %vm691_vm1, %v2444_v34, %v2445_v42  ;;  %v17808_v47 = vld [vmem:[#allocation136_spill] sm:$0xff] }
 0x28a   : > { %v12401_v50 = vpop.permute.xlu0 %2156  ;;  %v1793_v23 = vsel %vm1755_vm11, %v1791_v29, %v1792_v14  ;;  %v1794_v55 = vrot.slane %v1730_v15, 7  ;;  %v17807_v26 = vld [vmem:[#allocation139_spill] sm:$0xff] }
 0x28b   : > { %8638 = vmatprep.mubr.msk.f32.mxu0 %vm1802_vm12, %v1793_v23 }
 0x28c   : > { %v12409_v32 = vpop.permute.xlu1 %2158  ;;  %v1795_v6 = vsel %vm1755_vm11, %v1792_v14, %v1794_v55  ;;  %2394 = vrot.lane.b32.xlu1 %v11682_v9, %s10118_s26  ;;  %v17811_v55 = vld [vmem:[#allocation140_spill] sm:$0xff] }
 0x28d   : > { %8639 = vmatmul.mubr.msk.f32.gmra.mrb[14].mxu0 %vm1802_vm12, %v1795_v6  ;;  %2396 = vrot.lane.b32.xlu0 %v12412_v63, %s10118_s26  ;;  %v17812_v6 = vld [vmem:[#allocation146_spill] sm:$0xff] }
 0x28e   : > { %v12414_v52 = vpop.permute.xlu0 %2160 }
 0x290   : > { %v12421_v24 = vpop.permute.xlu1 %2162  ;;  %2398 = vrot.lane.b32.xlu1 %v17692_v46, %s10118_s26 }
 0x291   : > { %2400 = vrot.lane.b32.xlu0 %v17695_v7, %s10118_s26 }
 0x292   : > { %v12423_v38 = vpop.permute.xlu0 %2164 }
 0x294   : > { %v12431_v13 = vpop.permute.xlu1 %2166  ;;  %2402 = vrot.lane.b32.xlu1 %v12429_v54, %s10118_s26 }
 0x295   : > { %17785 = vst [vmem:[#allocation29_spill] sm:$0xff] %v12431_v13  ;;  %2404 = vrot.lane.b32.xlu0 %v17710_v3, %s10118_s26  ;;  %v12457_v3 = vld [vmem:[#allocation2 + $0x200] sm:$0xff] }
 0x296   : > { %v12433_v19 = vpop.permute.xlu0 %2168 }
 0x297   : > { %17786 = vst [vmem:[#allocation30_spill] sm:$0xff] %v12433_v19 }
 0x298   : > { %v12439_v9 = vpop.permute.xlu1 %2170  ;;  %2406 = vrot.lane.b32.xlu1 %v17708_v61, %s10118_s26 }
 0x299   : > { %17787 = vst [vmem:[#allocation31_spill] sm:$0xff] %v12439_v9  ;;  %2408 = vrot.lane.b32.xlu0 %v12441_v5, %s10118_s26 }
 0x29a   : > { %v12443_v46 = vpop.permute.xlu0 %2172 }
 0x29b   : > { %17788 = vst [vmem:[#allocation33_spill] sm:$0xff] %v12443_v46 }
 0x29c   : > { %v12449_v7 = vpop.permute.xlu1 %2174  ;;  %2410 = vrot.lane.b32.xlu1 %v17718_v18, %s10118_s26  ;;  %v12471_v18 = vld [vmem:[#allocation2 + $0x210] sm:$0xff] }
 0x29d   : > { %17789 = vst [vmem:[#allocation34_spill] sm:$0xff] %v12449_v7  ;;  %2412 = vrot.lane.b32.xlu0 %v17721_v12, %s10118_s26 }
 0x29e   : > { %v12451_v8 = vpop.permute.xlu0 %2176 }
 0x29f   : > { %17790 = vst [vmem:[#allocation35_spill] sm:$0xff] %v12451_v8 }
 0x2a0   : > { %v12459_v30 = vpop.permute.xlu1 %2178  ;;  %2414 = vrot.lane.b32.xlu1 %v12457_v3, %s10118_s26 }
 0x2a1   : > { %17791 = vst [vmem:[#allocation36_spill] sm:$0xff] %v12459_v30  ;;  %2416 = vrot.lane.b32.xlu0 %v12461_v60, %s10118_s26 }
 0x2a2   : > { %v12463_v61 = vpop.permute.xlu0 %2180 }
 0x2a3   : > { %17792 = vst [vmem:[#allocation37_spill] sm:$0xff] %v12463_v61 }
 0x2a4   : > { %v12473_v12 = vpop.permute.xlu1 %2182  ;;  %2418 = vrot.lane.b32.xlu1 %v12471_v18, %s10118_s26 }
 0x2a5   : > { %17793 = vst [vmem:[#allocation38_spill] sm:$0xff] %v12473_v12  ;;  %2468 = vrot.lane.b32.xlu0 %v2444_v34, %s10119_s15 }
 0x2a6   : > { %v12475_v27 = vpop.permute.xlu0 %2184 }
 0x2a7   : > { %17794 = vst [vmem:[#allocation39_spill] sm:$0xff] %v12475_v27 }
 0x2a8   : > { %v12481_v31 = vpop.permute.xlu1 %2186  ;;  %2470 = vrot.lane.b32.xlu1 %v2446_v56, %s10119_s15  ;;  %v17815_v56 = vld [vmem:[#allocation141_spill] sm:$0xff] }
 0x2a9   : > { %17795 = vst [vmem:[#allocation40_spill] sm:$0xff] %v12481_v31  ;;  %2472 = vrot.lane.b32.xlu0 %v2445_v42, %s10119_s15 }
 0x2aa   : > { %v12483_v51 = vpop.permute.xlu0 %2188 }
 0x2ab   : > { %17796 = vst [vmem:[#allocation41_spill] sm:$0xff] %v12483_v51 }
 0x2ac   : > { %v12487_v59 = vpop.permute.xlu1 %2190  ;;  %2474 = vrot.lane.b32.xlu1 %v17799_v44, %s10119_s15  ;;  %v17816_v44 = vld [vmem:[#allocation148_spill] sm:$0xff] }
 0x2ad   : > { %17797 = vst [vmem:[#allocation42_spill] sm:$0xff] %v12487_v59  ;;  %2476 = vrot.lane.b32.xlu0 %v17800_v22, %s10119_s15 }
 0x2ae   : > { %v12489_v16 = vpop.permute.xlu0 %2192 }
 0x2af   : > { %17798 = vst [vmem:[#allocation43_spill] sm:$0xff] %v12489_v16 }
 0x2b0   : > { %v12495_v58 = vpop.permute.xlu1 %2194  ;;  %2478 = vrot.lane.b32.xlu1 %v17803_v21, %s10119_s15 }
 0x2b1   : > { %17801 = vst [vmem:[#allocation44_spill] sm:$0xff] %v12495_v58  ;;  %2480 = vrot.lane.b32.xlu0 %v17804_v35, %s10119_s15  ;;  %v17819_v35 = vld [vmem:[#allocation152_spill] sm:$0xff] }
 0x2b2   : > { %v12497_v29 = vpop.permute.xlu0 %2196 }
 0x2b3   : > { %17802 = vst [vmem:[#allocation45_spill] sm:$0xff] %v12497_v29 }
 0x2b4   : > { %v12503_v11 = vpop.permute.xlu1 %2198  ;;  %2482 = vrot.lane.b32.xlu1 %v17807_v26, %s10119_s15  ;;  %v17820_v26 = vld [vmem:[#allocation149_spill] sm:$0xff] }
 0x2b5   : > { %17805 = vst [vmem:[#allocation46_spill] sm:$0xff] %v12503_v11  ;;  %2484 = vrot.lane.b32.xlu0 %v17808_v47, %s10119_s15 }
 0x2b6   : > { %v12505_v14 = vpop.permute.xlu0 %2200 }
 0x2b7   : > { %17806 = vst [vmem:[#allocation47_spill] sm:$0xff] %v12505_v14 }
 0x2b8   : > { %v12511_v15 = vpop.permute.xlu1 %2202  ;;  %2486 = vrot.lane.b32.xlu1 %v17811_v55, %s10119_s15 }
 0x2b9   : > { %17809 = vst [vmem:[#allocation48_spill] sm:$0xff] %v12511_v15  ;;  %2488 = vrot.lane.b32.xlu0 %v17812_v6, %s10119_s15  ;;  %v17823_v6 = vld [vmem:[#allocation156_spill] sm:$0xff] }
 0x2ba   : > { %v12513_v23 = vpop.permute.xlu0 %2276 }
 0x2bb   : > { %17810 = vst [vmem:[#allocation49_spill] sm:$0xff] %v12513_v23 }
 0x2bc   : > { %v12519_v34 = vpop.permute.xlu1 %2278  ;;  %2490 = vrot.lane.b32.xlu1 %v17815_v56, %s10119_s15  ;;  %v17824_v56 = vld [vmem:[#allocation162_spill] sm:$0xff] }
 0x2bd   : > { %17813 = vst [vmem:[#allocation50_spill] sm:$0xff] %v12519_v34  ;;  %2492 = vrot.lane.b32.xlu0 %v17816_v44, %s10119_s15 }
 0x2be   : > { %v12521_v42 = vpop.permute.xlu0 %2280 }
 0x2bf   : > { %17814 = vst [vmem:[#allocation51_spill] sm:$0xff] %v12521_v42  ;;  %v2054_v42 = vld [vmem:[#allocation2 + $0x138] sm:$0xff] }
 0x2c0   : > { %v12527_v22 = vpop.permute.xlu1 %2282  ;;  %2494 = vrot.lane.b32.xlu1 %v17819_v35, %s10119_s15  ;;  %v17828_v35 = vld [vmem:[#allocation164_spill] sm:$0xff] }
 0x2c1   : > { %17817 = vst [vmem:[#allocation52_spill] sm:$0xff] %v12527_v22  ;;  %2496 = vrot.lane.b32.xlu0 %v17820_v26, %s10119_s15  ;;  %v12552_v26 = vrot.slane %v12461_v60, 1 }
 0x2c2   : > { %v12529_v21 = vpop.permute.xlu0 %2284 }
 0x2c3   : > { %17818 = vst [vmem:[#allocation53_spill] sm:$0xff] %v12529_v21  ;;  %v17827_v21 = vld [vmem:[#allocation157_spill] sm:$0xff] }
 0x2c4   : > { %v12535_v47 = vpop.permute.xlu1 %2286  ;;  %2498 = vrot.lane.b32.xlu1 %v17823_v6, %s10119_s15 }
 0x2c5   : > { %17821 = vst [vmem:[#allocation54_spill] sm:$0xff] %v12535_v47  ;;  %2500 = vrot.lane.b32.xlu0 %v17824_v56, %s10119_s15  ;;  %v17831_v56 = vld [vmem:[#allocation168_spill] sm:$0xff] }
 0x2c6   : > { %v12537_v55 = vpop.permute.xlu0 %2288 }
 0x2c7   : > { %17822 = vst [vmem:[#allocation55_spill] sm:$0xff] %v12537_v55  ;;  %v12555_v55 = vrot.slane %v12471_v18, 1 }
 0x2c8   : > { %v12543_v44 = vpop.permute.xlu1 %2290  ;;  %2502 = vrot.lane.b32.xlu1 %v17827_v21, %s10119_s15 }
 0x2c9   : > { %17825 = vst [vmem:[#allocation56_spill] sm:$0xff] %v12543_v44  ;;  %2504 = vrot.lane.b32.xlu0 %v17828_v35, %s10119_s15  ;;  %v12570_v35 = vsel %vm691_vm1, %v12552_v26, %v12555_v55 }
 0x2ca   : > { %v12545_v22 = vpop.permute.xlu0 %2292 }
 0x2cb   : > { %17826 = vst [vmem:[#allocation57_spill] sm:$0xff] %v12545_v22  ;;  %v17832_v22 = vld [vmem:[#allocation165_spill] sm:$0xff] }
 0x2cc   : > { %v12557_v6 = vpop.permute.xlu1 %2294  ;;  %2506 = vrot.lane.b32.xlu1 %v17831_v56, %s10119_s15  ;;  %v2549_v56 = vrot.slane %v12278_v45, 2 }
 0x2cd   : > { %17829 = vst [vmem:[#allocation58_spill] sm:$0xff] %v12557_v6  ;;  %2508 = vrot.lane.b32.xlu0 %v17832_v22, %s10119_s15 }
 0x2ce   : > { %v12559_v47 = vpop.permute.xlu0 %2296 }
 0x2cf   : > { %17830 = vst [vmem:[#allocation59_spill] sm:$0xff] %v12559_v47  ;;  %v2548_v47 = vrot.slane %v12268_v10, 2 }
 0x2d0   : > { %v12565_v21 = vpop.permute.xlu1 %2298  ;;  %2510 = vrot.lane.b32.xlu1 %v12552_v26, %s10119_s15 }
 0x2d1   : > { %17833 = vst [vmem:[#allocation60_spill] sm:$0xff] %v12565_v21  ;;  %2512 = vrot.lane.b32.xlu0 %v12570_v35, %s10119_s15  ;;  %v2551_v21 = vrot.slane %v2054_v42, 2 }
 0x2d2   : > { %v12572_v44 = vpop.permute.xlu0 %2300 }
 0x2d3   : > { %17834 = vst [vmem:[#allocation61_spill] sm:$0xff] %v12572_v44  ;;  %v2550_v44 = vsel %vm796_vm2, %v2548_v47, %v2549_v56  ;;  %v2552_v10 = vsel %vm796_vm2, %v2549_v56, %v2551_v21 }
 0x2d4   : > { %v12580_v22 = vpop.permute.xlu1 %2302  ;;  %2514 = vrot.lane.b32.xlu1 %v12555_v55, %s10119_s15 }
 0x2d5   : > { %17835 = vst [vmem:[#allocation65_spill] sm:$0xff] %v12580_v22  ;;  %2588 = vrot.lane.b32.xlu0 %v2548_v47, %s10120_s17  ;;  %v17841_v22 = vld [vmem:[#allocation28_spill] sm:$0xff] }
 0x2d6   : > { %v12582_v6 = vpop.permute.xlu0 %2304 }
 0x2d7   : > { %17836 = vst [vmem:[#allocation66_spill] sm:$0xff] %v12582_v6 }
 0x2d8   : > { %v12588_v34 = vpop.permute.xlu1 %2306  ;;  %2590 = vrot.lane.b32.xlu1 %v2550_v44, %s10120_s17 }
 0x2d9   : > { %17837 = vst [vmem:[#allocation67_spill] sm:$0xff] %v12588_v34  ;;  %2592 = vrot.lane.b32.xlu0 %v2552_v10, %s10120_s17 }
 0x2da   : > { %v12591_v45 = vpop.permute.xlu0 %2308 }
 0x2db   : > { %17838 = vst [vmem:[#allocation68_spill] sm:$0xff] %v12591_v45 }
 0x2dc   : > { %v12595_v42 = vpop.permute.xlu1 %2310  ;;  %2594 = vrot.lane.b32.xlu1 %v17841_v22, %s10120_s17 }
 0x2dd   : > { %17839 = vst [vmem:[#allocation69_spill] sm:$0xff] %v12595_v42  ;;  %2596 = vrot.lane.b32.xlu0 %v11959_v48, %s10120_s17 }
 0x2de   : > { %v12597_v6 = vpop.permute.xlu0 %2312 }
 0x2df   : > { %17840 = vst [vmem:[#allocation70_spill] sm:$0xff] %v12597_v6 }
 0x2e0   : > { %v12603_v47 = vpop.permute.xlu1 %2314  ;;  %2598 = vrot.lane.b32.xlu1 %v11968_v49, %s10120_s17 }
 0x2e1   : > { %17842 = vst [vmem:[#allocation71_spill] sm:$0xff] %v12603_v47  ;;  %2600 = vrot.lane.b32.xlu0 %v11971_v57, %s10120_s17  ;;  %v3449_v47 = vld [vmem:[#allocation3 + $0x58] sm:$0xff] }
 0x2e2   : > { %v12605_v34 = vpop.permute.xlu0 %2316  ;;  %v3668_v45 = vrot.slane %v3449_v47, 2 }
 0x2e3   : > { %17843 = vst [vmem:[#allocation72_spill] sm:$0xff] %v12605_v34 }
 0x2e4   : > { %v12611_v44 = vpop.permute.xlu1 %2318  ;;  %2602 = vrot.lane.b32.xlu1 %v12020_v37, %s10120_s17 }
 0x2e5   : > { %17844 = vst [vmem:[#allocation73_spill] sm:$0xff] %v12611_v44  ;;  %2604 = vrot.lane.b32.xlu0 %v12037_v28, %s10120_s17 }
 0x2e6   : > { %v12613_v21 = vpop.permute.xlu0 %2320 }
 0x2e7   : > { %17845 = vst [vmem:[#allocation74_spill] sm:$0xff] %v12613_v21 }
 0x2e8   : > { %v12619_v48 = vpop.permute.xlu1 %2322  ;;  %2606 = vrot.lane.b32.xlu1 %v12046_v39, %s10120_s17 }
 0x2e9   : > { %17846 = vst [vmem:[#allocation75_spill] sm:$0xff] %v12619_v48  ;;  %2608 = vrot.lane.b32.xlu0 %v12064_v43, %s10120_s17 }
 0x2ea   : > { %v12621_v56 = vpop.permute.xlu0 %2372 }
 0x2eb   : > { %17847 = vst [vmem:[#allocation76_spill] sm:$0xff] %v12621_v56 }
 0x2ec   : > { %v12627_v49 = vpop.permute.xlu1 %2374  ;;  %2610 = vrot.lane.b32.xlu1 %v12071_v4, %s10120_s17 }
 0x2ed   : > { %17848 = vst [vmem:[#allocation77_spill] sm:$0xff] %v12627_v49  ;;  %2612 = vrot.lane.b32.xlu0 %v12074_v1, %s10120_s17 }
 0x2ee   : > { %v12629_v57 = vpop.permute.xlu0 %2376 }
 0x2ef   : > { %17849 = vst [vmem:[#allocation142_spill] sm:$0xff] %v12629_v57 }
 0x2f0   : > { %v12635_v37 = vpop.permute.xlu1 %2378  ;;  %2614 = vrot.lane.b32.xlu1 %v12114_v20, %s10120_s17  ;;  %v12660_v20 = vrot.slane %v12461_v60, 2 }
 0x2f1   : > { %17850 = vst [vmem:[#allocation143_spill] sm:$0xff] %v12635_v37  ;;  %2616 = vrot.lane.b32.xlu0 %v12128_v33, %s10120_s17  ;;  %v2584_v33 = vrot.slane %v12471_v18, 2 }
 0x2f2   : > { %v12637_v28 = vpop.permute.xlu0 %2380 }
 0x2f3   : > { %17851 = vst [vmem:[#allocation18_spill] sm:$0xff] %v12637_v28 }
 0x2f4   : > { %v12643_v39 = vpop.permute.xlu1 %2382  ;;  %2618 = vrot.lane.b32.xlu1 %v12137_v2, %s10120_s17  ;;  %v2082_v2 = vld [vmem:[#allocation2 + $0x218] sm:$0xff] }
 0x2f5   : > { %17852 = vst [vmem:[#allocation144_spill] sm:$0xff] %v12643_v39  ;;  %2620 = vrot.lane.b32.xlu0 %v12160_v40, %s10120_s17  ;;  %v2586_v40 = vrot.slane %v2082_v2, 2  ;;  %v12694_v2 = vld [vmem:[#allocation2 + $0x148] sm:$0xff] }
 0x2f6   : > { %v12645_v43 = vpop.permute.xlu0 %2384 }
 0x2f7   : > { %17853 = vst [vmem:[#allocation19_spill] sm:$0xff] %v12645_v43 }
 0x2f8   : > { %v12651_v4 = vpop.permute.xlu1 %2386  ;;  %2622 = vrot.lane.b32.xlu1 %v12167_v36, %s10120_s17 }
 0x2f9   : > { %17854 = vst [vmem:[#allocation147_spill] sm:$0xff] %v12651_v4  ;;  %2624 = vrot.lane.b32.xlu0 %v12170_v0, %s10120_s17  ;;  %v12675_v0 = vsel %vm796_vm2, %v12660_v20, %v2584_v33 }
 0x2fa   : > { %v12653_v1 = vpop.permute.xlu0 %2388 }
 0x2fb   : > { %17855 = vst [vmem:[#allocation145_spill] sm:$0xff] %v12653_v1 }
 0x2fc   : > { %v12663_v22 = vpop.permute.xlu1 %2390  ;;  %2626 = vrot.lane.b32.xlu1 %v12211_v17, %s10120_s17  ;;  %v12684_v17 = vsel %vm796_vm2, %v2584_v33, %v2586_v40  ;;  %v12708_v40 = vld [vmem:[#allocation2 + $0x168] sm:$0xff] }
 0x2fd   : > { %17856 = vst [vmem:[#allocation11_spill] sm:$0xff] %v12663_v22  ;;  %2628 = vrot.lane.b32.xlu0 %v12237_v25, %s10120_s17  ;;  %v2759_v56 = vrot.slane %v12708_v40, 1 }
 0x2fe   : > { %v12665_v10 = vpop.permute.xlu0 %2392 }
 0x2ff   : > { %17857 = vst [vmem:[#allocation150_spill] sm:$0xff] %v12665_v10 }
 0x300   : > { %v12671_v36 = vpop.permute.xlu1 %2394  ;;  %2630 = vrot.lane.b32.xlu1 %v12660_v20, %s10120_s17 }
 0x301   : > { %17858 = vst [vmem:[#allocation100_spill] sm:$0xff] %v12671_v36  ;;  %2632 = vrot.lane.b32.xlu0 %v12675_v0, %s10120_s17  ;;  %v12698_v36 = vld [vmem:[#allocation2 + $0x150] sm:$0xff] }
 0x302   : > { %v12677_v1 = vpop.permute.xlu0 %2396 }
 0x303   : > { %17859 = vst [vmem:[#allocation12_spill] sm:$0xff] %v12677_v1 }
 0x304   : > { %v12686_v10 = vpop.permute.xlu1 %2398  ;;  %2634 = vrot.lane.b32.xlu1 %v12684_v17, %s10120_s17 }
 0x305   : > { %17860 = vst [vmem:[#allocation13_spill] sm:$0xff] %v12686_v10  ;;  %2684 = vrot.lane.b32.xlu0 %v12305_v53, %s10121_s18  ;;  %v12716_v53 = vld [vmem:[#allocation2 + $0x170] sm:$0xff] }
 0x306   : > { %v12688_v25 = vpop.permute.xlu0 %2400  ;;  %v2760_v48 = vrot.slane %v12716_v53, 1 }
 0x307   : > { %17861 = vst [vmem:[#allocation116_spill] sm:$0xff] %v12688_v25 }
 0x308   : > { %v12696_v1 = vpop.permute.xlu1 %2402  ;;  %2686 = vrot.lane.b32.xlu1 %v12694_v2, %s10121_s18 }
 0x309   : > { %17862 = vst [vmem:[#allocation101_spill] sm:$0xff] %v12696_v1  ;;  %2688 = vrot.lane.b32.xlu0 %v12698_v36, %s10121_s18 }
 0x30a   : > { %v12700_v22 = vpop.permute.xlu0 %2404 }
 0x30b   : > { %17863 = vst [vmem:[#allocation102_spill] sm:$0xff] %v12700_v22 }
 0x30c   : > { %v12706_v33 = vpop.permute.xlu1 %2406  ;;  %2690 = vrot.lane.b32.xlu1 %v12348_v41, %s10121_s18  ;;  %v12730_v41 = vld [vmem:[#allocation2 + $0x190] sm:$0xff] }
 0x30d   : > { %17864 = vst [vmem:[#allocation151_spill] sm:$0xff] %v12706_v33  ;;  %2692 = vrot.lane.b32.xlu0 %v12708_v40, %s10121_s18  ;;  %v12726_v33 = vld [vmem:[#allocation2 + $0x188] sm:$0xff]  ;;  %v2871_v9 = vrot.slane %v12730_v41, 2 }
 0x30e   : > { %v12710_v25 = vpop.permute.xlu0 %2408  ;;  %v2870_v46 = vrot.slane %v12726_v33, 2 }
 0x30f   : > { %17865 = vst [vmem:[#allocation103_spill] sm:$0xff] %v12710_v25 }
 0x310   : > { %v12718_v22 = vpop.permute.xlu1 %2410  ;;  %2694 = vrot.lane.b32.xlu1 %v12716_v53, %s10121_s18 }
 0x311   : > { %17866 = vst [vmem:[#allocation117_spill] sm:$0xff] %v12718_v22  ;;  %2696 = vrot.lane.b32.xlu0 %v12396_v62, %s10121_s18  ;;  %v12740_v22 = vld [vmem:[#allocation2 + $0x1a8] sm:$0xff]  ;;  %v12748_v62 = vld [vmem:[#allocation2 + $0x1b0] sm:$0xff] }
 0x312   : > { %v12720_v1 = vpop.permute.xlu0 %2412 }
 0x313   : > { %17867 = vst [vmem:[#allocation155_spill] sm:$0xff] %v12720_v1 }
 0x314   : > { %v12728_v25 = vpop.permute.xlu1 %2414  ;;  %2698 = vrot.lane.b32.xlu1 %v12726_v33, %s10121_s18 }
 0x315   : > { %17868 = vst [vmem:[#allocation154_spill] sm:$0xff] %v12728_v25  ;;  %2700 = vrot.lane.b32.xlu0 %v12730_v41, %s10121_s18 }
 0x316   : > { %v12732_v10 = vpop.permute.xlu0 %2416 }
 0x317   : > { %17869 = vst [vmem:[#allocation20_spill] sm:$0xff] %v12732_v10 }
 0x318   : > { %v12738_v1 = vpop.permute.xlu1 %2418  ;;  %2702 = vrot.lane.b32.xlu1 %v12412_v63, %s10121_s18  ;;  %v12762_v63 = vld [vmem:[#allocation2 + $0x1d0] sm:$0xff] }
 0x319   : > { %17870 = vst [vmem:[#allocation153_spill] sm:$0xff] %v12738_v1  ;;  %2704 = vrot.lane.b32.xlu0 %v12740_v22, %s10121_s18  ;;  %v12758_v1 = vld [vmem:[#allocation2 + $0x1c8] sm:$0xff] }
 0x31a   : > { %v12742_v4 = vpop.permute.xlu0 %2468 }
 0x31b   : > { %17871 = vst [vmem:[#allocation14_spill] sm:$0xff] %v12742_v4 }
 0x31c   : > { %v12750_v10 = vpop.permute.xlu1 %2470  ;;  %2706 = vrot.lane.b32.xlu1 %v12748_v62, %s10121_s18 }
 0x31d   : > { %17872 = vst [vmem:[#allocation118_spill] sm:$0xff] %v12750_v10  ;;  %2708 = vrot.lane.b32.xlu0 %v12429_v54, %s10121_s18  ;;  %v12772_v10 = vld [vmem:[#allocation2 + $0x1e8] sm:$0xff]  ;;  %v12780_v54 = vld [vmem:[#allocation2 + $0x1f0] sm:$0xff] }
 0x31e   : > { %v12752_v25 = vpop.permute.xlu0 %2472 }
 0x31f   : > { %17873 = vst [vmem:[#allocation158_spill] sm:$0xff] %v12752_v25 }
 0x320   : > { %v12760_v4 = vpop.permute.xlu1 %2474  ;;  %2710 = vrot.lane.b32.xlu1 %v12758_v1, %s10121_s18 }
 0x321   : > { %17874 = vst [vmem:[#allocation104_spill] sm:$0xff] %v12760_v4  ;;  %2712 = vrot.lane.b32.xlu0 %v12762_v63, %s10121_s18 }
 0x322   : > { %v12764_v43 = vpop.permute.xlu0 %2476 }
 0x323   : > { %17875 = vst [vmem:[#allocation105_spill] sm:$0xff] %v12764_v43 }
 0x324   : > { %v12770_v25 = vpop.permute.xlu1 %2478  ;;  %2714 = vrot.lane.b32.xlu1 %v12441_v5, %s10121_s18  ;;  %v2112_v5 = vld [vmem:[#allocation2 + $0x220] sm:$0xff] }
 0x325   : > { %17876 = vst [vmem:[#allocation159_spill] sm:$0xff] %v12770_v25  ;;  %2716 = vrot.lane.b32.xlu0 %v12772_v10, %s10121_s18 }
 0x326   : > { %v12774_v39 = vpop.permute.xlu0 %2480 }
 0x327   : > { %17877 = vst [vmem:[#allocation119_spill] sm:$0xff] %v12774_v39 }
 0x328   : > { %v12782_v43 = vpop.permute.xlu1 %2482  ;;  %2718 = vrot.lane.b32.xlu1 %v12780_v54, %s10121_s18 }
 0x329   : > { %17878 = vst [vmem:[#allocation160_spill] sm:$0xff] %v12782_v43  ;;  %2720 = vrot.lane.b32.xlu0 %v12457_v3, %s10121_s18  ;;  %v2756_v3 = vrot.slane %v12694_v2, 1 }
 0x32a   : > { %v12784_v4 = vpop.permute.xlu0 %2484 }
 0x32b   : > { %17879 = vst [vmem:[#allocation120_spill] sm:$0xff] %v12784_v4  ;;  %v12800_v4 = vld [vmem:[#allocation2 + $0x228] sm:$0xff] }
 0x32c   : > { %v12790_v25 = vpop.permute.xlu1 %2486  ;;  %2722 = vrot.lane.b32.xlu1 %v12461_v60, %s10121_s18  ;;  %v12809_v60 = vld [vmem:[#allocation4] ss:$0 sm:$0xff] }
 0x32d   : > { %17880 = vst [vmem:[#allocation163_spill] sm:$0xff] %v12790_v25  ;;  %2724 = vrot.lane.b32.xlu0 %v12471_v18, %s10121_s18  ;;  %v2757_v25 = vrot.slane %v12698_v36, 1 }
 0x32e   : > { %v12792_v39 = vpop.permute.xlu0 %2488 }
 0x32f   : > { %17881 = vst [vmem:[#allocation161_spill] sm:$0xff] %v12792_v39  ;;  %v12811_v39 = vld [vmem:[#allocation2 + $0x230] sm:$0xff]  ;;  %v2758_v49 = vsel %vm691_vm1, %v2756_v3, %v2757_v25 }
 0x330   : > { %v12798_v43 = vpop.permute.xlu1 %2490  ;;  %2726 = vrot.lane.b32.xlu1 %v2112_v5, %s10121_s18 }
 0x331   : > { %17882 = vst [vmem:[#allocation32_spill] sm:$0xff] %v12798_v43  ;;  %2728 = vrot.lane.b32.xlu0 %v12800_v4, %s10121_s18 }
 0x332   : > { %v12802_v28 = vpop.permute.xlu0 %2492 }
 0x333   : > { %17883 = vst [vmem:[#allocation166_spill] sm:$0xff] %v12802_v28 }
 0x334   : > { %v12813_v18 = vpop.permute.xlu1 %2494  ;;  %2730 = vrot.lane.b32.xlu1 %v12811_v39, %s10121_s18 }
 0x335   : > { %17884 = vst [vmem:[#allocation78_spill] sm:$0xff] %v12813_v18  ;;  %2780 = vrot.lane.b32.xlu0 %v2756_v3, %s10122_s19 }
 0x336   : > { %v12815_v43 = vpop.permute.xlu0 %2496  ;;  %v8619_v37 = vpop.f32.mrb[0].mxu0 }
 0x337   : > { %17885 = vst [vmem:[#allocation106_spill] sm:$0xff] %v12815_v43  ;;  %v1911_v28 = vadd.f32 %v8619_v37, %v12809_v60  ;;  %v1905_v5 = vpop.f32.mrb[1].mxu0 }
 0x338   : > { %v1906_v57 = vadd.f32 %v12809_v60, %v1905_v5  ;;  %v12825_v21 = vpop.permute.xlu1 %2498  ;;  %2782 = vrot.lane.b32.xlu1 %v2758_v49, %s10122_s19  ;;  %v2761_v5 = vsel %vm691_vm1, %v2759_v56, %v2760_v48  ;;  %v2762_v49 = vrot.slane %v12726_v33, 1 }
 0x339   : > { %v1985_v18 = vmax.f32 %v1911_v28, 0.0  ;;  %17886 = vst [vmem:[#allocation88_spill] sm:$0xff] %v12825_v21  ;;  %2784 = vrot.lane.b32.xlu0 %v2757_v25, %s10122_s19 }
 0x33a   : > { %v1984_v43 = vmax.f32 %v1906_v57, 0.0  ;;  %v12827_v44 = vpop.permute.xlu0 %2500 }
 0x33b   : > { %17887 = vst [vmem:[#allocation121_spill] sm:$0xff] %v12827_v44  ;;  %2002 = vst.msk [vmem:[#allocation3 + $0x30] sm:$0xff] %vm392_vm3, %v1985_v18 }
 0x33c   : > { %2001 = vst.msk [vmem:[#allocation3 + $0x28] sm:$0xff] %vm392_vm3, %v1984_v43  ;;  %v12833_v37 = vpop.permute.xlu1 %2502  ;;  %v8622_v3 = vpop.f32.mrb[2].mxu0  ;;  %2786 = vrot.lane.b32.xlu1 %v2759_v56, %s10122_s19  ;;  %v2763_v43 = vrot.slane %v12730_v41, 1 }
 0x33d   : > { %17888 = vst [vmem:[#allocation79_spill] sm:$0xff] %v12833_v37  ;;  %v1921_v28 = vadd.f32 %v8622_v3, %v12809_v60  ;;  %v1915_v57 = vpop.f32.mrb[3].mxu0  ;;  %2788 = vrot.lane.b32.xlu0 %v2761_v5, %s10122_s19  ;;  %v2765_v5 = vrot.slane %v12740_v22, 1 }
 0x33e   : > { %v12837_v34 = vpop.permute.xlu0 %2504  ;;  %v1916_v44 = vadd.f32 %v12809_v60, %v1915_v57 }
 0x33f   : > { %17889 = vst [vmem:[#allocation107_spill] sm:$0xff] %v12837_v34  ;;  %v1987_v18 = vmax.f32 %v1921_v28, 0.0  ;;  %v2766_v28 = vrot.slane %v12748_v62, 1 }
 0x340   : > { %v1986_v25 = vmax.f32 %v1916_v44, 0.0  ;;  %v12844_v37 = vpop.permute.xlu1 %2506  ;;  %2790 = vrot.lane.b32.xlu1 %v2760_v48, %s10122_s19  ;;  %v2764_v44 = vsel %vm691_vm1, %v2762_v49, %v2763_v43 }
 0x341   : > { %17890 = vst [vmem:[#allocation167_spill] sm:$0xff] %v12844_v37  ;;  %2004 = vst.msk [vmem:[#allocation3 + $0x50] sm:$0xff] %vm392_vm3, %v1987_v18  ;;  %2792 = vrot.lane.b32.xlu0 %v2762_v49, %s10122_s19  ;;  %v2767_v49 = vsel %vm691_vm1, %v2765_v5, %v2766_v28 }
 0x342   : > { %v12847_v3 = vpop.permute.xlu0 %2508  ;;  %v8625_v34 = vpop.f32.mrb[4].mxu0  ;;  %2003 = vst.msk [vmem:[#allocation3 + $0x48] sm:$0xff] %vm392_vm3, %v1986_v25 }
 0x343   : > { %17891 = vst [vmem:[#allocation89_spill] sm:$0xff] %v12847_v3  ;;  %v1931_v57 = vadd.f32 %v8625_v34, %v12809_v60  ;;  %v1925_v56 = vpop.f32.mrb[5].mxu0 }
 0x344   : > { %v1926_v21 = vadd.f32 %v12809_v60, %v1925_v56  ;;  %v12857_v3 = vpop.permute.xlu1 %2510  ;;  %2794 = vrot.lane.b32.xlu1 %v2764_v44, %s10122_s19  ;;  %v2768_v44 = vrot.slane %v12758_v1, 1 }
 0x345   : > { %v1989_v18 = vmax.f32 %v1931_v57, 0.0  ;;  %17892 = vst [vmem:[#allocation122_spill] sm:$0xff] %v12857_v3  ;;  %2796 = vrot.lane.b32.xlu0 %v2763_v43, %s10122_s19 }
 0x346   : > { %v1988_v37 = vmax.f32 %v1926_v21, 0.0  ;;  %v12859_v25 = vpop.permute.xlu0 %2512 }
 0x347   : > { %17893 = vst [vmem:[#allocation90_spill] sm:$0xff] %v12859_v25  ;;  %2006 = vst.msk [vmem:[#allocation3 + $0x70] sm:$0xff] %vm392_vm3, %v1989_v18 }
 0x348   : > { %2005 = vst.msk [vmem:[#allocation3 + $0x68] sm:$0xff] %vm392_vm3, %v1988_v37  ;;  %v12865_v34 = vpop.permute.xlu1 %2514  ;;  %v8628_v48 = vpop.f32.mrb[6].mxu0  ;;  %2798 = vrot.lane.b32.xlu1 %v2765_v5, %s10122_s19  ;;  %v2769_v37 = vrot.slane %v12762_v63, 1 }
 0x349   : > { %17894 = vst [vmem:[#allocation108_spill] sm:$0xff] %v12865_v34  ;;  %v1941_v57 = vadd.f32 %v8628_v48, %v12809_v60  ;;  %v1935_v21 = vpop.f32.mrb[7].mxu0  ;;  %2800 = vrot.lane.b32.xlu0 %v2767_v49, %s10122_s19  ;;  %v2771_v49 = vrot.slane %v12772_v10, 1 }
 0x34a   : > { %v12869_v56 = vpop.permute.xlu0 %2588  ;;  %v1936_v25 = vadd.f32 %v12809_v60, %v1935_v21 }
 0x34b   : > { %17895 = vst [vmem:[#allocation169_spill] sm:$0xff] %v12869_v56  ;;  %v1991_v18 = vmax.f32 %v1941_v57, 0.0  ;;  %v2772_v57 = vrot.slane %v12780_v54, 1 }
 0x34c   : > { %v1990_v43 = vmax.f32 %v1936_v25, 0.0  ;;  %v12876_v34 = vpop.permute.xlu1 %2590  ;;  %2802 = vrot.lane.b32.xlu1 %v2766_v28, %s10122_s19  ;;  %v2770_v25 = vsel %vm691_vm1, %v2768_v44, %v2769_v37  ;;  %v12895_v28 = vld [vmem:[#allocation3 + $0x50] sm:$0xff] }
 0x34d   : > { %17896 = vst [vmem:[#allocation109_spill] sm:$0xff] %v12876_v34  ;;  %2008 = vst.msk [vmem:[#allocation3 + $0x90] sm:$0xff] %vm392_vm3, %v1991_v18  ;;  %2804 = vrot.lane.b32.xlu0 %v2768_v44, %s10122_s19 }
 0x34e   : > { %v12879_v48 = vpop.permute.xlu0 %2592  ;;  %v8631_v3 = vpop.f32.mrb[8].mxu0  ;;  %2007 = vst.msk [vmem:[#allocation3 + $0x88] sm:$0xff] %vm392_vm3, %v1990_v43  ;;  %v12901_v44 = vld [vmem:[#allocation3 + $0x70] sm:$0xff] }
 0x34f   : > { %17897 = vst [vmem:[#allocation123_spill] sm:$0xff] %v12879_v48  ;;  %v1951_v21 = vadd.f32 %v8631_v3, %v12809_v60  ;;  %v1945_v5 = vpop.f32.mrb[9].mxu0  ;;  %v12893_v3 = vld [vmem:[#allocation3 + $0x48] sm:$0xff] }
 0x350   : > { %v1946_v56 = vadd.f32 %v12809_v60, %v1945_v5  ;;  %v12889_v48 = vpop.permute.xlu1 %2594  ;;  %2806 = vrot.lane.b32.xlu1 %v2770_v25, %s10122_s19  ;;  %v12899_v5 = vld [vmem:[#allocation3 + $0x68] sm:$0xff] }
 0x351   : > { %v1993_v18 = vmax.f32 %v1951_v21, 0.0  ;;  %17898 = vst [vmem:[#allocation80_spill] sm:$0xff] %v12889_v48  ;;  %2808 = vrot.lane.b32.xlu0 %v2769_v37, %s10122_s19  ;;  %v12909_v48 = vrot.slane %v12893_v3, 2  ;;  %v3671_v37 = vrot.slane %v12901_v44, 2 }
 0x352   : > { %v1992_v34 = vmax.f32 %v1946_v56, 0.0  ;;  %v12891_v43 = vpop.permute.xlu0 %2596 }
 0x353   : > { %17899 = vst [vmem:[#allocation124_spill] sm:$0xff] %v12891_v43  ;;  %2010 = vst.msk [vmem:[#allocation3 + $0xb0] sm:$0xff] %vm392_vm3, %v1993_v18  ;;  %v2773_v43 = vsel %vm691_vm1, %v2771_v49, %v2772_v57  ;;  %v3666_v18 = vrot.slane %v12895_v28, 2 }
 0x354   : > { %2009 = vst.msk [vmem:[#allocation3 + $0xa8] sm:$0xff] %vm392_vm3, %v1992_v34  ;;  %v12905_v56 = vpop.permute.xlu1 %2598  ;;  %17901 = vst [vmem:[#allocation91_spill] sm:$0xff] %v12909_v48  ;;  %v12916_v34 = vrot.slane %v12899_v5, 2  ;;  %2810 = vrot.lane.b32.xlu1 %v2771_v49, %s10122_s19  ;;  %v2777_v49 = vrot.slane %v12800_v4, 1 }
 0x355   : > { %17900 = vst [vmem:[#allocation170_spill] sm:$0xff] %v12905_v56  ;;  %v8634_v21 = vpop.f32.mrb[10].mxu0  ;;  %2812 = vrot.lane.b32.xlu0 %v2773_v43, %s10122_s19  ;;  %v12932_v11 = vsel %vm796_vm2, %v3666_v18, %v3668_v45  ;;  %v4471_v45 = vrot.slane %v12909_v48, 7  ;;  %v12976_v59 = vld [vmem:[#allocation3 + $0x88] sm:$0xff] }
 0x356   : > { %v1961_v25 = vadd.f32 %v8634_v21, %v12809_v60  ;;  %v12913_v6 = vpop.permute.xlu0 %2600  ;;  %v1955_v42 = vpop.f32.mrb[11].mxu0  ;;  %17903 = vst [vmem:[#allocation21_spill] sm:$0xff] %v12916_v34  ;;  %v12926_v21 = vsel %vm796_vm2, %v12909_v48, %v3666_v18  ;;  %17907 = vst [vmem:[#allocation15_spill] sm:$0xff] %v12932_v11  ;;  %v12991_v51 = vrot.slane %v12976_v59, 2 }
 0x357   : > { %17902 = vst [vmem:[#allocation92_spill] sm:$0xff] %v12913_v6  ;;  %v1956_v56 = vadd.f32 %v12809_v60, %v1955_v42  ;;  %17905 = vst [vmem:[#allocation62_spill] sm:$0xff] %v12926_v21  ;;  %v12936_v42 = vsel %vm796_vm2, %v12916_v34, %v3671_v37  ;;  %v4472_v18 = vrot.slane %v12926_v21, 7 }
 0x358   : > { %v1995_v23 = vmax.f32 %v1961_v25, 0.0  ;;  %v12922_v14 = vpop.permute.xlu1 %2602  ;;  %17908 = vst [vmem:[#allocation125_spill] sm:$0xff] %v12936_v42  ;;  %2814 = vrot.lane.b32.xlu1 %v2772_v57, %s10122_s19  ;;  %v2778_v25 = vrot.slane %v12811_v39, 1  ;;  %v4487_v57 = vrot.slane %v12936_v42, 7  ;;  %17918 = vst [vmem:[#allocation94_spill] sm:$0xff] %v12991_v51 }
 0x359   : > { %v1994_v15 = vmax.f32 %v1956_v56, 0.0  ;;  %17904 = vst [vmem:[#allocation110_spill] sm:$0xff] %v12922_v14  ;;  %2816 = vrot.lane.b32.xlu0 %v12552_v26, %s10122_s19  ;;  %v12962_v26 = vsel %vm1755_vm11, %v4471_v45, %v4472_v18  ;;  %v12978_v45 = vld [vmem:[#allocation3 + $0x90] sm:$0xff] }
 0x35a   : > { %2012 = vst.msk [vmem:[#allocation3 + $0xd0] sm:$0xff] %vm392_vm3, %v1995_v23  ;;  %v12929_v47 = vpop.permute.xlu0 %2604  ;;  %v8637_v6 = vpop.f32.mrb[12].mxu0  ;;  %v3453_v23 = vld [vmem:[#allocation3 + $0x78] sm:$0xff]  ;;  %17911 = vst [vmem:[#allocation22_spill] sm:$0xff] %v12962_v26 }
 0x35b   : > { %17906 = vst [vmem:[#allocation24_spill] sm:$0xff] %v12929_v47  ;;  %2011 = vst.msk [vmem:[#allocation3 + $0xc8] sm:$0xff] %vm392_vm3, %v1994_v15  ;;  %v1971_v43 = vadd.f32 %v8637_v6, %v12809_v60  ;;  %v1965_v56 = vpop.f32.mrb[13].mxu0  ;;  %v4478_v15 = vrot.slane %v12932_v11, 7  ;;  %v4486_v6 = vrot.slane %v12916_v34, 7 }
 0x35c   : > { %v1966_v47 = vadd.f32 %v12809_v60, %v1965_v56  ;;  %v12948_v29 = vpop.permute.xlu1 %2606  ;;  %v3673_v56 = vrot.slane %v3453_v23, 2  ;;  %2818 = vrot.lane.b32.xlu1 %v12570_v35, %s10122_s19 }
 0x35d   : > { %v1997_v14 = vmax.f32 %v1971_v43, 0.0  ;;  %17909 = vst [vmem:[#allocation81_spill] sm:$0xff] %v12948_v29  ;;  %2820 = vrot.lane.b32.xlu0 %v12555_v55, %s10122_s19  ;;  %v12968_v23 = vsel %vm1755_vm11, %v4472_v18, %v4478_v15  ;;  %v3457_v18 = vld [vmem:[#allocation3 + $0x98] sm:$0xff]  ;;  %v2860_v15 = vrot.slane %v12694_v2, 2 }
 0x35e   : > { %v1996_v58 = vmax.f32 %v1966_v47, 0.0  ;;  %v12953_v16 = vpop.permute.xlu0 %2608  ;;  %v2779_v47 = vsel %vm691_vm1, %v2777_v49, %v2778_v25  ;;  %17913 = vst [vmem:[#allocation23_spill] sm:$0xff] %v12968_v23  ;;  %v12981_v26 = vsel %vm796_vm2, %v3671_v37, %v3673_v56  ;;  %v3676_v37 = vrot.slane %v12978_v45, 2 }
 0x35f   : > { %17910 = vst [vmem:[#allocation126_spill] sm:$0xff] %v12953_v16  ;;  %2014 = vst.msk [vmem:[#allocation3 + $0xf0] sm:$0xff] %vm392_vm3, %v1997_v14  ;;  %v2087_v16 = vld [vmem:[#allocation2 + $0x158] sm:$0xff]  ;;  %v12971_v14 = vsel %vm1755_vm11, %v4486_v6, %v4487_v57  ;;  %v2861_v6 = vrot.slane %v12698_v36, 2  ;;  %v3678_v2 = vrot.slane %v3457_v18, 2  ;;  %v13002_v36 = vld [vmem:[#allocation3 + $0xb0] sm:$0xff] }
 0x360   : > { %2013 = vst.msk [vmem:[#allocation3 + $0xe8] sm:$0xff] %vm392_vm3, %v1996_v58  ;;  %v12964_v43 = vpop.permute.xlu1 %2610  ;;  %v8640_v29 = vpop.f32.mrb[14].mxu0  ;;  %17914 = vst [vmem:[#allocation82_spill] sm:$0xff] %v12971_v14  ;;  %2822 = vrot.lane.b32.xlu1 %v2777_v49, %s10122_s19  ;;  %v2863_v14 = vrot.slane %v2087_v16, 2  ;;  %v13000_v16 = vld [vmem:[#allocation3 + $0xa8] sm:$0xff]  ;;  %v2865_v56 = vrot.slane %v12708_v40, 2 }
 0x361   : > { %17912 = vst [vmem:[#allocation93_spill] sm:$0xff] %v12964_v43  ;;  %v1981_v58 = vadd.f32 %v8640_v29, %v12809_v60  ;;  %v1975_v55 = vpop.f32.mrb[15].mxu0  ;;  %17916 = vst [vmem:[#allocation63_spill] sm:$0xff] %v12981_v26  ;;  %2824 = vrot.lane.b32.xlu0 %v2779_v47, %s10122_s19  ;;  %v2091_v47 = vld [vmem:[#allocation2 + $0x178] sm:$0xff] }
 0x362   : > { %v12974_v35 = vpop.permute.xlu0 %2612  ;;  %v1976_v43 = vadd.f32 %v12809_v60, %v1975_v55  ;;  %v4493_v60 = vrot.slane %v12981_v26, 7  ;;  %v2866_v55 = vrot.slane %v12716_v53, 2  ;;  %v13011_v18 = vld [vmem:[#allocation3 + $0xc8] sm:$0xff]  ;;  %v13028_v53 = vrot.slane %v13000_v16, 2 }
 0x363   : > { %17915 = vst [vmem:[#allocation111_spill] sm:$0xff] %v12974_v35  ;;  %v1999_v29 = vmax.f32 %v1981_v58, 0.0  ;;  %v3461_v58 = vld [vmem:[#allocation3 + $0xb8] sm:$0xff] }
 0x364   : > { %v1998_v23 = vmax.f32 %v1976_v43, 0.0  ;;  %v12988_v35 = vpop.permute.xlu1 %2614  ;;  %2826 = vrot.lane.b32.xlu1 %v2778_v25, %s10122_s19  ;;  %v2862_v43 = vsel %vm796_vm2, %v2860_v15, %v2861_v6  ;;  %v13013_v25 = vld [vmem:[#allocation3 + $0xd0] sm:$0xff]  ;;  %v13020_v40 = vsel %vm1755_vm11, %v4487_v57, %v4493_v60  ;;  %17925 = vst [vmem:[#allocation128_spill] sm:$0xff] %v13028_v53  ;;  %v3683_v57 = vrot.slane %v3461_v58, 2 }
 0x365   : > { %17917 = vst [vmem:[#allocation25_spill] sm:$0xff] %v12988_v35  ;;  %2016 = vst.msk [vmem:[#allocation3 + $0x110] sm:$0xff] %vm392_vm3, %v1999_v29  ;;  %2900 = vrot.lane.b32.xlu0 %v2860_v15, %s10123_s8  ;;  %v13025_v35 = vsel %vm796_vm2, %v3676_v37, %v3678_v2  ;;  %v13038_v60 = vrot.slane %v13011_v18, 2  ;;  %v3469_v2 = vld [vmem:[#allocation3 + $0xf8] sm:$0xff] }
 0x366   : > { %v12996_v49 = vpop.permute.xlu0 %2616  ;;  %2015 = vst.msk [vmem:[#allocation3 + $0x108] sm:$0xff] %vm392_vm3, %v1998_v23  ;;  %v2864_v23 = vsel %vm796_vm2, %v2861_v6, %v2863_v14  ;;  %17922 = vst [vmem:[#allocation112_spill] sm:$0xff] %v13020_v40  ;;  %v3681_v14 = vrot.slane %v13002_v36, 2  ;;  %v3465_v6 = vld [vmem:[#allocation3 + $0xd8] sm:$0xff]  ;;  %v13034_v27 = vld [vmem:[#allocation3 + $0xf0] sm:$0xff]  ;;  %v4501_v40 = vrot.slane %v12991_v51, 7 }
 0x367   : > { %17919 = vst [vmem:[#allocation127_spill] sm:$0xff] %v12996_v49  ;;  %v13017_v49 = vsel %vm796_vm2, %v12991_v51, %v3676_v37  ;;  %17924 = vst [vmem:[#allocation95_spill] sm:$0xff] %v13025_v35  ;;  %v13032_v31 = vld [vmem:[#allocation3 + $0xe8] sm:$0xff]  ;;  %v3686_v37 = vrot.slane %v13013_v25, 2  ;;  %v4508_v61 = vrot.slane %v13025_v35, 7  ;;  %v3691_v7 = vrot.slane %v13034_v27, 2 }
 0x368   : > { %v13008_v29 = vpop.permute.xlu1 %2618  ;;  %17921 = vst [vmem:[#allocation84_spill] sm:$0xff] %v13017_v49  ;;  %2902 = vrot.lane.b32.xlu1 %v2862_v43, %s10123_s8  ;;  %17926 = vst [vmem:[#allocation96_spill] sm:$0xff] %v13038_v60  ;;  %v2867_v43 = vsel %vm796_vm2, %v2865_v56, %v2866_v55  ;;  %v13051_v30 = vsel %vm796_vm2, %v13028_v53, %v3681_v14  ;;  %v13054_v8 = vrot.slane %v13032_v31, 2 }
 0x369   : > { %17920 = vst [vmem:[#allocation83_spill] sm:$0xff] %v13008_v29  ;;  %v2868_v29 = vrot.slane %v2091_v47, 2  ;;  %2904 = vrot.lane.b32.xlu0 %v2864_v23, %s10123_s8  ;;  %v3688_v47 = vrot.slane %v3465_v6, 2  ;;  %v2095_v23 = vld [vmem:[#allocation2 + $0x198] sm:$0xff]  ;;  %17929 = vst [vmem:[#allocation113_spill] sm:$0xff] %v13051_v30  ;;  %v13060_v6 = vsel %vm796_vm2, %v3681_v14, %v3683_v57  ;;  %v13068_v13 = vsel %vm796_vm2, %v13038_v60, %v3686_v37 }
 0x36a   : > { %v13022_v15 = vpop.permute.xlu0 %2620  ;;  %17930 = vst [vmem:[#allocation131_spill] sm:$0xff] %v13054_v8  ;;  %17931 = vst [vmem:[#allocation86_spill] sm:$0xff] %v13060_v6  ;;  %v2873_v14 = vrot.slane %v2095_v23, 2  ;;  %v4517_v41 = vrot.slane %v13051_v30, 7  ;;  %v2872_v23 = vsel %vm796_vm2, %v2870_v46, %v2871_v9 }
 0x36b   : > { %17923 = vst [vmem:[#allocation27_spill] sm:$0xff] %v13022_v15  ;;  %v4502_v15 = vrot.slane %v13017_v49, 7  ;;  %v2869_v19 = vsel %vm796_vm2, %v2866_v55, %v2868_v29  ;;  %17932 = vst [vmem:[#allocation132_spill] sm:$0xff] %v13068_v13  ;;  %v13076_v57 = vsel %vm796_vm2, %v3686_v37, %v3688_v47  ;;  %v2875_v55 = vrot.slane %v12740_v22, 2 }
 0x36c   : > { %v13043_v12 = vpop.permute.xlu1 %2622  ;;  %2906 = vrot.lane.b32.xlu1 %v2865_v56, %s10123_s8  ;;  %17935 = vst [vmem:[#allocation114_spill] sm:$0xff] %v13076_v57  ;;  %v4532_v22 = vrot.slane %v13068_v13, 7  ;;  %v2876_v47 = vrot.slane %v12748_v62, 2 }
 0x36d   : > { %17927 = vst [vmem:[#allocation16_spill] sm:$0xff] %v13043_v12  ;;  %v3693_v12 = vrot.slane %v3469_v2, 2  ;;  %2908 = vrot.lane.b32.xlu0 %v2867_v43, %s10123_s8  ;;  %v13071_v33 = vsel %vm1755_vm11, %v4501_v40, %v4502_v15  ;;  %v13079_v2 = vsel %vm1755_vm11, %v4502_v15, %v4508_v61  ;;  %v13087_v43 = vsel %vm796_vm2, %v13054_v8, %v3691_v7 }
 0x36e   : > { %v13047_v58 = vpop.permute.xlu0 %2624  ;;  %17933 = vst [vmem:[#allocation97_spill] sm:$0xff] %v13071_v33  ;;  %17936 = vst [vmem:[#allocation64_spill] sm:$0xff] %v13079_v2  ;;  %v4523_v40 = vrot.slane %v13060_v6, 7  ;;  %v4531_v15 = vrot.slane %v13038_v60, 7  ;;  %v13102_v2 = vld [vmem:[#allocation3 + $0x108] sm:$0xff]  ;;  %v13104_v33 = vld [vmem:[#allocation3 + $0x110] sm:$0xff] }
 0x36f   : > { %17928 = vst [vmem:[#allocation85_spill] sm:$0xff] %v13047_v58  ;;  %v4516_v58 = vrot.slane %v13028_v53, 7  ;;  %17938 = vst [vmem:[#allocation17_spill] sm:$0xff] %v13087_v43  ;;  %v13092_v37 = vsel %vm796_vm2, %v3691_v7, %v3693_v12  ;;  %v4538_v7 = vrot.slane %v13076_v57, 7 }
 0x370   : > { %v13073_v56 = vpop.permute.xlu1 %2626  ;;  %2910 = vrot.lane.b32.xlu1 %v2869_v19, %s10123_s8  ;;  %17939 = vst [vmem:[#allocation134_spill] sm:$0xff] %v13092_v37  ;;  %v13107_v19 = vsel %vm1755_vm11, %v4517_v41, %v4523_v40  ;;  %v13114_v62 = vsel %vm1755_vm11, %v4531_v15, %v4532_v22  ;;  %v13126_v40 = vrot.slane %v13104_v33, 1 }
 0x371   : > { %17934 = vst [vmem:[#allocation98_spill] sm:$0xff] %v13073_v56  ;;  %v13095_v61 = vsel %vm1755_vm11, %v4516_v58, %v4517_v41  ;;  %2912 = vrot.lane.b32.xlu0 %v2870_v46, %s10123_s8  ;;  %17941 = vst [vmem:[#allocation137_spill] sm:$0xff] %v13107_v19  ;;  %v2874_v58 = vsel %vm796_vm2, %v2871_v9, %v2873_v14  ;;  %v4547_v46 = vrot.slane %v13087_v43, 7  ;;  %v4553_v41 = vrot.slane %v13092_v37, 7 }
 0x372   : > { %v13083_v29 = vpop.permute.xlu0 %2628  ;;  %17940 = vst [vmem:[#allocation87_spill] sm:$0xff] %v13095_v61  ;;  %v2099_v61 = vld [vmem:[#allocation2 + $0x1b8] sm:$0xff]  ;;  %17943 = vst [vmem:[#allocation115_spill] sm:$0xff] %v13114_v62  ;;  %v13121_v13 = vsel %vm1755_vm11, %v4532_v22, %v4538_v7  ;;  %v13129_v9 = vrot.slane %v13102_v2, 1  ;;  %v2877_v7 = vsel %vm796_vm2, %v2875_v55, %v2876_v47 }
 0x373   : > { %17937 = vst [vmem:[#allocation26_spill] sm:$0xff] %v13083_v29  ;;  %v4546_v29 = vrot.slane %v13054_v8, 7  ;;  %17945 = vst [vmem:[#allocation129_spill] sm:$0xff] %v13121_v13  ;;  %v2878_v15 = vrot.slane %v2099_v61, 2  ;;  %v13136_v62 = vsel %vm1755_vm11, %v4547_v46, %v4553_v41  ;;  %v2103_v13 = vld [vmem:[#allocation2 + $0x1d8] sm:$0xff]  ;;  %v2881_v61 = vrot.slane %v12762_v63, 2 }
 0x374   : > { %v13110_v12 = vpop.permute.xlu1 %2630  ;;  %2914 = vrot.lane.b32.xlu1 %v2872_v23, %s10123_s8  ;;  %17946 = vst [vmem:[#allocation133_spill] sm:$0xff] %v13126_v40  ;;  %17947 = vst [vmem:[#allocation130_spill] sm:$0xff] %v13129_v9  ;;  %v2885_v63 = vrot.slane %v12772_v10, 2 }
 0x375   : > { %17942 = vst [vmem:[#allocation99_spill] sm:$0xff] %v13110_v12  ;;  %v13132_v14 = vsel %vm1755_vm11, %v4546_v29, %v4547_v46  ;;  %2916 = vrot.lane.b32.xlu0 %v2874_v58, %s10123_s8  ;;  %17949 = vst [vmem:[#allocation139_spill] sm:$0xff] %v13136_v62  ;;  %v13147_v29 = vsel %vm691_vm1, %v13129_v9, %v13126_v40  ;;  %v2880_v58 = vrot.slane %v12758_v1, 2  ;;  %v2883_v62 = vrot.slane %v2103_v13, 2  ;;  %v2107_v13 = vld [vmem:[#allocation2 + $0x1f8] sm:$0xff] }
 0x376   : > { %v13118_v56 = vpop.permute.xlu0 %2632  ;;  %17948 = vst [vmem:[#allocation135_spill] sm:$0xff] %v13132_v14  ;;  %17951 = vst [vmem:[#allocation140_spill] sm:$0xff] %v13147_v29  ;;  %v2879_v46 = vsel %vm796_vm2, %v2876_v47, %v2878_v15  ;;  %v2115_v29 = vld [vmem:[#allocation2 + $0x238] sm:$0xff] }
 0x377   : > { %17944 = vst [vmem:[#allocation138_spill] sm:$0xff] %v13118_v56  ;;  %v2882_v1 = vsel %vm796_vm2, %v2880_v58, %v2881_v61  ;;  %v2884_v47 = vsel %vm796_vm2, %v2881_v61, %v2883_v62  ;;  %v13183_v61 = vld [vmem:[#allocation3 + $0x8] sm:$0xff] }
 0x378   : > { %v13138_v22 = vpop.permute.xlu1 %2634  ;;  %2918 = vrot.lane.b32.xlu1 %v2875_v55, %s10123_s8  ;;  %v3551_v19 = vrot.slane %v13183_v61, 1 }
 0x379   : > { %17950 = vst [vmem:[#allocation136_spill] sm:$0xff] %v13138_v22  ;;  %2920 = vrot.lane.b32.xlu0 %v2877_v7, %s10123_s8  ;;  %v2886_v7 = vrot.slane %v12780_v54, 2 }
 0x37a   : > { %v13141_v23 = vpop.permute.xlu0 %2684 }
 0x37c   : > { %v13153_v41 = vpop.permute.xlu1 %2686  ;;  %2922 = vrot.lane.b32.xlu1 %v2879_v46, %s10123_s8  ;;  %v2888_v46 = vrot.slane %v2107_v13, 2  ;;  %v13188_v13 = vld [vmem:[#allocation3 + $0x10] sm:$0xff] }
 0x37d   : > { %2924 = vrot.lane.b32.xlu0 %v2880_v58, %s10123_s8  ;;  %v2887_v58 = vsel %vm796_vm2, %v2885_v63, %v2886_v7 }
 0x37e   : > { %v13155_v14 = vpop.permute.xlu0 %2688  ;;  %v2889_v10 = vsel %vm796_vm2, %v2886_v7, %v2888_v46  ;;  %v2896_v7 = vrot.slane %v12811_v39, 2  ;;  %v13207_v39 = vld [vmem:[#allocation3 + $0x30] sm:$0xff] }
 0x380   : > { %v13164_v40 = vpop.permute.xlu1 %2690  ;;  %2926 = vrot.lane.b32.xlu1 %v2882_v1, %s10123_s8  ;;  %v567_v1 = vld [vmem:[#allocation6 + $0x100] sm:$0xff] }
 0x381   : > { %2928 = vrot.lane.b32.xlu0 %v2884_v47, %s10123_s8  ;;  %v568_v47 = vld [vmem:[#allocation6 + $0x108] sm:$0xff] }
 0x382   : > { %v13167_v15 = vpop.permute.xlu0 %2692 }
 0x383   : > { %17952 = vst [vmem:[#allocation146_spill] sm:$0xff] %v13167_v15  ;;  %v9927_v15 = vld [vmem:[#allocation2 + $0x1f0] sm:$0xff] }
 0x384   : > { %v13171_v55 = vpop.permute.xlu1 %2694  ;;  %2930 = vrot.lane.b32.xlu1 %v2885_v63, %s10123_s8  ;;  %v13190_v63 = vpack.c.bf16 %v568_v47, %v567_v1 }
 0x385   : > { %17953 = vst [vmem:[#allocation141_spill] sm:$0xff] %v13171_v55  ;;  %2932 = vrot.lane.b32.xlu0 %v2887_v58, %s10123_s8  ;;  %v2895_v58 = vrot.slane %v12800_v4, 2  ;;  %v2898_v4 = vrot.slane %v2115_v29, 2  ;;  %v9921_v55 = vld [vmem:[#allocation2 + $0x1b0] sm:$0xff] }
 0x386   : > { %v13174_v9 = vpop.permute.xlu0 %2696  ;;  %17957 = vst [vmem:[#allocation156_spill] sm:$0xff] %v13190_v63  ;;  %8852 = vmatprep.subr.bf16.mxu1 %v13190_v63 }
 0x387   : > { %17954 = vst [vmem:[#allocation148_spill] sm:$0xff] %v13174_v9  ;;  %v2897_v47 = vsel %vm796_vm2, %v2895_v58, %v2896_v7  ;;  %v2899_v29 = vsel %vm796_vm2, %v2896_v7, %v2898_v4  ;;  %v18010_v9 = vld [vmem:[#allocation31_spill] sm:$0xff] }
 0x388   : > { %v13179_v54 = vpop.permute.xlu1 %2698  ;;  %2934 = vrot.lane.b32.xlu1 %v2889_v10, %s10123_s8  ;;  %v13205_v10 = vld [vmem:[#allocation3 + $0x28] sm:$0xff] }
 0x389   : > { %17955 = vst [vmem:[#allocation152_spill] sm:$0xff] %v13179_v54  ;;  %2936 = vrot.lane.b32.xlu0 %v12660_v20, %s10123_s8  ;;  %v3552_v20 = vrot.slane %v13188_v13, 1 }
 0x38a   : > { %v13181_v62 = vpop.permute.xlu0 %2700 }
 0x38b   : > { %17956 = vst [vmem:[#allocation149_spill] sm:$0xff] %v13181_v62  ;;  %v3553_v56 = vsel %vm691_vm1, %v3551_v19, %v3552_v20  ;;  %v13229_v62 = vrot.slane %v12893_v3, 1 }
 0x38c   : > { %v13194_v46 = vpop.permute.xlu1 %2702  ;;  %2938 = vrot.lane.b32.xlu1 %v12675_v0, %s10123_s8  ;;  %v13217_v0 = vrot.slane %v13205_v10, 1 }
 0x38d   : > { %17958 = vst [vmem:[#allocation162_spill] sm:$0xff] %v13194_v46  ;;  %2940 = vrot.lane.b32.xlu0 %v12684_v17, %s10123_s8  ;;  %v13220_v17 = vrot.slane %v13207_v39, 1  ;;  %17966 = vst [vmem:[#allocation173_spill] sm:$0xff] %v13229_v62 }
 0x38e   : > { %v13197_v22 = vpop.permute.xlu0 %2704  ;;  %17962 = vst [vmem:[#allocation165_spill] sm:$0xff] %v13217_v0 }
 0x38f   : > { %17959 = vst [vmem:[#allocation157_spill] sm:$0xff] %v13197_v22  ;;  %17963 = vst [vmem:[#allocation28_spill] sm:$0xff] %v13220_v17  ;;  %v8970_v22 = vpack.i.bf16 %v3553_v56, %v3551_v19  ;;  %v8975_v19 = vpack.i.bf16 %v13217_v0, %v3552_v20  ;;  %v13264_v20 = vrot.slane %v12978_v45, 1 }
 0x390   : > { %v13209_v1 = vpop.permute.xlu1 %2706  ;;  %2942 = vrot.lane.b32.xlu1 %v2895_v58, %s10123_s8  ;;  %v13232_v58 = vrot.slane %v12895_v28, 1 }
 0x391   : > { %17960 = vst [vmem:[#allocation164_spill] sm:$0xff] %v13209_v1  ;;  %2944 = vrot.lane.b32.xlu0 %v2897_v47, %s10123_s8  ;;  %17975 = vst [vmem:[#allocation182_spill] sm:$0xff] %v13264_v20 }
 0x392   : > { %v13213_v12 = vpop.permute.xlu0 %2708  ;;  %17967 = vst [vmem:[#allocation174_spill] sm:$0xff] %v13232_v58  ;;  %v13251_v47 = vsel %vm691_vm1, %v13229_v62, %v13232_v58 }
 0x393   : > { %17961 = vst [vmem:[#allocation168_spill] sm:$0xff] %v13213_v12  ;;  %v13238_v12 = vsel %vm691_vm1, %v13217_v0, %v13220_v17  ;;  %17971 = vst [vmem:[#allocation178_spill] sm:$0xff] %v13251_v47  ;;  %v13271_v0 = vpack.i.bf16 %v13251_v47, %v13229_v62  ;;  %v13292_v47 = vrot.slane %v13000_v16, 1  ;;  %v13295_v62 = vrot.slane %v13002_v36, 1 }
 0x394   : > { %v13224_v1 = vpop.permute.xlu1 %2710  ;;  %2946 = vrot.lane.b32.xlu1 %v2899_v29, %s10123_s8  ;;  %17968 = vst [vmem:[#allocation175_spill] sm:$0xff] %v13238_v12  ;;  %v8980_v4 = vpack.i.bf16 %v13220_v17, %v13238_v12  ;;  %v13254_v29 = vrot.slane %v12899_v5, 1 }
 0x395   : > { %17964 = vst [vmem:[#allocation171_spill] sm:$0xff] %v13224_v1  ;;  %8971 = vrot.lane.b32.xlu0 %v8970_v22, %s10123_s8  ;;  %v13261_v22 = vrot.slane %v12976_v59, 1  ;;  %17977 = vst [vmem:[#allocation184_spill] sm:$0xff] %v13271_v0 }
 0x396   : > { %v13226_v46 = vpop.permute.xlu0 %2712  ;;  %17972 = vst [vmem:[#allocation179_spill] sm:$0xff] %v13254_v29  ;;  %17982 = vst [vmem:[#allocation189_spill] sm:$0xff] %v13292_v47 }
 0x397   : > { %17965 = vst [vmem:[#allocation172_spill] sm:$0xff] %v13226_v46  ;;  %v13257_v46 = vrot.slane %v12901_v44, 1  ;;  %17974 = vst [vmem:[#allocation181_spill] sm:$0xff] %v13261_v22 }
 0x398   : > { %v13241_v56 = vpop.permute.xlu1 %2714  ;;  %8976 = vrot.lane.b32.xlu1 %v8975_v19, %s10123_s8  ;;  %17983 = vst [vmem:[#allocation190_spill] sm:$0xff] %v13295_v62 }
 0x399   : > { %17969 = vst [vmem:[#allocation176_spill] sm:$0xff] %v13241_v56  ;;  %17973 = vst [vmem:[#allocation180_spill] sm:$0xff] %v13257_v46  ;;  %8981 = vrot.lane.b32.xlu0 %v8980_v4, %s10123_s8  ;;  %v13282_v19 = vsel %vm691_vm1, %v13254_v29, %v13257_v46  ;;  %v13289_v4 = vsel %vm691_vm1, %v13261_v22, %v13264_v20  ;;  %v13311_v56 = vrot.slane %v13013_v25, 1 }
 0x39a   : > { %v13244_v7 = vpop.permute.xlu0 %2716  ;;  %17980 = vst [vmem:[#allocation187_spill] sm:$0xff] %v13282_v19  ;;  %17981 = vst [vmem:[#allocation188_spill] sm:$0xff] %v13289_v4 }
 0x39b   : > { %17970 = vst [vmem:[#allocation177_spill] sm:$0xff] %v13244_v7  ;;  %v13277_v7 = vpack.i.bf16 %v13254_v29, %v13232_v58  ;;  %v8995_v29 = vpack.i.bf16 %v13257_v46, %v13282_v19  ;;  %17987 = vst [vmem:[#allocation194_spill] sm:$0xff] %v13311_v56 }
 0x39c   : > { %v13267_v17 = vpop.permute.xlu1 %2718  ;;  %8986 = vrot.lane.b32.xlu1 %v13271_v0, %s10123_s8 }
 0x39d   : > { %17976 = vst [vmem:[#allocation183_spill] sm:$0xff] %v13267_v17  ;;  %17979 = vst [vmem:[#allocation186_spill] sm:$0xff] %v13277_v7  ;;  %8991 = vrot.lane.b32.xlu0 %v13277_v7, %s10123_s8  ;;  %v13308_v17 = vrot.slane %v13011_v18, 1  ;;  %v13317_v7 = vsel %vm691_vm1, %v13292_v47, %v13295_v62 }
 0x39e   : > { %v13273_v12 = vpop.permute.xlu0 %2720  ;;  %17988 = vst [vmem:[#allocation195_spill] sm:$0xff] %v13317_v7 }
 0x39f   : > { %17978 = vst [vmem:[#allocation185_spill] sm:$0xff] %v13273_v12  ;;  %v9000_v12 = vpack.i.bf16 %v13289_v4, %v13261_v22  ;;  %17986 = vst [vmem:[#allocation193_spill] sm:$0xff] %v13308_v17  ;;  %v9005_v4 = vpack.i.bf16 %v13292_v47, %v13264_v20  ;;  %v3655_v22 = vrot.slane %v13183_v61, 2  ;;  %v3656_v61 = vrot.slane %v13188_v13, 2  ;;  %v3441_v47 = vld [vmem:[#allocation3 + $0x18] sm:$0xff] }
 0x3a0   : > { %v13299_v58 = vpop.permute.xlu1 %2722  ;;  %8996 = vrot.lane.b32.xlu1 %v8995_v29, %s10123_s8  ;;  %v13332_v29 = vsel %vm691_vm1, %v13308_v17, %v13311_v56  ;;  %v3445_v20 = vld [vmem:[#allocation3 + $0x38] sm:$0xff] }
 0x3a1   : > { %17984 = vst [vmem:[#allocation191_spill] sm:$0xff] %v13299_v58  ;;  %9001 = vrot.lane.b32.xlu0 %v9000_v12, %s10123_s8  ;;  %17991 = vst [vmem:[#allocation198_spill] sm:$0xff] %v13332_v29  ;;  %v13335_v58 = vrot.slane %v13032_v31, 1  ;;  %v13338_v12 = vrot.slane %v13034_v27, 1 }
 0x3a2   : > { %v13303_v0 = vpop.permute.xlu0 %2724 }
 0x3a3   : > { %17985 = vst [vmem:[#allocation192_spill] sm:$0xff] %v13303_v0  ;;  %v9010_v0 = vpack.i.bf16 %v13295_v62, %v13317_v7  ;;  %17992 = vst [vmem:[#allocation199_spill] sm:$0xff] %v13335_v58  ;;  %v9015_v7 = vpack.i.bf16 %v13332_v29, %v13308_v17  ;;  %v13352_v1 = vpack.i.bf16 %v13335_v58, %v13311_v56  ;;  %v3661_v29 = vrot.slane %v13207_v39, 2 }
 0x3a4   : > { %v13320_v46 = vpop.permute.xlu1 %2726  ;;  %17993 = vst [vmem:[#allocation200_spill] sm:$0xff] %v13338_v12  ;;  %9006 = vrot.lane.b32.xlu1 %v9005_v4, %s10123_s8  ;;  %v13357_v13 = vsel %vm691_vm1, %v13335_v58, %v13338_v12  ;;  %v13361_v4 = vrot.slane %v13205_v10, 2  ;;  %v3663_v17 = vrot.slane %v3445_v20, 2 }
 0x3a5   : > { %17989 = vst [vmem:[#allocation196_spill] sm:$0xff] %v13320_v46  ;;  %9011 = vrot.lane.b32.xlu0 %v9010_v0, %s10123_s8  ;;  %17995 = vst [vmem:[#allocation202_spill] sm:$0xff] %v13352_v1  ;;  %v3658_v0 = vrot.slane %v3441_v47, 2  ;;  %v9025_v54 = vpack.i.bf16 %v13338_v12, %v13357_v13 }
 0x3a6   : > { %v13325_v19 = vpop.permute.xlu0 %2728  ;;  %17996 = vst [vmem:[#allocation203_spill] sm:$0xff] %v13357_v13  ;;  %v13379_v20 = vsel %vm796_vm2, %v3661_v29, %v3663_v17  ;;  %v9045_v17 = vpack.i.bf16 %v12926_v21, %v12909_v48  ;;  %v2018_v13 = vld [vmem:[#allocation2 + $0x100] sm:$0xff]  ;;  %v18030_v48 = vld [vmem:[#allocation49_spill] sm:$0xff] }
 0x3a7   : > { %17990 = vst [vmem:[#allocation197_spill] sm:$0xff] %v13325_v19  ;;  %v3657_v19 = vsel %vm796_vm2, %v3655_v22, %v3656_v61  ;;  %v3659_v47 = vsel %vm796_vm2, %v3656_v61, %v3658_v0  ;;  %17997 = vst [vmem:[#allocation204_spill] sm:$0xff] %v13379_v20 }
 0x3a8   : > { %v13343_v62 = vpop.permute.xlu1 %2730  ;;  %9016 = vrot.lane.b32.xlu1 %v9015_v7, %s10123_s8  ;;  %v13376_v7 = vsel %vm796_vm2, %v13361_v4, %v3661_v29 }
 0x3a9   : > { %17994 = vst [vmem:[#allocation201_spill] sm:$0xff] %v13343_v62  ;;  %9021 = vrot.lane.b32.xlu0 %v13352_v1, %s10123_s8  ;;  %v9030_v62 = vpack.i.bf16 %v3657_v19, %v3655_v22  ;;  %v9035_v19 = vpack.i.bf16 %v13361_v4, %v3659_v47  ;;  %v9040_v61 = vpack.i.bf16 %v13379_v20, %v13376_v7  ;;  %v18034_v20 = vld [vmem:[#allocation53_spill] sm:$0xff] }
 0x3aa   : > { %v13348_v46 = vpop.permute.xlu0 %2780  ;;  %v9055_v47 = vpack.i.bf16 %v12981_v26, %v12936_v42  ;;  %v18014_v26 = vld [vmem:[#allocation35_spill] sm:$0xff]  ;;  %v18015_v42 = vld [vmem:[#allocation36_spill] sm:$0xff] }
 0x3ac   : > { %v13366_v56 = vpop.permute.xlu1 %2782  ;;  %9026 = vrot.lane.b32.xlu1 %v9025_v54, %s10123_s8 }
 0x3ad   : > { %9031 = vrot.lane.b32.xlu0 %v9030_v62, %s10124_s10  ;;  %v9050_v62 = vpack.i.bf16 %v12916_v34, %v12932_v11  ;;  %v9922_v11 = vld [vmem:[#allocation2 + $0x1c0] sm:$0xff] }
 0x3ae   : > { %v13370_v58 = vpop.permute.xlu0 %2784 }
 0x3b0   : > { %v13382_v22 = vpop.permute.xlu1 %2786  ;;  %9036 = vrot.lane.b32.xlu1 %v9035_v19, %s10124_s10 }
 0x3b1   : > { %17998 = vst [vmem:[#allocation205_spill] sm:$0xff] %v13382_v22  ;;  %9041 = vrot.lane.b32.xlu0 %v9040_v61, %s10124_s10  ;;  %v9060_v61 = vpack.i.bf16 %v13017_v49, %v12991_v51  ;;  %v9905_v49 = vld [vmem:[#allocation2 + $0x108] sm:$0xff]  ;;  %v18013_v51 = vld [vmem:[#allocation34_spill] sm:$0xff] }
 0x3b2   : > { %v13385_v12 = vpop.permute.xlu0 %2788  ;;  %v18026_v22 = vld [vmem:[#allocation46_spill] sm:$0xff] }
 0x3b3   : > { %17999 = vst [vmem:[#allocation206_spill] sm:$0xff] %v13385_v12  ;;  %v18025_v12 = vld [vmem:[#allocation45_spill] sm:$0xff] }
 0x3b4   : > { %v13391_v54 = vpop.permute.xlu1 %2790  ;;  %9046 = vrot.lane.b32.xlu1 %v9045_v17, %s10124_s10  ;;  %v9065_v17 = vpack.i.bf16 %v13028_v53, %v13025_v35  ;;  %v9907_v53 = vld [vmem:[#allocation2 + $0x120] sm:$0xff] }
 0x3b5   : > { %18000 = vst [vmem:[#allocation207_spill] sm:$0xff] %v13391_v54  ;;  %9051 = vrot.lane.b32.xlu0 %v9050_v62, %s10124_s10  ;;  %v9910_v35 = vld [vmem:[#allocation2 + $0x140] sm:$0xff] }
 0x3b6   : > { %v13395_v29 = vpop.permute.xlu0 %2792 }
 0x3b7   : > { %18001 = vst [vmem:[#allocation208_spill] sm:$0xff] %v13395_v29  ;;  %v18009_v29 = vld [vmem:[#allocation30_spill] sm:$0xff] }
 0x3b8   : > { %v13401_v0 = vpop.permute.xlu1 %2794  ;;  %9056 = vrot.lane.b32.xlu1 %v9055_v47, %s10124_s10  ;;  %v2973_v47 = vsel %vm319_vm0, %v9905_v49, %v12409_v32  ;;  %v9909_v32 = vld [vmem:[#allocation2 + $0x130] sm:$0xff] }
 0x3b9   : > { %18002 = vst [vmem:[#allocation209_spill] sm:$0xff] %v13401_v0  ;;  %9061 = vrot.lane.b32.xlu0 %v9060_v61, %s10124_s10  ;;  %v9070_v0 = vpack.i.bf16 %v13060_v6, %v13051_v30  ;;  %v9906_v61 = vld [vmem:[#allocation2 + $0x110] sm:$0xff]  ;;  %v9908_v6 = vld [vmem:[#allocation2 + $0x128] sm:$0xff] }
 0x3ba   : > { %v13405_v19 = vpop.permute.xlu0 %2796  ;;  %v18008_v49 = vld [vmem:[#allocation29_spill] sm:$0xff] }
 0x3bb   : > { %18003 = vst [vmem:[#allocation210_spill] sm:$0xff] %v13405_v19  ;;  %v2972_v19 = vsel %vm319_vm0, %v2018_v13, %v12401_v50  ;;  %v18007_v50 = vld [vmem:[#allocation132_spill] sm:$0xff] }
 0x3bc   : > { %v13411_v1 = vpop.permute.xlu1 %2798  ;;  %9066 = vrot.lane.b32.xlu1 %v9065_v17, %s10124_s10  ;;  %v2976_v17 = vsel %vm319_vm0, %v9908_v6, %v12423_v38  ;;  %v9075_v13 = vpack.i.bf16 %v18007_v50, %v13038_v60  ;;  %v9080_v38 = vpack.i.bf16 %v13054_v8, %v13076_v57  ;;  %v9912_v6 = vld [vmem:[#allocation2 + $0x150] sm:$0xff]  ;;  %v9913_v60 = vld [vmem:[#allocation2 + $0x160] sm:$0xff] }
 0x3bd   : > { %18004 = vst [vmem:[#allocation211_spill] sm:$0xff] %v13411_v1  ;;  %9071 = vrot.lane.b32.xlu0 %v9070_v0, %s10124_s10  ;;  %v2974_v1 = vsel %vm319_vm0, %v9906_v61, %v12414_v52  ;;  %v2977_v0 = vsel %vm319_vm0, %v9909_v32, %v18008_v49  ;;  %v2978_v52 = vsel %vm319_vm0, %v9910_v35, %v18009_v29  ;;  %v9911_v61 = vld [vmem:[#allocation2 + $0x148] sm:$0xff]  ;;  %v9915_v29 = vld [vmem:[#allocation2 + $0x170] sm:$0xff] }
 0x3be   : > { %v13415_v62 = vpop.permute.xlu0 %2800  ;;  %v2981_v32 = vsel %vm319_vm0, %v9913_v60, %v18013_v51  ;;  %v9914_v49 = vld [vmem:[#allocation2 + $0x168] sm:$0xff]  ;;  %v18016_v8 = vld [vmem:[#allocation37_spill] sm:$0xff] }
 0x3bf   : > { %18005 = vst [vmem:[#allocation212_spill] sm:$0xff] %v13415_v62  ;;  %v2975_v62 = vsel %vm319_vm0, %v9907_v53, %v12421_v24  ;;  %v2979_v24 = vsel %vm319_vm0, %v9911_v61, %v18010_v9  ;;  %v2982_v35 = vsel %vm319_vm0, %v9914_v49, %v18014_v26  ;;  %v2983_v9 = vsel %vm319_vm0, %v9915_v29, %v18015_v42  ;;  %v3470_v61 = vld [vmem:[#allocation3 + $0x20] sm:$0xff]  ;;  %v9918_v51 = vld [vmem:[#allocation2 + $0x190] sm:$0xff]  ;;  %v9920_v42 = vld [vmem:[#allocation2 + $0x1a8] sm:$0xff] }
 0x3c0   : > { %v13431_v30 = vpop.permute.xlu1 %2802  ;;  %9076 = vrot.lane.b32.xlu1 %v9075_v13, %s10124_s10  ;;  %v18018_v60 = vld [vmem:[#allocation39_spill] sm:$0xff]  ;;  %v18019_v49 = vld [vmem:[#allocation40_spill] sm:$0xff]  ;;  %v18020_v13 = vld [vmem:[#allocation41_spill] sm:$0xff] }
 0x3c1   : > { %18006 = vst [vmem:[#allocation213_spill] sm:$0xff] %v13431_v30  ;;  %v18012_v30 = vld [vmem:[#allocation33_spill] sm:$0xff]  ;;  %v2986_v54 = vsel %vm319_vm0, %v9918_v51, %v18018_v60  ;;  %v9919_v26 = vld [vmem:[#allocation2 + $0x1a0] sm:$0xff]  ;;  %9081 = vrot.lane.b32.xlu0 %v9080_v38, %s10124_s10  ;;  %v2988_v29 = vsel %vm319_vm0, %v9920_v42, %v18020_v13  ;;  %v9085_v51 = vpack.i.bf16 %v13092_v37, %v13087_v43  ;;  %v9923_v60 = vld [vmem:[#allocation2 + $0x1c8] sm:$0xff] }
 0x3c2   : > { %v13441_v53 = vpop.permute.xlu0 %2804  ;;  %v2980_v50 = vsel %vm319_vm0, %v9912_v6, %v18012_v30  ;;  %v9917_v30 = vld [vmem:[#allocation2 + $0x188] sm:$0xff]  ;;  %v18017_v6 = vld [vmem:[#allocation38_spill] sm:$0xff]  ;;  %v2987_v63 = vsel %vm319_vm0, %v9919_v26, %v18019_v49  ;;  %v9924_v49 = vld [vmem:[#allocation2 + $0x1d0] sm:$0xff] }
 0x3c3   : > { %18011 = vst [vmem:[#allocation29_spill] sm:$0xff] %v13441_v53  ;;  %v9916_v53 = vld [vmem:[#allocation2 + $0x180] sm:$0xff]  ;;  %v2985_v34 = vsel %vm319_vm0, %v9917_v30, %v18017_v6  ;;  %v18024_v26 = vld [vmem:[#allocation44_spill] sm:$0xff]  ;;  %v2992_v42 = vsel %vm319_vm0, %v9924_v49, %v18025_v12  ;;  %v2996_v12 = vsel %vm1557_vm5, %v2972_v19, %v18030_v48 }
 0x3c4   : > { %v2984_v57 = vsel %vm319_vm0, %v9916_v53, %v18016_v8  ;;  %v18021_v8 = vld [vmem:[#allocation42_spill] sm:$0xff]  ;;  %v18022_v30 = vld [vmem:[#allocation43_spill] sm:$0xff]  ;;  %v13469_v21 = vpop.permute.xlu1 %2806  ;;  %v2991_v38 = vsel %vm319_vm0, %v9923_v60, %v18024_v26  ;;  %v18029_v60 = vld [vmem:[#allocation48_spill] sm:$0xff]  ;;  %9086 = vrot.lane.b32.xlu1 %v9085_v51, %s10124_s10 }
 0x3c5   : > { %v2989_v53 = vsel %vm319_vm0, %v9921_v55, %v18021_v8  ;;  %v2990_v6 = vsel %vm319_vm0, %v9922_v11, %v18022_v30  ;;  %18023 = vst [vmem:[#allocation30_spill] sm:$0xff] %v13469_v21  ;;  %v9925_v13 = vld [vmem:[#allocation2 + $0x1e0] sm:$0xff]  ;;  %v9090_v11 = vpack.i.bf16 %v13205_v10, %v3470_v61  ;;  %v9926_v21 = vld [vmem:[#allocation2 + $0x1e8] sm:$0xff]  ;;  %v2995_v26 = vsel %vm319_vm0, %v9927_v15, %v18029_v60  ;;  %v18038_v60 = vld [vmem:[#allocation57_spill] sm:$0xff] }
 0x3c6   : > { %v2993_v55 = vsel %vm319_vm0, %v9925_v13, %v18026_v22  ;;  %v13479_v8 = vpop.permute.xlu0 %2808  ;;  %v13482_v30 = vld [vmem:[#allocation3 + $0x40] sm:$0xff]  ;;  %v18033_v61 = vld [vmem:[#allocation52_spill] sm:$0xff] }
 0x3c7   : > { %18027 = vst [vmem:[#allocation31_spill] sm:$0xff] %v13479_v8  ;;  %v18028_v37 = vld [vmem:[#allocation47_spill] sm:$0xff]  ;;  %v18031_v49 = vld [vmem:[#allocation50_spill] sm:$0xff]  ;;  %v2999_v8 = vsel %vm1557_vm5, %v2975_v62, %v18033_v61  ;;  %9091 = vrot.lane.b32.xlu0 %v9090_v11, %s10125_s16 }
 0x3c8   : > { %v2994_v43 = vsel %vm319_vm0, %v9926_v21, %v18028_v37  ;;  %v2997_v22 = vsel %vm1557_vm5, %v2973_v47, %v18031_v49  ;;  %v18032_v13 = vld [vmem:[#allocation51_spill] sm:$0xff]  ;;  %v3000_v21 = vsel %vm1557_vm5, %v2976_v17, %v18034_v20  ;;  %v18035_v37 = vld [vmem:[#allocation54_spill] sm:$0xff]  ;;  %v18037_v47 = vld [vmem:[#allocation56_spill] sm:$0xff]  ;;  %v13508_v49 = vpop.permute.xlu1 %2810  ;;  %v9095_v20 = vpack.i.bf16 %v13482_v30, %v13207_v39 }
 0x3c9   : > { %v2998_v10 = vsel %vm1557_vm5, %v2974_v1, %v18032_v13  ;;  %v3001_v15 = vsel %vm1557_vm5, %v2977_v0, %v18035_v37  ;;  %v18036_v48 = vld [vmem:[#allocation55_spill] sm:$0xff]  ;;  %v3003_v51 = vsel %vm1557_vm5, %v2979_v24, %v18037_v47  ;;  %v3004_v1 = vsel %vm1557_vm5, %v2980_v50, %v18038_v60  ;;  %v18039_v62 = vld [vmem:[#allocation58_spill] sm:$0xff]  ;;  %v18041_v13 = vld [vmem:[#allocation60_spill] sm:$0xff] }
 0x3ca   : > { %v3002_v19 = vsel %vm1557_vm5, %v2978_v52, %v18036_v48  ;;  %v3005_v17 = vsel %vm1557_vm5, %v2981_v32, %v18039_v62  ;;  %v18040_v0 = vld [vmem:[#allocation59_spill] sm:$0xff]  ;;  %v3007_v52 = vsel %vm1557_vm5, %v2983_v9, %v18041_v13  ;;  %v13518_v61 = vpop.permute.xlu0 %2812  ;;  %v9100_v24 = vpack.i.bf16 %v12895_v28, %v12893_v3  ;;  %v18042_v50 = vld [vmem:[#allocation61_spill] sm:$0xff]  ;;  %v18044_v47 = vld [vmem:[#allocation66_spill] sm:$0xff]  ;;  %9096 = vrot.lane.b32.xlu1 %v9095_v20, %s10125_s16 }
 0x3cb   : > { %v3006_v11 = vsel %vm1557_vm5, %v2982_v35, %v18040_v0  ;;  %v3008_v37 = vsel %vm1557_vm5, %v2984_v57, %v18042_v50  ;;  %v18043_v48 = vld [vmem:[#allocation65_spill] sm:$0xff]  ;;  %v3010_v32 = vsel %vm1557_vm5, %v2986_v54, %v18044_v47  ;;  %v18045_v60 = vld [vmem:[#allocation67_spill] sm:$0xff]  ;;  %v18046_v62 = vld [vmem:[#allocation68_spill] sm:$0xff]  ;;  %vm5753_vm0 = vcmask 441344  }
 0x3cc   : > { %v3009_v39 = vsel %vm1557_vm5, %v2985_v34, %v18043_v48  ;;  %v3011_v35 = vsel %vm1557_vm5, %v2987_v63, %v18045_v60  ;;  %v13531_v9 = vld [vmem:[#allocation3 + $0x80] sm:$0xff]  ;;  %v3012_v0 = vsel %vm1557_vm5, %v2988_v29, %v18046_v62  ;;  %v18047_v3 = vld [vmem:[#allocation69_spill] sm:$0xff]  ;;  %9101 = vrot.lane.b32.xlu0 %v9100_v24, %s10125_s16  ;;  %v18050_v63 = vld [vmem:[#allocation72_spill] sm:$0xff] }
 0x3cd   : > { %v3013_v28 = vsel %vm1557_vm5, %v2989_v53, %v18047_v3  ;;  %v18048_v57 = vld [vmem:[#allocation70_spill] sm:$0xff]  ;;  %v18049_v34 = vld [vmem:[#allocation71_spill] sm:$0xff]  ;;  %v3016_v20 = vsel %vm1557_vm5, %v2992_v42, %v18050_v63  ;;  %v18051_v48 = vld [vmem:[#allocation73_spill] sm:$0xff]  ;;  %v13550_v53 = vpop.permute.xlu1 %2814 }
 0x3ce   : > { %v3014_v13 = vsel %vm1557_vm5, %v2990_v6, %v18048_v57  ;;  %v3015_v50 = vsel %vm1557_vm5, %v2991_v38, %v18049_v34  ;;  %v13542_v54 = vld [vmem:[#allocation3 + $0x60] sm:$0xff]  ;;  %v3017_v47 = vsel %vm1557_vm5, %v2993_v55, %v18051_v48  ;;  %v18054_v24 = vld [vmem:[#allocation76_spill] sm:$0xff]  ;;  %v18055_v57 = vld [vmem:[#allocation77_spill] sm:$0xff]  ;;  %v13560_v34 = vpop.permute.xlu0 %2816  ;;  %v9110_v55 = vpack.i.bf16 %v13531_v9, %v12901_v44 }
 0x3cf   : > { %v18052_v29 = vld [vmem:[#allocation74_spill] sm:$0xff]  ;;  %v9105_v6 = vpack.i.bf16 %v12899_v5, %v13542_v54  ;;  %v18053_v62 = vld [vmem:[#allocation75_spill] sm:$0xff]  ;;  %v3020_v3 = vsel %vm1582_vm6, %v2996_v12, %v18054_v24  ;;  %v3021_v42 = vsel %vm1582_vm6, %v2997_v22, %v18055_v57  ;;  %18056 = vst [vmem:[#allocation33_spill] sm:$0xff] %v13560_v34  ;;  %v18063_v34 = vld [vmem:[#allocation145_spill] sm:$0xff] }
 0x3d0   : > { %v3018_v60 = vsel %vm1557_vm5, %v2994_v43, %v18052_v29  ;;  %v3019_v38 = vsel %vm1557_vm5, %v2995_v26, %v18053_v62  ;;  %v18057_v43 = vld [vmem:[#allocation142_spill] sm:$0xff]  ;;  %v18058_v48 = vld [vmem:[#allocation143_spill] sm:$0xff]  ;;  %v18060_v62 = vld [vmem:[#allocation144_spill] sm:$0xff]  ;;  %9111 = vrot.lane.b32.xlu0 %v9110_v55, %s10125_s16 }
 0x3d1   : > { %v3022_v63 = vsel %vm1582_vm6, %v2998_v10, %v18057_v43  ;;  %v3023_v5 = vsel %vm1582_vm6, %v2999_v8, %v18058_v48  ;;  %v18059_v29 = vld [vmem:[#allocation18_spill] sm:$0xff]  ;;  %v3025_v12 = vsel %vm1582_vm6, %v3001_v15, %v18060_v62  ;;  %9106 = vrot.lane.b32.xlu1 %v9105_v6, %s10125_s16  ;;  %v18061_v22 = vld [vmem:[#allocation19_spill] sm:$0xff]  ;;  %v3028_v10 = vsel %vm1582_vm6, %v3004_v1, %v18063_v34  ;;  %v18066_v15 = vld [vmem:[#allocation100_spill] sm:$0xff]  ;;  %v13588_v62 = vpop.permute.xlu1 %2818 }
 0x3d2   : > { %v3024_v26 = vsel %vm1582_vm6, %v3000_v21, %v18059_v29  ;;  %v3026_v24 = vsel %vm1582_vm6, %v3002_v19, %v18061_v22  ;;  %v18062_v57 = vld [vmem:[#allocation147_spill] sm:$0xff]  ;;  %v18065_v21 = vld [vmem:[#allocation150_spill] sm:$0xff]  ;;  %v3031_v6 = vsel %vm1582_vm6, %v3007_v52, %v18066_v15  ;;  %v18067_v29 = vld [vmem:[#allocation12_spill] sm:$0xff]  ;;  %v13600_v52 = vpop.permute.xlu0 %2820 }
 0x3d3   : > { %v3027_v44 = vsel %vm1582_vm6, %v3003_v51, %v18062_v57  ;;  %v18064_v43 = vld [vmem:[#allocation11_spill] sm:$0xff]  ;;  %v3030_v48 = vsel %vm1582_vm6, %v3006_v11, %v18065_v21  ;;  %v3032_v19 = vsel %vm1582_vm6, %v3008_v37, %v18067_v29  ;;  %v9115_v51 = vpack.i.bf16 %v12978_v45, %v12976_v59  ;;  %v18068_v34 = vld [vmem:[#allocation13_spill] sm:$0xff]  ;;  %v18069_v55 = vld [vmem:[#allocation116_spill] sm:$0xff]  ;;  %18071 = vst [vmem:[#allocation34_spill] sm:$0xff] %v13600_v52 }
 0x3d4   : > { %v3029_v8 = vsel %vm1582_vm6, %v3005_v17, %v18064_v43  ;;  %v13592_v1 = vld [vmem:[#allocation3 + $0xa0] sm:$0xff]  ;;  %v3033_v17 = vsel %vm1582_vm6, %v3009_v39, %v18068_v34  ;;  %v3034_v22 = vsel %vm1582_vm6, %v3010_v32, %v18069_v55  ;;  %v18070_v11 = vld [vmem:[#allocation101_spill] sm:$0xff]  ;;  %v18078_v52 = vld [vmem:[#allocation20_spill] sm:$0xff] }
 0x3d5   : > { %v3035_v57 = vsel %vm1582_vm6, %v3011_v35, %v18070_v11  ;;  %v9120_v37 = vpack.i.bf16 %v13000_v16, %v13592_v1  ;;  %v13604_v43 = vld [vmem:[#allocation3 + $0xc0] sm:$0xff]  ;;  %v18075_v32 = vld [vmem:[#allocation117_spill] sm:$0xff]  ;;  %9116 = vrot.lane.b32.xlu1 %v9115_v51, %s10125_s16 }
 0x3d6   : > { %v18072_v21 = vld [vmem:[#allocation102_spill] sm:$0xff]  ;;  %v18073_v45 = vld [vmem:[#allocation151_spill] sm:$0xff]  ;;  %v3039_v34 = vsel %vm1582_vm6, %v3015_v50, %v18075_v32  ;;  %v13632_v32 = vpop.permute.xlu1 %2822 }
 0x3d7   : > { %v3036_v59 = vsel %vm1582_vm6, %v3012_v0, %v18072_v21  ;;  %v3037_v15 = vsel %vm1582_vm6, %v3013_v28, %v18073_v45  ;;  %v18074_v39 = vld [vmem:[#allocation103_spill] sm:$0xff]  ;;  %v18077_v16 = vld [vmem:[#allocation154_spill] sm:$0xff]  ;;  %v3042_v0 = vsel %vm1582_vm6, %v3018_v60, %v18078_v52  ;;  %v18079_v21 = vld [vmem:[#allocation153_spill] sm:$0xff]  ;;  %9121 = vrot.lane.b32.xlu0 %v9120_v37, %s10125_s16 }
 0x3d8   : > { %v3038_v29 = vsel %vm1582_vm6, %v3014_v13, %v18074_v39  ;;  %v18076_v35 = vld [vmem:[#allocation155_spill] sm:$0xff]  ;;  %v3041_v11 = vsel %vm1582_vm6, %v3017_v47, %v18077_v16  ;;  %v13623_v28 = vsel %vm1582_vm6, %v3019_v38, %v18079_v21  ;;  %v18080_v13 = vld [vmem:[#allocation14_spill] sm:$0xff]  ;;  %v9125_v47 = vpack.i.bf16 %v13604_v43, %v13002_v36  ;;  %v18083_v60 = vld [vmem:[#allocation104_spill] sm:$0xff]  ;;  %v13644_v16 = vpop.permute.xlu0 %2824 }
 0x3d9   : > { %v3040_v55 = vsel %vm1582_vm6, %v3016_v20, %v18076_v35  ;;  %v3044_v50 = vsel %vm1607_vm7, %v3020_v3, %v18080_v13  ;;  %v18081_v45 = vld [vmem:[#allocation118_spill] sm:$0xff]  ;;  %v3047_v38 = vsel %vm1607_vm7, %v3023_v5, %v18083_v60  ;;  %v18084_v52 = vld [vmem:[#allocation105_spill] sm:$0xff]  ;;  %v18085_v35 = vld [vmem:[#allocation159_spill] sm:$0xff] }
 0x3da   : > { %v3045_v51 = vsel %vm1607_vm7, %v3021_v42, %v18081_v45  ;;  %v18082_v39 = vld [vmem:[#allocation158_spill] sm:$0xff]  ;;  %v3048_v37 = vsel %vm1607_vm7, %v3024_v26, %v18084_v52  ;;  %v13642_v3 = vsel %vm1607_vm7, %v3025_v12, %v18085_v35  ;;  %v9130_v42 = vpack.i.bf16 %v13013_v25, %v13011_v18  ;;  %v18087_v36 = vld [vmem:[#allocation160_spill] sm:$0xff]  ;;  %v18089_v45 = vld [vmem:[#allocation163_spill] sm:$0xff]  ;;  %9126 = vrot.lane.b32.xlu1 %v9125_v47, %s10125_s16 }
 0x3db   : > { %v3046_v20 = vsel %vm1607_vm7, %v3022_v63, %v18082_v39  ;;  %v18086_v63 = vld [vmem:[#allocation119_spill] sm:$0xff]  ;;  %v13654_v13 = vsel %vm1607_vm7, %v3027_v44, %v18087_v36  ;;  %v18088_v5 = vld [vmem:[#allocation120_spill] sm:$0xff]  ;;  %v13662_v12 = vsel %vm1607_vm7, %v3029_v8, %v18089_v45  ;;  %v18090_v18 = vld [vmem:[#allocation161_spill] sm:$0xff] }
 0x3dc   : > { %v13650_v21 = vsel %vm1607_vm7, %v3026_v24, %v18086_v63  ;;  %v13658_v26 = vsel %vm1607_vm7, %v3028_v10, %v18088_v5  ;;  %v13665_v39 = vld [vmem:[#allocation3 + $0x100] sm:$0xff]  ;;  %v13669_v25 = vsel %vm1607_vm7, %v3030_v48, %v18090_v18  ;;  %v18091_v24 = vld [vmem:[#allocation32_spill] sm:$0xff]  ;;  %9131 = vrot.lane.b32.xlu0 %v9130_v42, %s10125_s16  ;;  %v18096_v36 = vld [vmem:[#allocation169_spill] sm:$0xff]  ;;  %v13696_v5 = vpop.permute.xlu1 %2826 }
 0x3dd   : > { %v13673_v44 = vsel %vm1607_vm7, %v3031_v6, %v18091_v24  ;;  %v18092_v60 = vld [vmem:[#allocation166_spill] sm:$0xff]  ;;  %v18095_v63 = vld [vmem:[#allocation88_spill] sm:$0xff]  ;;  %v18097_v45 = vld [vmem:[#allocation121_spill] sm:$0xff]  ;;  %v2901_v24 = vpop.permute.xlu0 %2900 }
 0x3de   : > { %v13677_v10 = vsel %vm1607_vm7, %v3032_v19, %v18092_v60  ;;  %v18093_v52 = vld [vmem:[#allocation78_spill] sm:$0xff]  ;;  %v13692_v6 = vsel %vm1607_vm7, %v3035_v57, %v18095_v63  ;;  %v3068_v19 = vsel %vm1632_vm8, %v3044_v50, %v18096_v36  ;;  %v13702_v42 = vsel %vm1607_vm7, %v3036_v59, %v18097_v45  ;;  %v18098_v18 = vld [vmem:[#allocation79_spill] sm:$0xff]  ;;  %v18101_v59 = vld [vmem:[#allocation109_spill] sm:$0xff] }
 0x3df   : > { %v13681_v8 = vsel %vm1607_vm7, %v3033_v17, %v18093_v52  ;;  %v13684_v47 = vld [vmem:[#allocation3 + $0xe0] sm:$0xff]  ;;  %v3092_v57 = vsel %vm1657_vm9, %v3068_v19, %v13141_v23  ;;  %v9140_v50 = vpack.i.bf16 %v13665_v39, %v13034_v27  ;;  %v3069_v63 = vsel %vm1632_vm8, %v3045_v51, %v18101_v59  ;;  %v18102_v23 = vld [vmem:[#allocation89_spill] sm:$0xff] }
 0x3e0   : > { %v18094_v35 = vld [vmem:[#allocation106_spill] sm:$0xff]  ;;  %v9135_v17 = vpack.i.bf16 %v13032_v31, %v13684_v47  ;;  %v18099_v60 = vld [vmem:[#allocation107_spill] sm:$0xff]  ;;  %v13727_v36 = vsel %vm1607_vm7, %v3040_v55, %v18102_v23  ;;  %v3093_v19 = vsel %vm1657_vm9, %v3069_v63, %v13153_v41 }
 0x3e1   : > { %v13688_v48 = vsel %vm1607_vm7, %v3034_v22, %v18094_v35  ;;  %v13706_v22 = vsel %vm1607_vm7, %v3037_v15, %v18098_v18  ;;  %v13714_v52 = vsel %vm1607_vm7, %v3038_v29, %v18099_v60  ;;  %v18100_v31 = vld [vmem:[#allocation167_spill] sm:$0xff]  ;;  %v3116_v15 = vsel %vm1682_vm10, %v3092_v57, %v13348_v46  ;;  %9141 = vrot.lane.b32.xlu0 %v9140_v50, %s10125_s16  ;;  %v18104_v51 = vld [vmem:[#allocation122_spill] sm:$0xff]  ;;  %v569_v50 = vld [vmem:[#allocation6 + $0x110] sm:$0xff] }
 0x3e2   : > { %v13718_v35 = vsel %vm1607_vm7, %v3039_v34, %v18100_v31  ;;  %9136 = vrot.lane.b32.xlu1 %v9135_v17, %s10125_s16  ;;  %v18103_v27 = vld [vmem:[#allocation123_spill] sm:$0xff]  ;;  %v3140_v34 = vsel %vm392_vm3, %v3116_v15, %v2901_v24  ;;  %v13737_v45 = vsel %vm1607_vm7, %v3041_v11, %v18104_v51  ;;  %v3117_v55 = vsel %vm1682_vm10, %v3093_v19, %v13366_v56  ;;  %v2903_v17 = vpop.permute.xlu1 %2902  ;;  %v18105_v18 = vld [vmem:[#allocation90_spill] sm:$0xff]  ;;  %v2905_v24 = vpop.permute.xlu0 %2904  ;;  %v18106_v56 = vld [vmem:[#allocation80_spill] sm:$0xff] }
 0x3e3   : > { %v3070_v29 = vsel %vm1632_vm8, %v3046_v20, %v18103_v27  ;;  %v9145_v20 = vpack.i.bf16 %v13104_v33, %v13102_v2  ;;  %v13747_v41 = vsel %vm1607_vm7, %v3042_v0, %v18105_v18  ;;  %v3141_v11 = vsel %vm392_vm3, %v3117_v55, %v2903_v17  ;;  %v570_v60 = vld [vmem:[#allocation6 + $0x118] sm:$0xff]  ;;  %v18107_v0 = vld [vmem:[#allocation124_spill] sm:$0xff] }
 0x3e4   : > { %v3094_v46 = vsel %vm1657_vm9, %v3070_v29, %v13155_v14  ;;  %v9150_v14 = vpack.i.bf16 %v13376_v7, %v13361_v4  ;;  %v3071_v31 = vsel %vm1632_vm8, %v3047_v38, %v18106_v56  ;;  %v3188_v59 = vrot.slane %v3140_v34, 7  ;;  %v18108_v4 = vld [vmem:[#allocation204_spill] sm:$0xff]  ;;  %v18109_v7 = vld [vmem:[#allocation91_spill] sm:$0xff]  ;;  %v18110_v19 = vld [vmem:[#allocation146_spill] sm:$0xff] }
 0x3e5   : > { %v3118_v57 = vsel %vm1682_vm10, %v3094_v46, %v13370_v58  ;;  %v3189_v63 = vrot.slane %v3141_v11, 7  ;;  %v3072_v58 = vsel %vm1632_vm8, %v3048_v37, %v18107_v0  ;;  %v3095_v23 = vsel %vm1657_vm9, %v3071_v31, %v13164_v40  ;;  %v18111_v34 = vld [vmem:[#allocation205_spill] sm:$0xff]  ;;  %v18112_v37 = vld [vmem:[#allocation206_spill] sm:$0xff]  ;;  %v18115_v56 = vld [vmem:[#allocation108_spill] sm:$0xff] }
 0x3e6   : > { %v3142_v15 = vsel %vm392_vm3, %v3118_v57, %v2905_v24  ;;  %9146 = vrot.lane.b32.xlu1 %v9145_v20, %s10125_s16  ;;  %9151 = vrot.lane.b32.xlu0 %v9150_v14, %s10123_s8  ;;  %v9155_v29 = vpack.i.bf16 %v18109_v7, %v18108_v4  ;;  %v3096_v38 = vsel %vm1657_vm9, %v3072_v58, %v18110_v19  ;;  %v2907_v46 = vpop.permute.xlu1 %2906  ;;  %v2909_v18 = vpop.permute.xlu0 %2908  ;;  %v18113_v11 = vld [vmem:[#allocation62_spill] sm:$0xff]  ;;  %v18114_v24 = vld [vmem:[#allocation15_spill] sm:$0xff]  ;;  %v18118_v4 = vld [vmem:[#allocation156_spill] sm:$0xff] }
 0x3e7   : > { %v3191_v27 = vrot.slane %v3142_v15, 7  ;;  %v3119_v51 = vsel %vm1682_vm10, %v3095_v23, %v18111_v34  ;;  %v3190_v55 = vsel %vm1755_vm11, %v3188_v59, %v3189_v63  ;;  %v13770_v17 = vpack.c.bf16 %v570_v60, %v569_v50  ;;  %v18116_v50 = vld [vmem:[#allocation170_spill] sm:$0xff]  ;;  %v13793_v23 = vld [vmem:[#allocation3 + $0x48] sm:$0xff] }
 0x3e8   : > { %v3120_v40 = vsel %vm1682_vm10, %v3096_v38, %v18112_v37  ;;  %v3143_v20 = vsel %vm392_vm3, %v3119_v51, %v2907_v46  ;;  %8651 = vmatprep.mubr.msk.f32.mxu1 %vm1802_vm12, %v3190_v55  ;;  %v9160_v14 = vpack.i.bf16 %v18114_v24, %v18113_v11  ;;  %v13782_v31 = vsel %vm1607_vm7, %v13623_v28, %v18115_v56  ;;  %v18119_v7 = vld [vmem:[#allocation92_spill] sm:$0xff]  ;;  %v18120_v19 = vld [vmem:[#allocation207_spill] sm:$0xff]  ;;  %v18121_v51 = vld [vmem:[#allocation21_spill] sm:$0xff] }
 0x3e9   : > { %v3192_v57 = vsel %vm1755_vm11, %v3189_v63, %v3191_v27  ;;  %v3073_v60 = vsel %vm1632_vm8, %v13642_v3, %v18116_v50  ;;  %v3193_v59 = vrot.slane %v3143_v20, 7  ;;  %v3144_v15 = vsel %vm392_vm3, %v3120_v40, %v2909_v18  ;;  %v18117_v63 = vld [vmem:[#allocation141_spill] sm:$0xff]  ;;  %v18123_v37 = vld [vmem:[#allocation63_spill] sm:$0xff]  ;;  %v18124_v40 = vld [vmem:[#allocation94_spill] sm:$0xff] }
 0x3ea   : > { %8652 = vmatmul.mubr.msk.f32.vlgmr.msra.gmra.mrb[0].mxu1 %vm1802_vm12, %v3192_v57  ;;  %9156 = vrot.lane.b32.xlu1 %v9155_v29, %s10123_s8  ;;  %v3097_v0 = vsel %vm1657_vm9, %v3073_v60, %v18117_v63  ;;  %v3194_v58 = vrot.slane %v3144_v15, 7  ;;  %v9210_v28 = vpack.i.bf16 %v13793_v23, %v13482_v30  ;;  %v13797_v27 = vld [vmem:[#allocation3 + $0x50] sm:$0xff]  ;;  %v3074_v29 = vsel %vm1632_vm8, %v13650_v21, %v18119_v7  ;;  %v2911_v34 = vpop.permute.xlu1 %2910  ;;  %v13811_v18 = vld [vmem:[#allocation3 + $0x118] sm:$0xff]  ;;  %v2913_v56 = vpop.permute.xlu0 %2912 }
 0x3eb   : > { %9161 = vrot.lane.b32.xlu0 %v9160_v14, %s10123_s8  ;;  %v9215_v3 = vpack.i.bf16 %v13542_v54, %v13797_v27  ;;  %8854 = vmatpush3.bf16.msra.mxu1 %v18118_v4  ;;  %v3121_v38 = vsel %vm1682_vm10, %v3097_v0, %v18120_v19  ;;  %v18122_v46 = vld [vmem:[#allocation125_spill] sm:$0xff]  ;;  %v9170_v20 = vpack.i.bf16 %v18124_v40, %v18123_v37  ;;  %v18125_v57 = vld [vmem:[#allocation110_spill] sm:$0xff]  ;;  %v18126_v24 = vld [vmem:[#allocation148_spill] sm:$0xff] }
 0x3ec   : > { %v9165_v55 = vpack.i.bf16 %v18122_v46, %v18121_v51  ;;  %8856 = vmatprep.subr.bf16.mxu1 %v13770_v17  ;;  %v3075_v11 = vsel %vm1632_vm8, %v13654_v13, %v18125_v57  ;;  %v3098_v21 = vsel %vm1657_vm9, %v3074_v29, %v18126_v24  ;;  %v3145_v14 = vsel %vm392_vm3, %v3121_v38, %v2911_v34  ;;  %v18127_v60 = vld [vmem:[#allocation24_spill] sm:$0xff]  ;;  %v18130_v19 = vld [vmem:[#allocation95_spill] sm:$0xff]  ;;  %v18131_v51 = vld [vmem:[#allocation81_spill] sm:$0xff] }
 0x3ed   : > { %v3195_v50 = vsel %vm1755_vm11, %v3193_v59, %v3194_v58  ;;  %v3076_v15 = vsel %vm1632_vm8, %v13658_v26, %v18127_v60  ;;  %v18128_v63 = vld [vmem:[#allocation208_spill] sm:$0xff]  ;;  %v3196_v7 = vrot.slane %v3145_v14, 7  ;;  %v3077_v38 = vsel %vm1632_vm8, %v13662_v12, %v18131_v51  ;;  %v18133_v37 = vld [vmem:[#allocation126_spill] sm:$0xff]  ;;  %v18134_v40 = vld [vmem:[#allocation149_spill] sm:$0xff] }
 0x3ee   : > { %v3122_v0 = vsel %vm1682_vm10, %v3098_v21, %v18128_v63  ;;  %8654 = vmatprep.mubr.msk.f32.mxu1 %vm1802_vm12, %v3195_v50  ;;  %9166 = vrot.lane.b32.xlu1 %v9165_v55, %s10123_s8  ;;  %v18129_v13 = vld [vmem:[#allocation84_spill] sm:$0xff]  ;;  %v3957_v46 = vrot.slane %v13811_v18, 2  ;;  %v3078_v55 = vsel %vm1632_vm8, %v13669_v25, %v18133_v37  ;;  %v3100_v57 = vsel %vm1657_vm9, %v3076_v15, %v18134_v40  ;;  %v18135_v24 = vld [vmem:[#allocation209_spill] sm:$0xff]  ;;  %v2915_v21 = vpop.permute.xlu1 %2914  ;;  %v18136_v14 = vld [vmem:[#allocation210_spill] sm:$0xff] }
 0x3ef   : > { %v9175_v29 = vpack.i.bf16 %v18130_v19, %v18129_v13  ;;  %v18132_v59 = vld [vmem:[#allocation152_spill] sm:$0xff]  ;;  %v3146_v26 = vsel %vm392_vm3, %v3122_v0, %v2913_v56  ;;  %9171 = vrot.lane.b32.xlu0 %v9170_v20, %s10123_s8  ;;  %8858 = vmatpush3.bf16.msra.mxu1 %v13770_v17  ;;  %v3124_v20 = vsel %vm1682_vm10, %v3100_v57, %v18136_v14  ;;  %v2917_v56 = vpop.permute.xlu0 %2916  ;;  %v18138_v60 = vld [vmem:[#allocation113_spill] sm:$0xff]  ;;  %v18139_v63 = vld [vmem:[#allocation86_spill] sm:$0xff]  ;;  %v3955_v40 = vrot.slane %v13104_v33, 2 }
 0x3f0   : > { %v3099_v34 = vsel %vm1657_vm9, %v3075_v11, %v18132_v59  ;;  %v3197_v11 = vsel %vm1755_vm11, %v3194_v58, %v3196_v7  ;;  %v18137_v50 = vld [vmem:[#allocation128_spill] sm:$0xff]  ;;  %v3198_v13 = vrot.slane %v3146_v26, 7  ;;  %v3148_v51 = vsel %vm392_vm3, %v3124_v20, %v2917_v56  ;;  %v18142_v7 = vld [vmem:[#allocation114_spill] sm:$0xff] }
 0x3f1   : > { %v3123_v12 = vsel %vm1682_vm10, %v3099_v34, %v18135_v24  ;;  %8655 = vmatmul.mubr.msk.f32.gmra.mrb[2].mxu1 %vm1802_vm12, %v3197_v11  ;;  %v9180_v25 = vpack.i.bf16 %v18138_v60, %v18137_v50  ;;  %v18140_v0 = vld [vmem:[#allocation96_spill] sm:$0xff]  ;;  %v18143_v34 = vld [vmem:[#allocation162_spill] sm:$0xff]  ;;  %v3201_v57 = vrot.slane %v3148_v51, 7  ;;  %v13864_v24 = vrot.slane %v13102_v2, 2  ;;  %v18148_v51 = vld [vmem:[#allocation111_spill] sm:$0xff] }
 0x3f2   : > { %v3147_v18 = vsel %vm392_vm3, %v3123_v12, %v2915_v21  ;;  %v9185_v15 = vpack.i.bf16 %v18140_v0, %v18139_v63  ;;  %9176 = vrot.lane.b32.xlu1 %v9175_v29, %s10123_s8  ;;  %v18141_v58 = vld [vmem:[#allocation132_spill] sm:$0xff]  ;;  %v3101_v37 = vsel %vm1657_vm9, %v3077_v38, %v18143_v34  ;;  %v551_v26 = vld [vmem:[#allocation6 + $0x80] sm:$0xff]  ;;  %v18144_v21 = vld [vmem:[#allocation157_spill] sm:$0xff]  ;;  %v2919_v20 = vpop.permute.xlu1 %2918 }
 0x3f3   : > { %v3199_v19 = vrot.slane %v3147_v18, 7  ;;  %v9190_v59 = vpack.i.bf16 %v18142_v7, %v18141_v58  ;;  %9181 = vrot.lane.b32.xlu0 %v9180_v25, %s10123_s8  ;;  %v552_v12 = vld [vmem:[#allocation6 + $0x88] sm:$0xff]  ;;  %v3102_v11 = vsel %vm1657_vm9, %v3078_v55, %v18144_v21  ;;  %v535_v33 = vld [vmem:[#allocation6] sm:$0xff]  ;;  %v2921_v25 = vpop.permute.xlu0 %2920  ;;  %v18147_v0 = vld [vmem:[#allocation93_spill] sm:$0xff]  ;;  %v3080_v58 = vsel %vm1632_vm8, %v13677_v10, %v18148_v51 }
 0x3f4   : > { %v18145_v29 = vld [vmem:[#allocation211_spill] sm:$0xff]  ;;  %v13871_v38 = vpack.c.bf16 %v552_v12, %v551_v26  ;;  %v18146_v50 = vld [vmem:[#allocation212_spill] sm:$0xff]  ;;  %v18151_v12 = vld [vmem:[#allocation17_spill] sm:$0xff]  ;;  %v13895_v21 = vsel %vm796_vm2, %v3955_v40, %v3957_v46 }
 0x3f5   : > { %v3125_v14 = vsel %vm1682_vm10, %v3101_v37, %v18145_v29  ;;  %v3200_v18 = vsel %vm1755_vm11, %v3198_v13, %v3199_v19  ;;  %v536_v56 = vld [vmem:[#allocation6 + $0x8] sm:$0xff]  ;;  %v3126_v60 = vsel %vm1682_vm10, %v3102_v11, %v18146_v50  ;;  %v3202_v55 = vsel %vm1755_vm11, %v3199_v19, %v3201_v57  ;;  %v553_v10 = vld [vmem:[#allocation6 + $0x90] sm:$0xff]  ;;  %v554_v11 = vld [vmem:[#allocation6 + $0x98] sm:$0xff] }
 0x3f6   : > { %v3149_v2 = vsel %vm392_vm3, %v3125_v14, %v2919_v20  ;;  %8657 = vmatprep.mubr.msk.f32.mxu1 %vm1802_vm12, %v3200_v18  ;;  %v13878_v63 = vpack.c.bf16 %v536_v56, %v535_v33  ;;  %v3079_v13 = vsel %vm1632_vm8, %v13673_v44, %v18147_v0  ;;  %v3150_v34 = vsel %vm392_vm3, %v3126_v60, %v2921_v25  ;;  %v18149_v37 = vld [vmem:[#allocation164_spill] sm:$0xff]  ;;  %v18150_v26 = vld [vmem:[#allocation131_spill] sm:$0xff]  ;;  %v18152_v29 = vld [vmem:[#allocation213_spill] sm:$0xff] }
 0x3f7   : > { %v3203_v7 = vrot.slane %v3149_v2, 7  ;;  %8658 = vmatmul.mubr.msk.f32.gmra.mrb[4].mxu1 %vm1802_vm12, %v3202_v55  ;;  %9186 = vrot.lane.b32.xlu1 %v9185_v15, %s10123_s8  ;;  %v3103_v19 = vsel %vm1657_vm9, %v3079_v13, %v18149_v37  ;;  %v3204_v57 = vrot.slane %v3150_v34, 7  ;;  %v9195_v44 = vpack.i.bf16 %v18151_v12, %v18150_v26  ;;  %v2923_v15 = vpop.permute.xlu1 %2922  ;;  %v18153_v20 = vld [vmem:[#allocation134_spill] sm:$0xff]  ;;  %v537_v46 = vld [vmem:[#allocation6 + $0x10] sm:$0xff]  ;;  %v2925_v25 = vpop.permute.xlu0 %2924  ;;  %v18156_v51 = vld [vmem:[#allocation127_spill] sm:$0xff] }
 0x3f8   : > { %9191 = vrot.lane.b32.xlu0 %v9190_v59, %s10123_s8  ;;  %8820 = vmatprep.subr.bf16.mxu0 %v13871_v38  ;;  %v3127_v14 = vsel %vm1682_vm10, %v3103_v19, %v18152_v29  ;;  %v9200_v18 = vpack.i.bf16 %v13864_v24, %v18153_v20  ;;  %v13904_v59 = vsel %vm796_vm2, %v13864_v24, %v3955_v40  ;;  %v538_v56 = vld [vmem:[#allocation6 + $0x18] sm:$0xff]  ;;  %v18154_v50 = vld [vmem:[#allocation168_spill] sm:$0xff] }
 0x3f9   : > { %8822 = vmatpush3.bf16.msra.mxu0 %v13878_v63  ;;  %v13907_v33 = vpack.c.bf16 %v554_v11, %v553_v10  ;;  %v3104_v60 = vsel %vm1657_vm9, %v3080_v58, %v18154_v50  ;;  %v3151_v2 = vsel %vm392_vm3, %v3127_v14, %v2923_v15  ;;  %v3205_v55 = vsel %vm1755_vm11, %v3203_v7, %v3204_v57  ;;  %v18155_v13 = vld [vmem:[#allocation25_spill] sm:$0xff]  ;;  %v18158_v58 = vld [vmem:[#allocation171_spill] sm:$0xff]  ;;  %v18159_v11 = vld [vmem:[#allocation172_spill] sm:$0xff] }
 0x3fa   : > { %v13913_v0 = vpack.c.bf16 %v538_v56, %v537_v46  ;;  %v3081_v40 = vsel %vm1632_vm8, %v13681_v8, %v18155_v13  ;;  %v3082_v34 = vsel %vm1632_vm8, %v13688_v48, %v18156_v51  ;;  %v18157_v37 = vld [vmem:[#allocation29_spill] sm:$0xff]  ;;  %v3206_v26 = vrot.slane %v3151_v2, 7  ;;  %8660 = vmatprep.mubr.msk.f32.mxu1 %vm1802_vm12, %v3205_v55  ;;  %v555_v48 = vld [vmem:[#allocation6 + $0xa0] sm:$0xff]  ;;  %v556_v10 = vld [vmem:[#allocation6 + $0xa8] sm:$0xff] }
 0x3fb   : > { %v3128_v19 = vsel %vm1682_vm10, %v3104_v60, %v18157_v37  ;;  %9196 = vrot.lane.b32.xlu1 %v9195_v44, %s10123_s8  ;;  %v3105_v7 = vsel %vm1657_vm9, %v3081_v40, %v18158_v58  ;;  %v9205_v8 = vpack.i.bf16 %v13895_v21, %v13904_v59  ;;  %8824 = vmatprep.subr.bf16.mxu0 %v13907_v33  ;;  %v18160_v14 = vld [vmem:[#allocation30_spill] sm:$0xff]  ;;  %v2927_v15 = vpop.permute.xlu1 %2926  ;;  %v540_v56 = vld [vmem:[#allocation6 + $0x28] sm:$0xff]  ;;  %v541_v23 = vld [vmem:[#allocation6 + $0x30] sm:$0xff] }
 0x3fc   : > { %v3152_v12 = vsel %vm392_vm3, %v3128_v19, %v2925_v25  ;;  %9201 = vrot.lane.b32.xlu0 %v9200_v18, %s10123_s8  ;;  %v3106_v29 = vsel %vm1657_vm9, %v3082_v34, %v18159_v11  ;;  %v3129_v44 = vsel %vm1682_vm10, %v3105_v7, %v18160_v14  ;;  %v3207_v20 = vsel %vm1755_vm11, %v3204_v57, %v3206_v26  ;;  %v539_v18 = vld [vmem:[#allocation6 + $0x20] sm:$0xff]  ;;  %v2929_v25 = vpop.permute.xlu0 %2928  ;;  %v13944_v13 = vld [vmem:[#allocation3 + $0x70] sm:$0xff] }
 0x3fd   : > { %8826 = vmatpush3.bf16.msra.mxu0 %v13913_v0  ;;  %v13938_v46 = vpack.c.bf16 %v556_v10, %v555_v48  ;;  %v18161_v50 = vld [vmem:[#allocation31_spill] sm:$0xff]  ;;  %v3153_v2 = vsel %vm392_vm3, %v3129_v44, %v2927_v15  ;;  %8661 = vmatmul.mubr.msk.f32.gmra.mrb[6].mxu1 %vm1802_vm12, %v3207_v20  ;;  %v13947_v57 = vpack.c.bf16 %v540_v56, %v539_v18  ;;  %v3208_v37 = vrot.slane %v3152_v12, 7  ;;  %v18164_v48 = vld [vmem:[#allocation176_spill] sm:$0xff]  ;;  %v18165_v14 = vld [vmem:[#allocation177_spill] sm:$0xff] }
 0x3fe   : > { %v3130_v60 = vsel %vm1682_vm10, %v3106_v29, %v18161_v50  ;;  %v9930_v55 = vld [vmem:[#allocation3 + $0x68] sm:$0xff]  ;;  %v3209_v19 = vrot.slane %v3153_v2, 7  ;;  %v558_v29 = vld [vmem:[#allocation6 + $0xb8] sm:$0xff] }
 0x3ff   : > { %v9220_v40 = vpack.i.bf16 %v13944_v13, %v9930_v55  ;;  %v18162_v51 = vld [vmem:[#allocation83_spill] sm:$0xff]  ;;  %v3154_v26 = vsel %vm392_vm3, %v3130_v60, %v2929_v25  ;;  %9206 = vrot.lane.b32.xlu1 %v9205_v8, %s10123_s8  ;;  %8828 = vmatprep.subr.bf16.mxu0 %v13938_v46  ;;  %v557_v8 = vld [vmem:[#allocation6 + $0xb0] sm:$0xff]  ;;  %v2931_v15 = vpop.permute.xlu1 %2930 }
 0x400   : > { %v3083_v34 = vsel %vm1632_vm8, %v13692_v6, %v18162_v51  ;;  %v18163_v58 = vld [vmem:[#allocation27_spill] sm:$0xff]  ;;  %v3211_v11 = vrot.slane %v3154_v26, 7  ;;  %9211 = vrot.lane.b32.xlu0 %v9210_v28, %s10124_s10  ;;  %v3210_v20 = vsel %vm1755_vm11, %v3208_v37, %v3209_v19  ;;  %v13974_v30 = vpack.c.bf16 %v558_v29, %v557_v8  ;;  %v542_v28 = vld [vmem:[#allocation6 + $0x38] sm:$0xff]  ;;  %v2933_v56 = vpop.permute.xlu0 %2932  ;;  %v18166_v60 = vld [vmem:[#allocation16_spill] sm:$0xff] }
 0x401   : > { %v3084_v7 = vsel %vm1632_vm8, %v13702_v42, %v18163_v58  ;;  %v3107_v10 = vsel %vm1657_vm9, %v3083_v34, %v18164_v48  ;;  %v13964_v6 = vld [vmem:[#allocation3 + $0x88] sm:$0xff]  ;;  %8830 = vmatpush3.bf16.msra.mxu0 %v13947_v57  ;;  %8663 = vmatprep.mubr.msk.f32.mxu1 %vm1802_vm12, %v3210_v20  ;;  %v3085_v2 = vsel %vm1632_vm8, %v13706_v22, %v18166_v60  ;;  %v14001_v26 = vld [vmem:[#allocation3 + $0xb0] sm:$0xff] }
 0x402   : > { %v9225_v12 = vpack.i.bf16 %v13964_v6, %v13531_v9  ;;  %v3108_v44 = vsel %vm1657_vm9, %v3084_v7, %v18165_v14  ;;  %v3131_v42 = vsel %vm1682_vm10, %v3107_v10, %v13508_v49  ;;  %v3212_v50 = vsel %vm1755_vm11, %v3209_v19, %v3211_v11  ;;  %v18167_v34 = vld [vmem:[#allocation183_spill] sm:$0xff]  ;;  %8832 = vmatprep.subr.bf16.mxu0 %v13974_v30  ;;  %v18168_v7 = vld [vmem:[#allocation85_spill] sm:$0xff] }
 0x403   : > { %v3132_v9 = vsel %vm1682_vm10, %v3108_v44, %v13518_v61  ;;  %v3155_v18 = vsel %vm392_vm3, %v3131_v42, %v2931_v15  ;;  %v13981_v49 = vpack.c.bf16 %v542_v28, %v541_v23  ;;  %8664 = vmatmul.mubr.msk.f32.gmra.mrb[8].mxu1 %vm1802_vm12, %v3212_v50  ;;  %9216 = vrot.lane.b32.xlu1 %v9215_v3, %s10124_s10  ;;  %v13992_v61 = vld [vmem:[#allocation3 + $0x90] sm:$0xff]  ;;  %v13999_v22 = vld [vmem:[#allocation3 + $0xa8] sm:$0xff]  ;;  %v2935_v10 = vpop.permute.xlu1 %2934  ;;  %v18170_v23 = vld [vmem:[#allocation98_spill] sm:$0xff] }
 0x404   : > { %v3213_v25 = vrot.slane %v3155_v18, 7  ;;  %v3156_v55 = vsel %vm392_vm3, %v3132_v9, %v2933_v56  ;;  %v9230_v51 = vpack.i.bf16 %v13592_v1, %v13992_v61  ;;  %v3109_v37 = vsel %vm1657_vm9, %v3085_v2, %v18167_v34  ;;  %9221 = vrot.lane.b32.xlu0 %v9220_v40, %s10124_s10  ;;  %v14005_v54 = vld [vmem:[#allocation3 + $0xc8] sm:$0xff]  ;;  %v14015_v11 = vld [vmem:[#allocation3 + $0xd0] sm:$0xff]  ;;  %v2937_v15 = vpop.permute.xlu0 %2936  ;;  %v18171_v9 = vld [vmem:[#allocation26_spill] sm:$0xff] }
 0x405   : > { %v3214_v19 = vrot.slane %v3156_v55, 7  ;;  %v9235_v58 = vpack.i.bf16 %v14001_v26, %v13999_v22  ;;  %v9240_v27 = vpack.i.bf16 %v14005_v54, %v13604_v43  ;;  %v559_v1 = vld [vmem:[#allocation6 + $0xc0] sm:$0xff]  ;;  %v560_v3 = vld [vmem:[#allocation6 + $0xc8] sm:$0xff]  ;;  %v3086_v40 = vsel %vm1632_vm8, %v13714_v52, %v18168_v7  ;;  %8834 = vmatpush3.bf16.msra.mxu0 %v13981_v49  ;;  %v18169_v44 = vld [vmem:[#allocation185_spill] sm:$0xff] }
 0x406   : > { %v3133_v48 = vsel %vm1682_vm10, %v3109_v37, %v13550_v53  ;;  %v9245_v8 = vpack.i.bf16 %v13684_v47, %v14015_v11  ;;  %v14020_v43 = vpack.c.bf16 %v560_v3, %v559_v1  ;;  %v543_v29 = vld [vmem:[#allocation6 + $0x40] sm:$0xff]  ;;  %v544_v14 = vld [vmem:[#allocation6 + $0x48] sm:$0xff]  ;;  %v3110_v42 = vsel %vm1657_vm9, %v3086_v40, %v18169_v44  ;;  %v18172_v56 = vld [vmem:[#allocation33_spill] sm:$0xff] }
 0x407   : > { %v3157_v52 = vsel %vm392_vm3, %v3133_v48, %v2935_v10  ;;  %v3215_v53 = vsel %vm1755_vm11, %v3213_v25, %v3214_v19  ;;  %v14026_v20 = vpack.c.bf16 %v544_v14, %v543_v29  ;;  %v3087_v28 = vsel %vm1632_vm8, %v13718_v35, %v18170_v23  ;;  %9226 = vrot.lane.b32.xlu1 %v9225_v12, %s10124_s10  ;;  %v18173_v2 = vld [vmem:[#allocation99_spill] sm:$0xff]  ;;  %v562_v37 = vld [vmem:[#allocation6 + $0xd8] sm:$0xff]  ;;  %v18175_v1 = vld [vmem:[#allocation192_spill] sm:$0xff]  ;;  %v2939_v7 = vpop.permute.xlu1 %2938 }
 0x408   : > { %v3088_v18 = vsel %vm1632_vm8, %v13727_v36, %v18171_v9  ;;  %v3134_v50 = vsel %vm1682_vm10, %v3110_v42, %v18172_v56  ;;  %v3216_v60 = vrot.slane %v3157_v52, 7  ;;  %8666 = vmatprep.mubr.msk.f32.mxu1 %vm1802_vm12, %v3215_v53  ;;  %v3089_v25 = vsel %vm1632_vm8, %v13737_v45, %v18173_v2  ;;  %v18174_v55 = vld [vmem:[#allocation191_spill] sm:$0xff]  ;;  %9231 = vrot.lane.b32.xlu0 %v9230_v51, %s10124_s10  ;;  %v561_v36 = vld [vmem:[#allocation6 + $0xd0] sm:$0xff]  ;;  %v546_v10 = vld [vmem:[#allocation6 + $0x58] sm:$0xff] }
 0x409   : > { %v3111_v34 = vsel %vm1657_vm9, %v3087_v28, %v18174_v55  ;;  %v3158_v35 = vsel %vm392_vm3, %v3134_v50, %v2937_v15  ;;  %8836 = vmatprep.subr.bf16.mxu0 %v14020_v43  ;;  %v3112_v3 = vsel %vm1657_vm9, %v3088_v18, %v18175_v1  ;;  %v14052_v40 = vpack.c.bf16 %v562_v37, %v561_v36  ;;  %v545_v48 = vld [vmem:[#allocation6 + $0x50] sm:$0xff]  ;;  %v563_v51 = vld [vmem:[#allocation6 + $0xe0] sm:$0xff]  ;;  %v564_v15 = vld [vmem:[#allocation6 + $0xe8] sm:$0xff] }
 0x40a   : > { %v3135_v12 = vsel %vm1682_vm10, %v3111_v34, %v13588_v62  ;;  %v3217_v45 = vsel %vm1755_vm11, %v3214_v19, %v3216_v60  ;;  %8838 = vmatpush3.bf16.msra.mxu0 %v14026_v20  ;;  %v18176_v29 = vld [vmem:[#allocation138_spill] sm:$0xff]  ;;  %v2941_v62 = vpop.permute.xlu0 %2940  ;;  %v14061_v19 = vpack.c.bf16 %v546_v10, %v545_v48  ;;  %v3218_v53 = vrot.slane %v3158_v35, 7  ;;  %v548_v18 = vld [vmem:[#allocation6 + $0x68] sm:$0xff]  ;;  %v565_v56 = vld [vmem:[#allocation6 + $0xf0] sm:$0xff] }
 0x40b   : > { %v3090_v14 = vsel %vm1632_vm8, %v13747_v41, %v18176_v29  ;;  %v18177_v44 = vld [vmem:[#allocation34_spill] sm:$0xff]  ;;  %v3159_v52 = vsel %vm392_vm3, %v3135_v12, %v2939_v7  ;;  %8667 = vmatmul.mubr.msk.f32.gmra.mrb[10].mxu1 %vm1802_vm12, %v3217_v45  ;;  %9236 = vrot.lane.b32.xlu1 %v9235_v58, %s10124_s10  ;;  %v14066_v41 = vpack.c.bf16 %v564_v15, %v563_v51  ;;  %v18178_v50 = vld [vmem:[#allocation196_spill] sm:$0xff]  ;;  %v18179_v2 = vld [vmem:[#allocation197_spill] sm:$0xff]  ;;  %v2943_v12 = vpop.permute.xlu1 %2942 }
 0x40c   : > { %v3136_v42 = vsel %vm1682_vm10, %v3112_v3, %v18177_v44  ;;  %v3219_v23 = vrot.slane %v3159_v52, 7  ;;  %8840 = vmatprep.subr.bf16.mxu0 %v14052_v40  ;;  %v547_v9 = vld [vmem:[#allocation6 + $0x60] sm:$0xff]  ;;  %v3113_v60 = vsel %vm1657_vm9, %v3089_v25, %v18178_v50  ;;  %v3114_v55 = vsel %vm1657_vm9, %v3090_v14, %v18179_v2  ;;  %9241 = vrot.lane.b32.xlu0 %v9240_v27, %s10124_s10  ;;  %v14073_v36 = vld [vmem:[#allocation3 + $0xf0] sm:$0xff]  ;;  %v566_v37 = vld [vmem:[#allocation6 + $0xf8] sm:$0xff] }
 0x40d   : > { %v3160_v28 = vsel %vm392_vm3, %v3136_v42, %v2941_v62  ;;  %v9938_v35 = vld [vmem:[#allocation3 + $0xe8] sm:$0xff]  ;;  %v3137_v1 = vsel %vm1682_vm10, %v3113_v60, %v13632_v32  ;;  %v3138_v3 = vsel %vm1682_vm10, %v3114_v55, %v13644_v16  ;;  %v14082_v7 = vpack.c.bf16 %v548_v18, %v547_v9  ;;  %v3531_v14 = vld [vmem:[#allocation3 + $0x120] sm:$0xff]  ;;  %v549_v44 = vld [vmem:[#allocation6 + $0x70] sm:$0xff] }
 0x40e   : > { %v3221_v34 = vrot.slane %v3160_v28, 7  ;;  %v9250_v58 = vpack.i.bf16 %v14073_v36, %v9938_v35  ;;  %v3220_v25 = vsel %vm1755_vm11, %v3218_v53, %v3219_v23  ;;  %8842 = vmatpush3.bf16.msra.mxu0 %v14061_v19  ;;  %v3161_v27 = vsel %vm392_vm3, %v3137_v1, %v2943_v12  ;;  %v2945_v45 = vpop.permute.xlu0 %2944  ;;  %v18180_v10 = vld [vmem:[#allocation136_spill] sm:$0xff]  ;;  %v550_v42 = vld [vmem:[#allocation6 + $0x78] sm:$0xff]  ;;  %v18183_v55 = vld [vmem:[#allocation179_spill] sm:$0xff] }
 0x40f   : > { %8669 = vmatprep.mubr.msk.f32.mxu1 %vm1802_vm12, %v3220_v25  ;;  %8844 = vmatprep.subr.bf16.mxu0 %v14066_v41  ;;  %v14088_v32 = vpack.c.bf16 %v566_v37, %v565_v56  ;;  %v3091_v16 = vsel %vm1632_vm8, %v13782_v31, %v18180_v10  ;;  %v3223_v51 = vrot.slane %v3161_v27, 7  ;;  %v3162_v29 = vsel %vm392_vm3, %v3138_v3, %v2945_v45  ;;  %v18181_v52 = vld [vmem:[#allocation201_spill] sm:$0xff]  ;;  %v2947_v53 = vpop.permute.xlu1 %2946  ;;  %v18182_v2 = vld [vmem:[#allocation22_spill] sm:$0xff]  ;;  %v18185_v35 = vld [vmem:[#allocation23_spill] sm:$0xff] }
 0x410   : > { %v3222_v48 = vsel %vm1755_vm11, %v3219_v23, %v3221_v34  ;;  %9246 = vrot.lane.b32.xlu1 %v9245_v8, %s10124_s10  ;;  %v3115_v62 = vsel %vm1657_vm9, %v3091_v16, %v18181_v52  ;;  %v3224_v15 = vrot.slane %v3162_v29, 7  ;;  %9251 = vrot.lane.b32.xlu0 %v9250_v58, %s10124_s10  ;;  %v9940_v23 = vld [vmem:[#allocation3 + $0x108] sm:$0xff]  ;;  %v14106_v47 = vpack.c.bf16 %v550_v42, %v549_v44  ;;  %v9941_v18 = vld [vmem:[#allocation3 + $0x110] sm:$0xff]  ;;  %v18186_v3 = vld [vmem:[#allocation82_spill] sm:$0xff] }
 0x411   : > { %8670 = vmatmul.mubr.msk.f32.gmra.mrb[12].mxu1 %vm1802_vm12, %v3222_v48  ;;  %v3139_v31 = vsel %vm1682_vm10, %v3115_v62, %v13696_v5  ;;  %v9255_v28 = vpack.i.bf16 %v9940_v23, %v13665_v39  ;;  %v9260_v56 = vpack.i.bf16 %v3531_v14, %v9941_v18  ;;  %v4131_v39 = vrot.slane %v13944_v13, 1  ;;  %v18184_v13 = vld [vmem:[#allocation184_spill] sm:$0xff]  ;;  %v571_v12 = vld [vmem:[%s17185_s5] sm:$0xff]  ;;  %v18188_v16 = vld [vmem:[#allocation97_spill] sm:$0xff] }
 0x412   : > { %8846 = vmatpush3.bf16.msra.mxu0 %v14082_v7  ;;  %v3163_v11 = vsel %vm392_vm3, %v3139_v31, %v2947_v53  ;;  %v14109_v8 = vpop.permute.xlu0 %8971  ;;  %v3225_v9 = vsel %vm1755_vm11, %v3223_v51, %v3224_v15  ;;  %v17288_v1 = vrot.slane %v13999_v22, 1  ;;  %v572_v25 = vld [vmem:[%s17185_s5 + $0x8] sm:$0xff]  ;;  %v17289_v27 = vrot.slane %v13992_v61, 1  ;;  %v18189_v51 = vld [vmem:[#allocation194_spill] sm:$0xff]  ;;  %v18193_v53 = vld [vmem:[#allocation137_spill] sm:$0xff] }
 0x413   : > { %8848 = vmatprep.subr.bf16.mxu0 %v14088_v32  ;;  %v3226_v50 = vrot.slane %v3163_v11, 7  ;;  %8672 = vmatprep.mubr.msk.f32.mxu1 %vm1802_vm12, %v3225_v9  ;;  %v4132_v34 = vsel %vm691_vm1, %v18183_v55, %v4131_v39  ;;  %v14145_v45 = vpack.c.bf16 %v572_v25, %v571_v12  ;;  %v18187_v48 = vld [vmem:[#allocation112_spill] sm:$0xff]  ;;  %v4143_v14 = vrot.slane %v14073_v36, 1  ;;  %v18191_v62 = vld [vmem:[#allocation87_spill] sm:$0xff]  ;;  %v18196_v11 = vld [vmem:[#allocation129_spill] sm:$0xff] }
 0x414   : > { %9256 = vrot.lane.b32.xlu1 %v9255_v28, %s10124_s10  ;;  %9261 = vrot.lane.b32.xlu0 %v9260_v56, %s10124_s10  ;;  %v9280_v37 = vpack.i.bf16 %v4131_v39, %v4132_v34  ;;  %v18190_v44 = vld [vmem:[#allocation64_spill] sm:$0xff]  ;;  %v18195_v28 = vld [vmem:[#allocation115_spill] sm:$0xff]  ;;  %v4561_v18 = vrot.slane %v13864_v24, 7  ;;  %v4562_v56 = vrot.slane %v13904_v59, 7  ;;  %v4568_v39 = vrot.slane %v13895_v21, 7  ;;  %v574_v25 = vld [vmem:[%s17185_s5 + $0x18] sm:$0xff] }
 0x415   : > { %v3227_v5 = vsel %vm1755_vm11, %v3224_v15, %v3226_v50  ;;  %8860 = vmatprep.subr.bf16.mxu1 %v14145_v45  ;;  %v18192_v15 = vld [vmem:[#allocation199_spill] sm:$0xff]  ;;  %v573_v12 = vld [vmem:[%s17185_s5 + $0x10] sm:$0xff] }
 0x416   : > { %8850 = vmatpush3.bf16.msra.mxu0 %v14106_v47  ;;  %8673 = vmatmul.mubr.msk.f32.gmra.mrb[14].mxu1 %vm1802_vm12, %v3227_v5  ;;  %v14120_v60 = vpop.permute.xlu0 %8981  ;;  %v4144_v31 = vsel %vm691_vm1, %v18192_v15, %v4143_v14  ;;  %v18197_v50 = vld [vmem:[#allocation135_spill] sm:$0xff]  ;;  %v4563_v34 = vsel %vm1755_vm11, %v4561_v18, %v4562_v56 }
 0x417   : > { %8868 = vmatprep.subr.bf16.mxu0 %v13871_v38  ;;  %8683 = vmatprep.mubr.msk.f32.mxu1 %vm392_vm3, %v18182_v2  ;;  %v4139_v38 = vrot.slane %v14005_v54, 1  ;;  %v9290_v54 = vpack.i.bf16 %v17288_v1, %v17289_v27  ;;  %v9310_v23 = vpack.i.bf16 %v4143_v14, %v4144_v31  ;;  %v18198_v5 = vld [vmem:[#allocation139_spill] sm:$0xff] }
 0x418   : > { %9271 = vrot.lane.b32.xlu0 %v18184_v13, %s10125_s16  ;;  %v4569_v13 = vsel %vm1755_vm11, %v4562_v56, %v4568_v39  ;;  %v8974_v56 = vunpack.i.h.bf16 %v14109_v8  ;;  %v3438_v39 = vld [vmem:[#allocation3] sm:$0xff] }
 0x419   : > { %v4141_v29 = vsel %vm691_vm1, %v4139_v38, %v18189_v51 }
 0x41a   : > { %8684 = vmatmul.mubr.msk.f32.vlgmr.msra.gmra.mrb[16].mxu1 %vm392_vm3, %v18185_v35  ;;  %v14131_v58 = vpop.permute.xlu0 %8991  ;;  %v9300_v52 = vpack.i.bf16 %v4141_v29, %v4139_v38 }
 0x41b   : > { %8686 = vmatprep.mubr.msk.f32.mxu1 %vm392_vm3, %v18186_v3  ;;  %8862 = vmatpush3.bf16.msra.mxu1 %v14145_v45 }
 0x41c   : > { %9281 = vrot.lane.b32.xlu0 %v9280_v37, %s10125_s16 }
 0x41e   : > { %8687 = vmatmul.mubr.msk.f32.gmra.mrb[18].mxu1 %vm392_vm3, %v18187_v48  ;;  %v14149_v10 = vpop.permute.xlu0 %9001  ;;  %v14212_v48 = vpack.c.bf16 %v574_v25, %v573_v12  ;;  %v9942_v12 = vld [vmem:[#allocation3 + $0x8] sm:$0xff] }
 0x41f   : > { %8689 = vmatprep.mubr.msk.f32.mxu1 %vm392_vm3, %v18188_v16  ;;  %v4272_v25 = vsel %vm392_vm3, %v9942_v12, %v8974_v56 }
 0x420   : > { %9291 = vrot.lane.b32.xlu0 %v9290_v54, %s10125_s16  ;;  %8864 = vmatprep.subr.bf16.mxu1 %v14212_v48 }
 0x421   : > { %8866 = vmatpush3.bf16.msra.mxu1 %v14212_v48 }
 0x422   : > { %8690 = vmatmul.mubr.msk.f32.gmra.mrb[20].mxu1 %vm392_vm3, %v18190_v44  ;;  %v14165_v42 = vpop.permute.xlu0 %9011  ;;  %8900 = vmatprep.subr.bf16.mxu1 %v18118_v4 }
 0x423   : > { %8692 = vmatprep.mubr.msk.f32.mxu1 %vm392_vm3, %v18191_v62 }
 0x424   : > { %9301 = vrot.lane.b32.xlu0 %v9300_v52, %s10125_s16 }
 0x426   : > { %8693 = vmatmul.mubr.msk.f32.gmra.mrb[22].mxu1 %vm392_vm3, %v18193_v53  ;;  %v14174_v36 = vpop.permute.xlu0 %9021 }
 0x427   : > { %18194 = vst [vmem:[#allocation35_spill] sm:$0xff] %v14174_v36  ;;  %8695 = vmatprep.mubr.msk.f32.mxu1 %vm392_vm3, %v18195_v28 }
 0x428   : > { %9311 = vrot.lane.b32.xlu0 %v9310_v23, %s10125_s16 }
 0x42a   : > { %8696 = vmatmul.mubr.msk.f32.gmra.mrb[24].mxu1 %vm392_vm3, %v18196_v11  ;;  %v9032_v9 = vpop.permute.xlu0 %9031 }
 0x42b   : > { %8698 = vmatprep.mubr.msk.f32.mxu1 %vm392_vm3, %v18197_v50  ;;  %v8973_v50 = vunpack.i.l.bf16 %v14109_v8 }
 0x42d   : > { %v4271_v1 = vsel %vm392_vm3, %v3438_v39, %v8973_v50  ;;  %v18220_v39 = vld [vmem:[#allocation175_spill] sm:$0xff] }
 0x42e   : > { %8699 = vmatmul.mubr.msk.f32.gmra.mrb[26].mxu1 %vm392_vm3, %v18198_v5  ;;  %v14188_v2 = vpop.permute.xlu0 %9041 }
 0x42f   : > { %18199 = vst [vmem:[#allocation36_spill] sm:$0xff] %v14188_v2  ;;  %8701 = vmatprep.mubr.msk.f32.mxu1 %vm392_vm3, %v4563_v34  ;;  %v9034_v34 = vunpack.i.h.bf16 %v9032_v9 }
 0x431   : > { %v4297_v15 = vsel %vm4295_vm13, %v4272_v25, %v9034_v34 }
 0x432   : > { %8702 = vmatmul.mubr.msk.f32.gmra.mrb[28].mxu1 %vm392_vm3, %v4569_v13  ;;  %v14194_v24 = vpop.permute.xlu0 %9051  ;;  %v9033_v13 = vunpack.i.l.bf16 %v9032_v9 }
 0x433   : > { %18200 = vst [vmem:[#allocation37_spill] sm:$0xff] %v14194_v24 }
 0x434   : > { %v4296_v8 = vsel %vm4295_vm13, %v4271_v1, %v9033_v13 }
 0x436   : > { %v14196_v59 = vpop.permute.xlu0 %9061 }
 0x437   : > { %18201 = vst [vmem:[#allocation38_spill] sm:$0xff] %v14196_v59  ;;  %v4960_v59 = vld [vmem:[#allocation3 + $0x110] sm:$0xff] }
 0x43a   : > { %v14198_v35 = vpop.permute.xlu0 %9071 }
 0x43b   : > { %18202 = vst [vmem:[#allocation39_spill] sm:$0xff] %v14198_v35 }
 0x43e   : > { %v14200_v21 = vpop.permute.xlu0 %9081 }
 0x43f   : > { %18203 = vst [vmem:[#allocation40_spill] sm:$0xff] %v14200_v21 }
 0x442   : > { %v9092_v37 = vpop.permute.xlu0 %9091 }
 0x443   : > { %v9094_v27 = vunpack.i.h.bf16 %v9092_v37 }
 0x445   : > { %v14251_v56 = vsel %vm4320_vm14, %v4297_v15, %v9094_v27 }
 0x446   : > { %v14202_v3 = vpop.permute.xlu0 %9101  ;;  %18219 = vst [vmem:[#allocation56_spill] sm:$0xff] %v14251_v56 }
 0x447   : > { %18204 = vst [vmem:[#allocation41_spill] sm:$0xff] %v14202_v3 }
 0x44a   : > { %v14204_v38 = vpop.permute.xlu0 %9111 }
 0x44b   : > { %18205 = vst [vmem:[#allocation42_spill] sm:$0xff] %v14204_v38 }
 0x44e   : > { %v14214_v54 = vpop.permute.xlu0 %9121 }
 0x44f   : > { %18206 = vst [vmem:[#allocation43_spill] sm:$0xff] %v14214_v54  ;;  %v14458_v54 = vld [vmem:[#allocation3 + $0x1d8] sm:$0xff] }
 0x452   : > { %v14219_v16 = vpop.permute.xlu0 %9131 }
 0x453   : > { %18207 = vst [vmem:[#allocation44_spill] sm:$0xff] %v14219_v16 }
 0x456   : > { %v14221_v29 = vpop.permute.xlu0 %9141 }
 0x457   : > { %18208 = vst [vmem:[#allocation45_spill] sm:$0xff] %v14221_v29  ;;  %v9093_v29 = vunpack.i.l.bf16 %v9092_v37  ;;  %v18221_v37 = vld [vmem:[#allocation165_spill] sm:$0xff] }
 0x459   : > { %v4321_v9 = vsel %vm4320_vm14, %v4296_v8, %v9093_v29  ;;  %v3534_v8 = vld [vmem:[#allocation3 + $0x138] sm:$0xff] }
 0x45a   : > { %v9152_v14 = vpop.permute.xlu0 %9151  ;;  %v4465_v13 = vrot.slane %v4321_v9, 7 }
 0x45b   : > { %v9154_v51 = vunpack.i.h.bf16 %v9152_v14 }
 0x45d   : > { %v4346_v12 = vsel %vm392_vm3, %v18220_v39, %v9154_v51 }
 0x45e   : > { %v14223_v44 = vpop.permute.xlu0 %9161 }
 0x45f   : > { %18209 = vst [vmem:[#allocation46_spill] sm:$0xff] %v14223_v44 }
 0x462   : > { %v14225_v52 = vpop.permute.xlu0 %9171 }
 0x463   : > { %18210 = vst [vmem:[#allocation47_spill] sm:$0xff] %v14225_v52 }
 0x466   : > { %v14227_v62 = vpop.permute.xlu0 %9181 }
 0x467   : > { %18211 = vst [vmem:[#allocation48_spill] sm:$0xff] %v14227_v62  ;;  %v14439_v62 = vld [vmem:[#allocation3 + $0x218] sm:$0xff] }
 0x46a   : > { %v14229_v31 = vpop.permute.xlu0 %9191 }
 0x46b   : > { %18212 = vst [vmem:[#allocation49_spill] sm:$0xff] %v14229_v31  ;;  %v9153_v31 = vunpack.i.l.bf16 %v9152_v14 }
 0x46e   : > { %v14231_v53 = vpop.permute.xlu0 %9201 }
 0x46f   : > { %18213 = vst [vmem:[#allocation50_spill] sm:$0xff] %v14231_v53 }
 0x472   : > { %v9212_v23 = vpop.permute.xlu0 %9211 }
 0x473   : > { %v9213_v16 = vunpack.i.l.bf16 %v9212_v23 }
 0x476   : > { %v14233_v28 = vpop.permute.xlu0 %9221 }
 0x477   : > { %18214 = vst [vmem:[#allocation51_spill] sm:$0xff] %v14233_v28 }
 0x47a   : > { %v14235_v11 = vpop.permute.xlu0 %9231 }
 0x47b   : > { %18215 = vst [vmem:[#allocation52_spill] sm:$0xff] %v14235_v11 }
 0x47e   : > { %v14237_v18 = vpop.permute.xlu0 %9241 }
 0x47f   : > { %18216 = vst [vmem:[#allocation53_spill] sm:$0xff] %v14237_v18 }
 0x482   : > { %v14241_v5 = vpop.permute.xlu0 %9251 }
 0x483   : > { %18217 = vst [vmem:[#allocation54_spill] sm:$0xff] %v14241_v5  ;;  %v9214_v5 = vunpack.i.h.bf16 %v9212_v23  ;;  %v17298_v23 = vrot.slane %v14251_v56, 7 }
 0x485   : > { %v4370_v14 = vsel %vm4295_vm13, %v4346_v12, %v9214_v5  ;;  %v4269_v12 = vrot.slane %v3534_v8, 2 }
 0x486   : > { %v14245_v21 = vpop.permute.xlu0 %9261 }
 0x487   : > { %18218 = vst [vmem:[#allocation55_spill] sm:$0xff] %v14245_v21  ;;  %v4345_v21 = vsel %vm392_vm3, %v18221_v37, %v9153_v31 }
 0x488   : > { %v4369_v1 = vsel %vm4295_vm13, %v4345_v21, %v9213_v16  ;;  %v4467_v21 = vsel %vm1755_vm11, %v4465_v13, %v17298_v23  ;;  %v14272_v16 = vpop.permute.xlu1 %8976 }
 0x48a   : > { %v9272_v50 = vpop.permute.xlu0 %9271 }
 0x48b   : > { %v9274_v18 = vunpack.i.h.bf16 %v9272_v50  ;;  %v9273_v34 = vunpack.i.l.bf16 %v9272_v50 }
 0x48d   : > { %v4393_v29 = vsel %vm4320_vm14, %v4369_v1, %v9273_v34  ;;  %v14262_v27 = vsel %vm4320_vm14, %v4370_v14, %v9274_v18  ;;  %v14277_v18 = vpop.permute.xlu1 %8986 }
 0x48e   : > { %18222 = vst [vmem:[#allocation57_spill] sm:$0xff] %v14262_v27  ;;  %v4468_v15 = vrot.slane %v4393_v29, 7  ;;  %v17297_v51 = vrot.slane %v14262_v27, 7 }
 0x490   : > { %v4470_v31 = vsel %vm1755_vm11, %v4468_v15, %v17297_v51 }
 0x491   : > { %4719 = vmatprep.mubr.f32.mxu0 %v4470_v31  ;;  %v14282_v5 = vpop.permute.xlu1 %8996 }
 0x492   : > { %4720 = vmatmul.mubr.f32.vlgmr.msra.gmra.mrb[16].mxu0 %v4467_v21 }
 0x493   : > { %8870 = vmatpush3.bf16.msra.mxu0 %v13878_v63 }
 0x494   : > { %8872 = vmatprep.subr.bf16.mxu0 %v13907_v33 }
 0x495   : > { %v14287_v63 = vpop.permute.xlu1 %9006 }
 0x497   : > { %8874 = vmatpush3.bf16.msra.mxu0 %v13913_v0 }
 0x498   : > { %8876 = vmatprep.subr.bf16.mxu0 %v13938_v46 }
 0x499   : > { %v14292_v33 = vpop.permute.xlu1 %9016 }
 0x49b   : > { %8878 = vmatpush3.bf16.msra.mxu0 %v13947_v57 }
 0x49c   : > { %8880 = vmatprep.subr.bf16.mxu0 %v13974_v30 }
 0x49d   : > { %v14296_v0 = vpop.permute.xlu1 %9026 }
 0x49e   : > { %18223 = vst [vmem:[#allocation58_spill] sm:$0xff] %v14296_v0  ;;  %v14433_v0 = vld [vmem:[#allocation3 + $0x198] sm:$0xff] }
 0x49f   : > { %8882 = vmatpush3.bf16.msra.mxu0 %v13981_v49  ;;  %v14302_v49 = vld [vmem:[#allocation4] ss:$0 sm:$0xff] }
 0x4a0   : > { %8884 = vmatprep.subr.bf16.mxu0 %v14020_v43 }
 0x4a1   : > { %v14298_v46 = vpop.permute.xlu1 %9036 }
 0x4a2   : > { %18224 = vst [vmem:[#allocation59_spill] sm:$0xff] %v14298_v46 }
 0x4a3   : > { %8886 = vmatpush3.bf16.msra.mxu0 %v14026_v20 }
 0x4a4   : > { %8888 = vmatprep.subr.bf16.mxu0 %v14052_v40 }
 0x4a5   : > { %v14300_v57 = vpop.permute.xlu1 %9046 }
 0x4a6   : > { %18225 = vst [vmem:[#allocation60_spill] sm:$0xff] %v14300_v57 }
 0x4a7   : > { %8890 = vmatpush3.bf16.msra.mxu0 %v14061_v19 }
 0x4a8   : > { %8892 = vmatprep.subr.bf16.mxu0 %v14066_v41 }
 0x4ab   : > { %8894 = vmatpush3.bf16.msra.mxu0 %v14082_v7  ;;  %v14307_v7 = vpop.permute.xlu1 %9056 }
 0x4ac   : > { %8896 = vmatprep.subr.bf16.mxu0 %v14088_v32  ;;  %18226 = vst [vmem:[#allocation61_spill] sm:$0xff] %v14307_v7 }
 0x4af   : > { %8898 = vmatpush3.bf16.msra.mxu0 %v14106_v47  ;;  %v14312_v37 = vpop.permute.xlu1 %9066 }
 0x4b0   : > { %18227 = vst [vmem:[#allocation65_spill] sm:$0xff] %v14312_v37 }
 0x4bd   : > { %v8653_v30 = vpop.f32.mrb[0].mxu1 }
 0x4be   : > { %v3332_v43 = vadd.f32 %v14302_v49, %v8653_v30  ;;  %v3326_v20 = vpop.f32.mrb[1].mxu1 }
 0x4bf   : > { %v3327_v40 = vadd.f32 %v14302_v49, %v3326_v20 }
 0x4c0   : > { %v3406_v19 = vmax.f32 %v3332_v43, 0.0 }
 0x4c1   : > { %v3405_v41 = vmax.f32 %v3327_v40, 0.0 }
 0x4c2   : > { %3423 = vst.msk [vmem:[#allocation3 + $0x130] sm:$0xff] %vm392_vm3, %v3406_v19  ;;  %v4133_v19 = vrot.slane %v13964_v6, 1 }
 0x4c3   : > { %3422 = vst.msk [vmem:[#allocation3 + $0x128] sm:$0xff] %vm392_vm3, %v3405_v41 }
 0x4c4   : > { %v8656_v32 = vpop.f32.mrb[2].mxu1 }
 0x4c5   : > { %v3342_v47 = vadd.f32 %v14302_v49, %v8656_v32  ;;  %v3336_v25 = vpop.f32.mrb[3].mxu1  ;;  %v18228_v32 = vld [vmem:[#allocation133_spill] sm:$0xff] }
 0x4c6   : > { %v3337_v9 = vadd.f32 %v14302_v49, %v3336_v25 }
 0x4c7   : > { %v3408_v50 = vmax.f32 %v3342_v47, 0.0 }
 0x4c8   : > { %v3407_v39 = vmax.f32 %v3337_v9, 0.0 }
 0x4c9   : > { %3425 = vst.msk [vmem:[#allocation3 + $0x150] sm:$0xff] %vm392_vm3, %v3408_v50  ;;  %v14315_v1 = vld [vmem:[#allocation3 + $0x130] sm:$0xff] }
 0x4ca   : > { %v8659_v34 = vpop.f32.mrb[4].mxu1  ;;  %3424 = vst.msk [vmem:[#allocation3 + $0x148] sm:$0xff] %vm392_vm3, %v3407_v39  ;;  %v14319_v29 = vld [vmem:[#allocation3 + $0x128] sm:$0xff]  ;;  %v4267_v15 = vrot.slane %v14315_v1, 2  ;;  %v14335_v39 = vpop.permute.xlu1 %9076  ;;  %v5793_v27 = vld [vmem:[#allocation3 + $0x130] sm:$0xff] }
 0x4cb   : > { %v3352_v14 = vadd.f32 %v14302_v49, %v8659_v34  ;;  %v3346_v13 = vpop.f32.mrb[5].mxu1  ;;  %v9265_v21 = vpack.i.bf16 %v14315_v1, %v14319_v29  ;;  %v4148_v30 = vrot.slane %v14319_v29, 1  ;;  %v4266_v43 = vrot.slane %v14319_v29, 2  ;;  %18229 = vst [vmem:[#allocation66_spill] sm:$0xff] %v14335_v39  ;;  %v5792_v55 = vld [vmem:[#allocation3 + $0x128] sm:$0xff] }
 0x4cc   : > { %v3347_v31 = vadd.f32 %v14302_v49, %v3346_v13  ;;  %v4270_v40 = vsel %vm796_vm2, %v4267_v15, %v4269_v12 }
 0x4cd   : > { %v3410_v20 = vmax.f32 %v3352_v14, 0.0  ;;  %9266 = vrot.lane.b32.xlu1 %v9265_v21, %s10124_s10  ;;  %v9320_v47 = vpack.i.bf16 %v4148_v30, %v18228_v32  ;;  %v4268_v25 = vsel %vm796_vm2, %v4266_v43, %v4267_v15  ;;  %v4576_v8 = vrot.slane %v4266_v43, 7  ;;  %v18231_v43 = vld [vmem:[#allocation186_spill] sm:$0xff] }
 0x4ce   : > { %v3409_v41 = vmax.f32 %v3347_v31, 0.0  ;;  %v4577_v9 = vrot.slane %v4268_v25, 7  ;;  %v4583_v50 = vrot.slane %v4270_v40, 7  ;;  %v18230_v14 = vrot.slane %v13992_v61, 1  ;;  %v4945_v40 = vld [vmem:[#allocation3 + $0x28] sm:$0xff] }
 0x4cf   : > { %3427 = vst.msk [vmem:[#allocation3 + $0x170] sm:$0xff] %vm392_vm3, %v3410_v20  ;;  %9321 = vrot.lane.b32.xlu0 %v9320_v47, %s10125_s16  ;;  %v4137_v15 = vrot.slane %v14001_v26, 1  ;;  %v18232_v26 = vrot.slane %v13999_v22, 1 }
 0x4d0   : > { %3426 = vst.msk [vmem:[#allocation3 + $0x168] sm:$0xff] %vm392_vm3, %v3409_v41  ;;  %v8662_v6 = vpop.f32.mrb[6].mxu1  ;;  %v4578_v12 = vsel %vm1755_vm11, %v4576_v8, %v4577_v9  ;;  %v4584_v34 = vsel %vm1755_vm11, %v4577_v9, %v4583_v50  ;;  %v4135_v13 = vsel %vm691_vm1, %v4133_v19, %v18230_v14  ;;  %v14355_v8 = vpop.permute.xlu1 %9086  ;;  %v4946_v50 = vld [vmem:[#allocation3 + $0x30] sm:$0xff] }
 0x4d1   : > { %v3362_v31 = vadd.f32 %v14302_v49, %v8662_v6  ;;  %v3356_v21 = vpop.f32.mrb[7].mxu1  ;;  %8704 = vmatprep.mubr.msk.f32.mxu1 %vm392_vm3, %v4578_v12  ;;  %9276 = vrot.lane.b32.xlu1 %v18231_v43, %s10125_s16  ;;  %v9285_v61 = vpack.i.bf16 %v4135_v13, %v4133_v19  ;;  %v4138_v25 = vsel %vm691_vm1, %v18232_v26, %v4137_v15  ;;  %v4947_v19 = vld [vmem:[#allocation3 + $0x48] sm:$0xff] }
 0x4d2   : > { %v3357_v20 = vadd.f32 %v14302_v49, %v3356_v21  ;;  %8705 = vmatmul.mubr.msk.f32.gmra.mrb[30].mxu1 %vm392_vm3, %v4584_v34  ;;  %18233 = vst [vmem:[#allocation67_spill] sm:$0xff] %v14355_v8  ;;  %v9295_v34 = vpack.i.bf16 %v4137_v15, %v4138_v25  ;;  %v4949_v21 = vld [vmem:[#allocation3 + $0x68] sm:$0xff]  ;;  %v4149_v15 = vrot.slane %v14315_v1, 1 }
 0x4d3   : > { %v3412_v41 = vmax.f32 %v3362_v31, 0.0  ;;  %8715 = vmatprep.mubr.msk.f32.mxu1 %vm392_vm3, %v4945_v40  ;;  %v4948_v31 = vld [vmem:[#allocation3 + $0x50] sm:$0xff]  ;;  %v4951_v26 = vld [vmem:[#allocation3 + $0x88] sm:$0xff] }
 0x4d4   : > { %v3411_v47 = vmax.f32 %v3357_v20, 0.0  ;;  %v14369_v43 = vpop.permute.xlu1 %9096  ;;  %v5796_v52 = vld [vmem:[#allocation3 + $0x148] sm:$0xff] }
 0x4d5   : > { %3429 = vst.msk [vmem:[#allocation3 + $0x190] sm:$0xff] %vm392_vm3, %v3412_v41  ;;  %9286 = vrot.lane.b32.xlu1 %v9285_v61, %s10125_s16  ;;  %18234 = vst [vmem:[#allocation68_spill] sm:$0xff] %v14369_v43  ;;  %v18235_v41 = vld [vmem:[#allocation202_spill] sm:$0xff]  ;;  %v4950_v61 = vld [vmem:[#allocation3 + $0x70] sm:$0xff] }
 0x4d6   : > { %v8665_v9 = vpop.f32.mrb[8].mxu1  ;;  %3428 = vst.msk [vmem:[#allocation3 + $0x188] sm:$0xff] %vm392_vm3, %v3411_v47  ;;  %8716 = vmatmul.mubr.msk.f32.vlgmr.msra.gmra.mrb[32].mxu1 %vm392_vm3, %v4946_v50  ;;  %v14478_v38 = vld [vmem:[#allocation3 + $0x170] sm:$0xff] }
 0x4d7   : > { %v3372_v6 = vadd.f32 %v14302_v49, %v8665_v9  ;;  %v3366_v12 = vpop.f32.mrb[9].mxu1  ;;  %8718 = vmatprep.mubr.msk.f32.mxu1 %vm392_vm3, %v4947_v19  ;;  %8902 = vmatpush3.bf16.msra.mxu1 %v18118_v4  ;;  %v4150_v9 = vsel %vm691_vm1, %v4148_v30, %v4149_v15  ;;  %v18238_v19 = vld [vmem:[#allocation130_spill] sm:$0xff] }
 0x4d8   : > { %v3367_v22 = vadd.f32 %v14302_v49, %v3366_v12  ;;  %8904 = vmatprep.subr.bf16.mxu1 %v13770_v17  ;;  %v14385_v50 = vpop.permute.xlu1 %9106  ;;  %v18237_v12 = vld [vmem:[#allocation140_spill] sm:$0xff] }
 0x4d9   : > { %v3414_v14 = vmax.f32 %v3372_v6, 0.0  ;;  %9296 = vrot.lane.b32.xlu1 %v9295_v34, %s10125_s16  ;;  %18236 = vst [vmem:[#allocation69_spill] sm:$0xff] %v14385_v50  ;;  %v4952_v34 = vld [vmem:[#allocation3 + $0x90] sm:$0xff] }
 0x4da   : > { %v3413_v13 = vmax.f32 %v3367_v22, 0.0  ;;  %8719 = vmatmul.mubr.msk.f32.gmra.mrb[34].mxu1 %vm392_vm3, %v4948_v31  ;;  %v18239_v22 = vpack.i.bf16 %v18237_v12, %v18238_v19  ;;  %v4953_v31 = vld [vmem:[#allocation3 + $0xa8] sm:$0xff] }
 0x4db   : > { %3431 = vst.msk [vmem:[#allocation3 + $0x1b0] sm:$0xff] %vm392_vm3, %v3414_v14  ;;  %8721 = vmatprep.mubr.msk.f32.mxu1 %vm392_vm3, %v4949_v21  ;;  %8906 = vmatpush3.bf16.msra.mxu1 %v13770_v17  ;;  %v9325_v21 = vpack.i.bf16 %v4149_v15, %v4150_v9  ;;  %v14410_v15 = vld [vmem:[#allocation3 + $0x168] sm:$0xff]  ;;  %v14412_v9 = vld [vmem:[#allocation3 + $0x170] sm:$0xff] }
 0x4dc   : > { %3430 = vst.msk [vmem:[#allocation3 + $0x1a8] sm:$0xff] %vm392_vm3, %v3413_v13  ;;  %8908 = vmatprep.subr.bf16.mxu1 %v14145_v45  ;;  %v4957_v19 = vld [vmem:[#allocation3 + $0xe8] sm:$0xff]  ;;  %v6585_v11 = vrot.slane %v14410_v15, 2 }
 0x4dd   : > { %9306 = vrot.lane.b32.xlu1 %v18235_v41, %s10125_s16  ;;  %v14397_v41 = vld [vmem:[#allocation3 + $0x148] sm:$0xff] }
 0x4de   : > { %v8668_v4 = vpop.f32.mrb[10].mxu1  ;;  %8722 = vmatmul.mubr.msk.f32.gmra.mrb[36].mxu1 %vm392_vm3, %v4950_v61  ;;  %v14399_v61 = vld [vmem:[#allocation3 + $0x150] sm:$0xff]  ;;  %v14450_v56 = vld [vmem:[#allocation3 + $0x188] sm:$0xff] }
 0x4df   : > { %v3382_v20 = vadd.f32 %v14302_v49, %v8668_v4  ;;  %v3376_v40 = vpop.f32.mrb[11].mxu1  ;;  %8724 = vmatprep.mubr.msk.f32.mxu1 %vm392_vm3, %v4951_v26  ;;  %v4954_v4 = vld [vmem:[#allocation3 + $0xb0] sm:$0xff] }
 0x4e0   : > { %v3377_v47 = vadd.f32 %v14302_v49, %v3376_v40  ;;  %v4955_v40 = vld [vmem:[#allocation3 + $0xc8] sm:$0xff] }
 0x4e1   : > { %v3416_v25 = vmax.f32 %v3382_v20, 0.0  ;;  %9316 = vrot.lane.b32.xlu1 %v18239_v22, %s10125_s16  ;;  %v14414_v22 = vld [vmem:[#allocation3 + $0x198] sm:$0xff] }
 0x4e2   : > { %v3415_v17 = vmax.f32 %v3377_v47, 0.0  ;;  %8725 = vmatmul.mubr.msk.f32.gmra.mrb[38].mxu1 %vm392_vm3, %v4952_v34  ;;  %v14401_v47 = vld [vmem:[#allocation3 + $0x138] sm:$0xff]  ;;  %v14416_v34 = vpop.permute.xlu1 %9116  ;;  %v6593_v53 = vrot.slane %v14414_v22, 2  ;;  %v4958_v22 = vld [vmem:[#allocation3 + $0xf0] sm:$0xff] }
 0x4e3   : > { %3433 = vst.msk [vmem:[#allocation3 + $0x1d0] sm:$0xff] %vm392_vm3, %v3416_v25  ;;  %8727 = vmatprep.mubr.msk.f32.mxu1 %vm392_vm3, %v4953_v31  ;;  %v5855_v25 = vld [vmem:[#allocation3 + $0x158] sm:$0xff]  ;;  %18240 = vst [vmem:[#allocation70_spill] sm:$0xff] %v14416_v34  ;;  %v6581_v31 = vrot.slane %v14399_v61, 2  ;;  %v14474_v35 = vld [vmem:[#allocation3 + $0x1a8] sm:$0xff] }
 0x4e4   : > { %v8671_v6 = vpop.f32.mrb[12].mxu1  ;;  %3432 = vst.msk [vmem:[#allocation3 + $0x1c8] sm:$0xff] %vm392_vm3, %v3415_v17  ;;  %v14404_v17 = vld [vmem:[#allocation3 + $0x178] sm:$0xff]  ;;  %v6583_v23 = vrot.slane %v5855_v25, 2 }
 0x4e5   : > { %v3392_v14 = vadd.f32 %v14302_v49, %v8671_v6  ;;  %v3386_v13 = vpop.f32.mrb[13].mxu1  ;;  %9326 = vrot.lane.b32.xlu1 %v9325_v21, %s10125_s16  ;;  %v14406_v6 = vld [vmem:[#allocation3 + $0x158] sm:$0xff]  ;;  %v6588_v8 = vrot.slane %v14404_v17, 2  ;;  %v14443_v17 = vld [vmem:[#allocation3 + $0x190] sm:$0xff] }
 0x4e6   : > { %v3387_v30 = vadd.f32 %v14302_v49, %v3386_v13  ;;  %8728 = vmatmul.mubr.msk.f32.gmra.mrb[40].mxu1 %vm392_vm3, %v4954_v4  ;;  %v6580_v13 = vrot.slane %v14397_v41, 2  ;;  %v14424_v21 = vld [vmem:[#allocation3 + $0x1d8] sm:$0xff]  ;;  %v6586_v4 = vrot.slane %v14412_v9, 2 }
 0x4e7   : > { %v3418_v20 = vmax.f32 %v3392_v14, 0.0  ;;  %8730 = vmatprep.mubr.msk.f32.mxu1 %vm392_vm3, %v4955_v40  ;;  %v4956_v14 = vld [vmem:[#allocation3 + $0xd0] sm:$0xff] }
 0x4e8   : > { %v3417_v26 = vmax.f32 %v3387_v30, 0.0  ;;  %v14422_v30 = vld [vmem:[#allocation3 + $0x1b8] sm:$0xff]  ;;  %v6582_v44 = vsel %vm796_vm2, %v6580_v13, %v6581_v31  ;;  %v6818_v39 = vrot.slane %v6580_v13, 7  ;;  %v6833_v13 = vrot.slane %v6585_v11, 7 }
 0x4e9   : > { %3435 = vst.msk [vmem:[#allocation3 + $0x1f0] sm:$0xff] %vm392_vm3, %v3418_v20  ;;  %v14427_v20 = vld [vmem:[#allocation3 + $0x178] sm:$0xff]  ;;  %v8674_v51 = vpop.f32.mrb[14].mxu1  ;;  %v18261_v2 = vrot.slane %v14422_v30, 2 }
 0x4ea   : > { %3434 = vst.msk [vmem:[#allocation3 + $0x1e8] sm:$0xff] %vm392_vm3, %v3417_v26  ;;  %v14430_v26 = vld [vmem:[#allocation3 + $0x1f8] sm:$0xff]  ;;  %v3402_v12 = vadd.f32 %v14302_v49, %v8674_v51  ;;  %v3396_v32 = vpop.f32.mrb[15].mxu1  ;;  %8731 = vmatmul.mubr.msk.f32.gmra.mrb[42].mxu1 %vm392_vm3, %v4956_v14  ;;  %v6584_v51 = vsel %vm796_vm2, %v6581_v31, %v6583_v23  ;;  %v14469_v23 = vrot.slane %v5792_v55, 2  ;;  %v6010_v31 = vrot.slane %v5793_v27, 2  ;;  %v5813_v36 = vld [vmem:[#allocation3 + $0x1d0] sm:$0xff] }
 0x4eb   : > { %v3397_v25 = vadd.f32 %v14302_v49, %v3396_v32  ;;  %8733 = vmatprep.mubr.msk.f32.mxu1 %vm392_vm3, %v4957_v19  ;;  %v14460_v19 = vpop.permute.xlu1 %9126  ;;  %v4959_v49 = vld [vmem:[#allocation3 + $0x108] sm:$0xff]  ;;  %v14466_v32 = vsel %vm796_vm2, %v6585_v11, %v6586_v4  ;;  %v6825_v37 = vrot.slane %v6584_v51, 7  ;;  %v14481_v55 = vrot.slane %v5796_v52, 2 }
 0x4ec   : > { %v3420_v28 = vmax.f32 %v3402_v12, 0.0  ;;  %v5797_v12 = vld [vmem:[#allocation3 + $0x150] sm:$0xff]  ;;  %18242 = vst [vmem:[#allocation72_spill] sm:$0xff] %v14460_v19  ;;  %18244 = vst [vmem:[#allocation74_spill] sm:$0xff] %v14469_v23  ;;  %v6819_v19 = vrot.slane %v6582_v44, 7  ;;  %v6834_v44 = vrot.slane %v14466_v32, 7  ;;  %v14505_v32 = vsel %vm796_vm2, %v14469_v23, %v6010_v31 }
 0x4ed   : > { %v3419_v14 = vmax.f32 %v3397_v25, 0.0  ;;  %v14454_v40 = vpop.f32.mrb[16].mxu1  ;;  %v6591_v25 = vrot.slane %v14443_v17, 2  ;;  %18245 = vst [vmem:[#allocation75_spill] sm:$0xff] %v14481_v55  ;;  %v6015_v27 = vrot.slane %v5797_v12, 2  ;;  %v6595_v52 = vrot.slane %v14474_v35, 2 }
 0x4ee   : > { %18241 = vst [vmem:[#allocation71_spill] sm:$0xff] %v14454_v40  ;;  %3437 = vst.msk [vmem:[#allocation3 + $0x210] sm:$0xff] %vm392_vm3, %v3420_v28  ;;  %v14463_v34 = vpop.f32.mrb[17].mxu1  ;;  %v5800_v40 = vld [vmem:[#allocation3 + $0x168] sm:$0xff]  ;;  %8734 = vmatmul.mubr.msk.f32.gmra.mrb[44].mxu1 %vm392_vm3, %v4958_v22  ;;  %v6590_v28 = vrot.slane %v14450_v56, 2  ;;  %v6589_v22 = vsel %vm796_vm2, %v6586_v4, %v6588_v8  ;;  %v14497_v12 = vld [vmem:[#allocation3 + $0x190] sm:$0xff]  ;;  %v6820_v8 = vsel %vm1755_vm11, %v6818_v39, %v6819_v19 }
 0x4ef   : > { %18243 = vst [vmem:[#allocation73_spill] sm:$0xff] %v14463_v34  ;;  %3436 = vst.msk [vmem:[#allocation3 + $0x208] sm:$0xff] %vm392_vm3, %v3419_v14  ;;  %v14476_v34 = vld [vmem:[#allocation3 + $0x1b0] sm:$0xff]  ;;  %8736 = vmatprep.mubr.msk.f32.mxu1 %vm392_vm3, %v4959_v49  ;;  %v14488_v3 = vrot.slane %v5800_v40, 2  ;;  %v14493_v49 = vsel %vm796_vm2, %v6591_v25, %v6593_v53  ;;  %v6020_v11 = vrot.slane %v14478_v38, 2  ;;  %v5804_v40 = vld [vmem:[#allocation3 + $0x188] sm:$0xff] }
 0x4f0   : > { %v6596_v51 = vrot.slane %v14476_v34, 2  ;;  %v6592_v4 = vsel %vm796_vm2, %v6590_v28, %v6591_v25  ;;  %18249 = vst [vmem:[#allocation143_spill] sm:$0xff] %v14505_v32  ;;  %v18250_v53 = vrot.slane %v14401_v47, 2  ;;  %v6840_v38 = vrot.slane %v6589_v22, 7  ;;  %v14516_v39 = vld [vmem:[#allocation3 + $0x1c8] sm:$0xff]  ;;  %v14518_v25 = vld [vmem:[#allocation3 + $0x1d0] sm:$0xff] }
 0x4f1   : > { %v14484_v50 = vpop.f32.mrb[18].mxu1  ;;  %18247 = vst [vmem:[#allocation77_spill] sm:$0xff] %v14488_v3  ;;  %18253 = vst [vmem:[#allocation19_spill] sm:$0xff] %v14518_v25  ;;  %v18255_v47 = vrot.slane %v14406_v6, 2  ;;  %v6025_v22 = vrot.slane %v14497_v12, 2  ;;  %v6849_v24 = vrot.slane %v6592_v4, 7 }
 0x4f2   : > { %18246 = vst [vmem:[#allocation76_spill] sm:$0xff] %v14484_v50  ;;  %v14490_v43 = vpop.f32.mrb[19].mxu1  ;;  %8737 = vmatmul.mubr.msk.f32.gmra.mrb[46].mxu1 %vm392_vm3, %v4960_v59  ;;  %v14510_v14 = vsel %vm796_vm2, %v6010_v31, %v18250_v53  ;;  %v14512_v50 = vpop.permute.xlu1 %9136  ;;  %v6826_v59 = vsel %vm1755_vm11, %v6819_v19, %v6825_v37  ;;  %v6855_v37 = vrot.slane %v14493_v49, 7  ;;  %v5808_v19 = vld [vmem:[#allocation3 + $0x1a8] sm:$0xff]  ;;  %v14537_v57 = vsel %vm796_vm2, %v6595_v52, %v6596_v51  ;;  %v5810_v12 = vld [vmem:[#allocation3 + $0x1b8] sm:$0xff] }
 0x4f3   : > { %18248 = vst [vmem:[#allocation142_spill] sm:$0xff] %v14490_v43  ;;  %18251 = vst [vmem:[#allocation18_spill] sm:$0xff] %v14510_v14  ;;  %8747 = vmatprep.mubr.msk.f32.mxu1 %vm392_vm3, %v6820_v8  ;;  %v14522_v43 = vsel %vm796_vm2, %v14481_v55, %v6015_v27  ;;  %v14527_v31 = vsel %vm796_vm2, %v6015_v27, %v18255_v47  ;;  %v6835_v8 = vsel %vm1755_vm11, %v6833_v13, %v6834_v44  ;;  %v5812_v6 = vld [vmem:[#allocation3 + $0x1c8] sm:$0xff]  ;;  %v5809_v27 = vld [vmem:[#allocation3 + $0x1b0] sm:$0xff] }
 0x4f4   : > { %18252 = vst [vmem:[#allocation144_spill] sm:$0xff] %v14512_v50  ;;  %18254 = vst [vmem:[#allocation147_spill] sm:$0xff] %v14522_v43  ;;  %v6848_v50 = vrot.slane %v6590_v28, 7  ;;  %v14541_v47 = vsel %vm796_vm2, %v14488_v3, %v6020_v11  ;;  %v14543_v13 = vrot.slane %v5804_v40, 2  ;;  %v6600_v28 = vrot.slane %v14516_v39, 2  ;;  %v14556_v46 = vld [vmem:[#allocation3 + $0x1e8] sm:$0xff] }
 0x4f5   : > { %18256 = vst [vmem:[#allocation145_spill] sm:$0xff] %v14527_v31  ;;  %v14529_v53 = vpop.f32.mrb[20].mxu1  ;;  %18259 = vst [vmem:[#allocation100_spill] sm:$0xff] %v14541_v47  ;;  %v6601_v49 = vrot.slane %v14518_v25, 2  ;;  %v6599_v40 = vsel %vm796_vm2, %v6596_v51, %v18261_v2  ;;  %v14561_v25 = vrot.slane %v5808_v19, 2  ;;  %v14569_v30 = vrot.slane %v5812_v6, 2 }
 0x4f6   : > { %18257 = vst [vmem:[#allocation11_spill] sm:$0xff] %v14529_v53  ;;  %v14534_v7 = vpop.f32.mrb[21].mxu1  ;;  %18260 = vst [vmem:[#allocation12_spill] sm:$0xff] %v14543_v13  ;;  %8748 = vmatmul.mubr.msk.f32.vlgmr.msra.gmra.mrb[48].mxu1 %vm392_vm3, %v6826_v59  ;;  %v14558_v59 = vld [vmem:[#allocation3 + $0x1f0] sm:$0xff]  ;;  %v6035_v2 = vrot.slane %v5813_v36, 2  ;;  %v14571_v51 = vpop.permute.xlu1 %9146  ;;  %v6850_v19 = vsel %vm1755_vm11, %v6848_v50, %v6849_v24  ;;  %v18266_v4 = vrot.slane %v14427_v20, 2  ;;  %v6856_v50 = vsel %vm1755_vm11, %v6849_v24, %v6855_v37 }
 0x4f7   : > { %18258 = vst [vmem:[#allocation150_spill] sm:$0xff] %v14534_v7  ;;  %8750 = vmatprep.mubr.msk.f32.mxu1 %vm392_vm3, %v6835_v8  ;;  %v6863_v7 = vrot.slane %v6595_v52, 7  ;;  %18262 = vst [vmem:[#allocation13_spill] sm:$0xff] %v14556_v46  ;;  %8910 = vmatpush3.bf16.msra.mxu1 %v14145_v45  ;;  %v6864_v8 = vrot.slane %v14537_v57, 7  ;;  %v6030_v52 = vrot.slane %v5809_v27, 2  ;;  %v6841_v45 = vsel %vm1755_vm11, %v6834_v44, %v6840_v38  ;;  %v14607_v44 = vld [vmem:[#allocation3 + $0x208] sm:$0xff] }
 0x4f8   : > { %18263 = vst [vmem:[#allocation116_spill] sm:$0xff] %v14558_v59  ;;  %18264 = vst [vmem:[#allocation101_spill] sm:$0xff] %v14561_v25  ;;  %8912 = vmatprep.subr.bf16.mxu1 %v14212_v48  ;;  %v14580_v31 = vsel %vm796_vm2, %v6020_v11, %v18266_v4  ;;  %v6032_v57 = vrot.slane %v5810_v12, 2  ;;  %v14584_v6 = vsel %vm796_vm2, %v6600_v28, %v6601_v49  ;;  %v6605_v36 = vrot.slane %v14556_v46, 2  ;;  %v14592_v11 = vld [vmem:[#allocation3 + $0x210] sm:$0xff]  ;;  %v5881_v47 = vld [vmem:[#allocation3 + $0x228] sm:$0xff] }
 0x4f9   : > { %v14565_v32 = vpop.f32.mrb[22].mxu1  ;;  %18265 = vst [vmem:[#allocation102_spill] sm:$0xff] %v14569_v30  ;;  %18267 = vst [vmem:[#allocation151_spill] sm:$0xff] %v14580_v31  ;;  %v6606_v27 = vrot.slane %v14558_v59, 2  ;;  %v6870_v20 = vrot.slane %v6599_v40, 7  ;;  %v18269_v38 = vrot.slane %v14433_v0, 2  ;;  %v14602_v4 = vsel %vm796_vm2, %v14543_v13, %v6025_v22 }
 0x4fa   : > { %v14573_v53 = vpop.f32.mrb[23].mxu1  ;;  %8751 = vmatmul.mubr.msk.f32.gmra.mrb[50].mxu1 %vm392_vm3, %v6841_v45  ;;  %18268 = vst [vmem:[#allocation103_spill] sm:$0xff] %v14592_v11  ;;  %18271 = vst [vmem:[#allocation155_spill] sm:$0xff] %v14602_v4  ;;  %v14611_v24 = vsel %vm796_vm2, %v14569_v30, %v6035_v2  ;;  %v18275_v0 = vrot.slane %v14458_v54, 2  ;;  %v6878_v40 = vrot.slane %v6600_v28, 7  ;;  %v6615_v14 = vrot.slane %v5881_v47, 2 }
 0x4fb   : > { %8753 = vmatprep.mubr.msk.f32.mxu1 %vm392_vm3, %v6850_v19  ;;  %8914 = vmatpush3.bf16.msra.mxu1 %v14212_v48  ;;  %v14598_v12 = vsel %vm796_vm2, %v6025_v22, %v18269_v38  ;;  %v6865_v19 = vsel %vm1755_vm11, %v6863_v7, %v6864_v8  ;;  %18273 = vst [vmem:[#allocation20_spill] sm:$0xff] %v14611_v24  ;;  %v6879_v7 = vrot.slane %v14584_v6, 7  ;;  %v18278_v38 = vrot.slane %v14424_v21, 2  ;;  %v14638_v6 = vpop.permute.xlu1 %9156 }
 0x4fc   : > { %18270 = vst [vmem:[#allocation117_spill] sm:$0xff] %v14598_v12  ;;  %v14615_v48 = vsel %vm796_vm2, %v14561_v25, %v6030_v52  ;;  %v14620_v37 = vsel %vm796_vm2, %v6035_v2, %v18275_v0  ;;  %v6607_v54 = vsel %vm796_vm2, %v6605_v36, %v6606_v27  ;;  %v6611_v2 = vrot.slane %v14592_v11, 2 }
 0x4fd   : > { %v14604_v45 = vpop.f32.mrb[24].mxu1  ;;  %18274 = vst [vmem:[#allocation153_spill] sm:$0xff] %v14615_v48  ;;  %18276 = vst [vmem:[#allocation14_spill] sm:$0xff] %v14620_v37  ;;  %v6604_v3 = vsel %vm796_vm2, %v6601_v49, %v18278_v38  ;;  %v14634_v0 = vsel %vm796_vm2, %v6030_v52, %v6032_v57  ;;  %v6610_v21 = vrot.slane %v14607_v44, 2  ;;  %v5882_v49 = vld [vmem:[#allocation3 + $0x230] sm:$0xff]  ;;  %v6871_v28 = vsel %vm1755_vm11, %v6864_v8, %v6870_v20 }
 0x4fe   : > { %18272 = vst [vmem:[#allocation154_spill] sm:$0xff] %v14604_v45  ;;  %v14622_v22 = vpop.f32.mrb[25].mxu1  ;;  %8754 = vmatmul.mubr.msk.f32.gmra.mrb[52].mxu1 %vm392_vm3, %v6856_v50  ;;  %18279 = vst [vmem:[#allocation158_spill] sm:$0xff] %v14634_v0  ;;  %v6616_v4 = vrot.slane %v5882_v49, 2  ;;  %v6880_v12 = vsel %vm1755_vm11, %v6878_v40, %v6879_v7  ;;  %v6885_v31 = vrot.slane %v6604_v3, 7  ;;  %v5883_v50 = vld [vmem:[#allocation3 + $0x238] sm:$0xff] }
 0x4ff   : > { %18277 = vst [vmem:[#allocation118_spill] sm:$0xff] %v14622_v22  ;;  %8756 = vmatprep.mubr.msk.f32.mxu1 %vm392_vm3, %v6865_v19  ;;  %v6491_v19 = vrot.slane %v14556_v46, 1  ;;  %v6492_v48 = vrot.slane %v14558_v59, 1  ;;  %v6893_v52 = vrot.slane %v6605_v36, 7  ;;  %v6894_v37 = vrot.slane %v6607_v54, 7 }
 0x500   : > { %v18282_v47 = vrot.slane %v14430_v26, 2  ;;  %v6494_v20 = vrot.slane %v14607_v44, 1  ;;  %v6612_v3 = vsel %vm796_vm2, %v6610_v21, %v6611_v2  ;;  %v17354_v49 = vrot.slane %v14592_v11, 1  ;;  %v14673_v26 = vpop.permute.xlu1 %9166 }
 0x501   : > { %v14648_v57 = vpop.f32.mrb[26].mxu1  ;;  %v6493_v40 = vsel %vm691_vm1, %v6491_v19, %v6492_v48  ;;  %v6618_v38 = vrot.slane %v5883_v50, 2  ;;  %v6886_v54 = vsel %vm1755_vm11, %v6879_v7, %v6885_v31  ;;  %v6895_v50 = vsel %vm1755_vm11, %v6893_v52, %v6894_v37  ;;  %v14692_v31 = vld [vmem:[#allocation3 + $0x1f0] sm:$0xff]  ;;  %v14694_v7 = vld [vmem:[#allocation3 + $0x208] sm:$0xff] }
 0x502   : > { %18280 = vst [vmem:[#allocation104_spill] sm:$0xff] %v14648_v57  ;;  %v14652_v13 = vpop.f32.mrb[27].mxu1  ;;  %8757 = vmatmul.mubr.msk.f32.gmra.mrb[54].mxu1 %vm392_vm3, %v6871_v28  ;;  %v6609_v8 = vsel %vm796_vm2, %v6606_v27, %v18282_v47  ;;  %v14669_v28 = vpack.i.bf16 %v6493_v40, %v6491_v19  ;;  %v14671_v36 = vpack.i.bf16 %v6494_v20, %v6492_v48  ;;  %v6908_v48 = vrot.slane %v6610_v21, 7  ;;  %v18335_v57 = vld [vmem:[#allocation130_spill] sm:$0xff] }
 0x503   : > { %18281 = vst [vmem:[#allocation105_spill] sm:$0xff] %v14652_v13  ;;  %8759 = vmatprep.mubr.msk.f32.mxu1 %vm392_vm3, %v6880_v12  ;;  %v6900_v12 = vrot.slane %v6609_v8, 7  ;;  %v6617_v47 = vsel %vm796_vm2, %v6615_v14, %v6616_v4  ;;  %v14682_v24 = vsel %vm691_vm1, %v6494_v20, %v17354_v49  ;;  %v6909_v19 = vrot.slane %v6612_v3, 7  ;;  %18290 = vst [vmem:[#allocation32_spill] sm:$0xff] %v14692_v31  ;;  %v14696_v8 = vld [vmem:[#allocation3 + $0x210] sm:$0xff] }
 0x504   : > { %18284 = vst [vmem:[#allocation119_spill] sm:$0xff] %v14669_v28  ;;  %18285 = vst [vmem:[#allocation160_spill] sm:$0xff] %v14671_v36  ;;  %v18288_v40 = vrot.slane %v14439_v62, 2  ;;  %v14689_v28 = vld [vmem:[#allocation3 + $0x1e8] sm:$0xff]  ;;  %v6923_v20 = vrot.slane %v6615_v14, 7  ;;  %v6619_v52 = vsel %vm796_vm2, %v6616_v4, %v6618_v38  ;;  %v17355_v49 = vrot.slane %v14696_v8, 1 }
 0x505   : > { %v14667_v0 = vpop.f32.mrb[28].mxu1  ;;  %18287 = vst [vmem:[#allocation163_spill] sm:$0xff] %v14682_v24  ;;  %18289 = vst [vmem:[#allocation161_spill] sm:$0xff] %v14689_v28  ;;  %v6901_v21 = vsel %vm1755_vm11, %v6894_v37, %v6900_v12  ;;  %v17358_v62 = vrot.slane %v14689_v28, 1  ;;  %v14706_v24 = vpop.permute.xlu1 %9176  ;;  %v6930_v14 = vrot.slane %v6619_v52, 7  ;;  %v9945_v52 = vld [vmem:[#allocation3 + $0x10] sm:$0xff] }
 0x506   : > { %18283 = vst [vmem:[#allocation159_spill] sm:$0xff] %v14667_v0  ;;  %v14675_v27 = vpop.f32.mrb[29].mxu1  ;;  %8760 = vmatmul.mubr.msk.f32.gmra.mrb[56].mxu1 %vm392_vm3, %v6886_v54  ;;  %v6614_v36 = vsel %vm796_vm2, %v6611_v2, %v18288_v40  ;;  %18291 = vst [vmem:[#allocation166_spill] sm:$0xff] %v14694_v7  ;;  %v6924_v54 = vrot.slane %v6617_v47, 7  ;;  %v6910_v2 = vsel %vm1755_vm11, %v6908_v48, %v6909_v19  ;;  %v17356_v40 = vrot.slane %v14694_v7, 1  ;;  %v18338_v13 = vld [vmem:[#allocation133_spill] sm:$0xff] }
 0x507   : > { %18286 = vst [vmem:[#allocation120_spill] sm:$0xff] %v14675_v27  ;;  %8762 = vmatprep.mubr.msk.f32.mxu1 %vm392_vm3, %v6895_v50  ;;  %18292 = vst [vmem:[#allocation78_spill] sm:$0xff] %v14696_v8  ;;  %v6915_v3 = vrot.slane %v6614_v36, 7  ;;  %v17357_v50 = vrot.slane %v14692_v31, 1  ;;  %v18298_v8 = vld [vmem:[#allocation35_spill] sm:$0xff]  ;;  %v18302_v31 = vld [vmem:[#allocation38_spill] sm:$0xff]  ;;  %v9178_v23 = vunpack.i.l.bf16 %v14706_v24 }
 0x508   : > { %v6925_v4 = vsel %vm1755_vm11, %v6923_v20, %v6924_v54  ;;  %v14722_v38 = vsel %vm691_vm1, %v17356_v40, %v17355_v49  ;;  %v6931_v12 = vsel %vm1755_vm11, %v6924_v54, %v6930_v14  ;;  %v8994_v20 = vunpack.i.h.bf16 %v14131_v58  ;;  %v9944_v54 = vld [vmem:[#allocation3 + $0x20] sm:$0xff] }
 0x509   : > { %v14715_v37 = vsel %vm691_vm1, %v17358_v62, %v17357_v50  ;;  %18294 = vst [vmem:[#allocation88_spill] sm:$0xff] %v14722_v38  ;;  %v6916_v36 = vsel %vm1755_vm11, %v6909_v19, %v6915_v3  ;;  %v14728_v47 = vpop.permute.xlu1 %9186  ;;  %v8998_v14 = vunpack.i.l.bf16 %v14282_v5  ;;  %v18296_v49 = vld [vmem:[#allocation59_spill] sm:$0xff]  ;;  %v9063_v28 = vunpack.i.l.bf16 %v18302_v31 }
 0x50a   : > { %8763 = vmatmul.mubr.msk.f32.gmra.mrb[58].mxu1 %vm392_vm3, %v6901_v21  ;;  %18293 = vst [vmem:[#allocation106_spill] sm:$0xff] %v14715_v37  ;;  %v8993_v21 = vunpack.i.l.bf16 %v14131_v58  ;;  %v9948_v58 = vld [vmem:[#allocation3 + $0x48] sm:$0xff]  ;;  %v9039_v40 = vunpack.i.h.bf16 %v18296_v49  ;;  %v9188_v27 = vunpack.i.l.bf16 %v14728_v47 }
 0x50b   : > { %8765 = vmatprep.mubr.msk.f32.mxu1 %vm392_vm3, %v6910_v2 }
 0x50d   : > { %v14735_v48 = vpop.permute.xlu1 %9196 }
 0x50e   : > { %8766 = vmatmul.mubr.msk.f32.gmra.mrb[60].mxu1 %vm392_vm3, %v6916_v36 }
 0x50f   : > { %8768 = vmatprep.mubr.msk.f32.mxu1 %vm392_vm3, %v6925_v4  ;;  %v9004_v4 = vunpack.i.h.bf16 %v14149_v10 }
 0x511   : > { %v14743_v19 = vpop.permute.xlu1 %9206 }
 0x512   : > { %8769 = vmatmul.mubr.msk.f32.gmra.mrb[62].mxu1 %vm392_vm3, %v6931_v12  ;;  %v9003_v12 = vunpack.i.l.bf16 %v14149_v10  ;;  %v9952_v10 = vld [vmem:[#allocation3 + $0x70] sm:$0xff] }
 0x513   : > { %8779 = vmatprep.mubr.msk.f32.mxu1 %vm392_vm3, %v14319_v29  ;;  %v8978_v29 = vunpack.i.l.bf16 %v14272_v16 }
 0x516   : > { %8780 = vmatmul.mubr.msk.f32.vlgmr.msra.gmra.mrb[64].mxu1 %vm392_vm3, %v14315_v1  ;;  %v8979_v1 = vunpack.i.h.bf16 %v14272_v16 }
 0x517   : > { %8782 = vmatprep.mubr.msk.f32.mxu1 %vm392_vm3, %v14397_v41  ;;  %v8984_v41 = vunpack.i.h.bf16 %v14120_v60 }
 0x518   : > { %v4274_v16 = vsel %vm392_vm3, %v9944_v54, %v8979_v1  ;;  %v9008_v1 = vunpack.i.l.bf16 %v14287_v63  ;;  %v9014_v54 = vunpack.i.h.bf16 %v14165_v42 }
 0x51a   : > { %8783 = vmatmul.mubr.msk.f32.gmra.mrb[66].mxu1 %vm392_vm3, %v14399_v61  ;;  %v8983_v61 = vunpack.i.l.bf16 %v14120_v60  ;;  %v8999_v60 = vunpack.i.h.bf16 %v14282_v5 }
 0x51b   : > { %8785 = vmatprep.mubr.msk.f32.mxu1 %vm392_vm3, %v14410_v15  ;;  %v14755_v15 = vpop.permute.xlu1 %9216 }
 0x51e   : > { %8786 = vmatmul.mubr.msk.f32.gmra.mrb[68].mxu1 %vm392_vm3, %v14412_v9  ;;  %v8989_v9 = vunpack.i.h.bf16 %v14277_v18 }
 0x51f   : > { %8788 = vmatprep.mubr.msk.f32.mxu1 %vm392_vm3, %v14450_v56  ;;  %v8988_v56 = vunpack.i.l.bf16 %v14277_v18  ;;  %v9947_v18 = vld [vmem:[#allocation3 + $0x28] sm:$0xff] }
 0x520   : > { %v4275_v2 = vsel %vm392_vm3, %v9947_v18, %v8983_v61  ;;  %v4278_v36 = vsel %vm392_vm3, %v9948_v58, %v8989_v9  ;;  %v9950_v61 = vld [vmem:[#allocation3 + $0x60] sm:$0xff]  ;;  %v4282_v18 = vsel %vm392_vm3, %v9952_v10, %v8999_v60  ;;  %v9018_v58 = vunpack.i.l.bf16 %v14292_v33 }
 0x521   : > { %v4280_v5 = vsel %vm392_vm3, %v9950_v61, %v8994_v20  ;;  %v9953_v20 = vld [vmem:[#allocation3 + $0x68] sm:$0xff]  ;;  %v9955_v60 = vld [vmem:[#allocation3 + $0x80] sm:$0xff] }
 0x522   : > { %8789 = vmatmul.mubr.msk.f32.gmra.mrb[70].mxu1 %vm392_vm3, %v14443_v17  ;;  %v4273_v17 = vsel %vm392_vm3, %v9945_v52, %v8978_v29  ;;  %v9949_v29 = vld [vmem:[#allocation3 + $0x40] sm:$0xff]  ;;  %v9013_v52 = vunpack.i.l.bf16 %v14165_v42  ;;  %v9954_v61 = vld [vmem:[#allocation3 + $0x88] sm:$0xff] }
 0x523   : > { %8791 = vmatprep.mubr.msk.f32.mxu1 %vm392_vm3, %v14474_v35  ;;  %v9946_v35 = vld [vmem:[#allocation3 + $0x30] sm:$0xff]  ;;  %v4284_v42 = vsel %vm392_vm3, %v9954_v61, %v9004_v4 }
 0x524   : > { %v14769_v3 = vsel %vm392_vm3, %v9946_v35, %v8984_v41  ;;  %v4277_v41 = vsel %vm392_vm3, %v9949_v29, %v8988_v56  ;;  %v9951_v35 = vld [vmem:[#allocation3 + $0x50] sm:$0xff]  ;;  %v18295_v56 = vld [vmem:[#allocation19_spill] sm:$0xff]  ;;  %v4281_v29 = vsel %vm392_vm3, %v9953_v20, %v8998_v14 }
 0x525   : > { %v4279_v9 = vsel %vm392_vm3, %v9951_v35, %v8993_v21  ;;  %v9038_v21 = vunpack.i.l.bf16 %v18296_v49  ;;  %v4283_v35 = vsel %vm392_vm3, %v9955_v60, %v9003_v12  ;;  %v18297_v20 = vld [vmem:[#allocation36_spill] sm:$0xff] }
 0x526   : > { %8792 = vmatmul.mubr.msk.f32.gmra.mrb[72].mxu1 %vm392_vm3, %v14476_v34  ;;  %v9009_v34 = vunpack.i.h.bf16 %v14287_v63  ;;  %v9019_v63 = vunpack.i.h.bf16 %v14292_v33  ;;  %v9956_v33 = vld [vmem:[#allocation3 + $0xa0] sm:$0xff]  ;;  %v9043_v50 = vunpack.i.l.bf16 %v18297_v20  ;;  %v9958_v4 = vld [vmem:[#allocation3 + $0xb0] sm:$0xff]  ;;  %v9959_v49 = vld [vmem:[#allocation3 + $0xa8] sm:$0xff]  ;;  %v9044_v12 = vunpack.i.h.bf16 %v18297_v20 }
 0x527   : > { %8794 = vmatprep.mubr.msk.f32.mxu1 %vm392_vm3, %v14516_v39  ;;  %v14784_v39 = vpop.permute.xlu1 %9226  ;;  %v14805_v61 = vsel %vm392_vm3, %v9958_v4, %v9014_v54  ;;  %v14808_v62 = vsel %vm392_vm3, %v9959_v49, %v9013_v52  ;;  %v9960_v60 = vld [vmem:[#allocation3 + $0xc8] sm:$0xff]  ;;  %v4298_v52 = vsel %vm4295_vm13, %v4273_v17, %v9038_v21  ;;  %v4299_v4 = vsel %vm4295_vm13, %v4274_v16, %v9039_v40  ;;  %v18300_v20 = vld [vmem:[#allocation37_spill] sm:$0xff] }
 0x528   : > { %v14800_v10 = vsel %vm392_vm3, %v9956_v33, %v9009_v34  ;;  %v14813_v34 = vsel %vm392_vm3, %v9960_v60, %v9019_v63  ;;  %v9961_v33 = vld [vmem:[#allocation3 + $0xc0] sm:$0xff]  ;;  %v9054_v49 = vunpack.i.h.bf16 %v18300_v20  ;;  %v9053_v63 = vunpack.i.l.bf16 %v18300_v20  ;;  %v18303_v16 = vld [vmem:[#allocation68_spill] sm:$0xff]  ;;  %v18304_v20 = vld [vmem:[#allocation41_spill] sm:$0xff] }
 0x529   : > { %v4301_v40 = vsel %vm4295_vm13, %v14769_v3, %v9044_v12  ;;  %v9099_v17 = vunpack.i.h.bf16 %v18303_v16  ;;  %v9098_v21 = vunpack.i.l.bf16 %v18303_v16  ;;  %v9103_v37 = vunpack.i.l.bf16 %v18304_v20  ;;  %v18305_v12 = vld [vmem:[#allocation69_spill] sm:$0xff] }
 0x52a   : > { %8795 = vmatmul.mubr.msk.f32.gmra.mrb[74].mxu1 %vm392_vm3, %v18295_v56  ;;  %v9957_v56 = vld [vmem:[#allocation3 + $0x90] sm:$0xff]  ;;  %v4305_v3 = vsel %vm4295_vm13, %v4280_v5, %v9054_v49  ;;  %v9108_v16 = vunpack.i.l.bf16 %v18305_v12 }
 0x52b   : > { %8797 = vmatprep.mubr.msk.f32.mxu1 %vm392_vm3, %v14556_v46  ;;  %v4285_v14 = vsel %vm392_vm3, %v9957_v56, %v9008_v1  ;;  %v14816_v1 = vsel %vm392_vm3, %v9961_v33, %v9018_v58  ;;  %v18299_v56 = vld [vmem:[#allocation60_spill] sm:$0xff]  ;;  %v14826_v60 = vpop.permute.xlu1 %9236  ;;  %v4300_v58 = vsel %vm4295_vm13, %v4275_v2, %v9043_v50  ;;  %v18301_v33 = vld [vmem:[#allocation61_spill] sm:$0xff]  ;;  %v9064_v50 = vunpack.i.h.bf16 %v18302_v31 }
 0x52c   : > { %v9049_v7 = vunpack.i.h.bf16 %v18299_v56  ;;  %v9048_v54 = vunpack.i.l.bf16 %v18299_v56  ;;  %v9059_v56 = vunpack.i.h.bf16 %v18301_v33  ;;  %v9058_v38 = vunpack.i.l.bf16 %v18301_v33  ;;  %v18306_v31 = vld [vmem:[#allocation65_spill] sm:$0xff] }
 0x52d   : > { %v9104_v2 = vunpack.i.h.bf16 %v18304_v20  ;;  %v4304_v33 = vsel %vm4295_vm13, %v4279_v9, %v9053_v63  ;;  %v4323_v9 = vsel %vm4320_vm14, %v4298_v52, %v9098_v21  ;;  %v4324_v5 = vsel %vm4320_vm14, %v4299_v4, %v9099_v17  ;;  %v18309_v17 = vld [vmem:[#allocation70_spill] sm:$0xff] }
 0x52e   : > { %8798 = vmatmul.mubr.msk.f32.gmra.mrb[76].mxu1 %vm392_vm3, %v14558_v59  ;;  %v4302_v46 = vsel %vm4295_vm13, %v4277_v41, %v9048_v54  ;;  %v9109_v59 = vunpack.i.h.bf16 %v18305_v12  ;;  %v4306_v30 = vsel %vm4295_vm13, %v4281_v29, %v9058_v38  ;;  %v4307_v41 = vsel %vm4295_vm13, %v4282_v18, %v9059_v56  ;;  %v18307_v54 = vld [vmem:[#allocation42_spill] sm:$0xff]  ;;  %v18308_v29 = vld [vmem:[#allocation39_spill] sm:$0xff] }
 0x52f   : > { %8800 = vmatprep.mubr.msk.f32.mxu1 %vm392_vm3, %v14607_v44  ;;  %v4303_v44 = vsel %vm4295_vm13, %v4278_v36, %v9049_v7  ;;  %v4308_v7 = vsel %vm4295_vm13, %v4283_v35, %v9063_v28  ;;  %v9068_v36 = vunpack.i.l.bf16 %v18306_v31  ;;  %v9113_v20 = vunpack.i.l.bf16 %v18307_v54  ;;  %v14854_v25 = vpop.permute.xlu1 %9246 }
 0x530   : > { %v4325_v49 = vsel %vm4320_vm14, %v4300_v58, %v9103_v37  ;;  %v4309_v63 = vsel %vm4295_vm13, %v4284_v42, %v9064_v50  ;;  %v9069_v38 = vunpack.i.h.bf16 %v18306_v31  ;;  %v9074_v18 = vunpack.i.h.bf16 %v18308_v29 }
 0x531   : > { %v4326_v28 = vsel %vm4320_vm14, %v4301_v40, %v9104_v2  ;;  %v9073_v35 = vunpack.i.l.bf16 %v18308_v29  ;;  %v9114_v56 = vunpack.i.h.bf16 %v18307_v54  ;;  %v4327_v12 = vsel %vm4320_vm14, %v4302_v46, %v9108_v16  ;;  %v18310_v2 = vld [vmem:[#allocation43_spill] sm:$0xff]  ;;  %v14875_v46 = vpop.permute.xlu0 %9281 }
 0x532   : > { %8801 = vmatmul.mubr.msk.f32.gmra.mrb[78].mxu1 %vm392_vm3, %v14592_v11  ;;  %v4328_v52 = vsel %vm4320_vm14, %v4303_v44, %v9109_v59  ;;  %v14868_v4 = vsel %vm4295_vm13, %v4285_v14, %v9068_v36  ;;  %v4474_v37 = vrot.slane %v4323_v9, 7  ;;  %v4480_v58 = vrot.slane %v4324_v5, 7  ;;  %v18311_v9 = vld [vmem:[#allocation66_spill] sm:$0xff] }
 0x533   : > { %v4481_v42 = vrot.slane %v4325_v49, 7  ;;  %v9119_v21 = vunpack.i.h.bf16 %v18309_v17  ;;  %v9118_v50 = vunpack.i.l.bf16 %v18309_v17  ;;  %v4489_v31 = vrot.slane %v4326_v28, 7  ;;  %v18312_v28 = vld [vmem:[#allocation56_spill] sm:$0xff] }
 0x534   : > { %v4329_v40 = vsel %vm4320_vm14, %v4304_v33, %v9113_v20  ;;  %v9124_v29 = vunpack.i.h.bf16 %v18310_v2  ;;  %v9123_v54 = vunpack.i.l.bf16 %v18310_v2  ;;  %v4495_v59 = vrot.slane %v4327_v12, 7  ;;  %v14889_v33 = vpop.permute.xlu1 %9256 }
 0x535   : > { %v4496_v44 = vrot.slane %v4328_v52, 7  ;;  %v14879_v14 = vsel %vm4295_vm13, %v14800_v10, %v9069_v38  ;;  %v14883_v16 = vsel %vm4295_vm13, %v14808_v62, %v9073_v35  ;;  %v14887_v36 = vsel %vm4295_vm13, %v14805_v61, %v9074_v18 }
 0x536   : > { %v14892_v20 = vsel %vm4320_vm14, %v4305_v3, %v9114_v56  ;;  %v18313_v10 = vrot.slane %v18312_v28, 7  ;;  %v4504_v62 = vrot.slane %v4329_v40, 7  ;;  %v14902_v35 = vsel %vm1755_vm11, %v4480_v58, %v4481_v42  ;;  %v14930_v40 = vpop.permute.xlu0 %9291 }
 0x537   : > { %v14905_v61 = vsel %vm1755_vm11, %v4481_v42, %v4489_v31  ;;  %v14908_v18 = vsel %vm4320_vm14, %v4306_v30, %v9118_v50  ;;  %v14911_v3 = vsel %vm4320_vm14, %v4307_v41, %v9119_v21  ;;  %v14914_v56 = vsel %vm1755_vm11, %v4495_v59, %v4496_v44  ;;  %v18314_v30 = vld [vmem:[#allocation46_spill] sm:$0xff]  ;;  %v18315_v50 = vld [vmem:[#allocation72_spill] sm:$0xff]  ;;  %v18316_v59 = vld [vmem:[#allocation51_spill] sm:$0xff] }
 0x538   : > { %v14899_v38 = vsel %vm1755_vm11, %v18313_v10, %v4474_v37  ;;  %v14918_v52 = vsel %vm4320_vm14, %v4308_v7, %v9123_v54  ;;  %v14921_v37 = vsel %vm4320_vm14, %v4309_v63, %v9124_v29  ;;  %v9159_v58 = vunpack.i.h.bf16 %v14638_v6  ;;  %v18318_v31 = vld [vmem:[#allocation28_spill] sm:$0xff]  ;;  %v18319_v29 = vld [vmem:[#allocation174_spill] sm:$0xff] }
 0x539   : > { %v9158_v42 = vunpack.i.l.bf16 %v14638_v6  ;;  %v9164_v17 = vunpack.i.h.bf16 %v18314_v30  ;;  %v9163_v41 = vunpack.i.l.bf16 %v18314_v30  ;;  %v14933_v7 = vsel %vm1755_vm11, %v4496_v44, %v4504_v62  ;;  %v18317_v62 = vld [vmem:[#allocation173_spill] sm:$0xff] }
 0x53a   : > { %v9219_v6 = vunpack.i.h.bf16 %v14755_v15  ;;  %v9218_v54 = vunpack.i.l.bf16 %v14755_v15  ;;  %v9223_v28 = vunpack.i.l.bf16 %v18316_v59  ;;  %v9224_v10 = vunpack.i.h.bf16 %v18316_v59  ;;  %v18320_v15 = vld [vmem:[#allocation178_spill] sm:$0xff] }
 0x53b   : > { %v9283_v30 = vunpack.i.l.bf16 %v14875_v46  ;;  %v4348_v49 = vsel %vm392_vm3, %v18317_v62, %v9159_v58  ;;  %v4347_v2 = vsel %vm392_vm3, %v18318_v31, %v9158_v42  ;;  %v4350_v12 = vsel %vm392_vm3, %v18319_v29, %v9164_v17  ;;  %v14960_v31 = vpop.permute.xlu0 %9301 }
 0x53c   : > { %v4349_v63 = vsel %vm392_vm3, %v18320_v15, %v9163_v41  ;;  %v9169_v59 = vunpack.i.h.bf16 %v14673_v26  ;;  %v9284_v43 = vunpack.i.h.bf16 %v14875_v46  ;;  %v9168_v44 = vunpack.i.l.bf16 %v14673_v26 }
 0x53d   : > { %v4371_v58 = vsel %vm4295_vm13, %v4347_v2, %v9218_v54  ;;  %v4372_v62 = vsel %vm4295_vm13, %v4348_v49, %v9219_v6  ;;  %v4373_v42 = vsel %vm4295_vm13, %v4349_v63, %v9223_v28  ;;  %v4374_v17 = vsel %vm4295_vm13, %v4350_v12, %v9224_v10  ;;  %v18321_v49 = vld [vmem:[#allocation47_spill] sm:$0xff] }
 0x53e   : > { %v4397_v46 = vsel %vm4320_vm14, %v4373_v42, %v9283_v30  ;;  %v9228_v26 = vunpack.i.l.bf16 %v14784_v39  ;;  %v9174_v6 = vunpack.i.h.bf16 %v18321_v49  ;;  %v4398_v12 = vsel %vm4320_vm14, %v4374_v17, %v9284_v43  ;;  %v18324_v42 = vld [vmem:[#allocation187_spill] sm:$0xff] }
 0x53f   : > { %v14927_v21 = vpop.permute.xlu1 %9266  ;;  %v9173_v10 = vunpack.i.l.bf16 %v18321_v49 }
 0x543   : > { %v9277_v11 = vpop.permute.xlu1 %9276 }
 0x544   : > { %v9279_v5 = vunpack.i.h.bf16 %v9277_v11  ;;  %v9278_v55 = vunpack.i.l.bf16 %v9277_v11  ;;  %v9229_v11 = vunpack.i.h.bf16 %v14784_v39  ;;  %v4352_v39 = vsel %vm392_vm3, %v18324_v42, %v9169_v59  ;;  %v18327_v59 = vld [vmem:[#allocation181_spill] sm:$0xff]  ;;  %v18329_v42 = vld [vmem:[#allocation182_spill] sm:$0xff] }
 0x546   : > { %v4395_v41 = vsel %vm4320_vm14, %v4371_v58, %v9278_v55  ;;  %v4396_v29 = vsel %vm4320_vm14, %v4372_v62, %v9279_v5  ;;  %v9179_v55 = vunpack.i.h.bf16 %v14706_v24  ;;  %v18322_v5 = vld [vmem:[#allocation57_spill] sm:$0xff]  ;;  %v4484_v62 = vrot.slane %v4397_v46, 7  ;;  %v14989_v24 = vpop.permute.xlu0 %9311 }
 0x547   : > { %v9287_v15 = vpop.permute.xlu1 %9286  ;;  %v4476_v2 = vrot.slane %v4395_v41, 7  ;;  %v4483_v54 = vrot.slane %v4396_v29, 7  ;;  %v18323_v58 = vrot.slane %v18322_v5, 7  ;;  %v18325_v41 = vld [vmem:[#allocation179_spill] sm:$0xff]  ;;  %v4376_v17 = vsel %vm4295_vm13, %v4352_v39, %v9229_v11  ;;  %v18328_v11 = vld [vmem:[#allocation180_spill] sm:$0xff] }
 0x548   : > { %v9289_v63 = vunpack.i.h.bf16 %v9287_v15  ;;  %v9288_v28 = vunpack.i.l.bf16 %v9287_v15  ;;  %v4351_v29 = vsel %vm392_vm3, %v18325_v41, %v9168_v44  ;;  %v18326_v15 = vld [vmem:[#allocation48_spill] sm:$0xff]  ;;  %v4354_v5 = vsel %vm392_vm3, %v18327_v59, %v9174_v6 }
 0x549   : > { %v4477_v30 = vsel %vm1755_vm11, %v18323_v58, %v4476_v2  ;;  %v9184_v0 = vunpack.i.h.bf16 %v18326_v15  ;;  %v4375_v43 = vsel %vm4295_vm13, %v4351_v29, %v9228_v26  ;;  %v4485_v46 = vsel %vm1755_vm11, %v4483_v54, %v4484_v62  ;;  %v18330_v54 = vld [vmem:[#allocation50_spill] sm:$0xff]  ;;  %v18331_v39 = vld [vmem:[#allocation52_spill] sm:$0xff] }
 0x54a   : > { %4724 = vmatprep.mubr.f32.mxu0 %v4477_v30  ;;  %v4491_v2 = vrot.slane %v4398_v12, 7  ;;  %v9183_v44 = vunpack.i.l.bf16 %v18326_v15  ;;  %v4399_v58 = vsel %vm4320_vm14, %v4375_v43, %v9288_v28  ;;  %v4400_v26 = vsel %vm4320_vm14, %v4376_v17, %v9289_v63  ;;  %v18332_v6 = vld [vmem:[#allocation188_spill] sm:$0xff]  ;;  %v18333_v15 = vld [vmem:[#allocation195_spill] sm:$0xff] }
 0x54b   : > { %v14982_v49 = vpop.permute.xlu1 %9296  ;;  %4725 = vmatmul.mubr.f32.gmra.mrb[18].mxu0 %v14899_v38  ;;  %v4353_v30 = vsel %vm392_vm3, %v18328_v11, %v9173_v10  ;;  %v4356_v38 = vsel %vm392_vm3, %v18329_v42, %v9179_v55  ;;  %v9204_v12 = vunpack.i.h.bf16 %v18330_v54  ;;  %v9233_v41 = vunpack.i.l.bf16 %v18331_v39  ;;  %v18334_v11 = vld [vmem:[#allocation189_spill] sm:$0xff] }
 0x54c   : > { %4729 = vmatprep.mubr.f32.mxu0 %v4485_v46  ;;  %v4355_v29 = vsel %vm392_vm3, %v18332_v6, %v9178_v23  ;;  %v4358_v46 = vsel %vm392_vm3, %v18333_v15, %v9184_v0  ;;  %v9209_v28 = vunpack.i.h.bf16 %v14743_v19  ;;  %v9293_v63 = vunpack.i.l.bf16 %v14930_v40  ;;  %v15014_v6 = vpop.permute.xlu0 %9321 }
 0x54d   : > { %v9238_v43 = vunpack.i.l.bf16 %v14826_v60  ;;  %v4492_v55 = vsel %vm1755_vm11, %v4484_v62, %v4491_v2  ;;  %v4498_v17 = vrot.slane %v4399_v58, 7  ;;  %v4499_v59 = vrot.slane %v4400_v26, 7  ;;  %v18336_v58 = vld [vmem:[#allocation53_spill] sm:$0xff]  ;;  %v18337_v26 = vld [vmem:[#allocation55_spill] sm:$0xff] }
 0x54e   : > { %v4357_v23 = vsel %vm392_vm3, %v18334_v11, %v9183_v44  ;;  %v9208_v42 = vunpack.i.l.bf16 %v14743_v19  ;;  %v9234_v0 = vunpack.i.h.bf16 %v18331_v39  ;;  %v9298_v15 = vunpack.i.l.bf16 %v14982_v49 }
 0x54f   : > { %v15006_v10 = vpop.permute.xlu1 %9306  ;;  %4730 = vmatmul.mubr.f32.gmra.mrb[20].mxu0 %v14902_v35  ;;  %v4366_v35 = vsel %vm392_vm3, %v18335_v57, %v9204_v12  ;;  %v4377_v62 = vsel %vm4295_vm13, %v4353_v30, %v9233_v41  ;;  %v9239_v2 = vunpack.i.h.bf16 %v14826_v60  ;;  %v9243_v44 = vunpack.i.l.bf16 %v18336_v58  ;;  %v18339_v30 = vld [vmem:[#allocation140_spill] sm:$0xff] }
 0x550   : > { %4734 = vmatprep.mubr.f32.mxu0 %v4492_v55  ;;  %v9264_v19 = vunpack.i.h.bf16 %v18337_v26  ;;  %v9294_v39 = vunpack.i.h.bf16 %v14930_v40  ;;  %v4401_v11 = vsel %vm4320_vm14, %v4377_v62, %v9293_v63  ;;  %v4368_v55 = vsel %vm392_vm3, %v18338_v13, %v9209_v28 }
 0x551   : > { %v4379_v45 = vsel %vm4295_vm13, %v4355_v29, %v9238_v43  ;;  %v9324_v22 = vunpack.i.h.bf16 %v15014_v6  ;;  %v4500_v60 = vsel %vm1755_vm11, %v4498_v17, %v4499_v59  ;;  %v4367_v12 = vsel %vm392_vm3, %v18339_v30, %v9208_v42 }
 0x552   : > { %v4378_v40 = vsel %vm4295_vm13, %v4354_v5, %v9234_v0  ;;  %v9299_v41 = vunpack.i.h.bf16 %v14982_v49  ;;  %v4403_v13 = vsel %vm4320_vm14, %v4379_v45, %v9298_v15  ;;  %v9244_v29 = vunpack.i.h.bf16 %v18336_v58 }
 0x553   : > { %v15030_v57 = vpop.permute.xlu1 %9316  ;;  %4735 = vmatmul.mubr.f32.gmra.mrb[22].mxu0 %v14905_v61  ;;  %v9269_v28 = vunpack.i.h.bf16 %v14927_v21  ;;  %v9268_v63 = vunpack.i.l.bf16 %v14927_v21  ;;  %v4506_v43 = vrot.slane %v4401_v11, 7  ;;  %v4380_v61 = vsel %vm4295_vm13, %v4356_v38, %v9239_v2 }
 0x554   : > { %4739 = vmatprep.mubr.f32.mxu0 %v4500_v60  ;;  %v4381_v17 = vsel %vm4295_vm13, %v4357_v23, %v9243_v44  ;;  %v4390_v42 = vsel %vm4295_vm13, %v4366_v35, %v9264_v19  ;;  %v4402_v5 = vsel %vm4320_vm14, %v4378_v40, %v9294_v39  ;;  %v9304_v49 = vunpack.i.h.bf16 %v14960_v31 }
 0x555   : > { %v4507_v45 = vsel %vm1755_vm11, %v4499_v59, %v4506_v43  ;;  %v4514_v15 = vrot.slane %v4403_v13, 7  ;;  %v4414_v62 = vsel %vm4320_vm14, %v4390_v42, %v9324_v22  ;;  %v9303_v21 = vunpack.i.l.bf16 %v14960_v31  ;;  %v18343_v42 = vld [vmem:[#allocation190_spill] sm:$0xff] }
 0x556   : > { %v4404_v23 = vsel %vm4320_vm14, %v4380_v61, %v9299_v41  ;;  %v4382_v35 = vsel %vm4295_vm13, %v4358_v46, %v9244_v29  ;;  %v4391_v2 = vsel %vm4295_vm13, %v4367_v12, %v9268_v63  ;;  %v4392_v44 = vsel %vm4295_vm13, %v4368_v55, %v9269_v28  ;;  %v18340_v46 = vld [vmem:[#allocation44_spill] sm:$0xff] }
 0x557   : > { %v9327_v0 = vpop.permute.xlu1 %9326  ;;  %4740 = vmatmul.mubr.f32.gmra.mrb[24].mxu0 %v14914_v56  ;;  %v4513_v19 = vrot.slane %v4402_v5, 7  ;;  %v9248_v56 = vunpack.i.l.bf16 %v14854_v25  ;;  %v4573_v39 = vrot.slane %v4414_v62, 7  ;;  %v4521_v11 = vrot.slane %v4404_v23, 7 }
 0x558   : > { %v9329_v58 = vunpack.i.h.bf16 %v9327_v0  ;;  %v9328_v38 = vunpack.i.l.bf16 %v9327_v0  ;;  %4744 = vmatprep.mubr.f32.mxu0 %v4507_v45  ;;  %v9134_v40 = vunpack.i.h.bf16 %v18340_v46  ;;  %v9308_v12 = vunpack.i.l.bf16 %v15006_v10 }
 0x559   : > { %v4515_v31 = vsel %vm1755_vm11, %v4513_v19, %v4514_v15  ;;  %v4405_v55 = vsel %vm4320_vm14, %v4381_v17, %v9303_v21  ;;  %v4406_v41 = vsel %vm4320_vm14, %v4382_v35, %v9304_v49  ;;  %v9133_v13 = vunpack.i.l.bf16 %v18340_v46 }
 0x55a   : > { %v4415_v59 = vsel %vm4320_vm14, %v4391_v2, %v9328_v38  ;;  %v4416_v22 = vsel %vm4320_vm14, %v4392_v44, %v9329_v58  ;;  %v18341_v29 = vrot.slane %v14908_v18, 7  ;;  %v9189_v61 = vunpack.i.h.bf16 %v14728_v47  ;;  %v18345_v58 = vld [vmem:[#allocation49_spill] sm:$0xff]  ;;  %v18348_v2 = vld [vmem:[#allocation54_spill] sm:$0xff] }
 0x55b   : > { %4745 = vmatmul.mubr.f32.gmra.mrb[26].mxu0 %v14933_v7  ;;  %v4574_v60 = vrot.slane %v4415_v59, 7  ;;  %v4581_v30 = vrot.slane %v4416_v22, 7  ;;  %v18342_v7 = vrot.slane %v14892_v20, 7  ;;  %v4359_v17 = vsel %vm392_vm3, %v18343_v42, %v9188_v27  ;;  %v18352_v18 = vld [vmem:[#allocation193_spill] sm:$0xff]  ;;  %v15123_v42 = vld [vmem:[#allocation8] ss:$0 sm:$0xff] }
 0x55c   : > { %4749 = vmatprep.mubr.f32.mxu0 %v4515_v31  ;;  %v9249_v5 = vunpack.i.h.bf16 %v14854_v25  ;;  %v18344_v49 = vunpack.i.l.bf16 %v18315_v50  ;;  %v4383_v0 = vsel %vm4295_vm13, %v4359_v17, %v9248_v56  ;;  %v4522_v45 = vsel %vm1755_vm11, %v4514_v15, %v4521_v11 }
 0x55d   : > { %v4512_v28 = vsel %vm1755_vm11, %v18342_v7, %v18341_v29  ;;  %v15071_v63 = vsel %vm1755_vm11, %v4573_v39, %v4574_v60  ;;  %v15074_v43 = vsel %vm1755_vm11, %v4574_v60, %v4581_v30  ;;  %v4528_v62 = vrot.slane %v4405_v55, 7  ;;  %v18353_v30 = vld [vmem:[#allocation198_spill] sm:$0xff] }
 0x55e   : > { %v4335_v20 = vsel %vm4320_vm14, %v14868_v4, %v18344_v49  ;;  %v4529_v21 = vrot.slane %v4406_v41, 7  ;;  %v9193_v38 = vunpack.i.l.bf16 %v18345_v58  ;;  %v9309_v47 = vunpack.i.h.bf16 %v15006_v10 }
 0x55f   : > { %4750 = vmatmul.mubr.f32.gmra.mrb[28].mxu0 %v4512_v28  ;;  %v18346_v27 = vrot.slane %v14911_v3, 7  ;;  %v18347_v25 = vmov %v18341_v29  ;;  %v4407_v4 = vsel %vm4320_vm14, %v4383_v0, %v9308_v12  ;;  %v9194_v35 = vunpack.i.h.bf16 %v18345_v58  ;;  %v18354_v29 = vld [vmem:[#allocation194_spill] sm:$0xff] }
 0x560   : > { %4754 = vmatprep.mubr.f32.mxu0 %v4522_v45  ;;  %v9253_v44 = vunpack.i.l.bf16 %v18348_v2  ;;  %v18349_v15 = vrot.slane %v14921_v37, 7  ;;  %v18350_v19 = vrot.slane %v14918_v52, 7  ;;  %v18351_v10 = vunpack.i.h.bf16 %v18315_v50 }
 0x561   : > { %v4520_v23 = vsel %vm1755_vm11, %v18347_v25, %v18346_v27  ;;  %v4360_v59 = vsel %vm392_vm3, %v18352_v18, %v9189_v61  ;;  %v9254_v39 = vunpack.i.h.bf16 %v18348_v2  ;;  %v9313_v22 = vunpack.i.l.bf16 %v14989_v24  ;;  %v18358_v2 = vld [vmem:[#allocation73_spill] sm:$0xff]  ;;  %v18361_v18 = vld [vmem:[#allocation40_spill] sm:$0xff] }
 0x562   : > { %v4527_v56 = vsel %vm1755_vm11, %v18350_v19, %v18349_v15  ;;  %v4336_v3 = vsel %vm4320_vm14, %v14879_v14, %v18351_v10  ;;  %v4534_v31 = vrot.slane %v4335_v20, 7  ;;  %v4384_v11 = vsel %vm4295_vm13, %v4360_v59, %v9249_v5 }
 0x563   : > { %4755 = vmatmul.mubr.f32.gmra.mrb[30].mxu0 %v4520_v23  ;;  %v4530_v52 = vsel %vm1755_vm11, %v4528_v62, %v4529_v21  ;;  %v4536_v60 = vrot.slane %v4407_v4, 7  ;;  %v15113_v50 = vsel %vm4320_vm14, %v14883_v16, %v9133_v13  ;;  %v4361_v14 = vsel %vm392_vm3, %v18353_v30, %v9193_v38  ;;  %v18356_v23 = vld [vmem:[#allocation203_spill] sm:$0xff] }
 0x564   : > { %v9314_v46 = vunpack.i.h.bf16 %v14989_v24  ;;  %4759 = vmatprep.mubr.f32.mxu0 %v4530_v52  ;;  %v4408_v55 = vsel %vm4320_vm14, %v4384_v11, %v9309_v47  ;;  %v4540_v41 = vrot.slane %v4336_v3, 7  ;;  %v4362_v7 = vsel %vm392_vm3, %v18354_v29, %v9194_v35  ;;  %v18357_v4 = vld [vmem:[#allocation199_spill] sm:$0xff] }
 0x565   : > { %v8399_v12 = vpop.f32.mrb[16].mxu0  ;;  %v9199_v28 = vunpack.i.h.bf16 %v14735_v48  ;;  %v4385_v61 = vsel %vm4295_vm13, %v4361_v14, %v9253_v44  ;;  %v4338_v13 = vsel %vm4320_vm14, %v14887_v36, %v9134_v40  ;;  %v9198_v24 = vunpack.i.l.bf16 %v14735_v48  ;;  %v18355_v40 = vld [vmem:[#allocation144_spill] sm:$0xff]  ;;  %v18364_v14 = vld [vmem:[#allocation45_spill] sm:$0xff] }
 0x566   : > { %v8400_v16 = vpop.f32.mrb[17].mxu0  ;;  %v4386_v17 = vsel %vm4295_vm13, %v4362_v7, %v9254_v39  ;;  %v4409_v49 = vsel %vm4320_vm14, %v4385_v61, %v9313_v22  ;;  %v9259_v20 = vunpack.i.h.bf16 %v14889_v33  ;;  %v9258_v0 = vunpack.i.l.bf16 %v14889_v33  ;;  %v18366_v61 = vld [vmem:[#allocation200_spill] sm:$0xff] }
 0x567   : > { %v8401_v5 = vadd.f32 %v8400_v16, %v8399_v12  ;;  %4760 = vmatmul.mubr.f32.gmra.mrb[32].mxu0 %v4527_v56  ;;  %v4537_v45 = vsel %vm1755_vm11, %v4529_v21, %v4536_v60  ;;  %v4543_v62 = vrot.slane %v4408_v55, 7  ;;  %v9319_v58 = vunpack.i.h.bf16 %v15030_v57 }
 0x568   : > { %v9318_v38 = vunpack.i.l.bf16 %v15030_v57  ;;  %4764 = vmatprep.mubr.f32.mxu0 %v4537_v45  ;;  %v4410_v48 = vsel %vm4320_vm14, %v4386_v17, %v9314_v46  ;;  %v9139_v47 = vunpack.i.h.bf16 %v18355_v40  ;;  %v9138_v27 = vunpack.i.l.bf16 %v18355_v40 }
 0x569   : > { %v4722_v36 = vadd.f32 %v8401_v5, %v15123_v42  ;;  %v4544_v25 = vrot.slane %v4409_v49, 7  ;;  %v4541_v33 = vrot.slane %v15113_v50, 7  ;;  %v4364_v21 = vsel %vm392_vm3, %v18356_v23, %v9199_v28  ;;  %v9962_v28 = vld [vmem:[#allocation3 + $0xd0] sm:$0xff] }
 0x56a   : > { %v4363_v35 = vsel %vm392_vm3, %v18357_v4, %v9198_v24  ;;  %v18360_v44 = vmov %v18349_v15  ;;  %v4388_v56 = vsel %vm4295_vm13, %v4364_v21, %v9259_v20  ;;  %v4551_v3 = vrot.slane %v4410_v48, 7  ;;  %v18368_v24 = vld [vmem:[#allocation67_spill] sm:$0xff] }
 0x56b   : > { %v15145_v57 = vadd.f32 %v18358_v2, %v4722_v36  ;;  %v4535_v15 = vsel %vm1755_vm11, %v18360_v44, %v4534_v31  ;;  %v4387_v19 = vsel %vm4295_vm13, %v4363_v35, %v9258_v0  ;;  %v4545_v10 = vsel %vm1755_vm11, %v4543_v62, %v4544_v25  ;;  %v9964_v35 = vld [vmem:[#allocation3 + $0xe0] sm:$0xff] }
 0x56c   : > { %4765 = vmatmul.mubr.f32.gmra.mrb[34].mxu0 %v4535_v15  ;;  %v9083_v59 = vunpack.i.l.bf16 %v18361_v18  ;;  %v9203_v39 = vunpack.i.l.bf16 %v18330_v54  ;;  %v4411_v22 = vsel %vm4320_vm14, %v4387_v19, %v9318_v38  ;;  %v4412_v11 = vsel %vm4320_vm14, %v4388_v56, %v9319_v58 }
 0x56d   : > { %18359 = vst [vmem:[#allocation169_spill] sm:$0xff] %v15145_v57  ;;  %4769 = vmatprep.mubr.f32.mxu0 %v4545_v10  ;;  %v18362_v37 = vunpack.i.l.bf16 %v18311_v9  ;;  %v18363_v52 = vunpack.i.h.bf16 %v18311_v9  ;;  %v9263_v50 = vunpack.i.l.bf16 %v18337_v26  ;;  %v4549_v30 = vrot.slane %v4338_v13, 7  ;;  %v9965_v10 = vld [vmem:[#allocation3 + $0xf0] sm:$0xff] }
 0x56e   : > { %v9143_v54 = vunpack.i.l.bf16 %v18364_v14  ;;  %v9323_v46 = vunpack.i.l.bf16 %v15014_v6  ;;  %v4542_v12 = vsel %vm1755_vm11, %v4540_v41, %v4541_v33  ;;  %v4552_v29 = vsel %vm1755_vm11, %v4544_v25, %v4551_v3  ;;  %v18367_v6 = vld [vmem:[#allocation58_spill] sm:$0xff] }
 0x56f   : > { %v4314_v31 = vsel %vm4295_vm13, %v14816_v1, %v18362_v37  ;;  %v4315_v60 = vsel %vm4295_vm13, %v14813_v34, %v18363_v52  ;;  %v4558_v1 = vrot.slane %v4411_v22, 7  ;;  %v4559_v7 = vrot.slane %v4412_v11, 7 }
 0x570   : > { %v4339_v55 = vsel %vm4320_vm14, %v4314_v31, %v9138_v27  ;;  %4770 = vmatmul.mubr.f32.gmra.mrb[36].mxu0 %v4542_v12  ;;  %v4340_v9 = vsel %vm4320_vm14, %v4315_v60, %v9139_v47  ;;  %v18365_v34 = vunpack.i.l.bf16 %v18298_v8  ;;  %v4365_v16 = vsel %vm392_vm3, %v18366_v61, %v9203_v39  ;;  %v9963_v47 = vld [vmem:[#allocation3 + $0xe8] sm:$0xff] }
 0x571   : > { %4774 = vmatprep.mubr.f32.mxu0 %v4552_v29  ;;  %v9028_v41 = vunpack.i.l.bf16 %v18367_v6  ;;  %v9088_v17 = vunpack.i.l.bf16 %v18368_v24  ;;  %v4389_v5 = vsel %vm4295_vm13, %v4365_v16, %v9263_v50  ;;  %v4550_v49 = vsel %vm1755_vm11, %v4541_v33, %v4549_v30  ;;  %v8272_v30 = vld [vmem:[%s17186_s6] ss:$0 sm:$0xff] }
 0x572   : > { %v4291_v26 = vsel %vm392_vm3, %v9962_v28, %v18365_v34  ;;  %v4555_v20 = vrot.slane %v4339_v55, 7  ;;  %v4556_v0 = vrot.slane %v4340_v9, 7  ;;  %v4413_v45 = vsel %vm4320_vm14, %v4389_v5, %v9323_v46 }
 0x573   : > { %v4316_v13 = vsel %vm4295_vm13, %v4291_v26, %v9083_v59  ;;  %v9024_v62 = vunpack.i.h.bf16 %v18298_v8  ;;  %v9148_v58 = vunpack.i.l.bf16 %v14571_v51  ;;  %v4560_v38 = vsel %vm1755_vm11, %v4558_v1, %v4559_v7 }
 0x574   : > { %4775 = vmatmul.mubr.f32.gmra.mrb[38].mxu0 %v4550_v49  ;;  %v4341_v36 = vsel %vm4320_vm14, %v4316_v13, %v9143_v54  ;;  %v9084_v48 = vunpack.i.h.bf16 %v18361_v18  ;;  %v9029_v40 = vunpack.i.h.bf16 %v18367_v6  ;;  %v4293_v27 = vsel %vm392_vm3, %v9963_v47, %v9028_v41 }
 0x575   : > { %4779 = vmatprep.mubr.f32.mxu0 %v4560_v38  ;;  %v9144_v25 = vunpack.i.h.bf16 %v18364_v14  ;;  %v4566_v33 = vrot.slane %v4413_v45, 7  ;;  %v9089_v8 = vunpack.i.h.bf16 %v18368_v24  ;;  %v4318_v23 = vsel %vm4295_vm13, %v4293_v27, %v9088_v17 }
 0x576   : > { %v4557_v21 = vsel %vm1755_vm11, %v4555_v20, %v4556_v0  ;;  %v4564_v4 = vrot.slane %v4341_v36, 7  ;;  %v4292_v2 = vsel %vm392_vm3, %v9964_v35, %v9024_v62  ;;  %v9149_v44 = vunpack.i.h.bf16 %v14571_v51 }
 0x577   : > { %v4567_v15 = vsel %vm1755_vm11, %v4559_v7, %v4566_v33  ;;  %v4343_v19 = vsel %vm4320_vm14, %v4318_v23, %v9148_v58  ;;  %v4317_v56 = vsel %vm4295_vm13, %v4292_v2, %v9084_v48  ;;  %v4294_v3 = vsel %vm392_vm3, %v9965_v10, %v9029_v40 }
 0x578   : > { %4780 = vmatmul.mubr.f32.gmra.mrb[40].mxu0 %v4557_v21  ;;  %v4342_v18 = vsel %vm4320_vm14, %v4317_v56, %v9144_v25  ;;  %v4319_v59 = vsel %vm4295_vm13, %v4294_v3, %v9089_v8  ;;  %v4565_v39 = vsel %vm1755_vm11, %v4556_v0, %v4564_v4  ;;  %v4571_v22 = vrot.slane %v4343_v19, 7 }
 0x579   : > { %4784 = vmatprep.mubr.f32.mxu0 %v4567_v15  ;;  %v4344_v51 = vsel %vm4320_vm14, %v4319_v59, %v9149_v44  ;;  %v4570_v11 = vrot.slane %v4342_v18, 7 }
 0x57a   : > { %v4579_v31 = vrot.slane %v4344_v51, 7 }
 0x57b   : > { %v4572_v37 = vsel %vm1755_vm11, %v4570_v11, %v4571_v22 }
 0x57c   : > { %4785 = vmatmul.mubr.f32.gmra.mrb[42].mxu0 %v4565_v39  ;;  %v4580_v52 = vsel %vm1755_vm11, %v4571_v22, %v4579_v31 }
 0x57d   : > { %4789 = vmatprep.mubr.f32.mxu0 %v15071_v63 }
 0x580   : > { %4790 = vmatmul.mubr.f32.gmra.mrb[44].mxu0 %v4572_v37 }
 0x581   : > { %4794 = vmatprep.mubr.f32.mxu0 %v15074_v43 }
 0x584   : > { %4795 = vmatmul.mubr.f32.gmra.mrb[46].mxu0 %v4580_v52 }
 0x5a5   : > { %v15208_v60 = vpop.f32.mrb[30].mxu1 }
 0x5a6   : > { %v15210_v50 = vpop.f32.mrb[31].mxu1 }
 0x5a9   : > { %v8717_v14 = vpop.f32.mrb[32].mxu1 }
 0x5aa   : > { %v15215_v63 = vadd.f32 %v8717_v14, %v8272_v30  ;;  %v5081_v54 = vpop.f32.mrb[33].mxu1 }
 0x5ab   : > { %v15217_v46 = vadd.f32 %v8272_v30, %v5081_v54 }
 0x5ac   : > { %5178 = vrot.lane.b32.xlu1 %v15215_v63, %s10126_s23 }
 0x5ad   : > { %v8720_v43 = vpop.f32.mrb[34].mxu1  ;;  %5176 = vrot.lane.b32.xlu0 %v15217_v46, %s10126_s23 }
 0x5ae   : > { %v15223_v12 = vadd.f32 %v8720_v43, %v8272_v30  ;;  %v5091_v55 = vpop.f32.mrb[35].mxu1 }
 0x5af   : > { %v15225_v29 = vadd.f32 %v8272_v30, %v5091_v55 }
 0x5b0   : > { %5182 = vrot.lane.b32.xlu1 %v15223_v12, %s10126_s23 }
 0x5b1   : > { %v8723_v1 = vpop.f32.mrb[36].mxu1  ;;  %5180 = vrot.lane.b32.xlu0 %v15225_v29, %s10126_s23 }
 0x5b2   : > { %v15231_v7 = vadd.f32 %v8723_v1, %v8272_v30  ;;  %v5101_v9 = vpop.f32.mrb[37].mxu1 }
 0x5b3   : > { %v15233_v28 = vadd.f32 %v8272_v30, %v5101_v9 }
 0x5b4   : > { %5186 = vrot.lane.b32.xlu1 %v15231_v7, %s10126_s23 }
 0x5b5   : > { %v8726_v34 = vpop.f32.mrb[38].mxu1  ;;  %5184 = vrot.lane.b32.xlu0 %v15233_v28, %s10126_s23 }
 0x5b6   : > { %v15239_v26 = vadd.f32 %v8726_v34, %v8272_v30  ;;  %v5111_v61 = vpop.f32.mrb[39].mxu1 }
 0x5b7   : > { %v15241_v16 = vadd.f32 %v8272_v30, %v5111_v61 }
 0x5b8   : > { %5190 = vrot.lane.b32.xlu1 %v15239_v26, %s10126_s23 }
 0x5b9   : > { %v8729_v6 = vpop.f32.mrb[40].mxu1  ;;  %5188 = vrot.lane.b32.xlu0 %v15241_v16, %s10126_s23 }
 0x5ba   : > { %v15247_v41 = vadd.f32 %v8729_v6, %v8272_v30  ;;  %v5121_v13 = vpop.f32.mrb[41].mxu1 }
 0x5bb   : > { %v15249_v24 = vadd.f32 %v8272_v30, %v5121_v13 }
 0x5bc   : > { %5194 = vrot.lane.b32.xlu1 %v15247_v41, %s10126_s23 }
 0x5bd   : > { %v8732_v17 = vpop.f32.mrb[42].mxu1  ;;  %5192 = vrot.lane.b32.xlu0 %v15249_v24, %s10126_s23 }
 0x5be   : > { %v15255_v5 = vadd.f32 %v8732_v17, %v8272_v30  ;;  %v5131_v49 = vpop.f32.mrb[43].mxu1 }
 0x5bf   : > { %v15257_v20 = vadd.f32 %v8272_v30, %v5131_v49 }
 0x5c0   : > { %5198 = vrot.lane.b32.xlu1 %v15255_v5, %s10126_s23 }
 0x5c1   : > { %v8735_v0 = vpop.f32.mrb[44].mxu1  ;;  %5196 = vrot.lane.b32.xlu0 %v15257_v20, %s10126_s23 }
 0x5c2   : > { %v15263_v45 = vadd.f32 %v8735_v0, %v8272_v30  ;;  %v5141_v62 = vpop.f32.mrb[45].mxu1 }
 0x5c3   : > { %v15265_v58 = vadd.f32 %v8272_v30, %v5141_v62 }
 0x5c4   : > { %5202 = vrot.lane.b32.xlu1 %v15263_v45, %s10126_s23 }
 0x5c5   : > { %v8738_v38 = vpop.f32.mrb[46].mxu1  ;;  %5200 = vrot.lane.b32.xlu0 %v15265_v58, %s10126_s23 }
 0x5c6   : > { %v15271_v36 = vadd.f32 %v8738_v38, %v8272_v30  ;;  %v5151_v48 = vpop.f32.mrb[47].mxu1 }
 0x5c7   : > { %v15273_v40 = vadd.f32 %v8272_v30, %v5151_v48 }
 0x5c8   : > { %5206 = vrot.lane.b32.xlu1 %v15271_v36, %s10126_s23 }
 0x5c9   : > { %v15277_v47 = vpop.f32.mrb[48].mxu1  ;;  %5204 = vrot.lane.b32.xlu0 %v15273_v40, %s10126_s23 }
 0x5ca   : > { %18369 = vst [vmem:[#allocation121_spill] sm:$0xff] %v15277_v47  ;;  %v15281_v27 = vpop.f32.mrb[49].mxu1 }
 0x5cb   : > { %18370 = vst [vmem:[#allocation79_spill] sm:$0xff] %v15281_v27 }
 0x5cd   : > { %v15283_v25 = vpop.f32.mrb[50].mxu1 }
 0x5ce   : > { %18371 = vst [vmem:[#allocation107_spill] sm:$0xff] %v15283_v25  ;;  %v15285_v33 = vpop.f32.mrb[51].mxu1 }
 0x5cf   : > { %18372 = vst [vmem:[#allocation167_spill] sm:$0xff] %v15285_v33 }
 0x5d1   : > { %v15287_v8 = vpop.f32.mrb[52].mxu1 }
 0x5d2   : > { %18373 = vst [vmem:[#allocation109_spill] sm:$0xff] %v15287_v8  ;;  %v15289_v23 = vpop.f32.mrb[53].mxu1 }
 0x5d3   : > { %18374 = vst [vmem:[#allocation89_spill] sm:$0xff] %v15289_v23 }
 0x5d5   : > { %v15291_v21 = vpop.f32.mrb[54].mxu1 }
 0x5d6   : > { %18375 = vst [vmem:[#allocation123_spill] sm:$0xff] %v15291_v21  ;;  %v15293_v4 = vpop.f32.mrb[55].mxu1 }
 0x5d7   : > { %18376 = vst [vmem:[#allocation122_spill] sm:$0xff] %v15293_v4 }
 0x5d9   : > { %v15295_v35 = vpop.f32.mrb[56].mxu1 }
 0x5da   : > { %18377 = vst [vmem:[#allocation90_spill] sm:$0xff] %v15295_v35  ;;  %v15297_v2 = vpop.f32.mrb[57].mxu1 }
 0x5db   : > { %18378 = vst [vmem:[#allocation80_spill] sm:$0xff] %v15297_v2 }
 0x5dd   : > { %v15299_v44 = vpop.f32.mrb[58].mxu1 }
 0x5de   : > { %18379 = vst [vmem:[#allocation124_spill] sm:$0xff] %v15299_v44  ;;  %v15301_v15 = vpop.f32.mrb[59].mxu1 }
 0x5df   : > { %18380 = vst [vmem:[#allocation204_spill] sm:$0xff] %v15301_v15 }
 0x5e1   : > { %v15303_v19 = vpop.f32.mrb[60].mxu1 }
 0x5e2   : > { %18381 = vst [vmem:[#allocation91_spill] sm:$0xff] %v15303_v19  ;;  %v15305_v56 = vpop.f32.mrb[61].mxu1  ;;  %v18394_v19 = vld [vmem:[#allocation71_spill] sm:$0xff] }
 0x5e3   : > { %18382 = vst [vmem:[#allocation146_spill] sm:$0xff] %v15305_v56 }
 0x5e5   : > { %v15307_v10 = vpop.f32.mrb[62].mxu1 }
 0x5e6   : > { %18383 = vst [vmem:[#allocation205_spill] sm:$0xff] %v15307_v10  ;;  %v15309_v3 = vpop.f32.mrb[63].mxu1 }
 0x5e7   : > { %18384 = vst [vmem:[#allocation206_spill] sm:$0xff] %v15309_v3 }
 0x5e9   : > { %v15311_v18 = vpop.f32.mrb[64].mxu1 }
 0x5ea   : > { %v15313_v59 = vpop.f32.mrb[65].mxu1 }
 0x5ed   : > { %v15315_v39 = vpop.f32.mrb[66].mxu1 }
 0x5ee   : > { %v15317_v22 = vpop.f32.mrb[67].mxu1 }
 0x5f1   : > { %v15319_v51 = vpop.f32.mrb[68].mxu1 }
 0x5f2   : > { %v15321_v11 = vpop.f32.mrb[69].mxu1 }
 0x5f5   : > { %v15323_v37 = vpop.f32.mrb[70].mxu1 }
 0x5f6   : > { %v15325_v31 = vpop.f32.mrb[71].mxu1 }
 0x5f7   : > { %18385 = vst [vmem:[#allocation62_spill] sm:$0xff] %v15325_v31 }
 0x5f9   : > { %v15327_v52 = vpop.f32.mrb[72].mxu1 }
 0x5fa   : > { %18386 = vst [vmem:[#allocation15_spill] sm:$0xff] %v15327_v52  ;;  %v15329_v30 = vpop.f32.mrb[73].mxu1 }
 0x5fb   : > { %18387 = vst [vmem:[#allocation108_spill] sm:$0xff] %v15329_v30 }
 0x5fd   : > { %v15331_v14 = vpop.f32.mrb[74].mxu1 }
 0x5fe   : > { %18388 = vst [vmem:[#allocation170_spill] sm:$0xff] %v15331_v14  ;;  %v15333_v54 = vpop.f32.mrb[75].mxu1 }
 0x5ff   : > { %18389 = vst [vmem:[#allocation141_spill] sm:$0xff] %v15333_v54 }
 0x601   : > { %v15335_v43 = vpop.f32.mrb[76].mxu1 }
 0x602   : > { %18390 = vst [vmem:[#allocation156_spill] sm:$0xff] %v15335_v43  ;;  %v15337_v55 = vpop.f32.mrb[77].mxu1 }
 0x603   : > { %18391 = vst [vmem:[#allocation92_spill] sm:$0xff] %v15337_v55  ;;  %v18410_v55 = vld [vmem:[#allocation105_spill] sm:$0xff] }
 0x605   : > { %v15339_v1 = vpop.f32.mrb[78].mxu1 }
 0x606   : > { %18392 = vst [vmem:[#allocation207_spill] sm:$0xff] %v15339_v1  ;;  %v15341_v9 = vpop.f32.mrb[79].mxu1 }
 0x607   : > { %18393 = vst [vmem:[#allocation21_spill] sm:$0xff] %v15341_v9 }
 0x61e   : > { %v5179_v34 = vpop.permute.xlu1 %5178  ;;  %v8402_v61 = vpop.f32.mrb[18].mxu0 }
 0x61f   : > { %v15344_v6 = vmax.f32 %v15215_v63, %v5179_v34  ;;  %v5177_v13 = vpop.permute.xlu0 %5176  ;;  %v8403_v17 = vpop.f32.mrb[19].mxu0 }
 0x620   : > { %v15347_v49 = vmax.f32 %v15217_v46, %v5177_v13  ;;  %v8404_v0 = vadd.f32 %v8403_v17, %v8402_v61 }
 0x621   : > { %5306 = vrot.lane.b32.xlu1 %v15344_v6, %s10127_s25 }
 0x622   : > { %v4727_v62 = vadd.f32 %v8404_v0, %v15123_v42  ;;  %v5183_v38 = vpop.permute.xlu1 %5182  ;;  %5304 = vrot.lane.b32.xlu0 %v15347_v49, %s10127_s25  ;;  %v8405_v48 = vpop.f32.mrb[20].mxu0 }
 0x623   : > { %v15355_v34 = vmax.f32 %v15223_v12, %v5183_v38  ;;  %v5181_v10 = vpop.permute.xlu0 %5180  ;;  %v8406_v3 = vpop.f32.mrb[21].mxu0 }
 0x624   : > { %v15358_v13 = vadd.f32 %v18394_v19, %v4727_v62  ;;  %v15361_v61 = vmax.f32 %v15225_v29, %v5181_v10  ;;  %v8407_v17 = vadd.f32 %v8406_v3, %v8405_v48  ;;  %v18396_v62 = vld [vmem:[#allocation142_spill] sm:$0xff] }
 0x625   : > { %5310 = vrot.lane.b32.xlu1 %v15355_v34, %s10127_s25 }
 0x626   : > { %18395 = vst [vmem:[#allocation125_spill] sm:$0xff] %v15358_v13  ;;  %v4732_v0 = vadd.f32 %v8407_v17, %v15123_v42  ;;  %v5187_v56 = vpop.permute.xlu1 %5186  ;;  %5308 = vrot.lane.b32.xlu0 %v15361_v61, %s10127_s25  ;;  %v8408_v38 = vpop.f32.mrb[22].mxu0  ;;  %v5242_v14 = vsub.f32 %v15225_v29, %v15361_v61 }
 0x627   : > { %v15369_v44 = vmax.f32 %v15231_v7, %v5187_v56  ;;  %v5185_v15 = vpop.permute.xlu0 %5184  ;;  %v8409_v19 = vpop.f32.mrb[23].mxu0 }
 0x628   : > { %v15372_v35 = vadd.f32 %v18396_v62, %v4732_v0  ;;  %v15375_v10 = vmax.f32 %v15233_v28, %v5185_v15  ;;  %v8410_v3 = vadd.f32 %v8409_v19, %v8408_v38  ;;  %v18398_v62 = vld [vmem:[#allocation76_spill] sm:$0xff]  ;;  %v5260_v31 = vmul.f32 1.442695, %v5242_v14 }
 0x629   : > { %5314 = vrot.lane.b32.xlu1 %v15369_v44, %s10127_s25  ;;  %v5245_v52 = vsub.f32 %v15231_v7, %v15369_v44 }
 0x62a   : > { %18397 = vst [vmem:[#allocation63_spill] sm:$0xff] %v15372_v35  ;;  %v4737_v48 = vadd.f32 %v8410_v3, %v15123_v42  ;;  %v5191_v17 = vpop.permute.xlu1 %5190  ;;  %5312 = vrot.lane.b32.xlu0 %v15375_v10, %s10127_s25  ;;  %v8411_v56 = vpop.f32.mrb[24].mxu0 }
 0x62b   : > { %v15383_v2 = vmax.f32 %v15239_v26, %v5191_v17  ;;  %v5189_v21 = vpop.permute.xlu0 %5188  ;;  %v8412_v0 = vpop.f32.mrb[25].mxu0 }
 0x62c   : > { %v15386_v4 = vadd.f32 %v18398_v62, %v4737_v48  ;;  %v15389_v15 = vmax.f32 %v15241_v16, %v5189_v21  ;;  %v8413_v38 = vadd.f32 %v8412_v0, %v8411_v56  ;;  %v18400_v62 = vld [vmem:[#allocation150_spill] sm:$0xff] }
 0x62d   : > { %5318 = vrot.lane.b32.xlu1 %v15383_v2, %s10127_s25 }
 0x62e   : > { %18399 = vst [vmem:[#allocation94_spill] sm:$0xff] %v15386_v4  ;;  %v4742_v19 = vadd.f32 %v8413_v38, %v15123_v42  ;;  %v5195_v3 = vpop.permute.xlu1 %5194  ;;  %5316 = vrot.lane.b32.xlu0 %v15389_v15, %s10127_s25  ;;  %v8414_v17 = vpop.f32.mrb[26].mxu0 }
 0x62f   : > { %v15397_v8 = vmax.f32 %v15247_v41, %v5195_v3  ;;  %v5193_v23 = vpop.permute.xlu0 %5192  ;;  %v8415_v48 = vpop.f32.mrb[27].mxu0 }
 0x630   : > { %v15400_v25 = vadd.f32 %v18400_v62, %v4742_v19  ;;  %v15403_v21 = vmax.f32 %v15249_v24, %v5193_v23  ;;  %v8416_v56 = vadd.f32 %v8415_v48, %v8414_v17  ;;  %v18402_v62 = vld [vmem:[#allocation11_spill] sm:$0xff] }
 0x631   : > { %5322 = vrot.lane.b32.xlu1 %v15397_v8, %s10127_s25 }
 0x632   : > { %18401 = vst [vmem:[#allocation110_spill] sm:$0xff] %v15400_v25  ;;  %v4747_v0 = vadd.f32 %v8416_v56, %v15123_v42  ;;  %v5199_v38 = vpop.permute.xlu1 %5198  ;;  %5320 = vrot.lane.b32.xlu0 %v15403_v21, %s10127_s25  ;;  %v8417_v3 = vpop.f32.mrb[28].mxu0  ;;  %v5248_v44 = vsub.f32 %v15249_v24, %v15403_v21 }
 0x633   : > { %v15411_v33 = vmax.f32 %v15255_v5, %v5199_v38  ;;  %v5197_v47 = vpop.permute.xlu0 %5196  ;;  %v8418_v19 = vpop.f32.mrb[29].mxu0 }
 0x634   : > { %v15414_v27 = vadd.f32 %v18402_v62, %v4747_v0  ;;  %v15417_v23 = vmax.f32 %v15257_v20, %v5197_v47  ;;  %v8419_v17 = vadd.f32 %v8418_v19, %v8417_v3 }
 0x635   : > { %5326 = vrot.lane.b32.xlu1 %v15411_v33, %s10127_s25 }
 0x636   : > { %18403 = vst [vmem:[#allocation148_spill] sm:$0xff] %v15414_v27  ;;  %v4752_v48 = vadd.f32 %v8419_v17, %v15123_v42  ;;  %v5203_v56 = vpop.permute.xlu1 %5202  ;;  %5324 = vrot.lane.b32.xlu0 %v15417_v23, %s10127_s25  ;;  %v8420_v38 = vpop.f32.mrb[30].mxu0 }
 0x637   : > { %v15425_v25 = vmax.f32 %v15263_v45, %v5203_v56  ;;  %v5201_v35 = vpop.permute.xlu0 %5200  ;;  %v8421_v0 = vpop.f32.mrb[31].mxu0 }
 0x638   : > { %v15428_v62 = vadd.f32 %v14573_v53, %v4752_v48  ;;  %v15431_v47 = vmax.f32 %v15265_v58, %v5201_v35  ;;  %v8422_v3 = vadd.f32 %v8421_v0, %v8420_v38 }
 0x639   : > { %5330 = vrot.lane.b32.xlu1 %v15425_v25, %s10127_s25 }
 0x63a   : > { %18404 = vst [vmem:[#allocation24_spill] sm:$0xff] %v15428_v62  ;;  %v4757_v19 = vadd.f32 %v8422_v3, %v15123_v42  ;;  %v5207_v17 = vpop.permute.xlu1 %5206  ;;  %5328 = vrot.lane.b32.xlu0 %v15431_v47, %s10127_s25  ;;  %v8423_v56 = vpop.f32.mrb[32].mxu0  ;;  %v18406_v62 = vld [vmem:[#allocation118_spill] sm:$0xff] }
 0x63b   : > { %v15439_v27 = vmax.f32 %v15271_v36, %v5207_v17  ;;  %v5205_v4 = vpop.permute.xlu0 %5204  ;;  %v8424_v53 = vpop.f32.mrb[33].mxu0 }
 0x63c   : > { %v15442_v48 = vadd.f32 %v14565_v32, %v4757_v19  ;;  %v15445_v35 = vmax.f32 %v15273_v40, %v5205_v4  ;;  %v8425_v38 = vadd.f32 %v8424_v53, %v8423_v56 }
 0x63d   : > { %5334 = vrot.lane.b32.xlu1 %v15439_v27, %s10127_s25 }
 0x63e   : > { %18405 = vst [vmem:[#allocation208_spill] sm:$0xff] %v15442_v48  ;;  %v4762_v0 = vadd.f32 %v8425_v38, %v15123_v42  ;;  %5332 = vrot.lane.b32.xlu0 %v15445_v35, %s10127_s25  ;;  %v18408_v48 = vld [vmem:[#allocation154_spill] sm:$0xff] }
 0x63f   : > { %v8426_v3 = vpop.f32.mrb[34].mxu0 }
 0x640   : > { %v8427_v17 = vpop.f32.mrb[35].mxu0  ;;  %v15453_v57 = vadd.f32 %v18406_v62, %v4762_v0 }
 0x641   : > { %v8428_v13 = vadd.f32 %v8427_v17, %v8426_v3  ;;  %v18412_v17 = vld [vmem:[#allocation104_spill] sm:$0xff] }
 0x642   : > { %18407 = vst [vmem:[#allocation84_spill] sm:$0xff] %v15453_v57 }
 0x643   : > { %v4767_v32 = vadd.f32 %v8428_v13, %v15123_v42  ;;  %v8429_v19 = vpop.f32.mrb[36].mxu0 }
 0x644   : > { %v8430_v4 = vpop.f32.mrb[37].mxu0 }
 0x645   : > { %v15457_v56 = vadd.f32 %v18408_v48, %v4767_v32  ;;  %v8431_v53 = vadd.f32 %v8430_v4, %v8429_v19  ;;  %v18414_v4 = vld [vmem:[#allocation120_spill] sm:$0xff] }
 0x647   : > { %18409 = vst [vmem:[#allocation95_spill] sm:$0xff] %v15457_v56  ;;  %v4772_v9 = vadd.f32 %v8431_v53, %v15123_v42  ;;  %v8432_v38 = vpop.f32.mrb[38].mxu0 }
 0x648   : > { %v8433_v1 = vpop.f32.mrb[39].mxu0 }
 0x649   : > { %v15461_v43 = vadd.f32 %v18410_v55, %v4772_v9  ;;  %v8434_v54 = vadd.f32 %v8433_v1, %v8432_v38  ;;  %v18416_v38 = vld [vmem:[#allocation159_spill] sm:$0xff] }
 0x64b   : > { %18411 = vst [vmem:[#allocation81_spill] sm:$0xff] %v15461_v43  ;;  %v4777_v62 = vadd.f32 %v8434_v54, %v15123_v42  ;;  %v8435_v0 = vpop.f32.mrb[40].mxu0 }
 0x64c   : > { %v8436_v3 = vpop.f32.mrb[41].mxu0 }
 0x64d   : > { %v15465_v13 = vadd.f32 %v18412_v17, %v4777_v62  ;;  %v8437_v57 = vadd.f32 %v8436_v3, %v8435_v0 }
 0x64f   : > { %18413 = vst [vmem:[#allocation152_spill] sm:$0xff] %v15465_v13  ;;  %v4782_v48 = vadd.f32 %v8437_v57, %v15123_v42  ;;  %v8438_v32 = vpop.f32.mrb[42].mxu0 }
 0x650   : > { %v8439_v19 = vpop.f32.mrb[43].mxu0 }
 0x651   : > { %v15469_v53 = vadd.f32 %v18414_v4, %v4782_v48  ;;  %v8440_v56 = vadd.f32 %v8439_v19, %v8438_v32 }
 0x653   : > { %18415 = vst [vmem:[#allocation126_spill] sm:$0xff] %v15469_v53  ;;  %v4787_v55 = vadd.f32 %v8440_v56, %v15123_v42  ;;  %v8441_v9 = vpop.f32.mrb[44].mxu0 }
 0x654   : > { %v8442_v1 = vpop.f32.mrb[45].mxu0 }
 0x655   : > { %v15473_v54 = vadd.f32 %v18416_v38, %v4787_v55  ;;  %v8443_v43 = vadd.f32 %v8442_v1, %v8441_v9 }
 0x657   : > { %18417 = vst [vmem:[#allocation149_spill] sm:$0xff] %v15473_v54  ;;  %v4792_v62 = vadd.f32 %v8443_v43, %v15123_v42  ;;  %v8444_v17 = vpop.f32.mrb[46].mxu0  ;;  %v5243_v54 = vsub.f32 %v15223_v12, %v15355_v34  ;;  %v5249_v34 = vsub.f32 %v15247_v41, %v15397_v8  ;;  %v5250_v8 = vsub.f32 %v15257_v20, %v15417_v23 }
 0x658   : > { %v8445_v0 = vpop.f32.mrb[47].mxu0 }
 0x659   : > { %v15477_v57 = vadd.f32 %v15210_v50, %v4792_v62  ;;  %v8446_v3 = vadd.f32 %v8445_v0, %v8444_v17  ;;  %v5262_v30 = vmul.f32 1.442695, %v5243_v54 }
 0x65b   : > { %18418 = vst [vmem:[#allocation209_spill] sm:$0xff] %v15477_v57  ;;  %v4797_v48 = vadd.f32 %v8446_v3, %v15123_v42 }
 0x65d   : > { %v15481_v32 = vadd.f32 %v15208_v60, %v4797_v48 }
 0x65f   : > { %18419 = vst [vmem:[#allocation210_spill] sm:$0xff] %v15481_v32 }
 0x693   : > { %v5307_v56 = vpop.permute.xlu1 %5306 }
 0x694   : > { %v5353_v19 = vsub.f32 %v15215_v63, %v5307_v56  ;;  %v5305_v4 = vpop.permute.xlu0 %5304 }
 0x695   : > { %v5352_v55 = vsub.f32 %v15217_v46, %v5305_v4 }
 0x696   : > { %v5370_v9 = vmul.f32 1.442695, %v5353_v19 }
 0x697   : > { %v5368_v1 = vmul.f32 1.442695, %v5352_v55  ;;  %v5311_v43 = vpop.permute.xlu1 %5310 }
 0x698   : > { %9690 = vpow2.f32 %v5370_v9  ;;  %v5355_v38 = vsub.f32 %v15223_v12, %v5311_v43  ;;  %v5309_v50 = vpop.permute.xlu0 %5308  ;;  %v5246_v12 = vsub.f32 %v15241_v16, %v15389_v15 }
 0x699   : > { %9692 = vpow2.f32 %v5368_v1  ;;  %v5354_v62 = vsub.f32 %v15225_v29, %v5309_v50 }
 0x69a   : > { %v5374_v42 = vmul.f32 1.442695, %v5355_v38 }
 0x69b   : > { %v5372_v17 = vmul.f32 1.442695, %v5354_v62  ;;  %v5315_v60 = vpop.permute.xlu1 %5314 }
 0x69c   : > { %9694 = vpow2.f32 %v5374_v42  ;;  %v5357_v0 = vsub.f32 %v15231_v7, %v5315_v60  ;;  %v5313_v3 = vpop.permute.xlu0 %5312  ;;  %v5268_v7 = vmul.f32 1.442695, %v5246_v12 }
 0x69d   : > { %9696 = vpow2.f32 %v5372_v17  ;;  %v5356_v48 = vsub.f32 %v15233_v28, %v5313_v3 }
 0x69e   : > { %v5378_v56 = vmul.f32 1.442695, %v5357_v0 }
 0x69f   : > { %v5376_v19 = vmul.f32 1.442695, %v5356_v48  ;;  %v5319_v4 = vpop.permute.xlu1 %5318 }
 0x6a0   : > { %9698 = vpow2.f32 %v5378_v56  ;;  %v5359_v55 = vsub.f32 %v15239_v26, %v5319_v4  ;;  %v5317_v9 = vpop.permute.xlu0 %5316 }
 0x6a1   : > { %9700 = vpow2.f32 %v5376_v19  ;;  %v5358_v1 = vsub.f32 %v15241_v16, %v5317_v9  ;;  %v5251_v16 = vsub.f32 %v15255_v5, %v15411_v33 }
 0x6a2   : > { %v15491_v43 = vpop.eup %9690  ;;  %v5382_v38 = vmul.f32 1.442695, %v5359_v55 }
 0x6a3   : > { %v15493_v50 = vpop.eup %9692  ;;  %v5380_v62 = vmul.f32 1.442695, %v5358_v1  ;;  %5418 = vrot.lane.b32.xlu1 %v15491_v43, %s10126_s23  ;;  %v5323_v42 = vpop.permute.xlu1 %5322  ;;  %v5278_v15 = vmul.f32 1.442695, %v5251_v16 }
 0x6a4   : > { %9702 = vpow2.f32 %v5382_v38  ;;  %v5361_v17 = vsub.f32 %v15247_v41, %v5323_v42  ;;  %5416 = vrot.lane.b32.xlu0 %v15493_v50, %s10126_s23  ;;  %v5321_v60 = vpop.permute.xlu0 %5320  ;;  %v5272_v41 = vmul.f32 1.442695, %v5248_v44 }
 0x6a5   : > { %9704 = vpow2.f32 %v5380_v62  ;;  %v5360_v0 = vsub.f32 %v15249_v24, %v5321_v60 }
 0x6a6   : > { %v15501_v3 = vpop.eup %9694  ;;  %v5386_v48 = vmul.f32 1.442695, %v5361_v17 }
 0x6a7   : > { %v15503_v56 = vpop.eup %9696  ;;  %v5384_v19 = vmul.f32 1.442695, %v5360_v0  ;;  %5422 = vrot.lane.b32.xlu1 %v15501_v3, %s10126_s23  ;;  %v5327_v4 = vpop.permute.xlu1 %5326 }
 0x6a8   : > { %9706 = vpow2.f32 %v5386_v48  ;;  %v5363_v55 = vsub.f32 %v15255_v5, %v5327_v4  ;;  %5420 = vrot.lane.b32.xlu0 %v15503_v56, %s10126_s23  ;;  %v5325_v9 = vpop.permute.xlu0 %5324  ;;  %v5253_v5 = vsub.f32 %v15263_v45, %v15425_v25 }
 0x6a9   : > { %9708 = vpow2.f32 %v5384_v19  ;;  %v5362_v1 = vsub.f32 %v15257_v20, %v5325_v9  ;;  %v5252_v20 = vsub.f32 %v15265_v58, %v15431_v47 }
 0x6aa   : > { %v15511_v38 = vpop.eup %9698  ;;  %v5390_v62 = vmul.f32 1.442695, %v5363_v55 }
 0x6ab   : > { %v15513_v42 = vpop.eup %9700  ;;  %v5388_v17 = vmul.f32 1.442695, %v5362_v1  ;;  %5426 = vrot.lane.b32.xlu1 %v15511_v38, %s10126_s23  ;;  %v5331_v60 = vpop.permute.xlu1 %5330 }
 0x6ac   : > { %9710 = vpow2.f32 %v5390_v62  ;;  %v5365_v0 = vsub.f32 %v15263_v45, %v5331_v60  ;;  %5424 = vrot.lane.b32.xlu0 %v15513_v42, %s10126_s23  ;;  %v5329_v48 = vpop.permute.xlu0 %5328  ;;  %v5255_v45 = vsub.f32 %v15271_v36, %v15439_v27 }
 0x6ad   : > { %9712 = vpow2.f32 %v5388_v17  ;;  %v5364_v19 = vsub.f32 %v15265_v58, %v5329_v48  ;;  %v5254_v58 = vsub.f32 %v15273_v40, %v15445_v35 }
 0x6ae   : > { %v15521_v4 = vpop.eup %9702  ;;  %v5394_v55 = vmul.f32 1.442695, %v5365_v0 }
 0x6af   : > { %v15523_v9 = vpop.eup %9704  ;;  %v5392_v1 = vmul.f32 1.442695, %v5364_v19  ;;  %5430 = vrot.lane.b32.xlu1 %v15521_v4, %s10126_s23  ;;  %v5335_v57 = vpop.permute.xlu1 %5334 }
 0x6b0   : > { %9714 = vpow2.f32 %v5394_v55  ;;  %v5367_v62 = vsub.f32 %v15271_v36, %v5335_v57  ;;  %5428 = vrot.lane.b32.xlu0 %v15523_v9, %s10126_s23  ;;  %v5333_v60 = vpop.permute.xlu0 %5332  ;;  %v5286_v36 = vmul.f32 1.442695, %v5255_v45 }
 0x6b1   : > { %9716 = vpow2.f32 %v5392_v1  ;;  %v5366_v17 = vsub.f32 %v15273_v40, %v5333_v60  ;;  %v5284_v40 = vmul.f32 1.442695, %v5254_v58 }
 0x6b2   : > { %v15531_v48 = vpop.eup %9706  ;;  %v5398_v0 = vmul.f32 1.442695, %v5367_v62 }
 0x6b3   : > { %v15533_v32 = vpop.eup %9708  ;;  %v5396_v19 = vmul.f32 1.442695, %v5366_v17  ;;  %5434 = vrot.lane.b32.xlu1 %v15531_v48, %s10126_s23 }
 0x6b4   : > { %9718 = vpow2.f32 %v5398_v0  ;;  %5432 = vrot.lane.b32.xlu0 %v15533_v32, %s10126_s23  ;;  %v5241_v0 = vsub.f32 %v15215_v63, %v15344_v6  ;;  %v5244_v63 = vsub.f32 %v15233_v28, %v15375_v10  ;;  %v5266_v6 = vmul.f32 1.442695, %v5245_v52 }
 0x6b5   : > { %9720 = vpow2.f32 %v5396_v19  ;;  %v5240_v19 = vsub.f32 %v15217_v46, %v15347_v49  ;;  %v5247_v46 = vsub.f32 %v15239_v26, %v15383_v2  ;;  %v5274_v52 = vmul.f32 1.442695, %v5249_v34 }
 0x6b6   : > { %v15539_v57 = vpop.eup %9710  ;;  %v5258_v53 = vmul.f32 1.442695, %v5241_v0  ;;  %v5264_v29 = vmul.f32 1.442695, %v5244_v63 }
 0x6b7   : > { %v15541_v55 = vpop.eup %9712  ;;  %5438 = vrot.lane.b32.xlu1 %v15539_v57, %s10126_s23  ;;  %v5256_v13 = vmul.f32 1.442695, %v5240_v19  ;;  %v5270_v49 = vmul.f32 1.442695, %v5247_v46  ;;  %v5282_v19 = vmul.f32 1.442695, %v5253_v5 }
 0x6b8   : > { %5436 = vrot.lane.b32.xlu0 %v15541_v55, %s10126_s23  ;;  %9722 = vpow2.f32 %v5258_v53  ;;  %v5280_v46 = vmul.f32 1.442695, %v5252_v20 }
 0x6b9   : > { %9724 = vpow2.f32 %v5256_v13  ;;  %v5276_v13 = vmul.f32 1.442695, %v5250_v8 }
 0x6ba   : > { %v15547_v1 = vpop.eup %9714  ;;  %9726 = vpow2.f32 %v5262_v30 }
 0x6bb   : > { %v15549_v62 = vpop.eup %9716  ;;  %5442 = vrot.lane.b32.xlu1 %v15547_v1, %s10126_s23  ;;  %9728 = vpow2.f32 %v5260_v31 }
 0x6bc   : > { %5440 = vrot.lane.b32.xlu0 %v15549_v62, %s10126_s23  ;;  %9730 = vpow2.f32 %v5266_v6 }
 0x6bd   : > { %9732 = vpow2.f32 %v5264_v29 }
 0x6be   : > { %v15555_v60 = vpop.eup %9718  ;;  %9734 = vpow2.f32 %v5270_v49 }
 0x6bf   : > { %v15557_v17 = vpop.eup %9720  ;;  %5446 = vrot.lane.b32.xlu1 %v15555_v60, %s10126_s23  ;;  %9736 = vpow2.f32 %v5268_v7 }
 0x6c0   : > { %5444 = vrot.lane.b32.xlu0 %v15557_v17, %s10126_s23 }
 0x6c2   : > { %v15583_v28 = vpop.eup %9722 }
 0x6c3   : > { %v15585_v2 = vpop.eup %9724 }
 0x6c4   : > { %v15593_v14 = vpop.eup %9726 }
 0x6c5   : > { %v15595_v10 = vpop.eup %9728 }
 0x6c6   : > { %v15603_v53 = vpop.eup %9730 }
 0x6c7   : > { %v15605_v0 = vpop.eup %9732 }
 0x6c8   : > { %v15613_v6 = vpop.eup %9734 }
 0x6c9   : > { %v15615_v12 = vpop.eup %9736 }
 0x715   : > { %v5419_v26 = vpop.permute.xlu1 %5418 }
 0x716   : > { %v5465_v31 = vadd.f32 %v15583_v28, %v5419_v26  ;;  %v5417_v30 = vpop.permute.xlu0 %5416 }
 0x717   : > { %v5464_v24 = vadd.f32 %v15585_v2, %v5417_v30 }
 0x718   : > { %9738 = vrcp.f32 %v5465_v31 }
 0x719   : > { %9740 = vrcp.f32 %v5464_v24  ;;  %v5423_v61 = vpop.permute.xlu1 %5422 }
 0x71a   : > { %9742 = vpow2.f32 %v5274_v52  ;;  %v5467_v33 = vadd.f32 %v15593_v14, %v5423_v61  ;;  %v5421_v21 = vpop.permute.xlu0 %5420 }
 0x71b   : > { %9744 = vpow2.f32 %v5272_v41  ;;  %v5466_v23 = vadd.f32 %v15595_v10, %v5421_v21 }
 0x71c   : > { %9746 = vrcp.f32 %v5467_v33 }
 0x71d   : > { %9748 = vrcp.f32 %v5466_v23  ;;  %v5427_v54 = vpop.permute.xlu1 %5426 }
 0x71e   : > { %9750 = vpow2.f32 %v5278_v15  ;;  %v5469_v25 = vadd.f32 %v15603_v53, %v5427_v54  ;;  %v5425_v63 = vpop.permute.xlu0 %5424 }
 0x71f   : > { %9752 = vpow2.f32 %v5276_v13  ;;  %v5468_v47 = vadd.f32 %v15605_v0, %v5425_v63 }
 0x720   : > { %9754 = vrcp.f32 %v5469_v25 }
 0x721   : > { %9756 = vrcp.f32 %v5468_v47  ;;  %v5431_v29 = vpop.permute.xlu1 %5430 }
 0x722   : > { %v15617_v49 = vpop.eup %9738  ;;  %9758 = vpow2.f32 %v5282_v19  ;;  %v5471_v27 = vadd.f32 %v15613_v6, %v5431_v29  ;;  %v5429_v34 = vpop.permute.xlu0 %5428 }
 0x723   : > { %v15620_v7 = vpop.eup %9740  ;;  %9760 = vpow2.f32 %v5280_v46  ;;  %v5470_v35 = vadd.f32 %v15615_v12, %v5429_v34  ;;  %5530 = vrot.lane.b32.xlu1 %v15617_v49, %s10127_s25 }
 0x724   : > { %v15625_v44 = vpop.eup %9742  ;;  %9762 = vrcp.f32 %v5471_v27  ;;  %5528 = vrot.lane.b32.xlu0 %v15620_v7, %s10127_s25 }
 0x725   : > { %v15629_v26 = vpop.eup %9744  ;;  %9764 = vrcp.f32 %v5470_v35  ;;  %v5435_v52 = vpop.permute.xlu1 %5434 }
 0x726   : > { %v15631_v16 = vpop.eup %9746  ;;  %9766 = vpow2.f32 %v5286_v36  ;;  %v5473_v31 = vadd.f32 %v15625_v44, %v5435_v52  ;;  %v5433_v30 = vpop.permute.xlu0 %5432 }
 0x727   : > { %v9749_v41 = vpop.eup %9748  ;;  %9768 = vpow2.f32 %v5284_v40  ;;  %v5472_v8 = vadd.f32 %v15629_v26, %v5433_v30  ;;  %5534 = vrot.lane.b32.xlu1 %v15631_v16, %s10127_s25 }
 0x728   : > { %v15637_v24 = vpop.eup %9750  ;;  %9770 = vrcp.f32 %v5473_v31  ;;  %5532 = vrot.lane.b32.xlu0 %v9749_v41, %s10127_s25 }
 0x729   : > { %v15640_v61 = vpop.eup %9752  ;;  %9772 = vrcp.f32 %v5472_v8  ;;  %v5439_v15 = vpop.permute.xlu1 %5438 }
 0x72a   : > { %v9755_v5 = vpop.eup %9754  ;;  %v5475_v33 = vadd.f32 %v15637_v24, %v5439_v15  ;;  %v5437_v21 = vpop.permute.xlu0 %5436 }
 0x72b   : > { %v9757_v13 = vpop.eup %9756  ;;  %v5474_v20 = vadd.f32 %v15640_v61, %v5437_v21  ;;  %5538 = vrot.lane.b32.xlu1 %v9755_v5, %s10127_s25 }
 0x72c   : > { %v15645_v23 = vpop.eup %9758  ;;  %9774 = vrcp.f32 %v5475_v33  ;;  %5536 = vrot.lane.b32.xlu0 %v9757_v13, %s10127_s25 }
 0x72d   : > { %v15648_v54 = vpop.eup %9760  ;;  %9776 = vrcp.f32 %v5474_v20  ;;  %v5443_v19 = vpop.permute.xlu1 %5442  ;;  %v5497_v20 = vmul.f32 %v15617_v49, %v15583_v28  ;;  %v5500_v28 = vmul.f32 %v9757_v13, %v15605_v0  ;;  %v15704_v13 = vld [vmem:[#allocation3 + $0x148] sm:$0xff] }
 0x72e   : > { %v9763_v45 = vpop.eup %9762  ;;  %v5477_v25 = vadd.f32 %v15645_v23, %v5443_v19  ;;  %v5441_v63 = vpop.permute.xlu0 %5440  ;;  %v5496_v19 = vmul.f32 %v15620_v7, %v15585_v2 }
 0x72f   : > { %v9765_v46 = vpop.eup %9764  ;;  %v5476_v58 = vadd.f32 %v15648_v54, %v5441_v63  ;;  %5542 = vrot.lane.b32.xlu1 %v9763_v45, %s10127_s25  ;;  %v5498_v63 = vmul.f32 %v9749_v41, %v15595_v10  ;;  %v5503_v2 = vmul.f32 %v9763_v45, %v15613_v6  ;;  %v15689_v6 = vld [vmem:[#allocation3 + $0x110] sm:$0xff] }
 0x730   : > { %v9767_v47 = vpop.eup %9766  ;;  %9778 = vrcp.f32 %v5477_v25  ;;  %5540 = vrot.lane.b32.xlu0 %v9765_v46, %s10127_s25  ;;  %v5499_v25 = vmul.f32 %v15631_v16, %v15593_v14  ;;  %v5502_v49 = vmul.f32 %v9765_v46, %v15615_v12  ;;  %18420 = vst [vmem:[#allocation128_spill] sm:$0xff] %v15689_v6  ;;  %v15691_v12 = vld [vmem:[#allocation3 + $0x108] sm:$0xff] }
 0x731   : > { %v9769_v29 = vpop.eup %9768  ;;  %9780 = vrcp.f32 %v5476_v58  ;;  %v5447_v36 = vpop.permute.xlu1 %5446  ;;  %v5501_v58 = vmul.f32 %v9755_v5, %v15603_v53  ;;  %18421 = vst [vmem:[#allocation113_spill] sm:$0xff] %v15691_v12  ;;  %v5900_v16 = vrot.slane %v15691_v12, 1 }
 0x732   : > { %v9771_v27 = vpop.eup %9770  ;;  %v5479_v34 = vadd.f32 %v9767_v47, %v5447_v36  ;;  %v5445_v40 = vpop.permute.xlu0 %5444 }
 0x733   : > { %v9773_v35 = vpop.eup %9772  ;;  %v5478_v52 = vadd.f32 %v9769_v29, %v5445_v40  ;;  %5546 = vrot.lane.b32.xlu1 %v9771_v27, %s10127_s25  ;;  %v5505_v14 = vmul.f32 %v9771_v27, %v15625_v44  ;;  %v15728_v40 = vld [vmem:[#allocation3 + $0x168] sm:$0xff] }
 0x734   : > { %9782 = vrcp.f32 %v5479_v34  ;;  %5544 = vrot.lane.b32.xlu0 %v9773_v35, %s10127_s25  ;;  %v5504_v10 = vmul.f32 %v9773_v35, %v15629_v26  ;;  %v5901_v26 = vrot.slane %v15689_v6, 1  ;;  %v15731_v35 = vrot.slane %v15728_v40, 1 }
 0x735   : > { %9784 = vrcp.f32 %v5478_v52  ;;  %v15733_v52 = vld [vmem:[#allocation3 + $0x170] sm:$0xff] }
 0x736   : > { %v9775_v31 = vpop.eup %9774  ;;  %v5902_v46 = vsel %vm691_vm1, %v5900_v16, %v5901_v26  ;;  %18429 = vst [vmem:[#allocation212_spill] sm:$0xff] %v15731_v35 }
 0x737   : > { %v9777_v30 = vpop.eup %9776  ;;  %5550 = vrot.lane.b32.xlu1 %v9775_v31, %s10127_s25  ;;  %v5507_v53 = vmul.f32 %v9775_v31, %v15637_v24  ;;  %v15699_v24 = vld [vmem:[#allocation3 + $0x128] sm:$0xff]  ;;  %v9330_v27 = vpack.i.bf16 %v5902_v46, %v5900_v16  ;;  %v15736_v31 = vrot.slane %v15733_v52, 1  ;;  %v15794_v16 = vld [vmem:[#allocation3 + $0x1f0] sm:$0xff] }
 0x738   : > { %5548 = vrot.lane.b32.xlu0 %v9777_v30, %s10127_s25  ;;  %v5506_v0 = vmul.f32 %v9777_v30, %v15640_v61  ;;  %18422 = vst [vmem:[#allocation86_spill] sm:$0xff] %v15699_v24  ;;  %v15702_v61 = vrot.slane %v15699_v24, 1 }
 0x739   : > { %18430 = vst [vmem:[#allocation93_spill] sm:$0xff] %v15736_v31 }
 0x73a   : > { %v9779_v8 = vpop.eup %9778  ;;  %18423 = vst [vmem:[#allocation96_spill] sm:$0xff] %v15702_v61 }
 0x73b   : > { %v9781_v15 = vpop.eup %9780  ;;  %5554 = vrot.lane.b32.xlu1 %v9779_v8, %s10127_s25  ;;  %v5509_v7 = vmul.f32 %v9779_v8, %v15645_v23  ;;  %v15707_v23 = vrot.slane %v15704_v13, 1 }
 0x73c   : > { %5552 = vrot.lane.b32.xlu0 %v9781_v15, %s10127_s25  ;;  %v5508_v44 = vmul.f32 %v9781_v15, %v15648_v54  ;;  %v15709_v54 = vld [vmem:[#allocation3 + $0x150] sm:$0xff] }
 0x73d   : > { %18424 = vst [vmem:[#allocation132_spill] sm:$0xff] %v15707_v23  ;;  %v15712_v45 = vrot.slane %v15709_v54, 1 }
 0x73e   : > { %v9783_v33 = vpop.eup %9782 }
 0x73f   : > { %v9785_v21 = vpop.eup %9784  ;;  %5558 = vrot.lane.b32.xlu1 %v9783_v33, %s10127_s25  ;;  %v5511_v41 = vmul.f32 %v9783_v33, %v9767_v47  ;;  %18425 = vst [vmem:[#allocation114_spill] sm:$0xff] %v15712_v45  ;;  %v15716_v47 = vld [vmem:[#allocation3 + $0x130] sm:$0xff]  ;;  %v15726_v34 = vsel %vm691_vm1, %v15707_v23, %v15712_v45  ;;  %v15752_v33 = vsel %vm691_vm1, %v15731_v35, %v15736_v31 }
 0x740   : > { %5556 = vrot.lane.b32.xlu0 %v9785_v21, %s10127_s25  ;;  %v5510_v5 = vmul.f32 %v9785_v21, %v9769_v29  ;;  %18426 = vst [vmem:[#allocation162_spill] sm:$0xff] %v15716_v47  ;;  %v15719_v36 = vrot.slane %v15716_v47, 1  ;;  %v9335_v29 = vpack.i.bf16 %v15702_v61, %v5901_v26  ;;  %18428 = vst [vmem:[#allocation211_spill] sm:$0xff] %v15726_v34  ;;  %v15755_v21 = vld [vmem:[#allocation3 + $0x190] sm:$0xff]  ;;  %v15792_v26 = vld [vmem:[#allocation3 + $0x1e8] sm:$0xff] }
 0x741   : > { %v9345_v8 = vpack.i.bf16 %v15726_v34, %v15707_v23  ;;  %18432 = vst [vmem:[#allocation164_spill] sm:$0xff] %v15752_v33  ;;  %v18454_v34 = vld [vmem:[#allocation153_spill] sm:$0xff]  ;;  %v18455_v23 = vld [vmem:[#allocation158_spill] sm:$0xff] }
 0x742   : > { %18427 = vst [vmem:[#allocation157_spill] sm:$0xff] %v15719_v36  ;;  %v15742_v30 = vsel %vm691_vm1, %v15702_v61, %v15719_v36 }
 0x743   : > { %5610 = vrot.lane.b32.xlu1 %v5497_v20, %s10128_s29  ;;  %18431 = vst [vmem:[#allocation111_spill] sm:$0xff] %v15742_v30  ;;  %v9340_v15 = vpack.i.bf16 %v15719_v36, %v15742_v30  ;;  %v15758_v20 = vrot.slane %v15755_v21, 1  ;;  %v9430_v36 = vpack.i.bf16 %v18455_v23, %v18454_v34 }
 0x744   : > { %5608 = vrot.lane.b32.xlu0 %v5496_v19, %s10128_s29  ;;  %v15760_v19 = vld [vmem:[#allocation3 + $0x188] sm:$0xff] }
 0x745   : > { %18433 = vst [vmem:[#allocation131_spill] sm:$0xff] %v15758_v20 }
 0x747   : > { %5614 = vrot.lane.b32.xlu1 %v5499_v25, %s10128_s29  ;;  %v15763_v25 = vrot.slane %v15760_v19, 1 }
 0x748   : > { %5612 = vrot.lane.b32.xlu0 %v5498_v63, %s10128_s29  ;;  %v9355_v63 = vpack.i.bf16 %v15736_v31, %v15752_v33 }
 0x749   : > { %18434 = vst [vmem:[#allocation17_spill] sm:$0xff] %v15763_v25 }
 0x74b   : > { %5618 = vrot.lane.b32.xlu1 %v5501_v58, %s10128_s29  ;;  %v15768_v58 = vld [vmem:[#allocation3 + $0x1a8] sm:$0xff] }
 0x74c   : > { %5616 = vrot.lane.b32.xlu0 %v5500_v28, %s10128_s29  ;;  %v15771_v28 = vrot.slane %v15768_v58, 1 }
 0x74e   : > { %18435 = vst [vmem:[#allocation213_spill] sm:$0xff] %v15771_v28 }
 0x74f   : > { %5622 = vrot.lane.b32.xlu1 %v5503_v2, %s10128_s29  ;;  %v9350_v2 = vpack.i.bf16 %v15731_v35, %v15712_v45  ;;  %v18451_v35 = vld [vmem:[#allocation155_spill] sm:$0xff] }
 0x750   : > { %5620 = vrot.lane.b32.xlu0 %v5502_v49, %s10128_s29  ;;  %v15775_v49 = vld [vmem:[#allocation3 + $0x1c8] sm:$0xff] }
 0x753   : > { %5626 = vrot.lane.b32.xlu1 %v5505_v14, %s10128_s29  ;;  %v5918_v14 = vrot.slane %v15775_v49, 1 }
 0x754   : > { %5624 = vrot.lane.b32.xlu0 %v5504_v10, %s10128_s29  ;;  %v15778_v10 = vld [vmem:[#allocation3 + $0x1d0] sm:$0xff] }
 0x757   : > { %5630 = vrot.lane.b32.xlu1 %v5507_v53, %s10128_s29  ;;  %v5919_v53 = vrot.slane %v15778_v10, 1 }
 0x758   : > { %5628 = vrot.lane.b32.xlu0 %v5506_v0, %s10128_s29  ;;  %v15785_v0 = vsel %vm691_vm1, %v15763_v25, %v15758_v20 }
 0x759   : > { %18436 = vst [vmem:[#allocation134_spill] sm:$0xff] %v15785_v0  ;;  %v5920_v46 = vsel %vm691_vm1, %v5918_v14, %v5919_v53 }
 0x75b   : > { %5634 = vrot.lane.b32.xlu1 %v5509_v7, %s10128_s29  ;;  %v15787_v7 = vld [vmem:[#allocation3 + $0x1b0] sm:$0xff] }
 0x75c   : > { %5632 = vrot.lane.b32.xlu0 %v5508_v44, %s10128_s29  ;;  %v15790_v44 = vrot.slane %v15787_v7, 1 }
 0x75e   : > { %18437 = vst [vmem:[#allocation168_spill] sm:$0xff] %v15790_v44 }
 0x75f   : > { %5638 = vrot.lane.b32.xlu1 %v5511_v41, %s10128_s29  ;;  %v9365_v41 = vpack.i.bf16 %v15771_v28, %v15758_v20  ;;  %v6005_v20 = vrot.slane %v15689_v6, 2 }
 0x760   : > { %5636 = vrot.lane.b32.xlu0 %v5510_v5, %s10128_s29  ;;  %v9360_v5 = vpack.i.bf16 %v15785_v0, %v15763_v25 }
 0x763   : > { %9336 = vrot.lane.b32.xlu1 %v9335_v29, %s10123_s8  ;;  %v5921_v29 = vrot.slane %v15792_v26, 1 }
 0x764   : > { %9331 = vrot.lane.b32.xlu0 %v9330_v27, %s10123_s8  ;;  %v5922_v27 = vrot.slane %v15794_v16, 1 }
 0x765   : > { %v9380_v31 = vpack.i.bf16 %v5921_v29, %v5919_v53  ;;  %v18443_v53 = vld [vmem:[#allocation18_spill] sm:$0xff] }
 0x766   : > { %v5923_v0 = vsel %vm691_vm1, %v5921_v29, %v5922_v27 }
 0x767   : > { %9346 = vrot.lane.b32.xlu1 %v9345_v8, %s10123_s8  ;;  %v15808_v8 = vsel %vm691_vm1, %v15771_v28, %v15790_v44  ;;  %v9385_v28 = vpack.i.bf16 %v5922_v27, %v5923_v0  ;;  %v18442_v0 = vld [vmem:[#allocation143_spill] sm:$0xff]  ;;  %v18447_v27 = vld [vmem:[#allocation77_spill] sm:$0xff] }
 0x768   : > { %9341 = vrot.lane.b32.xlu0 %v9340_v15, %s10123_s8  ;;  %18438 = vst [vmem:[#allocation25_spill] sm:$0xff] %v15808_v8  ;;  %v9375_v15 = vpack.i.bf16 %v5920_v46, %v5918_v14  ;;  %v18439_v46 = vld [vmem:[#allocation74_spill] sm:$0xff]  ;;  %v9400_v29 = vpack.i.bf16 %v18443_v53, %v18442_v0 }
 0x76b   : > { %9356 = vrot.lane.b32.xlu1 %v9355_v63, %s10123_s8  ;;  %v5790_v63 = vld [vmem:[#allocation3 + $0x118] sm:$0xff] }
 0x76c   : > { %9351 = vrot.lane.b32.xlu0 %v9350_v2, %s10123_s8  ;;  %v9370_v2 = vpack.i.bf16 %v15790_v44, %v15808_v8  ;;  %v6007_v25 = vrot.slane %v5790_v63, 2  ;;  %v18440_v8 = vld [vmem:[#allocation75_spill] sm:$0xff] }
 0x76f   : > { %9366 = vrot.lane.b32.xlu1 %v9365_v41, %s10123_s8  ;;  %v6004_v41 = vrot.slane %v15691_v12, 2 }
 0x770   : > { %9361 = vrot.lane.b32.xlu0 %v9360_v5, %s10123_s8  ;;  %v6008_v5 = vsel %vm796_vm2, %v6005_v20, %v6007_v25  ;;  %v18446_v25 = vld [vmem:[#allocation145_spill] sm:$0xff] }
 0x771   : > { %v6006_v14 = vsel %vm796_vm2, %v6004_v41, %v6005_v20  ;;  %v9395_v44 = vpack.i.bf16 %v18439_v46, %v6008_v5 }
 0x773   : > { %9376 = vrot.lane.b32.xlu1 %v9375_v15, %s10123_s8  ;;  %v9390_v15 = vpack.i.bf16 %v6006_v14, %v6004_v41  ;;  %v9410_v41 = vpack.i.bf16 %v18447_v27, %v18446_v25  ;;  %v18449_v14 = vld [vmem:[#allocation101_spill] sm:$0xff] }
 0x774   : > { %9371 = vrot.lane.b32.xlu0 %v9370_v2, %s10123_s8  ;;  %v18441_v2 = vld [vmem:[#allocation147_spill] sm:$0xff] }
 0x775   : > { %v9405_v63 = vpack.i.bf16 %v18441_v2, %v18440_v8 }
 0x777   : > { %9386 = vrot.lane.b32.xlu1 %v9385_v28, %s10123_s8  ;;  %v18445_v28 = vld [vmem:[#allocation151_spill] sm:$0xff] }
 0x778   : > { %9381 = vrot.lane.b32.xlu0 %v9380_v31, %s10123_s8  ;;  %v18444_v31 = vld [vmem:[#allocation100_spill] sm:$0xff] }
 0x779   : > { %v9415_v20 = vpack.i.bf16 %v18445_v28, %v18444_v31 }
 0x77b   : > { %9396 = vrot.lane.b32.xlu1 %v9395_v44, %s10124_s10  ;;  %v18448_v44 = vld [vmem:[#allocation117_spill] sm:$0xff] }
 0x77c   : > { %9391 = vrot.lane.b32.xlu0 %v9390_v15, %s10124_s10  ;;  %v9425_v5 = vpack.i.bf16 %v18449_v14, %v18448_v44  ;;  %v18450_v15 = vld [vmem:[#allocation12_spill] sm:$0xff] }
 0x77d   : > { %v9420_v33 = vpack.i.bf16 %v18451_v35, %v18450_v15 }
 0x77f   : > { %9406 = vrot.lane.b32.xlu1 %v9405_v63, %s10124_s10  ;;  %v18452_v63 = vld [vmem:[#allocation102_spill] sm:$0xff] }
 0x780   : > { %9401 = vrot.lane.b32.xlu0 %v9400_v29, %s10124_s10  ;;  %v18453_v29 = vld [vmem:[#allocation20_spill] sm:$0xff] }
 0x781   : > { %v9435_v45 = vpack.i.bf16 %v18453_v29, %v18452_v63 }
 0x783   : > { %9416 = vrot.lane.b32.xlu1 %v9415_v20, %s10124_s10 }
 0x784   : > { %9411 = vrot.lane.b32.xlu0 %v9410_v41, %s10124_s10 }
 0x787   : > { %9426 = vrot.lane.b32.xlu1 %v9425_v5, %s10124_s10 }
 0x788   : > { %9421 = vrot.lane.b32.xlu0 %v9420_v33, %s10124_s10 }
 0x78b   : > { %9436 = vrot.lane.b32.xlu1 %v9435_v45, %s10124_s10 }
 0x78c   : > { %9431 = vrot.lane.b32.xlu0 %v9430_v36, %s10124_s10 }
 0x795   : > { %v5531_v20 = vpop.permute.xlu1 %5530 }
 0x796   : > { %v5577_v41 = vmul.f32 %v15491_v43, %v5531_v20  ;;  %v5529_v61 = vpop.permute.xlu0 %5528 }
 0x797   : > { %v5576_v30 = vmul.f32 %v15493_v50, %v5529_v61 }
 0x798   : > { %5674 = vrot.lane.b32.xlu1 %v5577_v41, %s10128_s29 }
 0x799   : > { %v5535_v5 = vpop.permute.xlu1 %5534  ;;  %5672 = vrot.lane.b32.xlu0 %v5576_v30, %s10128_s29 }
 0x79a   : > { %v5579_v33 = vmul.f32 %v15501_v3, %v5535_v5  ;;  %v5533_v12 = vpop.permute.xlu0 %5532  ;;  %v15872_v5 = vld [vmem:[#allocation3 + $0x1f8] sm:$0xff] }
 0x79b   : > { %v5578_v6 = vmul.f32 %v15503_v56, %v5533_v12 }
 0x79c   : > { %5678 = vrot.lane.b32.xlu1 %v5579_v33, %s10128_s29 }
 0x79d   : > { %v5539_v45 = vpop.permute.xlu1 %5538  ;;  %5676 = vrot.lane.b32.xlu0 %v5578_v6, %s10128_s29 }
 0x79e   : > { %v5581_v43 = vmul.f32 %v15511_v38, %v5539_v45  ;;  %v5537_v36 = vpop.permute.xlu0 %5536 }
 0x79f   : > { %v5580_v50 = vmul.f32 %v15513_v42, %v5537_v36  ;;  %v6040_v36 = vrot.slane %v15794_v16, 2 }
 0x7a0   : > { %5682 = vrot.lane.b32.xlu1 %v5581_v43, %s10128_s29  ;;  %v6039_v43 = vrot.slane %v15792_v26, 2 }
 0x7a1   : > { %v5543_v61 = vpop.permute.xlu1 %5542  ;;  %5680 = vrot.lane.b32.xlu0 %v5580_v50, %s10128_s29 }
 0x7a2   : > { %v5583_v3 = vmul.f32 %v15521_v4, %v5543_v61  ;;  %v5541_v30 = vpop.permute.xlu0 %5540 }
 0x7a3   : > { %v5582_v56 = vmul.f32 %v15523_v9, %v5541_v30 }
 0x7a4   : > { %5686 = vrot.lane.b32.xlu1 %v5583_v3, %s10128_s29 }
 0x7a5   : > { %v5547_v12 = vpop.permute.xlu1 %5546  ;;  %5684 = vrot.lane.b32.xlu0 %v5582_v56, %s10128_s29  ;;  %v18456_v56 = vld [vmem:[#allocation14_spill] sm:$0xff] }
 0x7a6   : > { %v5585_v38 = vmul.f32 %v15531_v48, %v5547_v12  ;;  %v5545_v6 = vpop.permute.xlu0 %5544  ;;  %v15895_v12 = vld [vmem:[#allocation3 + $0x140] sm:$0xff] }
 0x7a7   : > { %v5584_v42 = vmul.f32 %v15533_v32, %v5545_v6 }
 0x7a8   : > { %5690 = vrot.lane.b32.xlu1 %v5585_v38, %s10128_s29 }
 0x7a9   : > { %v5551_v20 = vpop.permute.xlu1 %5550  ;;  %5688 = vrot.lane.b32.xlu0 %v5584_v42, %s10128_s29  ;;  %v9455_v42 = vpack.i.bf16 %v15895_v12, %v15716_v47 }
 0x7aa   : > { %v5587_v4 = vmul.f32 %v15539_v57, %v5551_v20  ;;  %v5549_v41 = vpop.permute.xlu0 %5548  ;;  %v17393_v57 = vrot.slane %v15872_v5, 2 }
 0x7ab   : > { %v5586_v9 = vmul.f32 %v15541_v55, %v5549_v41  ;;  %v15913_v41 = vld [vmem:[#allocation3 + $0x160] sm:$0xff] }
 0x7ac   : > { %5694 = vrot.lane.b32.xlu1 %v5587_v4, %s10128_s29  ;;  %18457 = vst [vmem:[#allocation127_spill] sm:$0xff] %v15913_v41 }
 0x7ad   : > { %v5555_v33 = vpop.permute.xlu1 %5554  ;;  %5692 = vrot.lane.b32.xlu0 %v5586_v9, %s10128_s29 }
 0x7ae   : > { %v5589_v48 = vmul.f32 %v15547_v1, %v5555_v33  ;;  %v5553_v32 = vpop.permute.xlu0 %5552  ;;  %v6041_v1 = vsel %vm796_vm2, %v6039_v43, %v6040_v36  ;;  %v9465_v33 = vpack.i.bf16 %v15728_v40, %v15913_v41  ;;  %v15933_v40 = vld [vmem:[#allocation3 + $0x1c0] sm:$0xff] }
 0x7af   : > { %v5588_v45 = vmul.f32 %v15549_v62, %v5553_v32  ;;  %v6043_v62 = vsel %vm796_vm2, %v6040_v36, %v17393_v57  ;;  %v15922_v32 = vld [vmem:[#allocation3 + $0x180] sm:$0xff]  ;;  %v9475_v36 = vpack.i.bf16 %v15755_v21, %v15760_v19 }
 0x7b0   : > { %5698 = vrot.lane.b32.xlu1 %v5589_v48, %s10128_s29  ;;  %v9445_v30 = vpack.i.bf16 %v6043_v62, %v6041_v1  ;;  %v9460_v48 = vpack.i.bf16 %v15709_v54, %v15704_v13  ;;  %18458 = vst [vmem:[#allocation29_spill] sm:$0xff] %v15922_v32  ;;  %v9978_v1 = vld [vmem:[#allocation3 + $0x148] sm:$0xff]  ;;  %v15947_v19 = vld [vmem:[#allocation3 + $0x1e0] sm:$0xff] }
 0x7b1   : > { %v5559_v55 = vpop.permute.xlu1 %5558  ;;  %5696 = vrot.lane.b32.xlu0 %v5588_v45, %s10128_s29  ;;  %v6476_v21 = vrot.slane %v9978_v1, 1 }
 0x7b2   : > { %v5591_v50 = vmul.f32 %v15555_v60, %v5559_v55  ;;  %v5557_v61 = vpop.permute.xlu0 %5556  ;;  %v9440_v60 = vpack.i.bf16 %v6039_v43, %v18456_v56  ;;  %v9470_v55 = vpack.i.bf16 %v15922_v32, %v15733_v52 }
 0x7b3   : > { %v5590_v3 = vmul.f32 %v15557_v17, %v5557_v61  ;;  %v15898_v17 = vld [vmem:[#allocation3 + $0x120] sm:$0xff]  ;;  %v9485_v61 = vpack.i.bf16 %v15933_v40, %v15787_v7  ;;  %v9490_v7 = vpack.i.bf16 %v15778_v10, %v15775_v49  ;;  %v18460_v49 = vpack.i.bf16 %v18442_v0, %v18439_v46 }
 0x7b4   : > { %5702 = vrot.lane.b32.xlu1 %v5591_v50, %s10128_s29  ;;  %v9450_v20 = vpack.i.bf16 %v15699_v24, %v15898_v17  ;;  %v9983_v24 = vld [vmem:[#allocation3 + $0x190] sm:$0xff] }
 0x7b5   : > { %v15889_v26 = vpop.permute.xlu1 %5610  ;;  %5700 = vrot.lane.b32.xlu0 %v5590_v3, %s10128_s29  ;;  %v15943_v3 = vld [vmem:[#allocation3 + $0x1a0] sm:$0xff]  ;;  %v6483_v47 = vrot.slane %v9983_v24, 1 }
 0x7b6   : > { %v15892_v16 = vpop.permute.xlu0 %5608  ;;  %18459 = vst [vmem:[#allocation171_spill] sm:$0xff] %v15943_v3  ;;  %v9480_v52 = vpack.i.bf16 %v15768_v58, %v15943_v3 }
 0x7b8   : > { %9446 = vrot.lane.b32.xlu1 %v9445_v30, %s10124_s10 }
 0x7b9   : > { %v15900_v38 = vpop.permute.xlu1 %5614  ;;  %9441 = vrot.lane.b32.xlu0 %v9440_v60, %s10124_s10  ;;  %v9495_v60 = vpack.i.bf16 %v6476_v21, %v15947_v19 }
 0x7ba   : > { %v15903_v6 = vpop.permute.xlu0 %5612 }
 0x7bc   : > { %9456 = vrot.lane.b32.xlu1 %v9455_v42, %s10125_s16  ;;  %v9979_v42 = vld [vmem:[#allocation3 + $0x150] sm:$0xff] }
 0x7bd   : > { %v15910_v4 = vpop.permute.xlu1 %5618  ;;  %9451 = vrot.lane.b32.xlu0 %v9450_v20, %s10125_s16  ;;  %v6477_v20 = vrot.slane %v9979_v42, 1  ;;  %v9520_v46 = vpack.i.bf16 %v15913_v41, %v9979_v42 }
 0x7be   : > { %v15915_v9 = vpop.permute.xlu0 %5616 }
 0x7c0   : > { %9466 = vrot.lane.b32.xlu1 %v9465_v33, %s10125_s16 }
 0x7c1   : > { %v15924_v45 = vpop.permute.xlu1 %5622  ;;  %9461 = vrot.lane.b32.xlu0 %v9460_v48, %s10125_s16  ;;  %v9505_v48 = vpack.i.bf16 %v9978_v1, %v15895_v12  ;;  %v18461_v1 = vpack.i.bf16 %v18440_v8, %v18443_v53 }
 0x7c2   : > { %v15927_v43 = vpop.permute.xlu0 %5620 }
 0x7c4   : > { %9476 = vrot.lane.b32.xlu1 %v9475_v36, %s10125_s16  ;;  %v6478_v36 = vsel %vm691_vm1, %v6476_v21, %v6477_v20 }
 0x7c5   : > { %v15936_v54 = vpop.permute.xlu1 %5626  ;;  %9471 = vrot.lane.b32.xlu0 %v9470_v55, %s10125_s16 }
 0x7c6   : > { %v15939_v50 = vpop.permute.xlu0 %5624 }
 0x7c8   : > { %9486 = vrot.lane.b32.xlu1 %v9485_v61, %s10125_s16  ;;  %v9510_v61 = vpack.i.bf16 %v6477_v20, %v6478_v36  ;;  %v18462_v20 = vpack.i.bf16 %v18446_v25, %v18441_v2 }
 0x7c9   : > { %v15950_v62 = vpop.permute.xlu1 %5630  ;;  %9481 = vrot.lane.b32.xlu0 %v9480_v52, %s10125_s16  ;;  %v9980_v52 = vld [vmem:[#allocation3 + $0x168] sm:$0xff] }
 0x7ca   : > { %v15953_v30 = vpop.permute.xlu0 %5628 }
 0x7cc   : > { %9496 = vrot.lane.b32.xlu1 %v9495_v60, %s10125_s16  ;;  %v6479_v60 = vrot.slane %v9980_v52, 1 }
 0x7cd   : > { %v15959_v58 = vpop.permute.xlu1 %5634  ;;  %9491 = vrot.lane.b32.xlu0 %v9490_v7, %s10125_s16  ;;  %v9981_v7 = vld [vmem:[#allocation3 + $0x170] sm:$0xff] }
 0x7ce   : > { %v15962_v33 = vpop.permute.xlu0 %5632  ;;  %v6480_v57 = vrot.slane %v9981_v7, 1 }
 0x7d0   : > { %9506 = vrot.lane.b32.xlu1 %v9505_v48, %s10124_s10  ;;  %v6481_v0 = vsel %vm691_vm1, %v6479_v60, %v6480_v57 }
 0x7d1   : > { %v15967_v55 = vpop.permute.xlu1 %5638  ;;  %9501 = vrot.lane.b32.xlu0 %v18460_v49, %s10123_s8  ;;  %v9535_v53 = vpack.i.bf16 %v6481_v0, %v6479_v60  ;;  %v9530_v49 = vpack.i.bf16 %v9981_v7, %v9980_v52  ;;  %v18464_v60 = vpack.i.bf16 %v18444_v31, %v18447_v27  ;;  %v9565_v31 = vpack.i.bf16 %v15943_v3, %v9983_v24 }
 0x7d2   : > { %v15973_v10 = vpop.permute.xlu0 %5636 }
 0x7d4   : > { %9516 = vrot.lane.b32.xlu1 %v18461_v1, %s10123_s8 }
 0x7d5   : > { %v15979_v21 = vpop.permute.xlu1 %9336  ;;  %9511 = vrot.lane.b32.xlu0 %v9510_v61, %s10125_s16  ;;  %v9982_v61 = vld [vmem:[#allocation3 + $0x188] sm:$0xff] }
 0x7d6   : > { %v15982_v48 = vpop.permute.xlu0 %9331  ;;  %v6482_v1 = vrot.slane %v9982_v61, 1  ;;  %v9550_v0 = vpack.i.bf16 %v9982_v61, %v15922_v32  ;;  %v18479_v32 = vld [vmem:[#allocation141_spill] sm:$0xff] }
 0x7d8   : > { %9526 = vrot.lane.b32.xlu1 %v18462_v20, %s10123_s8  ;;  %v9540_v25 = vpack.i.bf16 %v6482_v1, %v6480_v57  ;;  %v6484_v20 = vsel %vm691_vm1, %v6482_v1, %v6483_v47 }
 0x7d9   : > { %v15990_v36 = vpop.permute.xlu1 %9346  ;;  %9521 = vrot.lane.b32.xlu0 %v9520_v46, %s10124_s10  ;;  %v9555_v46 = vpack.i.bf16 %v6483_v47, %v6484_v20  ;;  %v18470_v47 = vpack.i.bf16 %v18450_v15, %v18445_v28 }
 0x7da   : > { %v15993_v8 = vpop.permute.xlu0 %9341 }
 0x7dc   : > { %9536 = vrot.lane.b32.xlu1 %v9535_v53, %s10125_s16 }
 0x7dd   : > { %v15996_v42 = vpop.permute.xlu1 %9356  ;;  %9531 = vrot.lane.b32.xlu0 %v9530_v49, %s10124_s10  ;;  %v9984_v49 = vld [vmem:[%s17186_s6] ss:$0 sm:$0xff] }
 0x7de   : > { %18463 = vst [vmem:[#allocation172_spill] sm:$0xff] %v15996_v42  ;;  %v15999_v2 = vpop.permute.xlu0 %9351  ;;  %v16030_v61 = vadd.f32 %v9984_v49, %v15311_v18  ;;  %v16035_v24 = vadd.f32 %v9984_v49, %v15313_v59  ;;  %v16042_v28 = vadd.f32 %v9984_v49, %v15315_v39  ;;  %v16056_v59 = vadd.f32 %v9984_v49, %v15319_v51  ;;  %v18473_v51 = vld [vmem:[#allocation15_spill] sm:$0xff] }
 0x7df   : > { %v16059_v20 = vadd.f32 %v9984_v49, %v15321_v11  ;;  %v16080_v11 = vadd.f32 %v9984_v49, %v18473_v51  ;;  %v16097_v3 = vadd.f32 %v9984_v49, %v18479_v32  ;;  %v18487_v32 = vld [vmem:[#allocation207_spill] sm:$0xff] }
 0x7e0   : > { %9546 = vrot.lane.b32.xlu1 %v18464_v60, %s10123_s8  ;;  %v16070_v60 = vadd.f32 %v9984_v49, %v15323_v37  ;;  %v18477_v37 = vld [vmem:[#allocation170_spill] sm:$0xff] }
 0x7e1   : > { %v16006_v52 = vpop.permute.xlu1 %9366  ;;  %9541 = vrot.lane.b32.xlu0 %v9540_v25, %s10125_s16  ;;  %v16047_v25 = vadd.f32 %v9984_v49, %v15317_v22  ;;  %18480 = vst [vmem:[#allocation185_spill] sm:$0xff] %v16097_v3 }
 0x7e2   : > { %18465 = vst [vmem:[#allocation30_spill] sm:$0xff] %v16006_v52  ;;  %v16009_v7 = vpop.permute.xlu0 %9361 }
 0x7e3   : > { %18466 = vst [vmem:[#allocation31_spill] sm:$0xff] %v16009_v7 }
 0x7e4   : > { %9556 = vrot.lane.b32.xlu1 %v9555_v46, %s10125_s16  ;;  %v18472_v46 = vld [vmem:[#allocation62_spill] sm:$0xff] }
 0x7e5   : > { %v16013_v53 = vpop.permute.xlu1 %9376  ;;  %9551 = vrot.lane.b32.xlu0 %v9550_v0, %s10124_s10  ;;  %v16073_v0 = vadd.f32 %v9984_v49, %v18472_v46  ;;  %v16094_v46 = vadd.f32 %v9984_v49, %v18477_v37  ;;  %v16118_v37 = vadd.f32 %v9984_v49, %v18487_v32  ;;  %v18493_v32 = vld [vmem:[#allocation125_spill] sm:$0xff] }
 0x7e6   : > { %18467 = vst [vmem:[#allocation83_spill] sm:$0xff] %v16013_v53  ;;  %v16016_v57 = vpop.permute.xlu0 %9371 }
 0x7e7   : > { %18468 = vst [vmem:[#allocation27_spill] sm:$0xff] %v16016_v57  ;;  %18478 = vst [vmem:[#allocation85_spill] sm:$0xff] %v16094_v46  ;;  %v18485_v57 = vld [vmem:[#allocation92_spill] sm:$0xff] }
 0x7e8   : > { %9566 = vrot.lane.b32.xlu1 %v9565_v31, %s10124_s10  ;;  %v16111_v53 = vadd.f32 %v9984_v49, %v18485_v57  ;;  %18488 = vst [vmem:[#allocation191_spill] sm:$0xff] %v16118_v37  ;;  %v9985_v57 = vld [vmem:[#allocation3 + $0x1b0] sm:$0xff] }
 0x7e9   : > { %v16020_v27 = vpop.permute.xlu1 %9386  ;;  %9561 = vrot.lane.b32.xlu0 %v18470_v47, %s10123_s8  ;;  %v18475_v47 = vld [vmem:[#allocation108_spill] sm:$0xff]  ;;  %v6486_v52 = vrot.slane %v9985_v57, 1 }
 0x7ea   : > { %18469 = vst [vmem:[#allocation176_spill] sm:$0xff] %v16020_v27  ;;  %v16032_v1 = vpop.permute.xlu0 %9381  ;;  %18486 = vst [vmem:[#allocation99_spill] sm:$0xff] %v16111_v53 }
 0x7eb   : > { %18471 = vst [vmem:[#allocation177_spill] sm:$0xff] %v16032_v1  ;;  %v16085_v1 = vadd.f32 %v9984_v49, %v18475_v47 }
 0x7ec   : > { %7513 = vrot.lane.b32.xlu1 %v16030_v61, %s10126_s23 }
 0x7ed   : > { %7511 = vrot.lane.b32.xlu0 %v16035_v24, %s10126_s23  ;;  %v16044_v15 = vpop.permute.xlu1 %9396  ;;  %18476 = vst [vmem:[#allocation183_spill] sm:$0xff] %v16085_v1 }
 0x7ee   : > { %v16049_v18 = vpop.permute.xlu0 %9391 }
 0x7f0   : > { %7517 = vrot.lane.b32.xlu1 %v16042_v28, %s10126_s23 }
 0x7f1   : > { %7515 = vrot.lane.b32.xlu0 %v16047_v25, %s10126_s23  ;;  %v16061_v39 = vpop.permute.xlu1 %9406 }
 0x7f2   : > { %v16065_v22 = vpop.permute.xlu0 %9401 }
 0x7f4   : > { %7521 = vrot.lane.b32.xlu1 %v16056_v59, %s10126_s23 }
 0x7f5   : > { %7519 = vrot.lane.b32.xlu0 %v16059_v20, %s10126_s23  ;;  %v16082_v31 = vpop.permute.xlu1 %9416 }
 0x7f6   : > { %18474 = vst [vmem:[#allocation16_spill] sm:$0xff] %v16082_v31  ;;  %v16087_v27 = vpop.permute.xlu0 %9411  ;;  %v18483_v31 = vld [vmem:[#allocation156_spill] sm:$0xff] }
 0x7f7   : > { %v16108_v41 = vadd.f32 %v9984_v49, %v18483_v31 }
 0x7f8   : > { %7525 = vrot.lane.b32.xlu1 %v16070_v60, %s10126_s23 }
 0x7f9   : > { %7523 = vrot.lane.b32.xlu0 %v16073_v0, %s10126_s23  ;;  %v16099_v51 = vpop.permute.xlu1 %9426  ;;  %18484 = vst [vmem:[#allocation33_spill] sm:$0xff] %v16108_v41 }
 0x7fa   : > { %18481 = vst [vmem:[#allocation98_spill] sm:$0xff] %v16099_v51  ;;  %v16103_v47 = vpop.permute.xlu0 %9421  ;;  %v18490_v51 = vld [vmem:[#allocation21_spill] sm:$0xff] }
 0x7fb   : > { %18482 = vst [vmem:[#allocation26_spill] sm:$0xff] %v16103_v47  ;;  %v16123_v7 = vadd.f32 %v9984_v49, %v18490_v51 }
 0x7fc   : > { %7529 = vrot.lane.b32.xlu1 %v16080_v11, %s10126_s23 }
 0x7fd   : > { %7527 = vrot.lane.b32.xlu0 %v16085_v1, %s10126_s23  ;;  %v16120_v47 = vpop.permute.xlu1 %9436  ;;  %18491 = vst [vmem:[#allocation138_spill] sm:$0xff] %v16123_v7 }
 0x7fe   : > { %18489 = vst [vmem:[#allocation192_spill] sm:$0xff] %v16120_v47  ;;  %v16125_v31 = vpop.permute.xlu0 %9431  ;;  %v5721_v47 = vsel %vm1802_vm12, %v18493_v32, %v15889_v26 }
 0x7ff   : > { %18492 = vst [vmem:[#allocation34_spill] sm:$0xff] %v16125_v31  ;;  %v9987_v31 = vld [vmem:[#allocation3 + $0x1c8] sm:$0xff] }
 0x800   : > { %7533 = vrot.lane.b32.xlu1 %v16094_v46, %s10126_s23 }
 0x801   : > { %7531 = vrot.lane.b32.xlu0 %v16097_v3, %s10126_s23 }
 0x804   : > { %7537 = vrot.lane.b32.xlu1 %v16108_v41, %s10126_s23  ;;  %v9986_v41 = vld [vmem:[#allocation3 + $0x1a8] sm:$0xff] }
 0x805   : > { %7535 = vrot.lane.b32.xlu0 %v16111_v53, %s10126_s23  ;;  %v6485_v3 = vrot.slane %v9986_v41, 1  ;;  %v9575_v51 = vpack.i.bf16 %v9985_v57, %v9986_v41  ;;  %v18494_v53 = vld [vmem:[#allocation169_spill] sm:$0xff]  ;;  %v18495_v57 = vpack.i.bf16 %v18448_v44, %v18451_v35 }
 0x806   : > { %v9988_v44 = vld [vmem:[#allocation3 + $0x1d0] sm:$0xff] }
 0x807   : > { %v6487_v1 = vsel %vm691_vm1, %v6485_v3, %v6486_v52 }
 0x808   : > { %7541 = vrot.lane.b32.xlu1 %v16118_v37, %s10126_s23  ;;  %v6488_v37 = vrot.slane %v9987_v31, 1 }
 0x809   : > { %7539 = vrot.lane.b32.xlu0 %v16123_v7, %s10126_s23  ;;  %v5720_v7 = vsel %vm1802_vm12, %v18494_v53, %v15892_v16  ;;  %v18496_v16 = vld [vmem:[#allocation94_spill] sm:$0xff] }
 0x80a   : > { %v5675_v49 = vpop.permute.xlu1 %5674  ;;  %v5723_v53 = vsel %vm1802_vm12, %v18496_v16, %v15900_v38  ;;  %v6489_v38 = vrot.slane %v9988_v44, 1 }
 0x80b   : > { %v5738_v46 = vsel %vm5736_vm15, %v5721_v47, %v5675_v49  ;;  %v5673_v42 = vpop.permute.xlu0 %5672 }
 0x80c   : > { %v5755_v26 = vsel %vm5753_vm0, %v5738_v46, 0.0  ;;  %v5737_v32 = vsel %vm5736_vm15, %v5720_v7, %v5673_v42  ;;  %9576 = vrot.lane.b32.xlu1 %v9575_v51, %s10124_s10  ;;  %v9585_v7 = vpack.i.bf16 %v6488_v37, %v6486_v52  ;;  %v18497_v46 = vld [vmem:[#allocation63_spill] sm:$0xff] }
 0x80d   : > { %5771 = vst [vmem:[%s16139_s13 + $0x8] sm:$0xff] %v5755_v26  ;;  %v5754_v41 = vsel %vm5753_vm0, %v5737_v32, 0.0  ;;  %9571 = vrot.lane.b32.xlu0 %v18495_v57, %s10123_s8  ;;  %v5722_v47 = vsel %vm1802_vm12, %v18497_v46, %v15903_v6  ;;  %v9580_v26 = vpack.i.bf16 %v6487_v1, %v6485_v3  ;;  %v18498_v6 = vld [vmem:[#allocation148_spill] sm:$0xff]  ;;  %v9595_v1 = vpack.i.bf16 %v9987_v31, %v15933_v40  ;;  %v18499_v57 = vld [vmem:[#allocation110_spill] sm:$0xff] }
 0x80e   : > { %5770 = vst [vmem:[%s16139_s13] sm:$0xff] %v5754_v41  ;;  %v5679_v42 = vpop.permute.xlu1 %5678  ;;  %v5725_v41 = vsel %vm1802_vm12, %v18498_v6, %v15910_v4  ;;  %v5724_v16 = vsel %vm1802_vm12, %v18499_v57, %v15915_v9  ;;  %v6490_v4 = vsel %vm691_vm1, %v6488_v37, %v6489_v38  ;;  %v18500_v31 = vpack.i.bf16 %v18454_v34, %v18449_v14  ;;  %v18501_v9 = vld [vmem:[#allocation208_spill] sm:$0xff] }
 0x80f   : > { %v5740_v49 = vsel %vm5736_vm15, %v5723_v53, %v5679_v42  ;;  %v5677_v51 = vpop.permute.xlu0 %5676  ;;  %v18503_v14 = vpack.i.bf16 %v18452_v63, %v18455_v23 }
 0x810   : > { %v5757_v32 = vsel %vm5753_vm0, %v5740_v49, 0.0  ;;  %v5739_v35 = vsel %vm5736_vm15, %v5722_v47, %v5677_v51  ;;  %9586 = vrot.lane.b32.xlu1 %v9585_v7, %s10125_s16  ;;  %v5727_v49 = vsel %vm1802_vm12, %v18501_v9, %v15924_v45 }
 0x811   : > { %5773 = vst [vmem:[%s16139_s13 + $0x18] sm:$0xff] %v5757_v32  ;;  %v5756_v52 = vsel %vm5753_vm0, %v5739_v35, 0.0  ;;  %9581 = vrot.lane.b32.xlu0 %v9580_v26, %s10125_s16  ;;  %v18502_v26 = vld [vmem:[#allocation24_spill] sm:$0xff] }
 0x812   : > { %5772 = vst [vmem:[%s16139_s13 + $0x10] sm:$0xff] %v5756_v52  ;;  %v5683_v3 = vpop.permute.xlu1 %5682  ;;  %v5726_v32 = vsel %vm1802_vm12, %v18502_v26, %v15927_v43  ;;  %v9600_v52 = vpack.i.bf16 %v6489_v38, %v6490_v4  ;;  %v18504_v43 = vld [vmem:[#allocation95_spill] sm:$0xff] }
 0x813   : > { %v5742_v53 = vsel %vm5736_vm15, %v5725_v41, %v5683_v3  ;;  %v5681_v42 = vpop.permute.xlu0 %5680  ;;  %v5729_v41 = vsel %vm1802_vm12, %v18504_v43, %v15936_v54  ;;  %v9610_v3 = vpack.i.bf16 %v15947_v19, %v9988_v44  ;;  %v18506_v19 = vpack.i.bf16 %v18456_v56, %v18453_v29  ;;  %v18507_v44 = vld [vmem:[#allocation152_spill] sm:$0xff] }
 0x814   : > { %v5759_v7 = vsel %vm5753_vm0, %v5742_v53, 0.0  ;;  %v5741_v46 = vsel %vm5736_vm15, %v5724_v16, %v5681_v42  ;;  %9596 = vrot.lane.b32.xlu1 %v9595_v1, %s10124_s10  ;;  %v18505_v1 = vld [vmem:[#allocation84_spill] sm:$0xff]  ;;  %v5731_v4 = vsel %vm1802_vm12, %v18507_v44, %v15950_v62 }
 0x815   : > { %5775 = vst [vmem:[%s16139_s13 + $0x28] sm:$0xff] %v5759_v7  ;;  %v5758_v47 = vsel %vm5753_vm0, %v5741_v46, 0.0  ;;  %9591 = vrot.lane.b32.xlu0 %v18500_v31, %s10123_s8  ;;  %v5728_v23 = vsel %vm1802_vm12, %v18505_v1, %v15939_v50  ;;  %v9989_v16 = vld [vmem:[#allocation3 + $0x1e8] sm:$0xff]  ;;  %v16214_v42 = vld [vmem:[#allocation3 + $0x1f0] sm:$0xff]  ;;  %v5850_v1 = vld [vmem:[#allocation3 + $0x218] sm:$0xff] }
 0x816   : > { %5774 = vst [vmem:[%s16139_s13 + $0x20] sm:$0xff] %v5758_v47  ;;  %v5687_v51 = vpop.permute.xlu1 %5686  ;;  %v6298_v53 = vrot.slane %v9989_v16, 2  ;;  %v6299_v7 = vrot.slane %v16214_v42, 2  ;;  %v18508_v31 = vld [vmem:[#allocation81_spill] sm:$0xff] }
 0x817   : > { %v5744_v37 = vsel %vm5736_vm15, %v5727_v49, %v5687_v51  ;;  %v5685_v35 = vpop.permute.xlu0 %5684  ;;  %v5730_v9 = vsel %vm1802_vm12, %v18508_v31, %v15953_v30  ;;  %v18510_v30 = vld [vmem:[#allocation116_spill] sm:$0xff] }
 0x818   : > { %v5761_v6 = vsel %vm5753_vm0, %v5744_v37, 0.0  ;;  %v5743_v34 = vsel %vm5736_vm15, %v5726_v32, %v5685_v35  ;;  %9606 = vrot.lane.b32.xlu1 %v18503_v14, %s10123_s8  ;;  %v6300_v56 = vsel %vm796_vm2, %v6298_v53, %v6299_v7  ;;  %v18509_v32 = vld [vmem:[#allocation119_spill] sm:$0xff]  ;;  %v18511_v37 = vld [vmem:[#allocation13_spill] sm:$0xff] }
 0x819   : > { %5777 = vst [vmem:[%s16139_s13 + $0x38] sm:$0xff] %v5761_v6  ;;  %v5760_v45 = vsel %vm5753_vm0, %v5743_v34, 0.0  ;;  %9601 = vrot.lane.b32.xlu0 %v9600_v52, %s10125_s16  ;;  %v18512_v35 = vpack.i.bf16 %v18510_v30, %v18511_v37  ;;  %v18513_v52 = vld [vmem:[#allocation149_spill] sm:$0xff]  ;;  %v9635_v14 = vpack.i.bf16 %v6300_v56, %v6298_v53  ;;  %v18516_v53 = vld [vmem:[#allocation210_spill] sm:$0xff]  ;;  %v9992_v56 = vld [vmem:[#allocation3 + $0x208] sm:$0xff] }
 0x81a   : > { %5776 = vst [vmem:[%s16139_s13 + $0x30] sm:$0xff] %v5760_v45  ;;  %v5691_v38 = vpop.permute.xlu1 %5690  ;;  %v5733_v6 = vsel %vm1802_vm12, %v18513_v52, %v15959_v58  ;;  %v18514_v45 = vld [vmem:[#allocation126_spill] sm:$0xff] }
 0x81b   : > { %v5746_v63 = vsel %vm5736_vm15, %v5729_v41, %v5691_v38  ;;  %v5689_v57 = vpop.permute.xlu0 %5688  ;;  %v5732_v43 = vsel %vm1802_vm12, %v18514_v45, %v15962_v33  ;;  %v5735_v33 = vsel %vm1802_vm12, %v18516_v53, %v15967_v55  ;;  %v9993_v55 = vld [vmem:[#allocation3 + $0x210] sm:$0xff] }
 0x81c   : > { %v5763_v54 = vsel %vm5753_vm0, %v5746_v63, 0.0  ;;  %v5745_v46 = vsel %vm5736_vm15, %v5728_v23, %v5689_v57  ;;  %9616 = vrot.lane.b32.xlu1 %v18506_v19, %s10123_s8  ;;  %v18515_v57 = vld [vmem:[#allocation160_spill] sm:$0xff] }
 0x81d   : > { %5779 = vst [vmem:[%s16139_s13 + $0x48] sm:$0xff] %v5763_v54  ;;  %v5762_v50 = vsel %vm5753_vm0, %v5745_v46, 0.0  ;;  %9611 = vrot.lane.b32.xlu0 %v9610_v3, %s10124_s10  ;;  %v5876_v3 = vld [vmem:[#allocation3 + $0x200] sm:$0xff] }
 0x81e   : > { %5778 = vst [vmem:[%s16139_s13 + $0x40] sm:$0xff] %v5762_v50  ;;  %v5695_v47 = vpop.permute.xlu1 %5694  ;;  %v18517_v46 = vld [vmem:[#allocation163_spill] sm:$0xff] }
 0x81f   : > { %v5748_v49 = vsel %vm5736_vm15, %v5731_v4, %v5695_v47  ;;  %v5693_v29 = vpop.permute.xlu0 %5692  ;;  %v9645_v19 = vpack.i.bf16 %v9989_v16, %v18517_v46  ;;  %v9991_v50 = vld [vmem:[#allocation3 + $0x208] sm:$0xff]  ;;  %v6306_v4 = vrot.slane %v5850_v1, 2  ;;  %v18518_v47 = vld [vmem:[#allocation209_spill] sm:$0xff] }
 0x820   : > { %v5765_v51 = vsel %vm5753_vm0, %v5748_v49, 0.0  ;;  %v5747_v26 = vsel %vm5736_vm15, %v5730_v9, %v5693_v29  ;;  %9626 = vrot.lane.b32.xlu1 %v18509_v32, %s10125_s16  ;;  %v9640_v44 = vpack.i.bf16 %v9991_v50, %v5876_v3  ;;  %v5734_v31 = vsel %vm1802_vm12, %v18518_v47, %v15973_v10  ;;  %v5880_v29 = vld [vmem:[#allocation3 + $0x220] sm:$0xff]  ;;  %v9994_v10 = vld [vmem:[#allocation3 + $0x228] sm:$0xff] }
 0x821   : > { %5781 = vst [vmem:[%s16139_s13 + $0x58] sm:$0xff] %v5765_v51  ;;  %v5764_v62 = vsel %vm5753_vm0, %v5747_v26, 0.0  ;;  %9621 = vrot.lane.b32.xlu0 %v18512_v35, %s10124_s10  ;;  %v6303_v51 = vrot.slane %v9992_v56, 2  ;;  %v6304_v26 = vrot.slane %v9993_v55, 2  ;;  %v6497_v30 = vrot.slane %v9994_v10, 1  ;;  %v9995_v35 = vld [vmem:[#allocation3 + $0x210] sm:$0xff] }
 0x822   : > { %5780 = vst [vmem:[%s16139_s13 + $0x50] sm:$0xff] %v5764_v62  ;;  %v5699_v34 = vpop.permute.xlu1 %5698  ;;  %v9655_v52 = vpack.i.bf16 %v5880_v29, %v9995_v35  ;;  %v9334_v29 = vunpack.i.h.bf16 %v15982_v48  ;;  %v18522_v35 = vld [vmem:[#allocation128_spill] sm:$0xff] }
 0x823   : > { %v5750_v41 = vsel %vm5736_vm15, %v5733_v6, %v5699_v34  ;;  %v5697_v38 = vpop.permute.xlu0 %5696  ;;  %v18519_v6 = vrot.slane %v15872_v5, 2 }
 0x824   : > { %v5767_v23 = vsel %vm5753_vm0, %v5750_v41, 0.0  ;;  %v5749_v63 = vsel %vm5736_vm15, %v5732_v43, %v5697_v38  ;;  %9636 = vrot.lane.b32.xlu1 %v9635_v14, %s10123_s8  ;;  %v6305_v43 = vsel %vm796_vm2, %v6303_v51, %v6304_v26  ;;  %v6307_v41 = vsel %vm796_vm2, %v6304_v26, %v6306_v4  ;;  %v9996_v38 = vld [vmem:[#allocation3 + $0x230] sm:$0xff] }
 0x825   : > { %5783 = vst [vmem:[%s16139_s13 + $0x68] sm:$0xff] %v5767_v23  ;;  %v5766_v58 = vsel %vm5753_vm0, %v5749_v63, 0.0  ;;  %9631 = vrot.lane.b32.xlu0 %v18515_v57, %s10125_s16  ;;  %v6302_v34 = vsel %vm796_vm2, %v6299_v7, %v18519_v6  ;;  %v6498_v1 = vrot.slane %v9996_v38, 1  ;;  %v9665_v63 = vpack.i.bf16 %v6307_v41, %v6305_v43  ;;  %v18520_v7 = vld [vmem:[#allocation103_spill] sm:$0xff]  ;;  %v18523_v6 = vld [vmem:[#allocation113_spill] sm:$0xff]  ;;  %v18524_v43 = vld [vmem:[#allocation162_spill] sm:$0xff] }
 0x826   : > { %5782 = vst [vmem:[%s16139_s13 + $0x60] sm:$0xff] %v5766_v58  ;;  %v5703_v54 = vpop.permute.xlu1 %5702  ;;  %v9650_v45 = vpack.i.bf16 %v6303_v51, %v6302_v34  ;;  %v18521_v57 = vrot.slane %v18520_v7, 1  ;;  %v9333_v51 = vunpack.i.l.bf16 %v15982_v48  ;;  %v9344_v26 = vunpack.i.h.bf16 %v15993_v8 }
 0x827   : > { %v5752_v9 = vsel %vm5736_vm15, %v5735_v33, %v5703_v54  ;;  %v5701_v49 = vpop.permute.xlu0 %5700  ;;  %v6499_v23 = vsel %vm691_vm1, %v6497_v30, %v6498_v1  ;;  %v9670_v54 = vpack.i.bf16 %v9996_v38, %v9994_v10  ;;  %v9399_v10 = vunpack.i.h.bf16 %v16044_v15 }
 0x828   : > { %v5769_v32 = vsel %vm5753_vm0, %v5752_v9, 0.0  ;;  %v5751_v16 = vsel %vm5736_vm15, %v5734_v31, %v5701_v49  ;;  %9646 = vrot.lane.b32.xlu1 %v9645_v19, %s10125_s16  ;;  %v9660_v53 = vpack.i.bf16 %v16214_v42, %v18521_v57  ;;  %v9675_v33 = vpack.i.bf16 %v6499_v23, %v6497_v30 }
 0x829   : > { %5785 = vst [vmem:[%s16139_s13 + $0x78] sm:$0xff] %v5769_v32  ;;  %v5768_v62 = vsel %vm5753_vm0, %v5751_v16, 0.0  ;;  %9641 = vrot.lane.b32.xlu0 %v9640_v44, %s10124_s10  ;;  %v9685_v44 = vpack.i.bf16 %v9993_v55, %v6498_v1  ;;  %v9680_v42 = vpack.i.bf16 %v9992_v56, %v5876_v3  ;;  %v9339_v9 = vunpack.i.h.bf16 %v15979_v21  ;;  %v5787_v56 = vld [vmem:[#allocation3 + $0x100] sm:$0xff] }
 0x82a   : > { %5784 = vst [vmem:[%s16139_s13 + $0x70] sm:$0xff] %v5768_v62  ;;  %v16278_v37 = vpop.permute.xlu1 %9446  ;;  %v9338_v49 = vunpack.i.l.bf16 %v15979_v21  ;;  %v9349_v55 = vunpack.i.h.bf16 %v15990_v36  ;;  %v9348_v3 = vunpack.i.l.bf16 %v15990_v36  ;;  %v9343_v32 = vunpack.i.l.bf16 %v15993_v8 }
 0x82b   : > { %v16285_v14 = vpop.permute.xlu0 %9441  ;;  %v9398_v16 = vunpack.i.l.bf16 %v16044_v15  ;;  %v9393_v21 = vunpack.i.l.bf16 %v16049_v18  ;;  %v6623_v48 = vsel %vm392_vm3, %v15898_v17, %v9339_v9  ;;  %v6621_v8 = vsel %vm392_vm3, %v18523_v6, %v9334_v29  ;;  %v18525_v17 = vld [vmem:[#allocation86_spill] sm:$0xff] }
 0x82c   : > { %9656 = vrot.lane.b32.xlu1 %v9655_v52, %s10124_s10  ;;  %v6622_v36 = vsel %vm392_vm3, %v18522_v35, %v9338_v49  ;;  %v9394_v52 = vunpack.i.h.bf16 %v16049_v18  ;;  %v6620_v34 = vsel %vm392_vm3, %v5787_v56, %v9333_v51  ;;  %v6627_v15 = vsel %vm392_vm3, %v15704_v13, %v9349_v55  ;;  %v18527_v56 = vld [vmem:[#allocation96_spill] sm:$0xff] }
 0x82d   : > { %9651 = vrot.lane.b32.xlu0 %v9650_v45, %s10123_s8  ;;  %v6626_v45 = vsel %vm392_vm3, %v15895_v12, %v9348_v3  ;;  %v6625_v41 = vsel %vm392_vm3, %v18524_v43, %v9344_v26  ;;  %v6624_v38 = vsel %vm392_vm3, %v18525_v17, %v9343_v32  ;;  %v9353_v1 = vunpack.i.l.bf16 %v15999_v2  ;;  %v18526_v3 = vld [vmem:[#allocation111_spill] sm:$0xff] }
 0x82e   : > { %v16292_v5 = vpop.permute.xlu1 %9456  ;;  %v6646_v18 = vsel %vm4295_vm13, %v6622_v36, %v9398_v16  ;;  %v6644_v7 = vsel %vm4295_vm13, %v6620_v34, %v9393_v21  ;;  %v9404_v9 = vunpack.i.h.bf16 %v16065_v22  ;;  %v9403_v49 = vunpack.i.l.bf16 %v16065_v22 }
 0x82f   : > { %v16294_v58 = vpop.permute.xlu0 %9451  ;;  %v9458_v51 = vunpack.i.l.bf16 %v16292_v5  ;;  %v9459_v35 = vunpack.i.h.bf16 %v16292_v5 }
 0x830   : > { %9666 = vrot.lane.b32.xlu1 %v9665_v63, %s10123_s8  ;;  %v6647_v63 = vsel %vm4295_vm13, %v6623_v48, %v9399_v10  ;;  %v9454_v13 = vunpack.i.h.bf16 %v16294_v58  ;;  %v9453_v57 = vunpack.i.l.bf16 %v16294_v58 }
 0x831   : > { %9661 = vrot.lane.b32.xlu0 %v9660_v53, %s10125_s16  ;;  %v6645_v53 = vsel %vm4295_vm13, %v6621_v8, %v9394_v52  ;;  %v6648_v8 = vsel %vm4295_vm13, %v6624_v38, %v9403_v49 }
 0x832   : > { %v16301_v46 = vpop.permute.xlu1 %9466  ;;  %v6668_v16 = vsel %vm4320_vm14, %v6644_v7, %v9453_v57 }
 0x833   : > { %v16303_v19 = vpop.permute.xlu0 %9461  ;;  %v6812_v17 = vrot.slane %v6668_v16, 7 }
 0x834   : > { %9676 = vrot.lane.b32.xlu1 %v9675_v33, %s10125_s16  ;;  %v9408_v33 = vunpack.i.l.bf16 %v16061_v39  ;;  %v9463_v5 = vunpack.i.l.bf16 %v16303_v19 }
 0x835   : > { %9671 = vrot.lane.b32.xlu0 %v9670_v54, %s10124_s10 }
 0x836   : > { %v16307_v50 = vpop.permute.xlu1 %9476  ;;  %v16369_v48 = vsel %vm4295_vm13, %v6626_v45, %v9408_v33  ;;  %v6670_v45 = vsel %vm4320_vm14, %v6646_v18, %v9458_v51  ;;  %v9464_v18 = vunpack.i.h.bf16 %v16303_v19 }
 0x837   : > { %v16309_v4 = vpop.permute.xlu0 %9471 }
 0x838   : > { %9686 = vrot.lane.b32.xlu1 %v9685_v44, %s10125_s16 }
 0x839   : > { %9681 = vrot.lane.b32.xlu0 %v9680_v42, %s10125_s16  ;;  %v9409_v42 = vunpack.i.h.bf16 %v16061_v39  ;;  %v6669_v39 = vsel %vm4320_vm14, %v6645_v53, %v9454_v13 }
 0x83a   : > { %v16313_v47 = vpop.permute.xlu1 %9486 }
 0x83b   : > { %v16315_v31 = vpop.permute.xlu0 %9481  ;;  %v16374_v6 = vsel %vm4295_vm13, %v6627_v15, %v9409_v42  ;;  %v6649_v15 = vsel %vm4295_vm13, %v6625_v41, %v9404_v9  ;;  %v18528_v42 = vld [vmem:[#allocation157_spill] sm:$0xff]  ;;  %v6821_v41 = vrot.slane %v6670_v45, 7  ;;  %v18529_v9 = vld [vmem:[#allocation132_spill] sm:$0xff] }
 0x83e   : > { %v16326_v62 = vpop.permute.xlu1 %9496 }
 0x83f   : > { %v16330_v30 = vpop.permute.xlu0 %9491  ;;  %v9499_v55 = vunpack.i.h.bf16 %v16326_v62 }
 0x842   : > { %v9507_v23 = vpop.permute.xlu1 %9506 }
 0x843   : > { %v9502_v12 = vpop.permute.xlu0 %9501  ;;  %v9508_v29 = vunpack.i.l.bf16 %v9507_v23  ;;  %v9509_v10 = vunpack.i.h.bf16 %v9507_v23  ;;  %v6813_v23 = vrot.slane %v6669_v39, 7  ;;  %v6672_v39 = vsel %vm4320_vm14, %v6648_v8, %v9463_v5 }
 0x844   : > { %v9504_v54 = vunpack.i.h.bf16 %v9502_v12  ;;  %v9503_v44 = vunpack.i.l.bf16 %v9502_v12 }
 0x845   : > { %v6822_v5 = vsel %vm1755_vm11, %v6813_v23, %v6821_v41 }
 0x846   : > { %v6693_v58 = vsel %vm392_vm3, %v18526_v3, %v9504_v54  ;;  %v6692_v26 = vsel %vm392_vm3, %v18527_v56, %v9503_v44  ;;  %v9517_v32 = vpop.permute.xlu1 %9516  ;;  %v6671_v44 = vsel %vm4320_vm14, %v6647_v63, %v9459_v35  ;;  %v6814_v56 = vsel %vm1755_vm11, %v6812_v17, %v6813_v23  ;;  %v18530_v35 = vld [vmem:[#allocation211_spill] sm:$0xff] }
 0x847   : > { %v9512_v21 = vpop.permute.xlu0 %9511  ;;  %v6716_v22 = vsel %vm4295_vm13, %v6692_v26, %v9508_v29  ;;  %v9518_v34 = vunpack.i.l.bf16 %v9517_v32  ;;  %v6717_v43 = vsel %vm4295_vm13, %v6693_v58, %v9509_v10  ;;  %v9519_v57 = vunpack.i.h.bf16 %v9517_v32 }
 0x848   : > { %v9513_v36 = vunpack.i.l.bf16 %v9512_v21  ;;  %v6740_v52 = vsel %vm4320_vm14, %v6716_v22, %v9499_v55  ;;  %v9514_v29 = vunpack.i.h.bf16 %v9512_v21  ;;  %v9469_v17 = vunpack.i.h.bf16 %v16301_v46 }
 0x849   : > { %v6815_v53 = vrot.slane %v6740_v52, 7  ;;  %v6694_v49 = vsel %vm392_vm3, %v18528_v42, %v9518_v34  ;;  %v6695_v26 = vsel %vm392_vm3, %v18529_v9, %v9519_v57 }
 0x84a   : > { %v9527_v7 = vpop.permute.xlu1 %9526  ;;  %v6741_v13 = vsel %vm4320_vm14, %v6717_v43, %v9513_v36 }
 0x84b   : > { %v9522_v12 = vpop.permute.xlu0 %9521  ;;  %v6816_v33 = vrot.slane %v6741_v13, 7  ;;  %v9528_v55 = vunpack.i.l.bf16 %v9527_v7  ;;  %v9529_v10 = vunpack.i.h.bf16 %v9527_v7  ;;  %v9468_v13 = vunpack.i.l.bf16 %v16301_v46 }
 0x84c   : > { %v9524_v54 = vunpack.i.h.bf16 %v9522_v12  ;;  %v9523_v38 = vunpack.i.l.bf16 %v9522_v12 }
 0x84d   : > { %v6817_v3 = vsel %vm1755_vm11, %v6815_v53, %v6816_v33  ;;  %v6696_v36 = vsel %vm392_vm3, %v18530_v35, %v9528_v55  ;;  %v6828_v53 = vrot.slane %v6672_v39, 7 }
 0x84e   : > { %v6718_v51 = vsel %vm4295_vm13, %v6694_v49, %v9523_v38  ;;  %v9537_v58 = vpop.permute.xlu1 %9536  ;;  %7060 = vmatprep.mubr.f32.mxu0 %v6817_v3  ;;  %v6719_v19 = vsel %vm4295_vm13, %v6695_v26, %v9524_v54  ;;  %v6673_v54 = vsel %vm4320_vm14, %v6649_v15, %v9464_v18  ;;  %v18531_v38 = vld [vmem:[#allocation114_spill] sm:$0xff]  ;;  %v6674_v15 = vsel %vm4320_vm14, %v16369_v48, %v9468_v13 }
 0x84f   : > { %v9538_v63 = vunpack.i.l.bf16 %v9537_v58  ;;  %v9532_v32 = vpop.permute.xlu0 %9531  ;;  %7061 = vmatmul.mubr.f32.vlgmr.msra.gmra.mrb[48].mxu0 %v6814_v56  ;;  %v6742_v16 = vsel %vm4320_vm14, %v6718_v51, %v9514_v29  ;;  %v9539_v52 = vunpack.i.h.bf16 %v9537_v58  ;;  %v6697_v42 = vsel %vm392_vm3, %v18531_v38, %v9529_v10 }
 0x850   : > { %v9533_v21 = vunpack.i.l.bf16 %v9532_v32  ;;  %v6823_v22 = vrot.slane %v6742_v16, 7  ;;  %v9534_v34 = vunpack.i.h.bf16 %v9532_v32  ;;  %v6827_v51 = vrot.slane %v6671_v44, 7 }
 0x851   : > { %v6743_v43 = vsel %vm4320_vm14, %v6719_v19, %v9538_v63  ;;  %v9413_v58 = vunpack.i.l.bf16 %v16087_v27  ;;  %v6836_v63 = vrot.slane %v6673_v54, 7  ;;  %v6675_v32 = vsel %vm4320_vm14, %v16374_v6, %v9469_v17  ;;  %v18532_v19 = vld [vmem:[#allocation164_spill] sm:$0xff] }
 0x852   : > { %v6720_v45 = vsel %vm4295_vm13, %v6696_v36, %v9533_v21  ;;  %v9547_v57 = vpop.permute.xlu1 %9546  ;;  %v6824_v8 = vsel %vm1755_vm11, %v6816_v33, %v6823_v22  ;;  %v6830_v46 = vrot.slane %v6743_v43, 7  ;;  %v6721_v55 = vsel %vm4295_vm13, %v6697_v42, %v9534_v34  ;;  %v18533_v22 = vld [vmem:[#allocation212_spill] sm:$0xff] }
 0x853   : > { %v9542_v7 = vpop.permute.xlu0 %9541  ;;  %7065 = vmatprep.mubr.f32.mxu0 %v6824_v8  ;;  %v6744_v12 = vsel %vm4320_vm14, %v6720_v45, %v9539_v52  ;;  %v9549_v3 = vunpack.i.h.bf16 %v9547_v57  ;;  %v9548_v33 = vunpack.i.l.bf16 %v9547_v57  ;;  %v6829_v9 = vsel %vm1755_vm11, %v6827_v51, %v6828_v53  ;;  %v9997_v52 = vld [vmem:[#allocation3 + $0x150] sm:$0xff] }
 0x854   : > { %v9543_v49 = vunpack.i.l.bf16 %v9542_v7  ;;  %7066 = vmatmul.mubr.f32.gmra.mrb[50].mxu0 %v6822_v5  ;;  %v6831_v29 = vrot.slane %v6744_v12, 7  ;;  %v9473_v44 = vunpack.i.l.bf16 %v16309_v4  ;;  %v9544_v16 = vunpack.i.h.bf16 %v9542_v7 }
 0x855   : > { %v6699_v21 = vsel %vm392_vm3, %v18532_v19, %v9549_v3  ;;  %v6698_v48 = vsel %vm392_vm3, %v18533_v22, %v9548_v33  ;;  %v6628_v6 = vsel %vm392_vm3, %v9997_v52, %v9353_v1  ;;  %v6842_v13 = vrot.slane %v6674_v15, 7 }
 0x856   : > { %v9557_v23 = vpop.permute.xlu1 %9556  ;;  %v6832_v56 = vsel %vm1755_vm11, %v6830_v46, %v6831_v29  ;;  %v6745_v41 = vsel %vm4320_vm14, %v6721_v55, %v9543_v49  ;;  %v6837_v57 = vsel %vm1755_vm11, %v6828_v53, %v6836_v63  ;;  %v6843_v5 = vrot.slane %v6675_v32, 7 }
 0x857   : > { %v9552_v18 = vpop.permute.xlu0 %9551  ;;  %7070 = vmatprep.mubr.f32.mxu0 %v6832_v56  ;;  %v6838_v26 = vrot.slane %v6745_v41, 7  ;;  %v9558_v35 = vunpack.i.l.bf16 %v9557_v23  ;;  %v6652_v12 = vsel %vm4295_vm13, %v6628_v6, %v9413_v58  ;;  %v9559_v46 = vunpack.i.h.bf16 %v9557_v23 }
 0x858   : > { %v9554_v39 = vunpack.i.h.bf16 %v9552_v18  ;;  %v9553_v10 = vunpack.i.l.bf16 %v9552_v18  ;;  %7071 = vmatmul.mubr.f32.gmra.mrb[52].mxu0 %v6829_v9  ;;  %v6676_v49 = vsel %vm4320_vm14, %v6652_v12, %v9473_v44  ;;  %v6844_v58 = vsel %vm1755_vm11, %v6842_v13, %v6843_v5 }
 0x859   : > { %v6839_v36 = vsel %vm1755_vm11, %v6831_v29, %v6838_v26  ;;  %v18534_v29 = vld [vmem:[#allocation93_spill] sm:$0xff]  ;;  %v6851_v15 = vrot.slane %v6676_v49, 7 }
 0x85a   : > { %v6723_v34 = vsel %vm4295_vm13, %v6699_v21, %v9554_v39  ;;  %v6722_v43 = vsel %vm4295_vm13, %v6698_v48, %v9553_v10  ;;  %v16426_v17 = vpop.permute.xlu1 %9566  ;;  %7075 = vmatprep.mubr.f32.mxu0 %v6839_v36 }
 0x85b   : > { %v16428_v45 = vpop.permute.xlu0 %9561  ;;  %v6746_v8 = vsel %vm4320_vm14, %v6722_v43, %v9544_v16  ;;  %v6747_v7 = vsel %vm4320_vm14, %v6723_v34, %v9558_v35  ;;  %v9568_v42 = vunpack.i.l.bf16 %v16426_v17  ;;  %v6852_v16 = vsel %vm1755_vm11, %v6843_v5, %v6851_v15  ;;  %v18542_v43 = vld [vmem:[#allocation183_spill] sm:$0xff]  ;;  %v18545_v5 = vld [vmem:[#allocation85_spill] sm:$0xff] }
 0x85c   : > { %v9563_v1 = vunpack.i.l.bf16 %v16428_v45  ;;  %7076 = vmatmul.mubr.f32.gmra.mrb[54].mxu0 %v6837_v57  ;;  %v6845_v54 = vrot.slane %v6746_v8, 7  ;;  %v6846_v38 = vrot.slane %v6747_v7, 7  ;;  %v18544_v8 = vld [vmem:[#allocation172_spill] sm:$0xff] }
 0x85d   : > { %v9359_v7 = vunpack.i.h.bf16 %v18544_v8 }
 0x85e   : > { %v6700_v53 = vsel %vm392_vm3, %v18534_v29, %v9563_v1  ;;  %v7514_v55 = vpop.permute.xlu1 %7513  ;;  %v6847_v3 = vsel %vm1755_vm11, %v6845_v54, %v6846_v38  ;;  %v16499_v54 = vld [vmem:[#allocation3 + $0x1c8] sm:$0xff]  ;;  %v18547_v29 = vld [vmem:[#allocation185_spill] sm:$0xff] }
 0x85f   : > { %v16441_v33 = vmax.f32 %v16030_v61, %v7514_v55  ;;  %v7512_v51 = vpop.permute.xlu0 %7511  ;;  %7080 = vmatprep.mubr.f32.mxu0 %v6847_v3  ;;  %v6724_v56 = vsel %vm4295_vm13, %v6700_v53, %v9568_v42  ;;  %v16502_v42 = vld [vmem:[#allocation3 + $0x1d0] sm:$0xff]  ;;  %v9354_v55 = vunpack.i.h.bf16 %v15999_v2  ;;  %v18549_v3 = vld [vmem:[#allocation30_spill] sm:$0xff] }
 0x860   : > { %v16446_v41 = vmax.f32 %v16035_v24, %v7512_v51  ;;  %7081 = vmatmul.mubr.f32.gmra.mrb[56].mxu0 %v6844_v58  ;;  %v6748_v23 = vsel %vm4320_vm14, %v6724_v56, %v9559_v46  ;;  %v17426_v49 = vrot.slane %v16502_v42, 1  ;;  %v9358_v46 = vunpack.i.l.bf16 %v18544_v8  ;;  %v18550_v56 = vld [vmem:[#allocation31_spill] sm:$0xff] }
 0x861   : > { %7641 = vrot.lane.b32.xlu1 %v16441_v33, %s10127_s25  ;;  %v6853_v18 = vrot.slane %v6748_v23, 7  ;;  %v9369_v51 = vunpack.i.h.bf16 %v18549_v3  ;;  %v9368_v58 = vunpack.i.l.bf16 %v18549_v3  ;;  %v9364_v23 = vunpack.i.h.bf16 %v18550_v56  ;;  %v18557_v3 = vld [vmem:[#allocation127_spill] sm:$0xff] }
 0x862   : > { %v7518_v9 = vpop.permute.xlu1 %7517  ;;  %7639 = vrot.lane.b32.xlu0 %v16446_v41, %s10127_s25  ;;  %v9363_v15 = vunpack.i.l.bf16 %v18550_v56  ;;  %v6629_v56 = vsel %vm392_vm3, %v18557_v3, %v9354_v55  ;;  %v18560_v3 = vld [vmem:[#allocation16_spill] sm:$0xff] }
 0x863   : > { %v16454_v26 = vmax.f32 %v16042_v28, %v7518_v9  ;;  %v7516_v63 = vpop.permute.xlu0 %7515  ;;  %v6854_v32 = vsel %vm1755_vm11, %v6846_v38, %v6853_v18  ;;  %v17427_v38 = vrot.slane %v16499_v54, 1  ;;  %v18551_v18 = vld [vmem:[#allocation83_spill] sm:$0xff] }
 0x864   : > { %v16458_v44 = vmax.f32 %v16047_v25, %v7516_v63  ;;  %7085 = vmatprep.mubr.f32.mxu0 %v6854_v32  ;;  %v9379_v9 = vunpack.i.h.bf16 %v18551_v18  ;;  %v10000_v32 = vld [vmem:[#allocation3 + $0x170] sm:$0xff] }
 0x865   : > { %18535 = vst [vmem:[#allocation196_spill] sm:$0xff] %v16454_v26  ;;  %7645 = vrot.lane.b32.xlu1 %v16454_v26, %s10127_s25  ;;  %7086 = vmatmul.mubr.f32.gmra.mrb[58].mxu0 %v6852_v16  ;;  %v6631_v2 = vsel %vm392_vm3, %v10000_v32, %v9359_v7  ;;  %v18552_v16 = vld [vmem:[#allocation33_spill] sm:$0xff] }
 0x866   : > { %18536 = vst [vmem:[#allocation197_spill] sm:$0xff] %v16458_v44  ;;  %v7522_v39 = vpop.permute.xlu1 %7521  ;;  %7643 = vrot.lane.b32.xlu0 %v16458_v44, %s10127_s25  ;;  %v16549_v55 = vsel %vm392_vm3, %v16499_v54, %v9379_v9 }
 0x867   : > { %v16466_v10 = vmax.f32 %v16056_v59, %v7522_v39  ;;  %v7520_v19 = vpop.permute.xlu0 %7519 }
 0x868   : > { %v16469_v21 = vmax.f32 %v16059_v20, %v7520_v19 }
 0x869   : > { %18537 = vst [vmem:[#allocation136_spill] sm:$0xff] %v16466_v10  ;;  %7649 = vrot.lane.b32.xlu1 %v16466_v10, %s10127_s25 }
 0x86a   : > { %18538 = vst [vmem:[#allocation201_spill] sm:$0xff] %v16469_v21  ;;  %v7526_v22 = vpop.permute.xlu1 %7525  ;;  %7647 = vrot.lane.b32.xlu0 %v16469_v21, %s10127_s25 }
 0x86b   : > { %v16476_v48 = vmax.f32 %v16070_v60, %v7526_v22  ;;  %v7524_v35 = vpop.permute.xlu0 %7523  ;;  %v16528_v22 = vsel %vm691_vm1, %v17427_v38, %v17426_v49 }
 0x86c   : > { %v16479_v36 = vmax.f32 %v16073_v0, %v7524_v35  ;;  %v10001_v35 = vld [vmem:[#allocation3 + $0x168] sm:$0xff] }
 0x86d   : > { %18539 = vst [vmem:[#allocation22_spill] sm:$0xff] %v16476_v48  ;;  %7653 = vrot.lane.b32.xlu1 %v16476_v48, %s10127_s25 }
 0x86e   : > { %18540 = vst [vmem:[#allocation184_spill] sm:$0xff] %v16479_v36  ;;  %v7530_v52 = vpop.permute.xlu1 %7529  ;;  %7651 = vrot.lane.b32.xlu0 %v16479_v36, %s10127_s25 }
 0x86f   : > { %v16486_v6 = vmax.f32 %v16080_v11, %v7530_v52  ;;  %v7528_v34 = vpop.permute.xlu0 %7527  ;;  %v6630_v52 = vsel %vm392_vm3, %v10001_v35, %v9358_v46  ;;  %v10003_v46 = vld [vmem:[#allocation3 + $0x188] sm:$0xff]  ;;  %v18559_v35 = vld [vmem:[#allocation29_spill] sm:$0xff] }
 0x870   : > { %v16489_v13 = vmax.f32 %v18542_v43, %v7528_v34  ;;  %v9378_v34 = vunpack.i.l.bf16 %v18551_v18  ;;  %v6633_v18 = vsel %vm392_vm3, %v10003_v46, %v9364_v23  ;;  %v18562_v23 = vld [vmem:[#allocation191_spill] sm:$0xff] }
 0x871   : > { %18541 = vst [vmem:[#allocation23_spill] sm:$0xff] %v16486_v6  ;;  %7657 = vrot.lane.b32.xlu1 %v16486_v6, %s10127_s25 }
 0x872   : > { %18543 = vst [vmem:[#allocation82_spill] sm:$0xff] %v16489_v13  ;;  %v7534_v57 = vpop.permute.xlu1 %7533  ;;  %7655 = vrot.lane.b32.xlu0 %v16489_v13, %s10127_s25  ;;  %v16562_v9 = vsel %vm392_vm3, %v15933_v40, %v9378_v34  ;;  %v18564_v13 = vld [vmem:[#allocation138_spill] sm:$0xff]  ;;  %v9478_v40 = vunpack.i.l.bf16 %v16307_v50  ;;  %v18567_v34 = vld [vmem:[#allocation176_spill] sm:$0xff] }
 0x873   : > { %v16497_v12 = vmax.f32 %v18545_v5, %v7534_v57  ;;  %v7532_v1 = vpop.permute.xlu0 %7531  ;;  %v18554_v57 = vld [vmem:[#allocation27_spill] sm:$0xff] }
 0x874   : > { %v16507_v53 = vmax.f32 %v18547_v29, %v7532_v1  ;;  %v9374_v8 = vunpack.i.h.bf16 %v18554_v57  ;;  %v18555_v1 = vld [vmem:[#allocation99_spill] sm:$0xff]  ;;  %v9373_v38 = vunpack.i.l.bf16 %v18554_v57  ;;  %v18561_v57 = vld [vmem:[#allocation98_spill] sm:$0xff] }
 0x875   : > { %18546 = vst [vmem:[#allocation112_spill] sm:$0xff] %v16497_v12  ;;  %7661 = vrot.lane.b32.xlu1 %v16497_v12, %s10127_s25 }
 0x876   : > { %18548 = vst [vmem:[#allocation97_spill] sm:$0xff] %v16507_v53  ;;  %v7538_v63 = vpop.permute.xlu1 %7537  ;;  %7659 = vrot.lane.b32.xlu0 %v16507_v53, %s10127_s25  ;;  %v10002_v53 = vld [vmem:[#allocation3 + $0x190] sm:$0xff] }
 0x877   : > { %v16521_v39 = vmax.f32 %v18552_v16, %v7538_v63  ;;  %v7536_v19 = vpop.permute.xlu0 %7535  ;;  %v18558_v63 = vld [vmem:[#allocation171_spill] sm:$0xff]  ;;  %v6634_v49 = vsel %vm392_vm3, %v10002_v53, %v9368_v58  ;;  %v9418_v53 = vunpack.i.l.bf16 %v18560_v3  ;;  %v9414_v58 = vunpack.i.h.bf16 %v16087_v27 }
 0x878   : > { %v16534_v7 = vmax.f32 %v18555_v1, %v7536_v19  ;;  %v6635_v32 = vsel %vm392_vm3, %v18558_v63, %v9369_v51  ;;  %v6632_v19 = vsel %vm392_vm3, %v18559_v35, %v9363_v15  ;;  %v9419_v51 = vunpack.i.h.bf16 %v18560_v3  ;;  %v10004_v35 = vld [vmem:[#allocation3 + $0x1b0] sm:$0xff]  ;;  %v10005_v27 = vld [vmem:[#allocation3 + $0x1a8] sm:$0xff] }
 0x879   : > { %18553 = vst [vmem:[#allocation64_spill] sm:$0xff] %v16521_v39  ;;  %7665 = vrot.lane.b32.xlu1 %v16521_v39, %s10127_s25  ;;  %v9428_v39 = vunpack.i.l.bf16 %v18561_v57  ;;  %v16565_v12 = vsel %vm392_vm3, %v10004_v35, %v9374_v8  ;;  %v16572_v6 = vsel %vm392_vm3, %v10005_v27, %v9373_v38  ;;  %v9564_v35 = vunpack.i.h.bf16 %v16428_v45 }
 0x87a   : > { %18556 = vst [vmem:[#allocation87_spill] sm:$0xff] %v16534_v7  ;;  %v7542_v63 = vpop.permute.xlu1 %7541  ;;  %7663 = vrot.lane.b32.xlu0 %v16534_v7, %s10127_s25  ;;  %v9429_v7 = vunpack.i.h.bf16 %v18561_v57  ;;  %v6654_v38 = vsel %vm4295_vm13, %v6630_v52, %v9418_v53  ;;  %v6655_v27 = vsel %vm4295_vm13, %v6631_v2, %v9419_v51  ;;  %v18568_v51 = vld [vmem:[#allocation17_spill] sm:$0xff]  ;;  %v18570_v53 = vld [vmem:[#allocation134_spill] sm:$0xff] }
 0x87b   : > { %v16558_v46 = vmax.f32 %v18562_v23, %v7542_v63  ;;  %v7540_v15 = vpop.permute.xlu0 %7539  ;;  %v18566_v63 = vld [vmem:[#allocation26_spill] sm:$0xff]  ;;  %v6678_v2 = vsel %vm4320_vm14, %v6654_v38, %v9478_v40 }
 0x87c   : > { %v16569_v3 = vmax.f32 %v18564_v13, %v7540_v15  ;;  %v9424_v36 = vunpack.i.h.bf16 %v18566_v63  ;;  %v9423_v48 = vunpack.i.l.bf16 %v18566_v63  ;;  %v9474_v15 = vunpack.i.h.bf16 %v16309_v4 }
 0x87d   : > { %18563 = vst [vmem:[#allocation137_spill] sm:$0xff] %v16558_v46  ;;  %7669 = vrot.lane.b32.xlu1 %v16558_v46, %s10127_s25  ;;  %v6653_v63 = vsel %vm4295_vm13, %v6629_v56, %v9414_v58  ;;  %v16589_v46 = vsel %vm4295_vm13, %v6634_v49, %v9428_v39  ;;  %v16592_v57 = vsel %vm4295_vm13, %v6635_v32, %v9429_v7  ;;  %v9479_v4 = vunpack.i.h.bf16 %v16307_v50  ;;  %v18569_v49 = vld [vmem:[#allocation131_spill] sm:$0xff] }
 0x87e   : > { %18565 = vst [vmem:[#allocation115_spill] sm:$0xff] %v16569_v3  ;;  %v9577_v21 = vpop.permute.xlu1 %9576  ;;  %7667 = vrot.lane.b32.xlu0 %v16569_v3, %s10127_s25  ;;  %v6656_v44 = vsel %vm4295_vm13, %v6632_v19, %v9423_v48  ;;  %v6657_v3 = vsel %vm4295_vm13, %v6633_v18, %v9424_v36  ;;  %v6701_v56 = vsel %vm392_vm3, %v18568_v51, %v9564_v35  ;;  %v9569_v58 = vunpack.i.h.bf16 %v16426_v17 }
 0x87f   : > { %v9572_v8 = vpop.permute.xlu0 %9571  ;;  %v9579_v52 = vunpack.i.h.bf16 %v9577_v21  ;;  %v6677_v50 = vsel %vm4320_vm14, %v6653_v63, %v9474_v15  ;;  %v9578_v48 = vunpack.i.l.bf16 %v9577_v21  ;;  %v6858_v38 = vrot.slane %v6678_v2, 7  ;;  %v18571_v15 = vld [vmem:[#allocation34_spill] sm:$0xff] }
 0x880   : > { %v9574_v45 = vunpack.i.h.bf16 %v9572_v8  ;;  %v9573_v10 = vunpack.i.l.bf16 %v9572_v8  ;;  %v6679_v35 = vsel %vm4320_vm14, %v6655_v27, %v9479_v4  ;;  %v9434_v63 = vunpack.i.h.bf16 %v18571_v15 }
 0x881   : > { %v9483_v17 = vunpack.i.l.bf16 %v16315_v31  ;;  %v9484_v2 = vunpack.i.h.bf16 %v16315_v31 }
 0x882   : > { %v6703_v39 = vsel %vm392_vm3, %v18569_v49, %v9574_v45  ;;  %v6702_v7 = vsel %vm392_vm3, %v18570_v53, %v9573_v10  ;;  %v9587_v32 = vpop.permute.xlu1 %9586  ;;  %v6725_v45 = vsel %vm4295_vm13, %v6701_v56, %v9569_v58  ;;  %v6857_v10 = vrot.slane %v6677_v50, 7 }
 0x883   : > { %v9588_v19 = vunpack.i.l.bf16 %v9587_v32  ;;  %v9582_v36 = vpop.permute.xlu0 %9581  ;;  %v6727_v18 = vsel %vm4295_vm13, %v6703_v39, %v9579_v52  ;;  %v6726_v51 = vsel %vm4295_vm13, %v6702_v7, %v9578_v48  ;;  %v9433_v7 = vunpack.i.l.bf16 %v18571_v15 }
 0x884   : > { %v9584_v40 = vunpack.i.h.bf16 %v9582_v36  ;;  %v9583_v8 = vunpack.i.l.bf16 %v9582_v36  ;;  %v6866_v48 = vrot.slane %v6679_v35, 7  ;;  %v6680_v15 = vsel %vm4320_vm14, %v6656_v44, %v9483_v17 }
 0x885   : > { %v6751_v49 = vsel %vm4320_vm14, %v6727_v18, %v9588_v19  ;;  %v9488_v19 = vunpack.i.l.bf16 %v16313_v47  ;;  %v6660_v44 = vsel %vm4295_vm13, %v16572_v6, %v9433_v7  ;;  %v6661_v17 = vsel %vm4295_vm13, %v16565_v12, %v9434_v63 }
 0x886   : > { %v9597_v21 = vpop.permute.xlu1 %9596  ;;  %v6749_v53 = vsel %vm4320_vm14, %v6725_v45, %v9583_v8  ;;  %v6750_v52 = vsel %vm4320_vm14, %v6726_v51, %v9584_v40  ;;  %v6868_v56 = vrot.slane %v6751_v49, 7  ;;  %v6859_v8 = vsel %vm1755_vm11, %v6857_v10, %v6858_v38  ;;  %v18572_v40 = vld [vmem:[#allocation25_spill] sm:$0xff] }
 0x887   : > { %v9592_v39 = vpop.permute.xlu0 %9591  ;;  %v6860_v27 = vrot.slane %v6749_v53, 7  ;;  %v6861_v4 = vrot.slane %v6750_v52, 7  ;;  %v9598_v36 = vunpack.i.l.bf16 %v9597_v21  ;;  %v9589_v45 = vunpack.i.h.bf16 %v9587_v32  ;;  %v18573_v51 = vld [vmem:[#allocation213_spill] sm:$0xff]  ;;  %v18574_v32 = vld [vmem:[#allocation192_spill] sm:$0xff] }
 0x888   : > { %v9594_v50 = vunpack.i.h.bf16 %v9592_v39  ;;  %v9593_v58 = vunpack.i.l.bf16 %v9592_v39  ;;  %v9599_v52 = vunpack.i.h.bf16 %v9597_v21  ;;  %v6681_v10 = vsel %vm4320_vm14, %v6657_v3, %v9484_v2 }
 0x889   : > { %v6862_v18 = vsel %vm1755_vm11, %v6860_v27, %v6861_v4  ;;  %v6869_v39 = vsel %vm1755_vm11, %v6861_v4, %v6868_v56  ;;  %v9439_v26 = vunpack.i.h.bf16 %v18574_v32  ;;  %v6867_v2 = vsel %vm1755_vm11, %v6858_v38, %v6866_v48 }
 0x88a   : > { %v6705_v31 = vsel %vm392_vm3, %v18572_v40, %v9594_v50  ;;  %v6704_v53 = vsel %vm392_vm3, %v18573_v51, %v9593_v58  ;;  %v9607_v49 = vpop.permute.xlu1 %9606  ;;  %7090 = vmatprep.mubr.f32.mxu0 %v6862_v18  ;;  %v9438_v50 = vunpack.i.l.bf16 %v18574_v32  ;;  %v6873_v18 = vrot.slane %v6681_v10, 7 }
 0x88b   : > { %v9602_v35 = vpop.permute.xlu0 %9601  ;;  %7091 = vmatmul.mubr.f32.gmra.mrb[60].mxu0 %v6859_v8  ;;  %v6728_v27 = vsel %vm4295_vm13, %v6704_v53, %v9598_v36  ;;  %v9608_v21 = vunpack.i.l.bf16 %v9607_v49  ;;  %v6729_v4 = vsel %vm4295_vm13, %v6705_v31, %v9599_v52  ;;  %v6872_v36 = vrot.slane %v6680_v15, 7  ;;  %v18575_v52 = vld [vmem:[#allocation168_spill] sm:$0xff] }
 0x88c   : > { %v9603_v40 = vunpack.i.l.bf16 %v9602_v35  ;;  %7095 = vmatprep.mubr.f32.mxu0 %v6869_v39  ;;  %v6752_v58 = vsel %vm4320_vm14, %v6728_v27, %v9589_v45  ;;  %v9609_v8 = vunpack.i.h.bf16 %v9607_v49  ;;  %v6682_v6 = vsel %vm4320_vm14, %v16589_v46, %v9488_v19 }
 0x88d   : > { %v6875_v45 = vrot.slane %v6752_v58, 7  ;;  %v9489_v12 = vunpack.i.h.bf16 %v16313_v47  ;;  %v9493_v63 = vunpack.i.l.bf16 %v16330_v30  ;;  %v6706_v39 = vsel %vm392_vm3, %v18575_v52, %v9608_v21 }
 0x88e   : > { %v6753_v56 = vsel %vm4320_vm14, %v6729_v4, %v9603_v40  ;;  %v9617_v3 = vpop.permute.xlu1 %9616  ;;  %v9604_v38 = vunpack.i.h.bf16 %v9602_v35  ;;  %v9494_v15 = vunpack.i.h.bf16 %v16330_v30  ;;  %v6874_v46 = vsel %vm1755_vm11, %v6872_v36, %v6873_v18 }
 0x88f   : > { %v9612_v51 = vpop.permute.xlu0 %9611  ;;  %7096 = vmatmul.mubr.f32.gmra.mrb[62].mxu0 %v6867_v2  ;;  %v6876_v53 = vrot.slane %v6753_v56, 7  ;;  %v9618_v48 = vunpack.i.l.bf16 %v9617_v3  ;;  %v6881_v47 = vrot.slane %v6682_v6, 7  ;;  %v18576_v19 = vrot.slane %v16499_v54, 1 }
 0x890   : > { %v9614_v7 = vunpack.i.h.bf16 %v9612_v51  ;;  %v9613_v31 = vunpack.i.l.bf16 %v9612_v51  ;;  %v9619_v58 = vunpack.i.h.bf16 %v9617_v3  ;;  %v6684_v51 = vsel %vm4320_vm14, %v6660_v44, %v9493_v63 }
 0x891   : > { %v6877_v49 = vsel %vm1755_vm11, %v6875_v45, %v6876_v53  ;;  %v6707_v40 = vsel %vm392_vm3, %v18576_v19, %v9609_v8  ;;  %v6708_v36 = vsel %vm392_vm3, %v16528_v22, %v9618_v48  ;;  %v6882_v52 = vsel %vm1755_vm11, %v6873_v18, %v6881_v47 }
 0x892   : > { %v6730_v27 = vsel %vm4295_vm13, %v6706_v39, %v9613_v31  ;;  %v9627_v10 = vpop.permute.xlu1 %9626  ;;  %7100 = vmatprep.mubr.f32.mxu0 %v6877_v49  ;;  %v6731_v56 = vsel %vm4295_vm13, %v6707_v40, %v9614_v7  ;;  %v6683_v7 = vsel %vm4320_vm14, %v16592_v57, %v9489_v12  ;;  %v18577_v39 = vrot.slane %v16502_v42, 1 }
 0x893   : > { %v9628_v4 = vunpack.i.l.bf16 %v9627_v10  ;;  %v9622_v21 = vpop.permute.xlu0 %9621  ;;  %7101 = vmatmul.mubr.f32.gmra.mrb[64].mxu0 %v6874_v46  ;;  %v6754_v35 = vsel %vm4320_vm14, %v6730_v27, %v9604_v38  ;;  %v9629_v45 = vunpack.i.h.bf16 %v9627_v10  ;;  %v6888_v38 = vrot.slane %v6684_v51, 7 }
 0x894   : > { %v9623_v30 = vunpack.i.l.bf16 %v9622_v21  ;;  %v6883_v2 = vrot.slane %v6754_v35, 7  ;;  %v9624_v6 = vunpack.i.h.bf16 %v9622_v21  ;;  %v6709_v44 = vsel %vm392_vm3, %v18577_v39, %v9619_v58  ;;  %v18578_v35 = vld [vmem:[#allocation106_spill] sm:$0xff] }
 0x895   : > { %v6755_v54 = vsel %vm4320_vm14, %v6731_v56, %v9628_v4  ;;  %v6685_v48 = vsel %vm4320_vm14, %v6661_v17, %v9494_v15  ;;  %v6662_v57 = vsel %vm4295_vm13, %v16562_v9, %v9438_v50  ;;  %v6887_v46 = vrot.slane %v6683_v7, 7 }
 0x896   : > { %v6732_v3 = vsel %vm4295_vm13, %v6708_v36, %v9623_v30  ;;  %v9637_v8 = vpop.permute.xlu1 %9636  ;;  %v6884_v31 = vsel %vm1755_vm11, %v6876_v53, %v6883_v2  ;;  %v6890_v53 = vrot.slane %v6755_v54, 7  ;;  %v6733_v18 = vsel %vm4295_vm13, %v6709_v44, %v9624_v6  ;;  %v18581_v54 = vld [vmem:[#allocation177_spill] sm:$0xff] }
 0x897   : > { %v9632_v63 = vpop.permute.xlu0 %9631  ;;  %7105 = vmatprep.mubr.f32.mxu0 %v6884_v31  ;;  %v6756_v22 = vsel %vm4320_vm14, %v6732_v3, %v9629_v45  ;;  %v9639_v49 = vunpack.i.h.bf16 %v9637_v8  ;;  %v9638_v12 = vunpack.i.l.bf16 %v9637_v8  ;;  %v6663_v47 = vsel %vm4295_vm13, %v16549_v55, %v9439_v26 }
 0x898   : > { %v9633_v27 = vunpack.i.l.bf16 %v9632_v63  ;;  %7106 = vmatmul.mubr.f32.gmra.mrb[66].mxu0 %v6882_v52  ;;  %v6891_v10 = vrot.slane %v6756_v22, 7  ;;  %v9498_v17 = vunpack.i.l.bf16 %v16326_v62  ;;  %v6889_v9 = vsel %vm1755_vm11, %v6887_v46, %v6888_v38  ;;  %v18579_v62 = vld [vmem:[#allocation161_spill] sm:$0xff] }
 0x899   : > { %v6896_v21 = vrot.slane %v6685_v48, 7  ;;  %v6711_v32 = vsel %vm392_vm3, %v18578_v35, %v9639_v49  ;;  %v9634_v56 = vunpack.i.h.bf16 %v9632_v63  ;;  %v18580_v55 = vrot.slane %v18579_v62, 1 }
 0x89a   : > { %v6757_v15 = vsel %vm4320_vm14, %v6733_v18, %v9633_v27  ;;  %v9647_v19 = vpop.permute.xlu1 %9646  ;;  %v6892_v40 = vsel %vm1755_vm11, %v6890_v53, %v6891_v10  ;;  %v9383_v6 = vunpack.i.l.bf16 %v18581_v54  ;;  %v6686_v52 = vsel %vm4320_vm14, %v6662_v57, %v9498_v17 }
 0x89b   : > { %v9649_v58 = vunpack.i.h.bf16 %v9647_v19  ;;  %v9642_v4 = vpop.permute.xlu0 %9641  ;;  %7110 = vmatprep.mubr.f32.mxu0 %v6892_v40  ;;  %v6898_v50 = vrot.slane %v6757_v15, 7  ;;  %v6710_v2 = vsel %vm392_vm3, %v18580_v55, %v9638_v12  ;;  %v9648_v51 = vunpack.i.l.bf16 %v9647_v19  ;;  %v10006_v12 = vld [vmem:[#allocation3 + $0x1f0] sm:$0xff] }
 0x89c   : > { %v9644_v30 = vunpack.i.h.bf16 %v9642_v4  ;;  %v9643_v26 = vunpack.i.l.bf16 %v9642_v4  ;;  %7111 = vmatmul.mubr.f32.gmra.mrb[68].mxu0 %v6889_v9  ;;  %v6897_v39 = vsel %vm1755_vm11, %v6888_v38, %v6896_v21  ;;  %v9443_v53 = vunpack.i.l.bf16 %v16285_v14 }
 0x89d   : > { %v6687_v36 = vsel %vm4320_vm14, %v6663_v47, %v9649_v58  ;;  %v6899_v45 = vsel %vm1755_vm11, %v6891_v10, %v6898_v50  ;;  %v6902_v18 = vrot.slane %v6686_v52, 7  ;;  %v18582_v46 = vunpack.i.h.bf16 %v18567_v34  ;;  %v18583_v47 = vld [vmem:[#allocation32_spill] sm:$0xff] }
 0x89e   : > { %v6735_v3 = vsel %vm4295_vm13, %v6711_v32, %v9644_v30  ;;  %v6734_v8 = vsel %vm4295_vm13, %v6710_v2, %v9643_v26  ;;  %v9657_v31 = vpop.permute.xlu1 %9656  ;;  %7115 = vmatprep.mubr.f32.mxu0 %v6899_v45  ;;  %v6903_v22 = vrot.slane %v6687_v36, 7  ;;  %v9384_v38 = vunpack.i.h.bf16 %v18581_v54  ;;  %v10007_v58 = vld [vmem:[#allocation3 + $0x1e8] sm:$0xff] }
 0x89f   : > { %v9652_v7 = vpop.permute.xlu0 %9651  ;;  %v6758_v44 = vsel %vm4320_vm14, %v6734_v8, %v9634_v56  ;;  %v6759_v63 = vsel %vm4320_vm14, %v6735_v3, %v9648_v51  ;;  %v6643_v57 = vsel %vm392_vm3, %v10006_v12, %v18582_v46  ;;  %v18584_v17 = vrot.slane %v18583_v47, 1  ;;  %v10008_v47 = vld [vmem:[#allocation3 + $0x1e0] sm:$0xff] }
 0x8a0   : > { %v9653_v48 = vunpack.i.l.bf16 %v9652_v7  ;;  %7116 = vmatmul.mubr.f32.gmra.mrb[70].mxu0 %v6897_v39  ;;  %v6905_v49 = vrot.slane %v6758_v44, 7  ;;  %v6906_v27 = vrot.slane %v6759_v63, 7  ;;  %v9654_v10 = vunpack.i.h.bf16 %v9652_v7 }
 0x8a1   : > { %v18585_v4 = vunpack.i.l.bf16 %v18567_v34  ;;  %v6640_v50 = vsel %vm392_vm3, %v16502_v42, %v9383_v6  ;;  %v9658_v21 = vunpack.i.l.bf16 %v9657_v31  ;;  %v6904_v32 = vsel %vm1755_vm11, %v6902_v18, %v6903_v22  ;;  %v18586_v34 = vld [vmem:[#allocation166_spill] sm:$0xff] }
 0x8a2   : > { %v6712_v15 = vsel %vm392_vm3, %v18584_v17, %v9653_v48  ;;  %v9667_v19 = vpop.permute.xlu1 %9666  ;;  %v6907_v40 = vsel %vm1755_vm11, %v6905_v49, %v6906_v27  ;;  %v9449_v56 = vunpack.i.h.bf16 %v16278_v37  ;;  %v9448_v30 = vunpack.i.l.bf16 %v16278_v37 }
 0x8a3   : > { %v6642_v9 = vsel %vm392_vm3, %v10007_v58, %v18585_v4  ;;  %v9662_v35 = vpop.permute.xlu0 %9661  ;;  %7120 = vmatprep.mubr.f32.mxu0 %v6907_v40  ;;  %v6664_v55 = vsel %vm4295_vm13, %v6640_v50, %v9443_v53  ;;  %v18587_v2 = vrot.slane %v18586_v34, 1  ;;  %v9668_v36 = vunpack.i.l.bf16 %v9667_v19 }
 0x8a4   : > { %v9664_v26 = vunpack.i.h.bf16 %v9662_v35  ;;  %v9663_v62 = vunpack.i.l.bf16 %v9662_v35  ;;  %7121 = vmatmul.mubr.f32.gmra.mrb[72].mxu0 %v6904_v32  ;;  %v6736_v42 = vsel %vm4295_vm13, %v6712_v15, %v9658_v21  ;;  %v9659_v45 = vunpack.i.h.bf16 %v9657_v31 }
 0x8a5   : > { %v6713_v51 = vsel %vm392_vm3, %v18587_v2, %v9654_v10  ;;  %v9669_v54 = vunpack.i.h.bf16 %v9667_v19  ;;  %v9444_v63 = vunpack.i.h.bf16 %v16285_v14  ;;  %v18588_v10 = vld [vmem:[#allocation88_spill] sm:$0xff]  ;;  %v6641_v17 = vsel %vm392_vm3, %v10008_v47, %v9384_v38  ;;  %v18589_v19 = vld [vmem:[#allocation78_spill] sm:$0xff] }
 0x8a6   : > { %v6688_v6 = vsel %vm4320_vm14, %v6664_v55, %v9664_v26  ;;  %v6760_v3 = vsel %vm4320_vm14, %v6736_v42, %v9663_v62  ;;  %v9677_v8 = vpop.permute.xlu1 %9676  ;;  %v6737_v48 = vsel %vm4295_vm13, %v6713_v51, %v9659_v45  ;;  %v6714_v31 = vsel %vm392_vm3, %v18588_v10, %v9668_v36 }
 0x8a7   : > { %v9679_v37 = vunpack.i.h.bf16 %v9677_v8  ;;  %v9678_v52 = vunpack.i.l.bf16 %v9677_v8  ;;  %v9672_v7 = vpop.permute.xlu0 %9671  ;;  %v6913_v39 = vrot.slane %v6760_v3, 7  ;;  %v6911_v44 = vrot.slane %v6688_v6, 7 }
 0x8a8   : > { %v9674_v49 = vunpack.i.h.bf16 %v9672_v7  ;;  %v9673_v53 = vunpack.i.l.bf16 %v9672_v7  ;;  %v6667_v15 = vsel %vm4295_vm13, %v6643_v57, %v9449_v56  ;;  %v18590_v14 = vrot.slane %v18589_v19, 1 }
 0x8a9   : > { %v6761_v18 = vsel %vm4320_vm14, %v6737_v48, %v9678_v52  ;;  %v6914_v12 = vsel %vm1755_vm11, %v6906_v27, %v6913_v39  ;;  %v6912_v46 = vsel %vm1755_vm11, %v6903_v22, %v6911_v44  ;;  %v6666_v56 = vsel %vm4295_vm13, %v6642_v9, %v9448_v30 }
 0x8aa   : > { %v6715_v40 = vsel %vm392_vm3, %v18590_v14, %v9669_v54  ;;  %v6738_v58 = vsel %vm4295_vm13, %v6714_v31, %v9673_v53  ;;  %v9687_v4 = vpop.permute.xlu1 %9686  ;;  %7125 = vmatprep.mubr.f32.mxu0 %v6914_v12  ;;  %v6920_v26 = vrot.slane %v6761_v18, 7  ;;  %v6665_v62 = vsel %vm4295_vm13, %v6641_v17, %v9444_v63 }
 0x8ab   : > { %v6739_v50 = vsel %vm4295_vm13, %v6715_v40, %v9674_v49  ;;  %v9689_v21 = vunpack.i.h.bf16 %v9687_v4  ;;  %v9688_v35 = vunpack.i.l.bf16 %v9687_v4  ;;  %v9682_v27 = vpop.permute.xlu0 %9681  ;;  %7126 = vmatmul.mubr.f32.gmra.mrb[74].mxu0 %v6912_v46  ;;  %v6762_v22 = vsel %vm4320_vm14, %v6738_v58, %v9679_v37 }
 0x8ac   : > { %v9684_v32 = vunpack.i.h.bf16 %v9682_v27  ;;  %v9683_v38 = vunpack.i.l.bf16 %v9682_v27  ;;  %v6921_v57 = vrot.slane %v6762_v22, 7 }
 0x8ad   : > { %v6691_v55 = vsel %vm4320_vm14, %v6667_v15, %v9689_v21  ;;  %v6763_v34 = vsel %vm4320_vm14, %v6739_v50, %v9688_v35 }
 0x8ae   : > { %v6690_v2 = vsel %vm4320_vm14, %v6666_v56, %v9684_v32  ;;  %v6689_v51 = vsel %vm4320_vm14, %v6665_v62, %v9683_v38  ;;  %v6922_v36 = vsel %vm1755_vm11, %v6920_v26, %v6921_v57  ;;  %v6928_v42 = vrot.slane %v6763_v34, 7 }
 0x8af   : > { %7130 = vmatprep.mubr.f32.mxu0 %v6922_v36  ;;  %v6917_v45 = vrot.slane %v6689_v51, 7  ;;  %v6918_v54 = vrot.slane %v6690_v2, 7  ;;  %v6926_v30 = vrot.slane %v6691_v55, 7 }
 0x8b0   : > { %v6929_v6 = vsel %vm1755_vm11, %v6921_v57, %v6928_v42 }
 0x8b1   : > { %v6919_v9 = vsel %vm1755_vm11, %v6917_v45, %v6918_v54  ;;  %v6927_v3 = vsel %vm1755_vm11, %v6918_v54, %v6926_v30 }
 0x8b2   : > { %7131 = vmatmul.mubr.f32.gmra.mrb[76].mxu0 %v6919_v9 }
 0x8b3   : > { %7135 = vmatprep.mubr.f32.mxu0 %v6929_v6 }
 0x8b6   : > { %7136 = vmatmul.mubr.f32.gmra.mrb[78].mxu0 %v6927_v3 }
 0x8d3   : > { %v7642_v8 = vpop.permute.xlu1 %7641 }
 0x8d4   : > { %v7688_v37 = vsub.f32 %v16030_v61, %v7642_v8  ;;  %v7640_v52 = vpop.permute.xlu0 %7639 }
 0x8d5   : > { %v7687_v7 = vsub.f32 %v16035_v24, %v7640_v52 }
 0x8d6   : > { %v7705_v39 = vmul.f32 1.442695, %v7688_v37 }
 0x8d7   : > { %v7703_v44 = vmul.f32 1.442695, %v7687_v7  ;;  %v7646_v63 = vpop.permute.xlu1 %7645 }
 0x8d8   : > { %9786 = vpow2.f32 %v7705_v39  ;;  %v7690_v48 = vsub.f32 %v16042_v28, %v7646_v63  ;;  %v7644_v49 = vpop.permute.xlu0 %7643 }
 0x8d9   : > { %9788 = vpow2.f32 %v7703_v44  ;;  %v7689_v53 = vsub.f32 %v16047_v25, %v7644_v49 }
 0x8da   : > { %v7709_v10 = vmul.f32 1.442695, %v7690_v48 }
 0x8db   : > { %v7707_v31 = vmul.f32 1.442695, %v7689_v53  ;;  %v7650_v18 = vpop.permute.xlu1 %7649 }
 0x8dc   : > { %9790 = vpow2.f32 %v7709_v10  ;;  %v7692_v12 = vsub.f32 %v16056_v59, %v7650_v18  ;;  %v7648_v46 = vpop.permute.xlu0 %7647 }
 0x8dd   : > { %9792 = vpow2.f32 %v7707_v31  ;;  %v7691_v47 = vsub.f32 %v16059_v20, %v7648_v46 }
 0x8de   : > { %v7713_v17 = vmul.f32 1.442695, %v7692_v12 }
 0x8df   : > { %v7711_v15 = vmul.f32 1.442695, %v7691_v47  ;;  %v7654_v19 = vpop.permute.xlu1 %7653 }
 0x8e0   : > { %9794 = vpow2.f32 %v7713_v17  ;;  %v7694_v14 = vsub.f32 %v16070_v60, %v7654_v19  ;;  %v7652_v40 = vpop.permute.xlu0 %7651 }
 0x8e1   : > { %9796 = vpow2.f32 %v7711_v15  ;;  %v7693_v58 = vsub.f32 %v16073_v0, %v7652_v40 }
 0x8e2   : > { %v16751_v4 = vpop.eup %9786  ;;  %v7717_v50 = vmul.f32 1.442695, %v7694_v14 }
 0x8e3   : > { %v16753_v21 = vpop.eup %9788  ;;  %v7715_v35 = vmul.f32 1.442695, %v7693_v58  ;;  %7753 = vrot.lane.b32.xlu1 %v16751_v4, %s10126_s23  ;;  %v7658_v27 = vpop.permute.xlu1 %7657  ;;  %v16823_v58 = vld [vmem:[#allocation8] ss:$0 sm:$0xff] }
 0x8e4   : > { %9798 = vpow2.f32 %v7717_v50  ;;  %v7696_v22 = vsub.f32 %v16080_v11, %v7658_v27  ;;  %7751 = vrot.lane.b32.xlu0 %v16753_v21, %s10126_s23  ;;  %v7656_v32 = vpop.permute.xlu0 %7655  ;;  %v18591_v27 = vld [vmem:[#allocation79_spill] sm:$0xff] }
 0x8e5   : > { %9800 = vpow2.f32 %v7715_v35  ;;  %v7695_v38 = vsub.f32 %v18542_v43, %v7656_v32 }
 0x8e6   : > { %v16761_v26 = vpop.eup %9790  ;;  %v7721_v57 = vmul.f32 1.442695, %v7696_v22 }
 0x8e7   : > { %v16763_v56 = vpop.eup %9792  ;;  %v7719_v62 = vmul.f32 1.442695, %v7695_v38  ;;  %7757 = vrot.lane.b32.xlu1 %v16761_v26, %s10126_s23  ;;  %v7662_v55 = vpop.permute.xlu1 %7661 }
 0x8e8   : > { %9802 = vpow2.f32 %v7721_v57  ;;  %v7698_v34 = vsub.f32 %v18545_v5, %v7662_v55  ;;  %7755 = vrot.lane.b32.xlu0 %v16763_v56, %s10126_s23  ;;  %v7660_v2 = vpop.permute.xlu0 %7659 }
 0x8e9   : > { %9804 = vpow2.f32 %v7719_v62  ;;  %v7697_v51 = vsub.f32 %v18547_v29, %v7660_v2 }
 0x8ea   : > { %v16771_v36 = vpop.eup %9794  ;;  %v7725_v42 = vmul.f32 1.442695, %v7698_v34  ;;  %v18592_v34 = vld [vmem:[#allocation121_spill] sm:$0xff] }
 0x8eb   : > { %v16773_v45 = vpop.eup %9796  ;;  %v7723_v54 = vmul.f32 1.442695, %v7697_v51  ;;  %7761 = vrot.lane.b32.xlu1 %v16771_v36, %s10126_s23  ;;  %v7666_v6 = vpop.permute.xlu1 %7665 }
 0x8ec   : > { %9806 = vpow2.f32 %v7725_v42  ;;  %v7700_v9 = vsub.f32 %v18552_v16, %v7666_v6  ;;  %7759 = vrot.lane.b32.xlu0 %v16773_v45, %s10126_s23  ;;  %v7664_v30 = vpop.permute.xlu0 %7663 }
 0x8ed   : > { %9808 = vpow2.f32 %v7723_v54  ;;  %v7699_v3 = vsub.f32 %v18555_v1, %v7664_v30 }
 0x8ee   : > { %v16781_v8 = vpop.eup %9798  ;;  %v7729_v37 = vmul.f32 1.442695, %v7700_v9  ;;  %v18593_v9 = vld [vmem:[#allocation167_spill] sm:$0xff] }
 0x8ef   : > { %v16783_v52 = vpop.eup %9800  ;;  %v7727_v7 = vmul.f32 1.442695, %v7699_v3  ;;  %7765 = vrot.lane.b32.xlu1 %v16781_v8, %s10126_s23  ;;  %v7670_v39 = vpop.permute.xlu1 %7669 }
 0x8f0   : > { %9810 = vpow2.f32 %v7729_v37  ;;  %v7702_v44 = vsub.f32 %v18562_v23, %v7670_v39  ;;  %7763 = vrot.lane.b32.xlu0 %v16783_v52, %s10126_s23  ;;  %v7668_v63 = vpop.permute.xlu0 %7667 }
 0x8f1   : > { %9812 = vpow2.f32 %v7727_v7  ;;  %v7701_v48 = vsub.f32 %v18564_v13, %v7668_v63 }
 0x8f2   : > { %v16791_v49 = vpop.eup %9802  ;;  %v7733_v53 = vmul.f32 1.442695, %v7702_v44  ;;  %v18594_v44 = vld [vmem:[#allocation107_spill] sm:$0xff] }
 0x8f3   : > { %v16793_v10 = vpop.eup %9804  ;;  %v7731_v31 = vmul.f32 1.442695, %v7701_v48  ;;  %7769 = vrot.lane.b32.xlu1 %v16791_v49, %s10126_s23 }
 0x8f4   : > { %9814 = vpow2.f32 %v7733_v53  ;;  %7767 = vrot.lane.b32.xlu0 %v16793_v10, %s10126_s23 }
 0x8f5   : > { %9816 = vpow2.f32 %v7731_v31 }
 0x8f6   : > { %v16799_v18 = vpop.eup %9806 }
 0x8f7   : > { %v16801_v12 = vpop.eup %9808  ;;  %7773 = vrot.lane.b32.xlu1 %v16799_v18, %s10126_s23 }
 0x8f8   : > { %7771 = vrot.lane.b32.xlu0 %v16801_v12, %s10126_s23 }
 0x8fa   : > { %v16807_v46 = vpop.eup %9810 }
 0x8fb   : > { %v16809_v47 = vpop.eup %9812  ;;  %7777 = vrot.lane.b32.xlu1 %v16807_v46, %s10126_s23 }
 0x8fc   : > { %7775 = vrot.lane.b32.xlu0 %v16809_v47, %s10126_s23 }
 0x8fe   : > { %v16815_v17 = vpop.eup %9814 }
 0x8ff   : > { %v16817_v15 = vpop.eup %9816  ;;  %7781 = vrot.lane.b32.xlu1 %v16815_v17, %s10126_s23 }
 0x900   : > { %7779 = vrot.lane.b32.xlu0 %v16817_v15, %s10126_s23 }
 0x922   : > { %v8519_v19 = vpop.f32.mrb[48].mxu0 }
 0x923   : > { %v8520_v14 = vpop.f32.mrb[49].mxu0 }
 0x924   : > { %v8521_v40 = vadd.f32 %v8520_v14, %v8519_v19  ;;  %v18595_v19 = vld [vmem:[#allocation89_spill] sm:$0xff] }
 0x926   : > { %v7063_v50 = vadd.f32 %v16823_v58, %v8521_v40 }
 0x927   : > { %v8522_v35 = vpop.f32.mrb[50].mxu0 }
 0x928   : > { %v16827_v22 = vadd.f32 %v18591_v27, %v7063_v50  ;;  %v8523_v32 = vpop.f32.mrb[51].mxu0  ;;  %v18597_v27 = vld [vmem:[#allocation109_spill] sm:$0xff] }
 0x929   : > { %v8524_v38 = vadd.f32 %v8523_v32, %v8522_v35 }
 0x92b   : > { %v7068_v57 = vadd.f32 %v16823_v58, %v8524_v38  ;;  %v8525_v62 = vpop.f32.mrb[52].mxu0  ;;  %v7576_v38 = vsub.f32 %v16030_v61, %v16441_v33  ;;  %v18603_v33 = vld [vmem:[#allocation22_spill] sm:$0xff] }
 0x92c   : > { %v8526_v55 = vpop.f32.mrb[53].mxu0 }
 0x92d   : > { %v16831_v2 = vadd.f32 %v18592_v34, %v7068_v57  ;;  %v8527_v51 = vadd.f32 %v8526_v55, %v8525_v62  ;;  %v7575_v57 = vsub.f32 %v16035_v24, %v16446_v41  ;;  %v7593_v62 = vmul.f32 1.442695, %v7576_v38  ;;  %v18599_v55 = vld [vmem:[#allocation196_spill] sm:$0xff] }
 0x92e   : > { %v7578_v34 = vsub.f32 %v16042_v28, %v18599_v55  ;;  %v7582_v24 = vsub.f32 %v16070_v60, %v18603_v33  ;;  %v18604_v28 = vld [vmem:[#allocation184_spill] sm:$0xff] }
 0x92f   : > { %v7073_v42 = vadd.f32 %v16823_v58, %v8527_v51  ;;  %v8528_v54 = vpop.f32.mrb[54].mxu0  ;;  %v7591_v51 = vmul.f32 1.442695, %v7575_v57  ;;  %9818 = vpow2.f32 %v7593_v62  ;;  %v18608_v57 = vld [vmem:[#allocation97_spill] sm:$0xff] }
 0x930   : > { %v8529_v6 = vpop.f32.mrb[55].mxu0  ;;  %v7585_v62 = vsub.f32 %v18547_v29, %v18608_v57  ;;  %v18610_v29 = vld [vmem:[#allocation87_spill] sm:$0xff] }
 0x931   : > { %v16835_v30 = vadd.f32 %v18593_v9, %v7073_v42  ;;  %v8530_v3 = vadd.f32 %v8529_v6, %v8528_v54  ;;  %v18600_v42 = vld [vmem:[#allocation197_spill] sm:$0xff]  ;;  %v7597_v6 = vmul.f32 1.442695, %v7578_v34  ;;  %v18601_v9 = vld [vmem:[#allocation136_spill] sm:$0xff]  ;;  %9820 = vpow2.f32 %v7591_v51 }
 0x932   : > { %v7577_v54 = vsub.f32 %v16047_v25, %v18600_v42 }
 0x933   : > { %v7078_v37 = vadd.f32 %v16823_v58, %v8530_v3  ;;  %v8531_v7 = vpop.f32.mrb[56].mxu0  ;;  %v7580_v3 = vsub.f32 %v16056_v59, %v18601_v9  ;;  %9822 = vpow2.f32 %v7597_v6 }
 0x934   : > { %v8532_v39 = vpop.f32.mrb[57].mxu0 }
 0x935   : > { %v16839_v63 = vadd.f32 %v18594_v44, %v7078_v37  ;;  %v8533_v48 = vadd.f32 %v8532_v39, %v8531_v7  ;;  %v7595_v37 = vmul.f32 1.442695, %v7577_v54  ;;  %v18602_v7 = vld [vmem:[#allocation201_spill] sm:$0xff]  ;;  %v7601_v41 = vmul.f32 1.442695, %v7580_v3 }
 0x936   : > { %v7579_v61 = vsub.f32 %v16059_v20, %v18602_v7  ;;  %v7581_v39 = vsub.f32 %v16073_v0, %v18604_v28  ;;  %v7605_v44 = vmul.f32 1.442695, %v7582_v24  ;;  %v18607_v0 = vld [vmem:[#allocation112_spill] sm:$0xff]  ;;  %v7611_v3 = vmul.f32 1.442695, %v7585_v62 }
 0x937   : > { %v7083_v53 = vadd.f32 %v16823_v58, %v8533_v48  ;;  %9824 = vpow2.f32 %v7595_v37  ;;  %v18605_v48 = vld [vmem:[#allocation23_spill] sm:$0xff]  ;;  %v7587_v37 = vsub.f32 %v18555_v1, %v18610_v29 }
 0x938   : > { %v8534_v31 = vpop.f32.mrb[58].mxu0  ;;  %v7599_v25 = vmul.f32 1.442695, %v7579_v61  ;;  %9826 = vpow2.f32 %v7601_v41  ;;  %v7603_v59 = vmul.f32 1.442695, %v7581_v39 }
 0x939   : > { %v16843_v14 = vadd.f32 %v18595_v19, %v7083_v53  ;;  %v8535_v40 = vpop.f32.mrb[59].mxu0  ;;  %v7584_v53 = vsub.f32 %v16080_v11, %v18605_v48  ;;  %v16869_v20 = vpop.eup %9818  ;;  %v7615_v1 = vmul.f32 1.442695, %v7587_v37  ;;  %v18612_v48 = vld [vmem:[#allocation115_spill] sm:$0xff] }
 0x93a   : > { %v8536_v50 = vadd.f32 %v8535_v40, %v8534_v31  ;;  %v18606_v31 = vld [vmem:[#allocation82_spill] sm:$0xff]  ;;  %9828 = vpow2.f32 %v7599_v25 }
 0x93b   : > { %18596 = vst [vmem:[#allocation129_spill] sm:$0xff] %v16843_v14  ;;  %v7583_v19 = vsub.f32 %v18542_v43, %v18606_v31  ;;  %v16871_v40 = vpop.eup %9820  ;;  %9830 = vpow2.f32 %v7605_v44 }
 0x93c   : > { %v7088_v35 = vadd.f32 %v16823_v58, %v8536_v50  ;;  %v7609_v50 = vmul.f32 1.442695, %v7584_v53  ;;  %9832 = vpow2.f32 %v7603_v59  ;;  %v7589_v53 = vsub.f32 %v18564_v13, %v18612_v48 }
 0x93d   : > { %v7607_v11 = vmul.f32 1.442695, %v7583_v19  ;;  %v16879_v55 = vpop.eup %9822 }
 0x93e   : > { %v16847_v32 = vadd.f32 %v18597_v27, %v7088_v35  ;;  %v7586_v35 = vsub.f32 %v18545_v5, %v18607_v0  ;;  %v18609_v5 = vld [vmem:[#allocation64_spill] sm:$0xff]  ;;  %v7619_v62 = vmul.f32 1.442695, %v7589_v53 }
 0x93f   : > { %v7588_v54 = vsub.f32 %v18552_v16, %v18609_v5  ;;  %v18611_v16 = vld [vmem:[#allocation137_spill] sm:$0xff]  ;;  %v18613_v5 = vld [vmem:[#allocation122_spill] sm:$0xff] }
 0x940   : > { %18598 = vst [vmem:[#allocation135_spill] sm:$0xff] %v16847_v32  ;;  %v7613_v42 = vmul.f32 1.442695, %v7586_v35  ;;  %v7590_v28 = vsub.f32 %v18562_v23, %v18611_v16 }
 0x941   : > { %v16881_v51 = vpop.eup %9824  ;;  %v7617_v41 = vmul.f32 1.442695, %v7588_v54 }
 0x942   : > { %v16889_v61 = vpop.eup %9826  ;;  %v7621_v35 = vmul.f32 1.442695, %v7590_v28 }
 0x944   : > { %v16891_v24 = vpop.eup %9828 }
 0x945   : > { %v16899_v19 = vpop.eup %9830 }
 0x955   : > { %v7754_v60 = vpop.permute.xlu1 %7753 }
 0x956   : > { %v7800_v27 = vadd.f32 %v16869_v20, %v7754_v60  ;;  %v7752_v38 = vpop.permute.xlu0 %7751 }
 0x957   : > { %v7799_v43 = vadd.f32 %v16871_v40, %v7752_v38 }
 0x958   : > { %9834 = vrcp.f32 %v7800_v27 }
 0x959   : > { %9836 = vrcp.f32 %v7799_v43  ;;  %v7758_v34 = vpop.permute.xlu1 %7757 }
 0x95a   : > { %9838 = vpow2.f32 %v7609_v50  ;;  %v7802_v6 = vadd.f32 %v16879_v55, %v7758_v34  ;;  %v7756_v9 = vpop.permute.xlu0 %7755  ;;  %v16901_v50 = vpop.eup %9832 }
 0x95b   : > { %9840 = vpow2.f32 %v7607_v11  ;;  %v7801_v7 = vadd.f32 %v16881_v51, %v7756_v9 }
 0x95c   : > { %9842 = vrcp.f32 %v7802_v6 }
 0x95d   : > { %9844 = vrcp.f32 %v7801_v7  ;;  %v7762_v33 = vpop.permute.xlu1 %7761 }
 0x95e   : > { %9846 = vpow2.f32 %v7613_v42  ;;  %v7804_v39 = vadd.f32 %v16889_v61, %v7762_v33  ;;  %v7760_v25 = vpop.permute.xlu0 %7759  ;;  %v8537_v44 = vpop.f32.mrb[60].mxu0 }
 0x95f   : > { %9848 = vpow2.f32 %v7611_v3  ;;  %v7803_v59 = vadd.f32 %v16891_v24, %v7760_v25  ;;  %v8538_v31 = vpop.f32.mrb[61].mxu0 }
 0x960   : > { %9850 = vrcp.f32 %v7804_v39  ;;  %v8539_v60 = vadd.f32 %v8538_v31, %v8537_v44  ;;  %v18615_v44 = vld [vmem:[#allocation123_spill] sm:$0xff] }
 0x961   : > { %9852 = vrcp.f32 %v7803_v59  ;;  %v7766_v23 = vpop.permute.xlu1 %7765 }
 0x962   : > { %v16903_v0 = vpop.eup %9834  ;;  %9854 = vpow2.f32 %v7617_v41  ;;  %v7093_v27 = vadd.f32 %v16823_v58, %v8539_v60  ;;  %v7806_v38 = vadd.f32 %v16899_v19, %v7766_v23  ;;  %v7764_v13 = vpop.permute.xlu0 %7763 }
 0x963   : > { %v8540_v11 = vpop.f32.mrb[62].mxu0  ;;  %v16907_v57 = vpop.eup %9836  ;;  %9856 = vpow2.f32 %v7615_v1  ;;  %v7805_v43 = vadd.f32 %v16901_v50, %v7764_v13  ;;  %7865 = vrot.lane.b32.xlu1 %v16903_v0, %s10127_s25 }
 0x964   : > { %v8541_v34 = vpop.f32.mrb[63].mxu0  ;;  %v16912_v42 = vpop.eup %9838  ;;  %v16915_v54 = vadd.f32 %v18613_v5, %v7093_v27  ;;  %9858 = vrcp.f32 %v7806_v38  ;;  %7863 = vrot.lane.b32.xlu0 %v16907_v57, %s10127_s25 }
 0x965   : > { %v8542_v6 = vadd.f32 %v8541_v34, %v8540_v11  ;;  %v16919_v9 = vpop.eup %9840  ;;  %9860 = vrcp.f32 %v7805_v43  ;;  %v7770_v3 = vpop.permute.xlu1 %7769 }
 0x966   : > { %18614 = vst [vmem:[#allocation139_spill] sm:$0xff] %v16915_v54  ;;  %v16921_v29 = vpop.eup %9842  ;;  %9862 = vpow2.f32 %v7621_v35  ;;  %v7808_v7 = vadd.f32 %v16912_v42, %v7770_v3  ;;  %v7768_v33 = vpop.permute.xlu0 %7767  ;;  %v18623_v54 = vld [vmem:[#allocation124_spill] sm:$0xff] }
 0x967   : > { %v7098_v37 = vadd.f32 %v16823_v58, %v8542_v6  ;;  %v8543_v41 = vpop.f32.mrb[64].mxu0  ;;  %v16925_v16 = vpop.eup %9844  ;;  %9864 = vpow2.f32 %v7619_v62  ;;  %v7807_v28 = vadd.f32 %v16919_v9, %v7768_v33  ;;  %7869 = vrot.lane.b32.xlu1 %v16921_v29, %s10127_s25  ;;  %v18617_v62 = vld [vmem:[#allocation80_spill] sm:$0xff] }
 0x968   : > { %v8544_v39 = vpop.f32.mrb[65].mxu0  ;;  %v16930_v25 = vpop.eup %9846  ;;  %9866 = vrcp.f32 %v7808_v7  ;;  %7867 = vrot.lane.b32.xlu0 %v16925_v16, %s10127_s25 }
 0x969   : > { %v16933_v1 = vadd.f32 %v18615_v44, %v7098_v37  ;;  %v8545_v48 = vadd.f32 %v8544_v39, %v8543_v41  ;;  %v16937_v53 = vpop.eup %9848  ;;  %9868 = vrcp.f32 %v7807_v28  ;;  %v7774_v59 = vpop.permute.xlu1 %7773 }
 0x96a   : > { %v16939_v31 = vpop.eup %9850  ;;  %v7810_v23 = vadd.f32 %v16930_v25, %v7774_v59  ;;  %v7772_v35 = vpop.permute.xlu0 %7771 }
 0x96b   : > { %18616 = vst [vmem:[#allocation175_spill] sm:$0xff] %v16933_v1  ;;  %v7103_v60 = vadd.f32 %v16823_v58, %v8545_v48  ;;  %v16943_v27 = vpop.eup %9852  ;;  %v7809_v38 = vadd.f32 %v16937_v53, %v7772_v35  ;;  %7873 = vrot.lane.b32.xlu1 %v16939_v31, %s10127_s25  ;;  %v8546_v13 = vpop.f32.mrb[66].mxu0 }
 0x96c   : > { %v16948_v11 = vpop.eup %9854  ;;  %9870 = vrcp.f32 %v7810_v23  ;;  %7871 = vrot.lane.b32.xlu0 %v16943_v27, %s10127_s25  ;;  %v8547_v34 = vpop.f32.mrb[67].mxu0  ;;  %v18619_v23 = vld [vmem:[#allocation90_spill] sm:$0xff] }
 0x96d   : > { %v16951_v43 = vadd.f32 %v18617_v62, %v7103_v60  ;;  %v16955_v5 = vpop.eup %9856  ;;  %9872 = vrcp.f32 %v7809_v38  ;;  %v8548_v6 = vadd.f32 %v8547_v34, %v8546_v13  ;;  %v7778_v3 = vpop.permute.xlu1 %7777 }
 0x96e   : > { %v16957_v37 = vpop.eup %9858  ;;  %v7812_v7 = vadd.f32 %v16948_v11, %v7778_v3  ;;  %v7776_v33 = vpop.permute.xlu0 %7775 }
 0x96f   : > { %18618 = vst [vmem:[#allocation165_spill] sm:$0xff] %v16951_v43  ;;  %v16960_v41 = vpop.eup %9860  ;;  %v7108_v28 = vadd.f32 %v16823_v58, %v8548_v6  ;;  %v7811_v39 = vadd.f32 %v16955_v5, %v7776_v33  ;;  %7877 = vrot.lane.b32.xlu1 %v16957_v37, %s10127_s25  ;;  %v8549_v44 = vpop.f32.mrb[68].mxu0 }
 0x970   : > { %v16966_v48 = vpop.eup %9862  ;;  %9874 = vrcp.f32 %v7812_v7  ;;  %7875 = vrot.lane.b32.xlu0 %v16960_v41, %s10127_s25  ;;  %v8550_v59 = vpop.f32.mrb[69].mxu0 }
 0x971   : > { %v16970_v60 = vpop.eup %9864  ;;  %v16973_v35 = vadd.f32 %v18619_v23, %v7108_v28  ;;  %9876 = vrcp.f32 %v7811_v39  ;;  %v8551_v38 = vadd.f32 %v8550_v59, %v8549_v44  ;;  %v7782_v13 = vpop.permute.xlu1 %7781  ;;  %v18621_v39 = vld [vmem:[#allocation204_spill] sm:$0xff] }
 0x972   : > { %v16975_v62 = vpop.eup %9866  ;;  %v7814_v34 = vadd.f32 %v16966_v48, %v7782_v13  ;;  %v7780_v6 = vpop.permute.xlu0 %7779 }
 0x973   : > { %18620 = vst [vmem:[#allocation186_spill] sm:$0xff] %v16973_v35  ;;  %v9869_v3 = vpop.eup %9868  ;;  %v7113_v7 = vadd.f32 %v16823_v58, %v8551_v38  ;;  %v7813_v33 = vadd.f32 %v16970_v60, %v7780_v6  ;;  %7881 = vrot.lane.b32.xlu1 %v16975_v62, %s10127_s25  ;;  %v8552_v43 = vpop.f32.mrb[70].mxu0 }
 0x974   : > { %9878 = vrcp.f32 %v7814_v34  ;;  %7879 = vrot.lane.b32.xlu0 %v9869_v3, %s10127_s25  ;;  %v8553_v28 = vpop.f32.mrb[71].mxu0 }
 0x975   : > { %v16984_v44 = vadd.f32 %v18621_v39, %v7113_v7  ;;  %9880 = vrcp.f32 %v7813_v33  ;;  %v8554_v59 = vadd.f32 %v8553_v28, %v8552_v43  ;;  %v18624_v43 = vld [vmem:[#allocation146_spill] sm:$0xff] }
 0x976   : > { %v9871_v23 = vpop.eup %9870 }
 0x977   : > { %18622 = vst [vmem:[#allocation202_spill] sm:$0xff] %v16984_v44  ;;  %v9873_v13 = vpop.eup %9872  ;;  %v7118_v35 = vadd.f32 %v16823_v58, %v8554_v59  ;;  %7885 = vrot.lane.b32.xlu1 %v9871_v23, %s10127_s25  ;;  %v8555_v38 = vpop.f32.mrb[72].mxu0 }
 0x978   : > { %7883 = vrot.lane.b32.xlu0 %v9873_v13, %s10127_s25  ;;  %v8556_v6 = vpop.f32.mrb[73].mxu0 }
 0x979   : > { %v16990_v34 = vadd.f32 %v18623_v54, %v7118_v35  ;;  %v8557_v1 = vadd.f32 %v8556_v6, %v8555_v38  ;;  %v7832_v35 = vmul.f32 %v16903_v0, %v16869_v20  ;;  %v7831_v38 = vmul.f32 %v16907_v57, %v16871_v40  ;;  %v18625_v6 = vld [vmem:[#allocation91_spill] sm:$0xff] }
 0x97a   : > { %v9875_v14 = vpop.eup %9874  ;;  %v7833_v20 = vmul.f32 %v16925_v16, %v16881_v51  ;;  %v7838_v16 = vmul.f32 %v16957_v37, %v16899_v19  ;;  %v7841_v19 = vmul.f32 %v9873_v13, %v16937_v53 }
 0x97b   : > { %v9877_v32 = vpop.eup %9876  ;;  %v7123_v7 = vadd.f32 %v16823_v58, %v8557_v1  ;;  %7889 = vrot.lane.b32.xlu1 %v9875_v14, %s10127_s25 }
 0x97c   : > { %7887 = vrot.lane.b32.xlu0 %v9877_v32, %s10127_s25  ;;  %v7843_v37 = vmul.f32 %v9877_v32, %v16955_v5 }
 0x97d   : > { %v16996_v33 = vadd.f32 %v18624_v43, %v7123_v7 }
 0x97e   : > { %v9879_v28 = vpop.eup %9878  ;;  %v8558_v39 = vpop.f32.mrb[74].mxu0 }
 0x97f   : > { %v9881_v59 = vpop.eup %9880  ;;  %7893 = vrot.lane.b32.xlu1 %v9879_v28, %s10127_s25  ;;  %v8559_v44 = vpop.f32.mrb[75].mxu0 }
 0x980   : > { %v8560_v54 = vadd.f32 %v8559_v44, %v8558_v39  ;;  %7891 = vrot.lane.b32.xlu0 %v9881_v59, %s10127_s25  ;;  %v7834_v44 = vmul.f32 %v16921_v29, %v16879_v55  ;;  %v18626_v55 = vld [vmem:[#allocation206_spill] sm:$0xff] }
 0x982   : > { %v7128_v1 = vadd.f32 %v16823_v58, %v8560_v54  ;;  %v7836_v54 = vmul.f32 %v16939_v31, %v16889_v61  ;;  %v7837_v61 = vmul.f32 %v16960_v41, %v16901_v50  ;;  %v18627_v31 = vld [vmem:[#allocation205_spill] sm:$0xff]  ;;  %v7844_v50 = vmul.f32 %v9875_v14, %v16948_v11 }
 0x983   : > { %7945 = vrot.lane.b32.xlu1 %v7832_v35, %s10128_s29 }
 0x984   : > { %v17007_v7 = vadd.f32 %v18625_v6, %v7128_v1  ;;  %7943 = vrot.lane.b32.xlu0 %v7831_v38, %s10128_s29  ;;  %v7835_v1 = vmul.f32 %v16943_v27, %v16891_v24  ;;  %v7840_v24 = vmul.f32 %v16975_v62, %v16912_v42  ;;  %v7839_v27 = vmul.f32 %v9869_v3, %v16919_v9 }
 0x985   : > { %v8561_v43 = vpop.f32.mrb[76].mxu0  ;;  %v7846_v42 = vmul.f32 %v9879_v28, %v16966_v48  ;;  %v7845_v9 = vmul.f32 %v9881_v59, %v16970_v60 }
 0x986   : > { %v8562_v39 = vpop.f32.mrb[77].mxu0 }
 0x987   : > { %v8563_v0 = vadd.f32 %v8562_v39, %v8561_v43  ;;  %7949 = vrot.lane.b32.xlu1 %v7834_v44, %s10128_s29 }
 0x988   : > { %7947 = vrot.lane.b32.xlu0 %v7833_v20, %s10128_s29 }
 0x989   : > { %v7133_v40 = vadd.f32 %v16823_v58, %v8563_v0  ;;  %v8564_v57 = vpop.f32.mrb[78].mxu0 }
 0x98a   : > { %v8565_v35 = vpop.f32.mrb[79].mxu0 }
 0x98b   : > { %v17022_v29 = vadd.f32 %v18626_v55, %v7133_v40  ;;  %v8566_v38 = vadd.f32 %v8565_v35, %v8564_v57  ;;  %7953 = vrot.lane.b32.xlu1 %v7836_v54, %s10128_s29 }
 0x98c   : > { %7951 = vrot.lane.b32.xlu0 %v7835_v1, %s10128_s29 }
 0x98d   : > { %v7138_v51 = vadd.f32 %v16823_v58, %v8566_v38  ;;  %v7842_v58 = vmul.f32 %v9871_v23, %v16930_v25 }
 0x98f   : > { %v17032_v6 = vadd.f32 %v18627_v31, %v7138_v51  ;;  %7957 = vrot.lane.b32.xlu1 %v7838_v16, %s10128_s29 }
 0x990   : > { %7955 = vrot.lane.b32.xlu0 %v7837_v61, %s10128_s29 }
 0x993   : > { %7961 = vrot.lane.b32.xlu1 %v7840_v24, %s10128_s29 }
 0x994   : > { %7959 = vrot.lane.b32.xlu0 %v7839_v27, %s10128_s29 }
 0x997   : > { %7965 = vrot.lane.b32.xlu1 %v7842_v58, %s10128_s29 }
 0x998   : > { %7963 = vrot.lane.b32.xlu0 %v7841_v19, %s10128_s29 }
 0x99b   : > { %7969 = vrot.lane.b32.xlu1 %v7844_v50, %s10128_s29 }
 0x99c   : > { %7967 = vrot.lane.b32.xlu0 %v7843_v37, %s10128_s29 }
 0x99f   : > { %7973 = vrot.lane.b32.xlu1 %v7846_v42, %s10128_s29 }
 0x9a0   : > { %7971 = vrot.lane.b32.xlu0 %v7845_v9, %s10128_s29 }
 0x9d5   : > { %v7866_v25 = vpop.permute.xlu1 %7865 }
 0x9d6   : > { %v7912_v53 = vmul.f32 %v16751_v4, %v7866_v25  ;;  %v7864_v41 = vpop.permute.xlu0 %7863 }
 0x9d7   : > { %v7911_v14 = vmul.f32 %v16753_v21, %v7864_v41 }
 0x9d8   : > { %8009 = vrot.lane.b32.xlu1 %v7912_v53, %s10128_s29 }
 0x9d9   : > { %v7870_v32 = vpop.permute.xlu1 %7869  ;;  %8007 = vrot.lane.b32.xlu0 %v7911_v14, %s10128_s29 }
 0x9da   : > { %v7914_v11 = vmul.f32 %v16761_v26, %v7870_v32  ;;  %v7868_v5 = vpop.permute.xlu0 %7867 }
 0x9db   : > { %v7913_v48 = vmul.f32 %v16763_v56, %v7868_v5 }
 0x9dc   : > { %8013 = vrot.lane.b32.xlu1 %v7914_v11, %s10128_s29 }
 0x9dd   : > { %v7874_v60 = vpop.permute.xlu1 %7873  ;;  %8011 = vrot.lane.b32.xlu0 %v7913_v48, %s10128_s29  ;;  %v18628_v48 = vld [vmem:[#allocation135_spill] sm:$0xff] }
 0x9de   : > { %v7916_v4 = vmul.f32 %v16771_v36, %v7874_v60  ;;  %v7872_v62 = vpop.permute.xlu0 %7871 }
 0x9df   : > { %v7915_v21 = vmul.f32 %v16773_v45, %v7872_v62 }
 0x9e0   : > { %8017 = vrot.lane.b32.xlu1 %v7916_v4, %s10128_s29  ;;  %v18629_v4 = vld [vmem:[#allocation129_spill] sm:$0xff] }
 0x9e1   : > { %v7878_v3 = vpop.permute.xlu1 %7877  ;;  %8015 = vrot.lane.b32.xlu0 %v7915_v21, %s10128_s29 }
 0x9e2   : > { %v7918_v26 = vmul.f32 %v16781_v8, %v7878_v3  ;;  %v7876_v23 = vpop.permute.xlu0 %7875 }
 0x9e3   : > { %v7917_v56 = vmul.f32 %v16783_v52, %v7876_v23 }
 0x9e4   : > { %8021 = vrot.lane.b32.xlu1 %v7918_v26, %s10128_s29 }
 0x9e5   : > { %v7882_v13 = vpop.permute.xlu1 %7881  ;;  %8019 = vrot.lane.b32.xlu0 %v7917_v56, %s10128_s29  ;;  %v18630_v56 = vld [vmem:[#allocation175_spill] sm:$0xff] }
 0x9e6   : > { %v7920_v36 = vmul.f32 %v16791_v49, %v7882_v13  ;;  %v7880_v28 = vpop.permute.xlu0 %7879 }
 0x9e7   : > { %v7919_v45 = vmul.f32 %v16793_v10, %v7880_v28  ;;  %v18631_v28 = vld [vmem:[#allocation139_spill] sm:$0xff] }
 0x9e8   : > { %8025 = vrot.lane.b32.xlu1 %v7920_v36, %s10128_s29 }
 0x9e9   : > { %v7886_v59 = vpop.permute.xlu1 %7885  ;;  %8023 = vrot.lane.b32.xlu0 %v7919_v45, %s10128_s29 }
 0x9ea   : > { %v7922_v8 = vmul.f32 %v16799_v18, %v7886_v59  ;;  %v7884_v43 = vpop.permute.xlu0 %7883 }
 0x9eb   : > { %v7921_v52 = vmul.f32 %v16801_v12, %v7884_v43 }
 0x9ec   : > { %8029 = vrot.lane.b32.xlu1 %v7922_v8, %s10128_s29 }
 0x9ed   : > { %v7890_v44 = vpop.permute.xlu1 %7889  ;;  %8027 = vrot.lane.b32.xlu0 %v7921_v52, %s10128_s29 }
 0x9ee   : > { %v7924_v49 = vmul.f32 %v16807_v46, %v7890_v44  ;;  %v7888_v39 = vpop.permute.xlu0 %7887 }
 0x9ef   : > { %v7923_v10 = vmul.f32 %v16809_v47, %v7888_v39 }
 0x9f0   : > { %8033 = vrot.lane.b32.xlu1 %v7924_v49, %s10128_s29  ;;  %v18632_v49 = vld [vmem:[#allocation186_spill] sm:$0xff] }
 0x9f1   : > { %v7894_v20 = vpop.permute.xlu1 %7893  ;;  %8031 = vrot.lane.b32.xlu0 %v7923_v10, %s10128_s29 }
 0x9f2   : > { %v7926_v18 = vmul.f32 %v16815_v17, %v7894_v20  ;;  %v7892_v0 = vpop.permute.xlu0 %7891  ;;  %v18633_v20 = vld [vmem:[#allocation165_spill] sm:$0xff] }
 0x9f3   : > { %v7925_v12 = vmul.f32 %v16817_v15, %v7892_v0 }
 0x9f4   : > { %8037 = vrot.lane.b32.xlu1 %v7926_v18, %s10128_s29 }
 0x9f5   : > { %8035 = vrot.lane.b32.xlu0 %v7925_v12, %s10128_s29  ;;  %v7946_v40 = vpop.permute.xlu1 %7945 }
 0x9f6   : > { %v7944_v57 = vpop.permute.xlu0 %7943  ;;  %v8056_v27 = vsel %vm1802_vm12, %v16831_v2, %v7946_v40 }
 0x9f7   : > { %v8055_v19 = vsel %vm1802_vm12, %v16827_v22, %v7944_v57 }
 0x9f9   : > { %v7950_v46 = vpop.permute.xlu1 %7949 }
 0x9fa   : > { %v7948_v54 = vpop.permute.xlu0 %7947  ;;  %v8058_v53 = vsel %vm1802_vm12, %v16839_v63, %v7950_v46 }
 0x9fb   : > { %v8057_v22 = vsel %vm1802_vm12, %v16835_v30, %v7948_v54 }
 0x9fd   : > { %v7954_v35 = vpop.permute.xlu1 %7953 }
 0x9fe   : > { %v7952_v47 = vpop.permute.xlu0 %7951  ;;  %v8060_v63 = vsel %vm1802_vm12, %v18628_v48, %v7954_v35 }
 0x9ff   : > { %v8059_v30 = vsel %vm1802_vm12, %v18629_v4, %v7952_v47  ;;  %v18634_v47 = vld [vmem:[#allocation202_spill] sm:$0xff] }
 0xa01   : > { %v7958_v1 = vpop.permute.xlu1 %7957 }
 0xa02   : > { %v7956_v55 = vpop.permute.xlu0 %7955  ;;  %v8062_v13 = vsel %vm1802_vm12, %v18630_v56, %v7958_v1 }
 0xa03   : > { %v8061_v45 = vsel %vm1802_vm12, %v18631_v28, %v7956_v55 }
 0xa05   : > { %v7962_v38 = vpop.permute.xlu1 %7961 }
 0xa06   : > { %v7960_v51 = vpop.permute.xlu0 %7959  ;;  %v8064_v39 = vsel %vm1802_vm12, %v18632_v49, %v7962_v38 }
 0xa07   : > { %v8063_v18 = vsel %vm1802_vm12, %v18633_v20, %v7960_v51 }
 0xa09   : > { %v7966_v16 = vpop.permute.xlu1 %7965 }
 0xa0a   : > { %v7964_v17 = vpop.permute.xlu0 %7963  ;;  %v8066_v54 = vsel %vm1802_vm12, %v16990_v34, %v7966_v16 }
 0xa0b   : > { %v8065_v1 = vsel %vm1802_vm12, %v18634_v47, %v7964_v17 }
 0xa0d   : > { %v17085_v61 = vpop.permute.xlu1 %7969 }
 0xa0e   : > { %v17087_v15 = vpop.permute.xlu0 %7967  ;;  %v8068_v34 = vsel %vm1802_vm12, %v17007_v7, %v17085_v61 }
 0xa0f   : > { %v8067_v17 = vsel %vm1802_vm12, %v16996_v33, %v17087_v15 }
 0xa11   : > { %v17089_v31 = vpop.permute.xlu1 %7973 }
 0xa12   : > { %v17091_v24 = vpop.permute.xlu0 %7971  ;;  %v8070_v7 = vsel %vm1802_vm12, %v17032_v6, %v17089_v31 }
 0xa13   : > { %v8069_v33 = vsel %vm1802_vm12, %v17022_v29, %v17091_v24 }
 0xa4a   : > { %v8010_v58 = vpop.permute.xlu1 %8009 }
 0xa4b   : > { %v8072_v50 = vsel %vm5736_vm15, %v8056_v27, %v8010_v58  ;;  %v8008_v37 = vpop.permute.xlu0 %8007 }
 0xa4c   : > { %v8088_v42 = vsel %vm5753_vm0, %v8072_v50, 0.0  ;;  %v8071_v9 = vsel %vm5736_vm15, %v8055_v19, %v8008_v37 }
 0xa4d   : > { %8104 = vst [vmem:[%s16139_s13 + $0x88] sm:$0xff] %v8088_v42  ;;  %v8087_v25 = vsel %vm5753_vm0, %v8071_v9, 0.0 }
 0xa4e   : > { %8103 = vst [vmem:[%s16139_s13 + $0x80] sm:$0xff] %v8087_v25  ;;  %v8014_v2 = vpop.permute.xlu1 %8013 }
 0xa4f   : > { %v8074_v41 = vsel %vm5736_vm15, %v8058_v53, %v8014_v2  ;;  %v8012_v14 = vpop.permute.xlu0 %8011 }
 0xa50   : > { %v8090_v32 = vsel %vm5753_vm0, %v8074_v41, 0.0  ;;  %v8073_v11 = vsel %vm5736_vm15, %v8057_v22, %v8012_v14 }
 0xa51   : > { %8106 = vst [vmem:[%s16139_s13 + $0x98] sm:$0xff] %v8090_v32  ;;  %v8089_v5 = vsel %vm5753_vm0, %v8073_v11, 0.0 }
 0xa52   : > { %8105 = vst [vmem:[%s16139_s13 + $0x90] sm:$0xff] %v8089_v5  ;;  %v8018_v60 = vpop.permute.xlu1 %8017 }
 0xa53   : > { %v8076_v62 = vsel %vm5736_vm15, %v8060_v63, %v8018_v60  ;;  %v8016_v21 = vpop.permute.xlu0 %8015 }
 0xa54   : > { %v8092_v3 = vsel %vm5753_vm0, %v8076_v62, 0.0  ;;  %v8075_v26 = vsel %vm5736_vm15, %v8059_v30, %v8016_v21 }
 0xa55   : > { %8108 = vst [vmem:[%s16139_s13 + $0xa8] sm:$0xff] %v8092_v3  ;;  %v8091_v23 = vsel %vm5753_vm0, %v8075_v26, 0.0 }
 0xa56   : > { %8107 = vst [vmem:[%s16139_s13 + $0xa0] sm:$0xff] %v8091_v23  ;;  %v8022_v36 = vpop.permute.xlu1 %8021 }
 0xa57   : > { %v8078_v59 = vsel %vm5736_vm15, %v8062_v13, %v8022_v36  ;;  %v8020_v8 = vpop.permute.xlu0 %8019 }
 0xa58   : > { %v8094_v43 = vsel %vm5753_vm0, %v8078_v59, 0.0  ;;  %v8077_v52 = vsel %vm5736_vm15, %v8061_v45, %v8020_v8 }
 0xa59   : > { %8110 = vst [vmem:[%s16139_s13 + $0xb8] sm:$0xff] %v8094_v43  ;;  %v8093_v44 = vsel %vm5753_vm0, %v8077_v52, 0.0 }
 0xa5a   : > { %8109 = vst [vmem:[%s16139_s13 + $0xb0] sm:$0xff] %v8093_v44  ;;  %v8026_v10 = vpop.permute.xlu1 %8025 }
 0xa5b   : > { %v8080_v0 = vsel %vm5736_vm15, %v8064_v39, %v8026_v10  ;;  %v8024_v12 = vpop.permute.xlu0 %8023 }
 0xa5c   : > { %v8096_v40 = vsel %vm5753_vm0, %v8080_v0, 0.0  ;;  %v8079_v57 = vsel %vm5736_vm15, %v8063_v18, %v8024_v12 }
 0xa5d   : > { %8112 = vst [vmem:[%s16139_s13 + $0xc8] sm:$0xff] %v8096_v40  ;;  %v8095_v46 = vsel %vm5753_vm0, %v8079_v57, 0.0 }
 0xa5e   : > { %8111 = vst [vmem:[%s16139_s13 + $0xc0] sm:$0xff] %v8095_v46  ;;  %v8030_v35 = vpop.permute.xlu1 %8029 }
 0xa5f   : > { %v8082_v55 = vsel %vm5736_vm15, %v8066_v54, %v8030_v35  ;;  %v8028_v38 = vpop.permute.xlu0 %8027 }
 0xa60   : > { %v8098_v51 = vsel %vm5753_vm0, %v8082_v55, 0.0  ;;  %v8081_v27 = vsel %vm5736_vm15, %v8065_v1, %v8028_v38 }
 0xa61   : > { %8114 = vst [vmem:[%s16139_s13 + $0xd8] sm:$0xff] %v8098_v51  ;;  %v8097_v58 = vsel %vm5753_vm0, %v8081_v27, 0.0 }
 0xa62   : > { %8113 = vst [vmem:[%s16139_s13 + $0xd0] sm:$0xff] %v8097_v58  ;;  %v8034_v16 = vpop.permute.xlu1 %8033 }
 0xa63   : > { %v8084_v19 = vsel %vm5736_vm15, %v8068_v34, %v8034_v16  ;;  %v8032_v50 = vpop.permute.xlu0 %8031 }
 0xa64   : > { %v8100_v37 = vsel %vm5753_vm0, %v8084_v19, 0.0  ;;  %v8083_v42 = vsel %vm5736_vm15, %v8067_v17, %v8032_v50 }
 0xa65   : > { %8116 = vst [vmem:[%s16139_s13 + $0xe8] sm:$0xff] %v8100_v37  ;;  %v8099_v9 = vsel %vm5753_vm0, %v8083_v42, 0.0 }
 0xa66   : > { %8115 = vst [vmem:[%s16139_s13 + $0xe0] sm:$0xff] %v8099_v9  ;;  %v8038_v61 = vpop.permute.xlu1 %8037 }
 0xa67   : > { %v8086_v15 = vsel %vm5736_vm15, %v8070_v7, %v8038_v61  ;;  %v8036_v25 = vpop.permute.xlu0 %8035 }
 0xa68   : > { %v8102_v53 = vsel %vm5753_vm0, %v8086_v15, 0.0  ;;  %v8085_v2 = vsel %vm5736_vm15, %v8069_v33, %v8036_v25 }
 0xa69   : > { %8118 = vst [vmem:[%s16139_s13 + $0xf8] sm:$0xff] %v8102_v53  ;;  %v8101_v22 = vsel %vm5753_vm0, %v8085_v2, 0.0 }
 0xa6a   : > { %8117 = vst [vmem:[%s16139_s13 + $0xf0] sm:$0xff] %v8101_v22 }
 0xa6b PF: > { %s19_s24 = sadd.s32 1, %s10108_s24  }
 0xa6c   : > { %p16_p3 = scmp.ge.s32.totalorder %s19_s24, 4  }
 0xa6e   :  { %18 = sbr.rel (!%p16_p3) target bundleno = 2 (0x2), region = 101 }
 0xa75   :  { %8140 = vsyncpa [#allocation5], 1 }
 0xa76   :  { %8142 = vsyncpa [#allocation5 + $0x1], 1 }
 0xa77   :  { %8143 = vsyncpa [#allocation7], 1 }

</bundles_post_ra>
